<compile_context>
chip_gen: v5e
topology: v5e:2x2
jax: 0.10.0
libtpu: 0.0.40
codegen_flags: <defaults>
</compile_context>

<pallas_src>
import jax
import jax.numpy as jnp
import numpy as np
from jax.experimental import pallas as pl
from jax.experimental.pallas import tpu as pltpu

_BN_EPS = 1e-5


# -----------------------------------------------------------------------------
# Fused whole-encoder kernel (one grid step = one batch sample, all 5 blocks)
# -----------------------------------------------------------------------------
def _make_encoder_kernel(num_blocks, spatial):
    """spatial: list of per-block (h, w) for a single sample."""

    def kernel(*refs):
        x_ref = refs[0]
        w_refs = refs[1:1 + 4 * num_blocks]                   # (w1,b1,w2,b2) per block
        out_refs = refs[1 + 4 * num_blocks:1 + 5 * num_blocks]
        scratch = refs[1 + 5 * num_blocks:]
        xpads = [scratch[2 * b] for b in range(num_blocks)]
        mids = [scratch[2 * b + 1] for b in range(num_blocks)]
        rowmaxes = list(scratch[2 * num_blocks:])             # one per pooled block

        def zero_halo(ref):
            # Zero only the 1-pixel ring; the interior is overwritten below.
            hh, ww, cc = ref.shape
            zr = jnp.zeros((1, ww, cc), ref.dtype)
            zc = jnp.zeros((hh, 1, cc), ref.dtype)
            ref[0:1, :, :] = zr
            ref[hh - 1:hh, :, :] = zr
            ref[:, 0:1, :] = zc
            ref[:, ww - 1:ww, :] = zc

        def conv3x3_bias_relu(src_ref, w_ref, b_ref, h, w):
            # src_ref: (h+2, w+2, cin) zero-ring-padded f32 tile in VMEM.
            # w_ref:   (9, cin, cout) bf16 (BN scale folded).  b_ref: (1, cout) f32.
            cin = src_ref.shape[-1]
            acc = None
            for k, (ky, kx) in enumerate(
                    [(ky, kx) for ky in range(3) for kx in range(3)]):
                tap = src_ref[ky:ky + h, kx:kx + w, :].reshape(h * w, cin)
                part = jnp.dot(tap.astype(jnp.bfloat16), w_ref[k],
                               preferred_element_type=jnp.float32)
                acc = part if acc is None else acc + part
            return jnp.maximum(acc + b_ref[...], 0.0)          # (h*w, cout) f32

        cur = x_ref[...]                                       # (h0, w0, cin0) f32
        for b in range(num_blocks):
            h, w = spatial[b]
            xpad, mid, out_ref = xpads[b], mids[b], out_refs[b]
            w1, b1, w2, b2 = w_refs[4 * b:4 * b + 4]

            zero_halo(xpad)
            zero_halo(mid)
            xpad[1:h + 1, 1:w + 1, :] = cur                    # block input -> halo tile

            y1 = conv3x3_bias_relu(xpad, w1, b1, h, w)         # conv1+BN+ReLU
            mid[1:h + 1, 1:w + 1, :] = y1.reshape(h, w, y1.shape[-1])

            y2 = conv3x3_bias_relu(mid, w2, b2, h, w)          # conv2+BN+ReLU
            cout = y2.shape[-1]
            y2hw = y2.reshape(h, w, cout)
            out_ref[...] = y2hw.astype(out_ref.dtype)          # bf16 skip writeback

            if b < num_blocks - 1:
                # 2x2 maxpool (stride 2) from the live f32 value.
                ho, wo = h // 2, w // 2
                y4 = y2hw.reshape(ho, 2, w, cout)              # major-dim split (free)
                rm = rowmaxes[b]
                rm[...] = jnp.maximum(y4[:, 0], y4[:, 1])      # (ho, w, cout) f32
                cur = jnp.maximum(rm[:, pl.ds(0, wo, stride=2), :],
                                  rm[:, pl.ds(1, wo, stride=2), :])

    return kernel


# -----------------------------------------------------------------------------
# Wrapper: single pallas_call over the whole encoder, grid over batch
# -----------------------------------------------------------------------------
def _fold_conv(p):
    """Fold eval-mode BN scale into bf16 weights; layout (9, cin, cout) for taps."""
    w = (p["w"] * p["scale"][None, None, None, :]).astype(jnp.bfloat16)
    kh, kw, cin, cout = w.shape
    return {"w": w.reshape(kh * kw, cin, cout),
            "b": p["bias"].reshape(1, cout).astype(jnp.float32)}


def encoder_pallas(folded, x_nhwc):
    n, h0, w0, cin0 = x_nhwc.shape
    nb = len(folded)

    spatial, cins = [], []
    hh, ww, ci = h0, w0, cin0
    for i, fp in enumerate(folded):
        spatial.append((hh, ww))
        cins.append(ci)
        ci = fp["conv2"]["w"].shape[-1]
        if i < nb - 1:
            assert hh % 2 == 0 and ww % 2 == 0, "MaxPool2d(2,2) needs even H, W"
            hh, ww = hh // 2, ww // 2
    cmids = [fp["conv1"]["w"].shape[-1] for fp in folded]
    couts = [fp["conv2"]["w"].shape[-1] for fp in folded]

    inputs = [x_nhwc]
    in_specs = [pl.BlockSpec((None, h0, w0, cin0), lambda i: (i, 0, 0, 0))]
    for fp in folded:
        for cname in ("conv1", "conv2"):
            wgt, bias = fp[cname]["w"], fp[cname]["b"]
            inputs += [wgt, bias]
            in_specs.append(pl.BlockSpec(wgt.shape, lambda i: (0, 0, 0)))
            in_specs.append(pl.BlockSpec(bias.shape, lambda i: (0, 0)))

    out_shape = tuple(
        jax.ShapeDtypeStruct((n, sh, sw, couts[b]), jnp.bfloat16)
        for b, (sh, sw) in enumerate(spatial))
    out_specs = tuple(
        pl.BlockSpec((None, sh, sw, couts[b]), lambda i: (i, 0, 0, 0))
        for b, (sh, sw) in enumerate(spatial))

    scratch = []
    for b, (sh, sw) in enumerate(spatial):
        scratch.append(pltpu.VMEM((sh + 2, sw + 2, cins[b]), jnp.float32))   # padded block input
        scratch.append(pltpu.VMEM((sh + 2, sw + 2, cmids[b]), jnp.float32))  # padded conv1 act
    for b in range(nb - 1):
        sh, sw = spatial[b]
        scratch.append(pltpu.VMEM((sh // 2, sw, couts[b]), jnp.float32))     # pool row-max stage

    return pl.pallas_call(
        _make_encoder_kernel(nb, spatial),
        out_shape=out_shape,
        grid=(n,),
        in_specs=in_specs,
        out_specs=out_specs,
        scratch_shapes=scratch,
        compiler_params=pltpu.CompilerParams(
            dimension_semantics=("parallel",)),
    )(*inputs)


def unet_encoder_forward(params, x_nchw):
    folded = [{c: _fold_conv(p[c]) for c in ("conv1", "conv2")} for p in params]
    x = jnp.transpose(x_nchw, (0, 2, 3, 1)).astype(jnp.float32)    # NCHW -> NHWC
    feats = encoder_pallas(folded, x)
    to_nchw = lambda t: jnp.transpose(t, (0, 3, 1, 2))
    return to_nchw(feats[-1]), [to_nchw(f) for f in feats[:-1]]


# -----------------------------------------------------------------------------
# Parameter init (deterministic, synthetic); BN folded in eval mode
# -----------------------------------------------------------------------------
def init_conv_bn(key, cin, cout):
    kw, kb, kg, kbe, km, kv = jax.random.split(key, 6)
    fan_in = float(cin * 9)
    w = jax.random.normal(kw, (3, 3, cin, cout), jnp.float32) / jnp.sqrt(fan_in)
    b = 0.1 * jax.random.normal(kb, (cout,), jnp.float32)
    gamma = 1.0 + 0.1 * jax.random.normal(kg, (cout,), jnp.float32)
    beta = 0.1 * jax.random.normal(kbe, (cout,), jnp.float32)
    mean = 0.1 * jax.random.normal(km, (cout,), jnp.float32)
    var = 1.0 + 0.1 * jnp.abs(jax.random.normal(kv, (cout,), jnp.float32))
    scale = gamma / jnp.sqrt(var + _BN_EPS)          # fold BN (eval mode)
    bias = beta + scale * (b - mean)                 # fold conv bias too
    return {"w": w, "scale": scale, "bias": bias}


def init_vgg_block(key, cin, cmid, cout):
    k1, k2 = jax.random.split(key)
    return {"conv1": init_conv_bn(k1, cin, cmid),
            "conv2": init_conv_bn(k2, cmid, cout)}


def init_encoder(key, input_channels, nb_filter):
    keys = jax.random.split(key, 5)
    chans = [input_channels] + list(nb_filter)
    return [init_vgg_block(keys[i], chans[i], nb_filter[i], nb_filter[i])
            for i in range(5)]


# -----------------------------------------------------------------------------
# Pure-JAX reference (same folded bf16 weights / bf16 conv inputs, f32 math)
# -----------------------------------------------------------------------------
def _ref_conv_bias_relu(x, w9, b):
    _, cin, cout = w9.shape
    wf = w9.reshape(3, 3, cin, cout).astype(jnp.float32)
    xb = x.astype(jnp.bfloat16).astype(jnp.float32)
    y = jax.lax.conv_general_dilated(
        xb, wf, (1, 1), "SAME",
        dimension_numbers=("NHWC", "HWIO", "NHWC"),
        precision=jax.lax.Precision.HIGHEST)
    return jnp.maximum(y + b.reshape(1, 1, 1, cout), 0.0)


def _ref_forward(params, x_nchw):
    folded = [{c: _fold_conv(p[c]) for c in ("conv1", "conv2")} for p in params]
    x = jnp.transpose(x_nchw, (0, 2, 3, 1))
    feats = []
    for i, fp in enumerate(folded):
        if i > 0:
            x = jax.lax.reduce_window(x, -jnp.inf, jax.lax.max,
                                      (1, 2, 2, 1), (1, 2, 2, 1), "VALID")
        x = _ref_conv_bias_relu(x, fp["conv1"]["w"], fp["conv1"]["b"])
        x = _ref_conv_bias_relu(x, fp["conv2"]["w"], fp["conv2"]["b"])
        feats.append(x)
    to_nchw = lambda t: jnp.transpose(t, (0, 3, 1, 2))
    return to_nchw(feats[-1]), [to_nchw(f) for f in feats[:-1]]


# -----------------------------------------------------------------------------
if __name__ == "__main__":
    config = {"input_channels": 4, "nb_filters": [8, 16, 32, 64, 64]}
    key = jax.random.PRNGKey(0)
    kx, kp = jax.random.split(key)
    x = jax.random.normal(kx, (2, config["input_channels"], 16, 16), jnp.float32)
    params = init_encoder(kp, config["input_channels"], config["nb_filters"])

    fwd = jax.jit(unet_encoder_forward)
    out, skips = fwd(params, x)
    jax.block_until_ready((out, skips))

    ref_out, ref_skips = _ref_forward(params, x)
    f32 = lambda t: np.asarray(t.astype(jnp.float32))
    # Kernel features are bf16; f32 reference comparison allows half-ulp bf16
    # rounding (<=0.2% rel) plus f32 accumulation-order noise.
    np.testing.assert_allclose(f32(out), np.asarray(ref_out), rtol=5e-3, atol=2e-3)
    for a, b in zip(skips, ref_skips):
        np.testing.assert_allclose(f32(a), np.asarray(b), rtol=5e-3, atol=2e-3)

    assert out.shape == (2, 64, 1, 1)
    assert [tuple(s.shape) for s in skips] == [
        (2, 8, 16, 16), (2, 16, 8, 8), (2, 32, 4, 4), (2, 64, 2, 2)]
    print("KERNEL_OK")
</pallas_src>

<mosaic_0001>
module attributes {stable_mosaic.version = 11 : i64} {
  func.func @kernel(%arg0: i32, %arg1: memref<1x16x16x4xf32, #tpu.memory_space<vmem>>, %arg2: memref<9x4x8xbf16, #tpu.memory_space<vmem>>, %arg3: memref<1x8xf32, #tpu.memory_space<vmem>>, %arg4: memref<9x8x8xbf16, #tpu.memory_space<vmem>>, %arg5: memref<1x8xf32, #tpu.memory_space<vmem>>, %arg6: memref<9x8x16xbf16, #tpu.memory_space<vmem>>, %arg7: memref<1x16xf32, #tpu.memory_space<vmem>>, %arg8: memref<9x16x16xbf16, #tpu.memory_space<vmem>>, %arg9: memref<1x16xf32, #tpu.memory_space<vmem>>, %arg10: memref<9x16x32xbf16, #tpu.memory_space<vmem>>, %arg11: memref<1x32xf32, #tpu.memory_space<vmem>>, %arg12: memref<9x32x32xbf16, #tpu.memory_space<vmem>>, %arg13: memref<1x32xf32, #tpu.memory_space<vmem>>, %arg14: memref<9x32x64xbf16, #tpu.memory_space<vmem>>, %arg15: memref<1x64xf32, #tpu.memory_space<vmem>>, %arg16: memref<9x64x64xbf16, #tpu.memory_space<vmem>>, %arg17: memref<1x64xf32, #tpu.memory_space<vmem>>, %arg18: memref<9x64x64xbf16, #tpu.memory_space<vmem>>, %arg19: memref<1x64xf32, #tpu.memory_space<vmem>>, %arg20: memref<9x64x64xbf16, #tpu.memory_space<vmem>>, %arg21: memref<1x64xf32, #tpu.memory_space<vmem>>, %arg22: memref<1x16x16x8xbf16, #tpu.memory_space<vmem>>, %arg23: memref<1x8x8x16xbf16, #tpu.memory_space<vmem>>, %arg24: memref<1x4x4x32xbf16, #tpu.memory_space<vmem>>, %arg25: memref<1x2x2x64xbf16, #tpu.memory_space<vmem>>, %arg26: memref<1x1x1x64xbf16, #tpu.memory_space<vmem>>, %arg27: memref<18x18x4xf32, #tpu.memory_space<vmem>>, %arg28: memref<18x18x8xf32, #tpu.memory_space<vmem>>, %arg29: memref<10x10x8xf32, #tpu.memory_space<vmem>>, %arg30: memref<10x10x16xf32, #tpu.memory_space<vmem>>, %arg31: memref<6x6x16xf32, #tpu.memory_space<vmem>>, %arg32: memref<6x6x32xf32, #tpu.memory_space<vmem>>, %arg33: memref<4x4x32xf32, #tpu.memory_space<vmem>>, %arg34: memref<4x4x64xf32, #tpu.memory_space<vmem>>, %arg35: memref<3x3x64xf32, #tpu.memory_space<vmem>>, %arg36: memref<3x3x64xf32, #tpu.memory_space<vmem>>, %arg37: memref<8x16x8xf32, #tpu.memory_space<vmem>>, %arg38: memref<4x8x16xf32, #tpu.memory_space<vmem>>, %arg39: memref<2x4x32xf32, #tpu.memory_space<vmem>>, %arg40: memref<1x2x64xf32, #tpu.memory_space<vmem>>) attributes {dimension_semantics = [#tpu.dimension_semantics<parallel>], iteration_bounds = array<i64: 2>, scalar_prefetch = 0 : i64, scratch_operands = 14 : i64, tpu.core_type = #tpu.core_type<tc>, window_params = [{transform_indices = @transform_0, window_bounds = array<i64: 1, 16, 16, 4>}, {pipeline_mode = #tpu.pipeline_mode<synchronous>, transform_indices = @transform_1, window_bounds = array<i64: 9, 4, 8>}, {pipeline_mode = #tpu.pipeline_mode<synchronous>, transform_indices = @transform_2, window_bounds = array<i64: 1, 8>}, {pipeline_mode = #tpu.pipeline_mode<synchronous>, transform_indices = @transform_3, window_bounds = array<i64: 9, 8, 8>}, {pipeline_mode = #tpu.pipeline_mode<synchronous>, transform_indices = @transform_4, window_bounds = array<i64: 1, 8>}, {pipeline_mode = #tpu.pipeline_mode<synchronous>, transform_indices = @transform_5, window_bounds = array<i64: 9, 8, 16>}, {pipeline_mode = #tpu.pipeline_mode<synchronous>, transform_indices = @transform_6, window_bounds = array<i64: 1, 16>}, {pipeline_mode = #tpu.pipeline_mode<synchronous>, transform_indices = @transform_7, window_bounds = array<i64: 9, 16, 16>}, {pipeline_mode = #tpu.pipeline_mode<synchronous>, transform_indices = @transform_8, window_bounds = array<i64: 1, 16>}, {pipeline_mode = #tpu.pipeline_mode<synchronous>, transform_indices = @transform_9, window_bounds = array<i64: 9, 16, 32>}, {pipeline_mode = #tpu.pipeline_mode<synchronous>, transform_indices = @transform_10, window_bounds = array<i64: 1, 32>}, {pipeline_mode = #tpu.pipeline_mode<synchronous>, transform_indices = @transform_11, window_bounds = array<i64: 9, 32, 32>}, {pipeline_mode = #tpu.pipeline_mode<synchronous>, transform_indices = @transform_12, window_bounds = array<i64: 1, 32>}, {pipeline_mode = #tpu.pipeline_mode<synchronous>, transform_indices = @transform_13, window_bounds = array<i64: 9, 32, 64>}, {pipeline_mode = #tpu.pipeline_mode<synchronous>, transform_indices = @transform_14, window_bounds = array<i64: 1, 64>}, {pipeline_mode = #tpu.pipeline_mode<synchronous>, transform_indices = @transform_15, window_bounds = array<i64: 9, 64, 64>}, {pipeline_mode = #tpu.pipeline_mode<synchronous>, transform_indices = @transform_16, window_bounds = array<i64: 1, 64>}, {pipeline_mode = #tpu.pipeline_mode<synchronous>, transform_indices = @transform_17, window_bounds = array<i64: 9, 64, 64>}, {pipeline_mode = #tpu.pipeline_mode<synchronous>, transform_indices = @transform_18, window_bounds = array<i64: 1, 64>}, {pipeline_mode = #tpu.pipeline_mode<synchronous>, transform_indices = @transform_19, window_bounds = array<i64: 9, 64, 64>}, {pipeline_mode = #tpu.pipeline_mode<synchronous>, transform_indices = @transform_20, window_bounds = array<i64: 1, 64>}, {transform_indices = @transform_21, window_bounds = array<i64: 1, 16, 16, 8>}, {transform_indices = @transform_22, window_bounds = array<i64: 1, 8, 8, 16>}, {transform_indices = @transform_23, window_bounds = array<i64: 1, 4, 4, 32>}, {transform_indices = @transform_24, window_bounds = array<i64: 1, 2, 2, 64>}, {transform_indices = @transform_25, window_bounds = array<i64: 1, 1, 1, 64>}]} {
    %c0 = arith.constant 0 : index
    %c0_0 = arith.constant 0 : index
    %c0_1 = arith.constant 0 : index
    %c0_2 = arith.constant 0 : index
    %0 = vector.load %arg1[%c0, %c0_0, %c0_1, %c0_2] : memref<1x16x16x4xf32, #tpu.memory_space<vmem>>, vector<1x16x16x4xf32>
    %1 = vector.shape_cast %0 : vector<1x16x16x4xf32> to vector<16x16x4xf32>
    %cst = arith.constant 0.000000e+00 : f32
    %2 = vector.broadcast %cst : f32 to vector<1x18x4xf32>
    %cst_3 = arith.constant 0.000000e+00 : f32
    %3 = vector.broadcast %cst_3 : f32 to vector<18x1x4xf32>
    %c0_4 = arith.constant 0 : index
    %c0_5 = arith.constant 0 : index
    %c0_6 = arith.constant 0 : index
    %4 = vector.load %arg27[%c0_4, %c0_5, %c0_6] : memref<18x18x4xf32, #tpu.memory_space<vmem>>, vector<1x18x4xf32>
    tpu.vector_store %arg27[%c0_4, %c0_5, %c0_6], %2 {strides = array<i32>} : memref<18x18x4xf32, #tpu.memory_space<vmem>>, vector<1x18x4xf32>,
    %c17 = arith.constant 17 : index
    %c0_7 = arith.constant 0 : index
    %c0_8 = arith.constant 0 : index
    %5 = vector.load %arg27[%c17, %c0_7, %c0_8] : memref<18x18x4xf32, #tpu.memory_space<vmem>>, vector<1x18x4xf32>
    tpu.vector_store %arg27[%c17, %c0_7, %c0_8], %2 {strides = array<i32>} : memref<18x18x4xf32, #tpu.memory_space<vmem>>, vector<1x18x4xf32>,
    %c0_9 = arith.constant 0 : index
    %c0_10 = arith.constant 0 : index
    %c0_11 = arith.constant 0 : index
    %6 = vector.load %arg27[%c0_9, %c0_10, %c0_11] : memref<18x18x4xf32, #tpu.memory_space<vmem>>, vector<18x1x4xf32>
    tpu.vector_store %arg27[%c0_9, %c0_10, %c0_11], %3 {strides = array<i32>} : memref<18x18x4xf32, #tpu.memory_space<vmem>>, vector<18x1x4xf32>,
    %c0_12 = arith.constant 0 : index
    %c17_13 = arith.constant 17 : index
    %c0_14 = arith.constant 0 : index
    %7 = vector.load %arg27[%c0_12, %c17_13, %c0_14] : memref<18x18x4xf32, #tpu.memory_space<vmem>>, vector<18x1x4xf32>
    tpu.vector_store %arg27[%c0_12, %c17_13, %c0_14], %3 {strides = array<i32>} : memref<18x18x4xf32, #tpu.memory_space<vmem>>, vector<18x1x4xf32>,
    %cst_15 = arith.constant 0.000000e+00 : f32
    %8 = vector.broadcast %cst_15 : f32 to vector<1x18x8xf32>
    %cst_16 = arith.constant 0.000000e+00 : f32
    %9 = vector.broadcast %cst_16 : f32 to vector<18x1x8xf32>
    %c0_17 = arith.constant 0 : index
    %c0_18 = arith.constant 0 : index
    %c0_19 = arith.constant 0 : index
    %10 = vector.load %arg28[%c0_17, %c0_18, %c0_19] : memref<18x18x8xf32, #tpu.memory_space<vmem>>, vector<1x18x8xf32>
    tpu.vector_store %arg28[%c0_17, %c0_18, %c0_19], %8 {strides = array<i32>} : memref<18x18x8xf32, #tpu.memory_space<vmem>>, vector<1x18x8xf32>,
    %c17_20 = arith.constant 17 : index
    %c0_21 = arith.constant 0 : index
    %c0_22 = arith.constant 0 : index
    %11 = vector.load %arg28[%c17_20, %c0_21, %c0_22] : memref<18x18x8xf32, #tpu.memory_space<vmem>>, vector<1x18x8xf32>
    tpu.vector_store %arg28[%c17_20, %c0_21, %c0_22], %8 {strides = array<i32>} : memref<18x18x8xf32, #tpu.memory_space<vmem>>, vector<1x18x8xf32>,
    %c0_23 = arith.constant 0 : index
    %c0_24 = arith.constant 0 : index
    %c0_25 = arith.constant 0 : index
    %12 = vector.load %arg28[%c0_23, %c0_24, %c0_25] : memref<18x18x8xf32, #tpu.memory_space<vmem>>, vector<18x1x8xf32>
    tpu.vector_store %arg28[%c0_23, %c0_24, %c0_25], %9 {strides = array<i32>} : memref<18x18x8xf32, #tpu.memory_space<vmem>>, vector<18x1x8xf32>,
    %c0_26 = arith.constant 0 : index
    %c17_27 = arith.constant 17 : index
    %c0_28 = arith.constant 0 : index
    %13 = vector.load %arg28[%c0_26, %c17_27, %c0_28] : memref<18x18x8xf32, #tpu.memory_space<vmem>>, vector<18x1x8xf32>
    tpu.vector_store %arg28[%c0_26, %c17_27, %c0_28], %9 {strides = array<i32>} : memref<18x18x8xf32, #tpu.memory_space<vmem>>, vector<18x1x8xf32>,
    %c1 = arith.constant 1 : index
    %c1_29 = arith.constant 1 : index
    %c0_30 = arith.constant 0 : index
    %14 = vector.load %arg27[%c1, %c1_29, %c0_30] : memref<18x18x4xf32, #tpu.memory_space<vmem>>, vector<16x16x4xf32>
    tpu.vector_store %arg27[%c1, %c1_29, %c0_30], %1 {strides = array<i32>} : memref<18x18x4xf32, #tpu.memory_space<vmem>>, vector<16x16x4xf32>,
    %c0_31 = arith.constant 0 : index
    %c0_32 = arith.constant 0 : index
    %c0_33 = arith.constant 0 : index
    %15 = vector.load %arg27[%c0_31, %c0_32, %c0_33] : memref<18x18x4xf32, #tpu.memory_space<vmem>>, vector<16x16x4xf32>
    %16 = vector.shape_cast %15 : vector<16x16x4xf32> to vector<256x4xf32>
    %17 = arith.truncf %16 : vector<256x4xf32> to vector<256x4xbf16>
    %c0_34 = arith.constant 0 : index
    %c0_35 = arith.constant 0 : index
    %c0_36 = arith.constant 0 : index
    %18 = vector.load %arg2[%c0_34, %c0_35, %c0_36] : memref<9x4x8xbf16, #tpu.memory_space<vmem>>, vector<1x4x8xbf16>
    %19 = vector.shape_cast %18 : vector<1x4x8xbf16> to vector<4x8xbf16>
    %cst_37 = arith.constant dense<0.000000e+00> : vector<256x8xf32>
    %20 = tpu.matmul %17, %19, %cst_37 {dimension_numbers = #tpu.dot_dimension_numbers<[1], [0], [0], [1], [0, 0, 1, 1], [], []>} : vector<256x4xbf16>, vector<4x8xbf16>, vector<256x8xf32> -> vector<256x8xf32>
    %c0_38 = arith.constant 0 : index
    %c1_39 = arith.constant 1 : index
    %c0_40 = arith.constant 0 : index
    %21 = vector.load %arg27[%c0_38, %c1_39, %c0_40] : memref<18x18x4xf32, #tpu.memory_space<vmem>>, vector<16x16x4xf32>
    %22 = vector.shape_cast %21 : vector<16x16x4xf32> to vector<256x4xf32>
    %23 = arith.truncf %22 : vector<256x4xf32> to vector<256x4xbf16>
    %c1_41 = arith.constant 1 : index
    %c0_42 = arith.constant 0 : index
    %c0_43 = arith.constant 0 : index
    %24 = vector.load %arg2[%c1_41, %c0_42, %c0_43] : memref<9x4x8xbf16, #tpu.memory_space<vmem>>, vector<1x4x8xbf16>
    %25 = vector.shape_cast %24 : vector<1x4x8xbf16> to vector<4x8xbf16>
    %cst_44 = arith.constant dense<0.000000e+00> : vector<256x8xf32>
    %26 = tpu.matmul %23, %25, %cst_44 {dimension_numbers = #tpu.dot_dimension_numbers<[1], [0], [0], [1], [0, 0, 1, 1], [], []>} : vector<256x4xbf16>, vector<4x8xbf16>, vector<256x8xf32> -> vector<256x8xf32>
    %27 = arith.addf %20, %26 : vector<256x8xf32>
    %c0_45 = arith.constant 0 : index
    %c2 = arith.constant 2 : index
    %c0_46 = arith.constant 0 : index
    %28 = vector.load %arg27[%c0_45, %c2, %c0_46] : memref<18x18x4xf32, #tpu.memory_space<vmem>>, vector<16x16x4xf32>
    %29 = vector.shape_cast %28 : vector<16x16x4xf32> to vector<256x4xf32>
    %30 = arith.truncf %29 : vector<256x4xf32> to vector<256x4xbf16>
    %c2_47 = arith.constant 2 : index
    %c0_48 = arith.constant 0 : index
    %c0_49 = arith.constant 0 : index
    %31 = vector.load %arg2[%c2_47, %c0_48, %c0_49] : memref<9x4x8xbf16, #tpu.memory_space<vmem>>, vector<1x4x8xbf16>
    %32 = vector.shape_cast %31 : vector<1x4x8xbf16> to vector<4x8xbf16>
    %cst_50 = arith.constant dense<0.000000e+00> : vector<256x8xf32>
    %33 = tpu.matmul %30, %32, %cst_50 {dimension_numbers = #tpu.dot_dimension_numbers<[1], [0], [0], [1], [0, 0, 1, 1], [], []>} : vector<256x4xbf16>, vector<4x8xbf16>, vector<256x8xf32> -> vector<256x8xf32>
    %34 = arith.addf %27, %33 : vector<256x8xf32>
    %c1_51 = arith.constant 1 : index
    %c0_52 = arith.constant 0 : index
    %c0_53 = arith.constant 0 : index
    %35 = vector.load %arg27[%c1_51, %c0_52, %c0_53] : memref<18x18x4xf32, #tpu.memory_space<vmem>>, vector<16x16x4xf32>
    %36 = vector.shape_cast %35 : vector<16x16x4xf32> to vector<256x4xf32>
    %37 = arith.truncf %36 : vector<256x4xf32> to vector<256x4xbf16>
    %c3 = arith.constant 3 : index
    %c0_54 = arith.constant 0 : index
    %c0_55 = arith.constant 0 : index
    %38 = vector.load %arg2[%c3, %c0_54, %c0_55] : memref<9x4x8xbf16, #tpu.memory_space<vmem>>, vector<1x4x8xbf16>
    %39 = vector.shape_cast %38 : vector<1x4x8xbf16> to vector<4x8xbf16>
    %cst_56 = arith.constant dense<0.000000e+00> : vector<256x8xf32>
    %40 = tpu.matmul %37, %39, %cst_56 {dimension_numbers = #tpu.dot_dimension_numbers<[1], [0], [0], [1], [0, 0, 1, 1], [], []>} : vector<256x4xbf16>, vector<4x8xbf16>, vector<256x8xf32> -> vector<256x8xf32>
    %41 = arith.addf %34, %40 : vector<256x8xf32>
    %c1_57 = arith.constant 1 : index
    %c1_58 = arith.constant 1 : index
    %c0_59 = arith.constant 0 : index
    %42 = vector.load %arg27[%c1_57, %c1_58, %c0_59] : memref<18x18x4xf32, #tpu.memory_space<vmem>>, vector<16x16x4xf32>
    %43 = vector.shape_cast %42 : vector<16x16x4xf32> to vector<256x4xf32>
    %44 = arith.truncf %43 : vector<256x4xf32> to vector<256x4xbf16>
    %c4 = arith.constant 4 : index
    %c0_60 = arith.constant 0 : index
    %c0_61 = arith.constant 0 : index
    %45 = vector.load %arg2[%c4, %c0_60, %c0_61] : memref<9x4x8xbf16, #tpu.memory_space<vmem>>, vector<1x4x8xbf16>
    %46 = vector.shape_cast %45 : vector<1x4x8xbf16> to vector<4x8xbf16>
    %cst_62 = arith.constant dense<0.000000e+00> : vector<256x8xf32>
    %47 = tpu.matmul %44, %46, %cst_62 {dimension_numbers = #tpu.dot_dimension_numbers<[1], [0], [0], [1], [0, 0, 1, 1], [], []>} : vector<256x4xbf16>, vector<4x8xbf16>, vector<256x8xf32> -> vector<256x8xf32>
    %48 = arith.addf %41, %47 : vector<256x8xf32>
    %c1_63 = arith.constant 1 : index
    %c2_64 = arith.constant 2 : index
    %c0_65 = arith.constant 0 : index
    %49 = vector.load %arg27[%c1_63, %c2_64, %c0_65] : memref<18x18x4xf32, #tpu.memory_space<vmem>>, vector<16x16x4xf32>
    %50 = vector.shape_cast %49 : vector<16x16x4xf32> to vector<256x4xf32>
    %51 = arith.truncf %50 : vector<256x4xf32> to vector<256x4xbf16>
    %c5 = arith.constant 5 : index
    %c0_66 = arith.constant 0 : index
    %c0_67 = arith.constant 0 : index
    %52 = vector.load %arg2[%c5, %c0_66, %c0_67] : memref<9x4x8xbf16, #tpu.memory_space<vmem>>, vector<1x4x8xbf16>
    %53 = vector.shape_cast %52 : vector<1x4x8xbf16> to vector<4x8xbf16>
    %cst_68 = arith.constant dense<0.000000e+00> : vector<256x8xf32>
    %54 = tpu.matmul %51, %53, %cst_68 {dimension_numbers = #tpu.dot_dimension_numbers<[1], [0], [0], [1], [0, 0, 1, 1], [], []>} : vector<256x4xbf16>, vector<4x8xbf16>, vector<256x8xf32> -> vector<256x8xf32>
    %55 = arith.addf %48, %54 : vector<256x8xf32>
    %c2_69 = arith.constant 2 : index
    %c0_70 = arith.constant 0 : index
    %c0_71 = arith.constant 0 : index
    %56 = vector.load %arg27[%c2_69, %c0_70, %c0_71] : memref<18x18x4xf32, #tpu.memory_space<vmem>>, vector<16x16x4xf32>
    %57 = vector.shape_cast %56 : vector<16x16x4xf32> to vector<256x4xf32>
    %58 = arith.truncf %57 : vector<256x4xf32> to vector<256x4xbf16>
    %c6 = arith.constant 6 : index
    %c0_72 = arith.constant 0 : index
    %c0_73 = arith.constant 0 : index
    %59 = vector.load %arg2[%c6, %c0_72, %c0_73] : memref<9x4x8xbf16, #tpu.memory_space<vmem>>, vector<1x4x8xbf16>
    %60 = vector.shape_cast %59 : vector<1x4x8xbf16> to vector<4x8xbf16>
    %cst_74 = arith.constant dense<0.000000e+00> : vector<256x8xf32>
    %61 = tpu.matmul %58, %60, %cst_74 {dimension_numbers = #tpu.dot_dimension_numbers<[1], [0], [0], [1], [0, 0, 1, 1], [], []>} : vector<256x4xbf16>, vector<4x8xbf16>, vector<256x8xf32> -> vector<256x8xf32>
    %62 = arith.addf %55, %61 : vector<256x8xf32>
    %c2_75 = arith.constant 2 : index
    %c1_76 = arith.constant 1 : index
    %c0_77 = arith.constant 0 : index
    %63 = vector.load %arg27[%c2_75, %c1_76, %c0_77] : memref<18x18x4xf32, #tpu.memory_space<vmem>>, vector<16x16x4xf32>
    %64 = vector.shape_cast %63 : vector<16x16x4xf32> to vector<256x4xf32>
    %65 = arith.truncf %64 : vector<256x4xf32> to vector<256x4xbf16>
    %c7 = arith.constant 7 : index
    %c0_78 = arith.constant 0 : index
    %c0_79 = arith.constant 0 : index
    %66 = vector.load %arg2[%c7, %c0_78, %c0_79] : memref<9x4x8xbf16, #tpu.memory_space<vmem>>, vector<1x4x8xbf16>
    %67 = vector.shape_cast %66 : vector<1x4x8xbf16> to vector<4x8xbf16>
    %cst_80 = arith.constant dense<0.000000e+00> : vector<256x8xf32>
    %68 = tpu.matmul %65, %67, %cst_80 {dimension_numbers = #tpu.dot_dimension_numbers<[1], [0], [0], [1], [0, 0, 1, 1], [], []>} : vector<256x4xbf16>, vector<4x8xbf16>, vector<256x8xf32> -> vector<256x8xf32>
    %69 = arith.addf %62, %68 : vector<256x8xf32>
    %c2_81 = arith.constant 2 : index
    %c2_82 = arith.constant 2 : index
    %c0_83 = arith.constant 0 : index
    %70 = vector.load %arg27[%c2_81, %c2_82, %c0_83] : memref<18x18x4xf32, #tpu.memory_space<vmem>>, vector<16x16x4xf32>
    %71 = vector.shape_cast %70 : vector<16x16x4xf32> to vector<256x4xf32>
    %72 = arith.truncf %71 : vector<256x4xf32> to vector<256x4xbf16>
    %c8 = arith.constant 8 : index
    %c0_84 = arith.constant 0 : index
    %c0_85 = arith.constant 0 : index
    %73 = vector.load %arg2[%c8, %c0_84, %c0_85] : memref<9x4x8xbf16, #tpu.memory_space<vmem>>, vector<1x4x8xbf16>
    %74 = vector.shape_cast %73 : vector<1x4x8xbf16> to vector<4x8xbf16>
    %cst_86 = arith.constant dense<0.000000e+00> : vector<256x8xf32>
    %75 = tpu.matmul %72, %74, %cst_86 {dimension_numbers = #tpu.dot_dimension_numbers<[1], [0], [0], [1], [0, 0, 1, 1], [], []>} : vector<256x4xbf16>, vector<4x8xbf16>, vector<256x8xf32> -> vector<256x8xf32>
    %76 = arith.addf %69, %75 : vector<256x8xf32>
    %c0_87 = arith.constant 0 : index
    %c0_88 = arith.constant 0 : index
    %77 = vector.load %arg3[%c0_87, %c0_88] : memref<1x8xf32, #tpu.memory_space<vmem>>, vector<1x8xf32>
    %78 = vector.broadcast %77 : vector<1x8xf32> to vector<256x8xf32>
    %79 = arith.addf %76, %78 : vector<256x8xf32>
    %cst_89 = arith.constant 0.000000e+00 : f32
    %80 = vector.broadcast %cst_89 : f32 to vector<256x8xf32>
    %81 = arith.maximumf %79, %80 : vector<256x8xf32>
    %82 = vector.shape_cast %81 : vector<256x8xf32> to vector<16x16x8xf32>
    %c1_90 = arith.constant 1 : index
    %c1_91 = arith.constant 1 : index
    %c0_92 = arith.constant 0 : index
    %83 = vector.load %arg28[%c1_90, %c1_91, %c0_92] : memref<18x18x8xf32, #tpu.memory_space<vmem>>, vector<16x16x8xf32>
    tpu.vector_store %arg28[%c1_90, %c1_91, %c0_92], %82 {strides = array<i32>} : memref<18x18x8xf32, #tpu.memory_space<vmem>>, vector<16x16x8xf32>,
    %c0_93 = arith.constant 0 : index
    %c0_94 = arith.constant 0 : index
    %c0_95 = arith.constant 0 : index
    %84 = vector.load %arg28[%c0_93, %c0_94, %c0_95] : memref<18x18x8xf32, #tpu.memory_space<vmem>>, vector<16x16x8xf32>
    %85 = vector.shape_cast %84 : vector<16x16x8xf32> to vector<256x8xf32>
    %86 = arith.truncf %85 : vector<256x8xf32> to vector<256x8xbf16>
    %c0_96 = arith.constant 0 : index
    %c0_97 = arith.constant 0 : index
    %c0_98 = arith.constant 0 : index
    %87 = vector.load %arg4[%c0_96, %c0_97, %c0_98] : memref<9x8x8xbf16, #tpu.memory_space<vmem>>, vector<1x8x8xbf16>
    %88 = vector.shape_cast %87 : vector<1x8x8xbf16> to vector<8x8xbf16>
    %cst_99 = arith.constant dense<0.000000e+00> : vector<256x8xf32>
    %89 = tpu.matmul %86, %88, %cst_99 {dimension_numbers = #tpu.dot_dimension_numbers<[1], [0], [0], [1], [0, 0, 1, 1], [], []>} : vector<256x8xbf16>, vector<8x8xbf16>, vector<256x8xf32> -> vector<256x8xf32>
    %c0_100 = arith.constant 0 : index
    %c1_101 = arith.constant 1 : index
    %c0_102 = arith.constant 0 : index
    %90 = vector.load %arg28[%c0_100, %c1_101, %c0_102] : memref<18x18x8xf32, #tpu.memory_space<vmem>>, vector<16x16x8xf32>
    %91 = vector.shape_cast %90 : vector<16x16x8xf32> to vector<256x8xf32>
    %92 = arith.truncf %91 : vector<256x8xf32> to vector<256x8xbf16>
    %c1_103 = arith.constant 1 : index
    %c0_104 = arith.constant 0 : index
    %c0_105 = arith.constant 0 : index
    %93 = vector.load %arg4[%c1_103, %c0_104, %c0_105] : memref<9x8x8xbf16, #tpu.memory_space<vmem>>, vector<1x8x8xbf16>
    %94 = vector.shape_cast %93 : vector<1x8x8xbf16> to vector<8x8xbf16>
    %cst_106 = arith.constant dense<0.000000e+00> : vector<256x8xf32>
    %95 = tpu.matmul %92, %94, %cst_106 {dimension_numbers = #tpu.dot_dimension_numbers<[1], [0], [0], [1], [0, 0, 1, 1], [], []>} : vector<256x8xbf16>, vector<8x8xbf16>, vector<256x8xf32> -> vector<256x8xf32>
    %96 = arith.addf %89, %95 : vector<256x8xf32>
    %c0_107 = arith.constant 0 : index
    %c2_108 = arith.constant 2 : index
    %c0_109 = arith.constant 0 : index
    %97 = vector.load %arg28[%c0_107, %c2_108, %c0_109] : memref<18x18x8xf32, #tpu.memory_space<vmem>>, vector<16x16x8xf32>
    %98 = vector.shape_cast %97 : vector<16x16x8xf32> to vector<256x8xf32>
    %99 = arith.truncf %98 : vector<256x8xf32> to vector<256x8xbf16>
    %c2_110 = arith.constant 2 : index
    %c0_111 = arith.constant 0 : index
    %c0_112 = arith.constant 0 : index
    %100 = vector.load %arg4[%c2_110, %c0_111, %c0_112] : memref<9x8x8xbf16, #tpu.memory_space<vmem>>, vector<1x8x8xbf16>
    %101 = vector.shape_cast %100 : vector<1x8x8xbf16> to vector<8x8xbf16>
    %cst_113 = arith.constant dense<0.000000e+00> : vector<256x8xf32>
    %102 = tpu.matmul %99, %101, %cst_113 {dimension_numbers = #tpu.dot_dimension_numbers<[1], [0], [0], [1], [0, 0, 1, 1], [], []>} : vector<256x8xbf16>, vector<8x8xbf16>, vector<256x8xf32> -> vector<256x8xf32>
    %103 = arith.addf %96, %102 : vector<256x8xf32>
    %c1_114 = arith.constant 1 : index
    %c0_115 = arith.constant 0 : index
    %c0_116 = arith.constant 0 : index
    %104 = vector.load %arg28[%c1_114, %c0_115, %c0_116] : memref<18x18x8xf32, #tpu.memory_space<vmem>>, vector<16x16x8xf32>
    %105 = vector.shape_cast %104 : vector<16x16x8xf32> to vector<256x8xf32>
    %106 = arith.truncf %105 : vector<256x8xf32> to vector<256x8xbf16>
    %c3_117 = arith.constant 3 : index
    %c0_118 = arith.constant 0 : index
    %c0_119 = arith.constant 0 : index
    %107 = vector.load %arg4[%c3_117, %c0_118, %c0_119] : memref<9x8x8xbf16, #tpu.memory_space<vmem>>, vector<1x8x8xbf16>
    %108 = vector.shape_cast %107 : vector<1x8x8xbf16> to vector<8x8xbf16>
    %cst_120 = arith.constant dense<0.000000e+00> : vector<256x8xf32>
    %109 = tpu.matmul %106, %108, %cst_120 {dimension_numbers = #tpu.dot_dimension_numbers<[1], [0], [0], [1], [0, 0, 1, 1], [], []>} : vector<256x8xbf16>, vector<8x8xbf16>, vector<256x8xf32> -> vector<256x8xf32>
    %110 = arith.addf %103, %109 : vector<256x8xf32>
    %c1_121 = arith.constant 1 : index
    %c1_122 = arith.constant 1 : index
    %c0_123 = arith.constant 0 : index
    %111 = vector.load %arg28[%c1_121, %c1_122, %c0_123] : memref<18x18x8xf32, #tpu.memory_space<vmem>>, vector<16x16x8xf32>
    %112 = vector.shape_cast %111 : vector<16x16x8xf32> to vector<256x8xf32>
    %113 = arith.truncf %112 : vector<256x8xf32> to vector<256x8xbf16>
    %c4_124 = arith.constant 4 : index
    %c0_125 = arith.constant 0 : index
    %c0_126 = arith.constant 0 : index
    %114 = vector.load %arg4[%c4_124, %c0_125, %c0_126] : memref<9x8x8xbf16, #tpu.memory_space<vmem>>, vector<1x8x8xbf16>
    %115 = vector.shape_cast %114 : vector<1x8x8xbf16> to vector<8x8xbf16>
    %cst_127 = arith.constant dense<0.000000e+00> : vector<256x8xf32>
    %116 = tpu.matmul %113, %115, %cst_127 {dimension_numbers = #tpu.dot_dimension_numbers<[1], [0], [0], [1], [0, 0, 1, 1], [], []>} : vector<256x8xbf16>, vector<8x8xbf16>, vector<256x8xf32> -> vector<256x8xf32>
    %117 = arith.addf %110, %116 : vector<256x8xf32>
    %c1_128 = arith.constant 1 : index
    %c2_129 = arith.constant 2 : index
    %c0_130 = arith.constant 0 : index
    %118 = vector.load %arg28[%c1_128, %c2_129, %c0_130] : memref<18x18x8xf32, #tpu.memory_space<vmem>>, vector<16x16x8xf32>
    %119 = vector.shape_cast %118 : vector<16x16x8xf32> to vector<256x8xf32>
    %120 = arith.truncf %119 : vector<256x8xf32> to vector<256x8xbf16>
    %c5_131 = arith.constant 5 : index
    %c0_132 = arith.constant 0 : index
    %c0_133 = arith.constant 0 : index
    %121 = vector.load %arg4[%c5_131, %c0_132, %c0_133] : memref<9x8x8xbf16, #tpu.memory_space<vmem>>, vector<1x8x8xbf16>
    %122 = vector.shape_cast %121 : vector<1x8x8xbf16> to vector<8x8xbf16>
    %cst_134 = arith.constant dense<0.000000e+00> : vector<256x8xf32>
    %123 = tpu.matmul %120, %122, %cst_134 {dimension_numbers = #tpu.dot_dimension_numbers<[1], [0], [0], [1], [0, 0, 1, 1], [], []>} : vector<256x8xbf16>, vector<8x8xbf16>, vector<256x8xf32> -> vector<256x8xf32>
    %124 = arith.addf %117, %123 : vector<256x8xf32>
    %c2_135 = arith.constant 2 : index
    %c0_136 = arith.constant 0 : index
    %c0_137 = arith.constant 0 : index
    %125 = vector.load %arg28[%c2_135, %c0_136, %c0_137] : memref<18x18x8xf32, #tpu.memory_space<vmem>>, vector<16x16x8xf32>
    %126 = vector.shape_cast %125 : vector<16x16x8xf32> to vector<256x8xf32>
    %127 = arith.truncf %126 : vector<256x8xf32> to vector<256x8xbf16>
    %c6_138 = arith.constant 6 : index
    %c0_139 = arith.constant 0 : index
    %c0_140 = arith.constant 0 : index
    %128 = vector.load %arg4[%c6_138, %c0_139, %c0_140] : memref<9x8x8xbf16, #tpu.memory_space<vmem>>, vector<1x8x8xbf16>
    %129 = vector.shape_cast %128 : vector<1x8x8xbf16> to vector<8x8xbf16>
    %cst_141 = arith.constant dense<0.000000e+00> : vector<256x8xf32>
    %130 = tpu.matmul %127, %129, %cst_141 {dimension_numbers = #tpu.dot_dimension_numbers<[1], [0], [0], [1], [0, 0, 1, 1], [], []>} : vector<256x8xbf16>, vector<8x8xbf16>, vector<256x8xf32> -> vector<256x8xf32>
    %131 = arith.addf %124, %130 : vector<256x8xf32>
    %c2_142 = arith.constant 2 : index
    %c1_143 = arith.constant 1 : index
    %c0_144 = arith.constant 0 : index
    %132 = vector.load %arg28[%c2_142, %c1_143, %c0_144] : memref<18x18x8xf32, #tpu.memory_space<vmem>>, vector<16x16x8xf32>
    %133 = vector.shape_cast %132 : vector<16x16x8xf32> to vector<256x8xf32>
    %134 = arith.truncf %133 : vector<256x8xf32> to vector<256x8xbf16>
    %c7_145 = arith.constant 7 : index
    %c0_146 = arith.constant 0 : index
    %c0_147 = arith.constant 0 : index
    %135 = vector.load %arg4[%c7_145, %c0_146, %c0_147] : memref<9x8x8xbf16, #tpu.memory_space<vmem>>, vector<1x8x8xbf16>
    %136 = vector.shape_cast %135 : vector<1x8x8xbf16> to vector<8x8xbf16>
    %cst_148 = arith.constant dense<0.000000e+00> : vector<256x8xf32>
    %137 = tpu.matmul %134, %136, %cst_148 {dimension_numbers = #tpu.dot_dimension_numbers<[1], [0], [0], [1], [0, 0, 1, 1], [], []>} : vector<256x8xbf16>, vector<8x8xbf16>, vector<256x8xf32> -> vector<256x8xf32>
    %138 = arith.addf %131, %137 : vector<256x8xf32>
    %c2_149 = arith.constant 2 : index
    %c2_150 = arith.constant 2 : index
    %c0_151 = arith.constant 0 : index
    %139 = vector.load %arg28[%c2_149, %c2_150, %c0_151] : memref<18x18x8xf32, #tpu.memory_space<vmem>>, vector<16x16x8xf32>
    %140 = vector.shape_cast %139 : vector<16x16x8xf32> to vector<256x8xf32>
    %141 = arith.truncf %140 : vector<256x8xf32> to vector<256x8xbf16>
    %c8_152 = arith.constant 8 : index
    %c0_153 = arith.constant 0 : index
    %c0_154 = arith.constant 0 : index
    %142 = vector.load %arg4[%c8_152, %c0_153, %c0_154] : memref<9x8x8xbf16, #tpu.memory_space<vmem>>, vector<1x8x8xbf16>
    %143 = vector.shape_cast %142 : vector<1x8x8xbf16> to vector<8x8xbf16>
    %cst_155 = arith.constant dense<0.000000e+00> : vector<256x8xf32>
    %144 = tpu.matmul %141, %143, %cst_155 {dimension_numbers = #tpu.dot_dimension_numbers<[1], [0], [0], [1], [0, 0, 1, 1], [], []>} : vector<256x8xbf16>, vector<8x8xbf16>, vector<256x8xf32> -> vector<256x8xf32>
    %145 = arith.addf %138, %144 : vector<256x8xf32>
    %c0_156 = arith.constant 0 : index
    %c0_157 = arith.constant 0 : index
    %146 = vector.load %arg5[%c0_156, %c0_157] : memref<1x8xf32, #tpu.memory_space<vmem>>, vector<1x8xf32>
    %147 = vector.broadcast %146 : vector<1x8xf32> to vector<256x8xf32>
    %148 = arith.addf %145, %147 : vector<256x8xf32>
    %cst_158 = arith.constant 0.000000e+00 : f32
    %149 = vector.broadcast %cst_158 : f32 to vector<256x8xf32>
    %150 = arith.maximumf %148, %149 : vector<256x8xf32>
    %151 = vector.shape_cast %150 : vector<256x8xf32> to vector<16x16x8xf32>
    %152 = arith.truncf %151 : vector<16x16x8xf32> to vector<16x16x8xbf16>
    %c0_159 = arith.constant 0 : index
    %c0_160 = arith.constant 0 : index
    %c0_161 = arith.constant 0 : index
    %c0_162 = arith.constant 0 : index
    %153 = vector.load %arg22[%c0_159, %c0_160, %c0_161, %c0_162] : memref<1x16x16x8xbf16, #tpu.memory_space<vmem>>, vector<1x16x16x8xbf16>
    %154 = vector.shape_cast %153 : vector<1x16x16x8xbf16> to vector<16x16x8xbf16>
    %155 = vector.shape_cast %152 : vector<16x16x8xbf16> to vector<1x16x16x8xbf16>
    tpu.vector_store %arg22[%c0_159, %c0_160, %c0_161, %c0_162], %155 {strides = array<i32>} : memref<1x16x16x8xbf16, #tpu.memory_space<vmem>>, vector<1x16x16x8xbf16>,
    %156 = vector.shape_cast %151 : vector<16x16x8xf32> to vector<8x2x16x8xf32>
    %157 = vector.extract_strided_slice %156 {offsets = [0, 0, 0, 0], sizes = [8, 1, 16, 8], strides = [1, 1, 1, 1]} : vector<8x2x16x8xf32> to vector<8x1x16x8xf32>
    %158 = vector.shape_cast %157 : vector<8x1x16x8xf32> to vector<8x16x8xf32>
    %159 = vector.extract_strided_slice %156 {offsets = [0, 1, 0, 0], sizes = [8, 1, 16, 8], strides = [1, 1, 1, 1]} : vector<8x2x16x8xf32> to vector<8x1x16x8xf32>
    %160 = vector.shape_cast %159 : vector<8x1x16x8xf32> to vector<8x16x8xf32>
    %161 = arith.maximumf %158, %160 : vector<8x16x8xf32>
    %c0_163 = arith.constant 0 : index
    %c0_164 = arith.constant 0 : index
    %c0_165 = arith.constant 0 : index
    %162 = vector.load %arg37[%c0_163, %c0_164, %c0_165] : memref<8x16x8xf32, #tpu.memory_space<vmem>>, vector<8x16x8xf32>
    tpu.vector_store %arg37[%c0_163, %c0_164, %c0_165], %161 {strides = array<i32>} : memref<8x16x8xf32, #tpu.memory_space<vmem>>, vector<8x16x8xf32>,
    %c0_166 = arith.constant 0 : index
    %c0_167 = arith.constant 0 : index
    %c0_168 = arith.constant 0 : index
    %163 = tpu.strided_load %arg37[%c0_166, %c0_167, %c0_168] {strides = array<i32: 1, 2, 1>} : memref<8x16x8xf32, #tpu.memory_space<vmem>>, vector<8x8x8xf32>
    %c0_169 = arith.constant 0 : index
    %c1_170 = arith.constant 1 : index
    %c0_171 = arith.constant 0 : index
    %164 = tpu.strided_load %arg37[%c0_169, %c1_170, %c0_171] {strides = array<i32: 1, 2, 1>} : memref<8x16x8xf32, #tpu.memory_space<vmem>>, vector<8x8x8xf32>
    %165 = arith.maximumf %163, %164 : vector<8x8x8xf32>
    %cst_172 = arith.constant 0.000000e+00 : f32
    %166 = vector.broadcast %cst_172 : f32 to vector<1x10x8xf32>
    %cst_173 = arith.constant 0.000000e+00 : f32
    %167 = vector.broadcast %cst_173 : f32 to vector<10x1x8xf32>
    %c0_174 = arith.constant 0 : index
    %c0_175 = arith.constant 0 : index
    %c0_176 = arith.constant 0 : index
    %168 = vector.load %arg29[%c0_174, %c0_175, %c0_176] : memref<10x10x8xf32, #tpu.memory_space<vmem>>, vector<1x10x8xf32>
    tpu.vector_store %arg29[%c0_174, %c0_175, %c0_176], %166 {strides = array<i32>} : memref<10x10x8xf32, #tpu.memory_space<vmem>>, vector<1x10x8xf32>,
    %c9 = arith.constant 9 : index
    %c0_177 = arith.constant 0 : index
    %c0_178 = arith.constant 0 : index
    %169 = vector.load %arg29[%c9, %c0_177, %c0_178] : memref<10x10x8xf32, #tpu.memory_space<vmem>>, vector<1x10x8xf32>
    tpu.vector_store %arg29[%c9, %c0_177, %c0_178], %166 {strides = array<i32>} : memref<10x10x8xf32, #tpu.memory_space<vmem>>, vector<1x10x8xf32>,
    %c0_179 = arith.constant 0 : index
    %c0_180 = arith.constant 0 : index
    %c0_181 = arith.constant 0 : index
    %170 = vector.load %arg29[%c0_179, %c0_180, %c0_181] : memref<10x10x8xf32, #tpu.memory_space<vmem>>, vector<10x1x8xf32>
    tpu.vector_store %arg29[%c0_179, %c0_180, %c0_181], %167 {strides = array<i32>} : memref<10x10x8xf32, #tpu.memory_space<vmem>>, vector<10x1x8xf32>,
    %c0_182 = arith.constant 0 : index
    %c9_183 = arith.constant 9 : index
    %c0_184 = arith.constant 0 : index
    %171 = vector.load %arg29[%c0_182, %c9_183, %c0_184] : memref<10x10x8xf32, #tpu.memory_space<vmem>>, vector<10x1x8xf32>
    tpu.vector_store %arg29[%c0_182, %c9_183, %c0_184], %167 {strides = array<i32>} : memref<10x10x8xf32, #tpu.memory_space<vmem>>, vector<10x1x8xf32>,
    %cst_185 = arith.constant 0.000000e+00 : f32
    %172 = vector.broadcast %cst_185 : f32 to vector<1x10x16xf32>
    %cst_186 = arith.constant 0.000000e+00 : f32
    %173 = vector.broadcast %cst_186 : f32 to vector<10x1x16xf32>
    %c0_187 = arith.constant 0 : index
    %c0_188 = arith.constant 0 : index
    %c0_189 = arith.constant 0 : index
    %174 = vector.load %arg30[%c0_187, %c0_188, %c0_189] : memref<10x10x16xf32, #tpu.memory_space<vmem>>, vector<1x10x16xf32>
    tpu.vector_store %arg30[%c0_187, %c0_188, %c0_189], %172 {strides = array<i32>} : memref<10x10x16xf32, #tpu.memory_space<vmem>>, vector<1x10x16xf32>,
    %c9_190 = arith.constant 9 : index
    %c0_191 = arith.constant 0 : index
    %c0_192 = arith.constant 0 : index
    %175 = vector.load %arg30[%c9_190, %c0_191, %c0_192] : memref<10x10x16xf32, #tpu.memory_space<vmem>>, vector<1x10x16xf32>
    tpu.vector_store %arg30[%c9_190, %c0_191, %c0_192], %172 {strides = array<i32>} : memref<10x10x16xf32, #tpu.memory_space<vmem>>, vector<1x10x16xf32>,
    %c0_193 = arith.constant 0 : index
    %c0_194 = arith.constant 0 : index
    %c0_195 = arith.constant 0 : index
    %176 = vector.load %arg30[%c0_193, %c0_194, %c0_195] : memref<10x10x16xf32, #tpu.memory_space<vmem>>, vector<10x1x16xf32>
    tpu.vector_store %arg30[%c0_193, %c0_194, %c0_195], %173 {strides = array<i32>} : memref<10x10x16xf32, #tpu.memory_space<vmem>>, vector<10x1x16xf32>,
    %c0_196 = arith.constant 0 : index
    %c9_197 = arith.constant 9 : index
    %c0_198 = arith.constant 0 : index
    %177 = vector.load %arg30[%c0_196, %c9_197, %c0_198] : memref<10x10x16xf32, #tpu.memory_space<vmem>>, vector<10x1x16xf32>
    tpu.vector_store %arg30[%c0_196, %c9_197, %c0_198], %173 {strides = array<i32>} : memref<10x10x16xf32, #tpu.memory_space<vmem>>, vector<10x1x16xf32>,
    %c1_199 = arith.constant 1 : index
    %c1_200 = arith.constant 1 : index
    %c0_201 = arith.constant 0 : index
    %178 = vector.load %arg29[%c1_199, %c1_200, %c0_201] : memref<10x10x8xf32, #tpu.memory_space<vmem>>, vector<8x8x8xf32>
    tpu.vector_store %arg29[%c1_199, %c1_200, %c0_201], %165 {strides = array<i32>} : memref<10x10x8xf32, #tpu.memory_space<vmem>>, vector<8x8x8xf32>,
    %c0_202 = arith.constant 0 : index
    %c0_203 = arith.constant 0 : index
    %c0_204 = arith.constant 0 : index
    %179 = vector.load %arg29[%c0_202, %c0_203, %c0_204] : memref<10x10x8xf32, #tpu.memory_space<vmem>>, vector<8x8x8xf32>
    %180 = vector.shape_cast %179 : vector<8x8x8xf32> to vector<64x8xf32>
    %181 = arith.truncf %180 : vector<64x8xf32> to vector<64x8xbf16>
    %c0_205 = arith.constant 0 : index
    %c0_206 = arith.constant 0 : index
    %c0_207 = arith.constant 0 : index
    %182 = vector.load %arg6[%c0_205, %c0_206, %c0_207] : memref<9x8x16xbf16, #tpu.memory_space<vmem>>, vector<1x8x16xbf16>
    %183 = vector.shape_cast %182 : vector<1x8x16xbf16> to vector<8x16xbf16>
    %cst_208 = arith.constant dense<0.000000e+00> : vector<64x16xf32>
    %184 = tpu.matmul %181, %183, %cst_208 {dimension_numbers = #tpu.dot_dimension_numbers<[1], [0], [0], [1], [0, 0, 1, 1], [], []>} : vector<64x8xbf16>, vector<8x16xbf16>, vector<64x16xf32> -> vector<64x16xf32>
    %c0_209 = arith.constant 0 : index
    %c1_210 = arith.constant 1 : index
    %c0_211 = arith.constant 0 : index
    %185 = vector.load %arg29[%c0_209, %c1_210, %c0_211] : memref<10x10x8xf32, #tpu.memory_space<vmem>>, vector<8x8x8xf32>
    %186 = vector.shape_cast %185 : vector<8x8x8xf32> to vector<64x8xf32>
    %187 = arith.truncf %186 : vector<64x8xf32> to vector<64x8xbf16>
    %c1_212 = arith.constant 1 : index
    %c0_213 = arith.constant 0 : index
    %c0_214 = arith.constant 0 : index
    %188 = vector.load %arg6[%c1_212, %c0_213, %c0_214] : memref<9x8x16xbf16, #tpu.memory_space<vmem>>, vector<1x8x16xbf16>
    %189 = vector.shape_cast %188 : vector<1x8x16xbf16> to vector<8x16xbf16>
    %cst_215 = arith.constant dense<0.000000e+00> : vector<64x16xf32>
    %190 = tpu.matmul %187, %189, %cst_215 {dimension_numbers = #tpu.dot_dimension_numbers<[1], [0], [0], [1], [0, 0, 1, 1], [], []>} : vector<64x8xbf16>, vector<8x16xbf16>, vector<64x16xf32> -> vector<64x16xf32>
    %191 = arith.addf %184, %190 : vector<64x16xf32>
    %c0_216 = arith.constant 0 : index
    %c2_217 = arith.constant 2 : index
    %c0_218 = arith.constant 0 : index
    %192 = vector.load %arg29[%c0_216, %c2_217, %c0_218] : memref<10x10x8xf32, #tpu.memory_space<vmem>>, vector<8x8x8xf32>
    %193 = vector.shape_cast %192 : vector<8x8x8xf32> to vector<64x8xf32>
    %194 = arith.truncf %193 : vector<64x8xf32> to vector<64x8xbf16>
    %c2_219 = arith.constant 2 : index
    %c0_220 = arith.constant 0 : index
    %c0_221 = arith.constant 0 : index
    %195 = vector.load %arg6[%c2_219, %c0_220, %c0_221] : memref<9x8x16xbf16, #tpu.memory_space<vmem>>, vector<1x8x16xbf16>
    %196 = vector.shape_cast %195 : vector<1x8x16xbf16> to vector<8x16xbf16>
    %cst_222 = arith.constant dense<0.000000e+00> : vector<64x16xf32>
    %197 = tpu.matmul %194, %196, %cst_222 {dimension_numbers = #tpu.dot_dimension_numbers<[1], [0], [0], [1], [0, 0, 1, 1], [], []>} : vector<64x8xbf16>, vector<8x16xbf16>, vector<64x16xf32> -> vector<64x16xf32>
    %198 = arith.addf %191, %197 : vector<64x16xf32>
    %c1_223 = arith.constant 1 : index
    %c0_224 = arith.constant 0 : index
    %c0_225 = arith.constant 0 : index
    %199 = vector.load %arg29[%c1_223, %c0_224, %c0_225] : memref<10x10x8xf32, #tpu.memory_space<vmem>>, vector<8x8x8xf32>
    %200 = vector.shape_cast %199 : vector<8x8x8xf32> to vector<64x8xf32>
    %201 = arith.truncf %200 : vector<64x8xf32> to vector<64x8xbf16>
    %c3_226 = arith.constant 3 : index
    %c0_227 = arith.constant 0 : index
    %c0_228 = arith.constant 0 : index
    %202 = vector.load %arg6[%c3_226, %c0_227, %c0_228] : memref<9x8x16xbf16, #tpu.memory_space<vmem>>, vector<1x8x16xbf16>
    %203 = vector.shape_cast %202 : vector<1x8x16xbf16> to vector<8x16xbf16>
    %cst_229 = arith.constant dense<0.000000e+00> : vector<64x16xf32>
    %204 = tpu.matmul %201, %203, %cst_229 {dimension_numbers = #tpu.dot_dimension_numbers<[1], [0], [0], [1], [0, 0, 1, 1], [], []>} : vector<64x8xbf16>, vector<8x16xbf16>, vector<64x16xf32> -> vector<64x16xf32>
    %205 = arith.addf %198, %204 : vector<64x16xf32>
    %c1_230 = arith.constant 1 : index
    %c1_231 = arith.constant 1 : index
    %c0_232 = arith.constant 0 : index
    %206 = vector.load %arg29[%c1_230, %c1_231, %c0_232] : memref<10x10x8xf32, #tpu.memory_space<vmem>>, vector<8x8x8xf32>
    %207 = vector.shape_cast %206 : vector<8x8x8xf32> to vector<64x8xf32>
    %208 = arith.truncf %207 : vector<64x8xf32> to vector<64x8xbf16>
    %c4_233 = arith.constant 4 : index
    %c0_234 = arith.constant 0 : index
    %c0_235 = arith.constant 0 : index
    %209 = vector.load %arg6[%c4_233, %c0_234, %c0_235] : memref<9x8x16xbf16, #tpu.memory_space<vmem>>, vector<1x8x16xbf16>
    %210 = vector.shape_cast %209 : vector<1x8x16xbf16> to vector<8x16xbf16>
    %cst_236 = arith.constant dense<0.000000e+00> : vector<64x16xf32>
    %211 = tpu.matmul %208, %210, %cst_236 {dimension_numbers = #tpu.dot_dimension_numbers<[1], [0], [0], [1], [0, 0, 1, 1], [], []>} : vector<64x8xbf16>, vector<8x16xbf16>, vector<64x16xf32> -> vector<64x16xf32>
    %212 = arith.addf %205, %211 : vector<64x16xf32>
    %c1_237 = arith.constant 1 : index
    %c2_238 = arith.constant 2 : index
    %c0_239 = arith.constant 0 : index
    %213 = vector.load %arg29[%c1_237, %c2_238, %c0_239] : memref<10x10x8xf32, #tpu.memory_space<vmem>>, vector<8x8x8xf32>
    %214 = vector.shape_cast %213 : vector<8x8x8xf32> to vector<64x8xf32>
    %215 = arith.truncf %214 : vector<64x8xf32> to vector<64x8xbf16>
    %c5_240 = arith.constant 5 : index
    %c0_241 = arith.constant 0 : index
    %c0_242 = arith.constant 0 : index
    %216 = vector.load %arg6[%c5_240, %c0_241, %c0_242] : memref<9x8x16xbf16, #tpu.memory_space<vmem>>, vector<1x8x16xbf16>
    %217 = vector.shape_cast %216 : vector<1x8x16xbf16> to vector<8x16xbf16>
    %cst_243 = arith.constant dense<0.000000e+00> : vector<64x16xf32>
    %218 = tpu.matmul %215, %217, %cst_243 {dimension_numbers = #tpu.dot_dimension_numbers<[1], [0], [0], [1], [0, 0, 1, 1], [], []>} : vector<64x8xbf16>, vector<8x16xbf16>, vector<64x16xf32> -> vector<64x16xf32>
    %219 = arith.addf %212, %218 : vector<64x16xf32>
    %c2_244 = arith.constant 2 : index
    %c0_245 = arith.constant 0 : index
    %c0_246 = arith.constant 0 : index
    %220 = vector.load %arg29[%c2_244, %c0_245, %c0_246] : memref<10x10x8xf32, #tpu.memory_space<vmem>>, vector<8x8x8xf32>
    %221 = vector.shape_cast %220 : vector<8x8x8xf32> to vector<64x8xf32>
    %222 = arith.truncf %221 : vector<64x8xf32> to vector<64x8xbf16>
    %c6_247 = arith.constant 6 : index
    %c0_248 = arith.constant 0 : index
    %c0_249 = arith.constant 0 : index
    %223 = vector.load %arg6[%c6_247, %c0_248, %c0_249] : memref<9x8x16xbf16, #tpu.memory_space<vmem>>, vector<1x8x16xbf16>
    %224 = vector.shape_cast %223 : vector<1x8x16xbf16> to vector<8x16xbf16>
    %cst_250 = arith.constant dense<0.000000e+00> : vector<64x16xf32>
    %225 = tpu.matmul %222, %224, %cst_250 {dimension_numbers = #tpu.dot_dimension_numbers<[1], [0], [0], [1], [0, 0, 1, 1], [], []>} : vector<64x8xbf16>, vector<8x16xbf16>, vector<64x16xf32> -> vector<64x16xf32>
    %226 = arith.addf %219, %225 : vector<64x16xf32>
    %c2_251 = arith.constant 2 : index
    %c1_252 = arith.constant 1 : index
    %c0_253 = arith.constant 0 : index
    %227 = vector.load %arg29[%c2_251, %c1_252, %c0_253] : memref<10x10x8xf32, #tpu.memory_space<vmem>>, vector<8x8x8xf32>
    %228 = vector.shape_cast %227 : vector<8x8x8xf32> to vector<64x8xf32>
    %229 = arith.truncf %228 : vector<64x8xf32> to vector<64x8xbf16>
    %c7_254 = arith.constant 7 : index
    %c0_255 = arith.constant 0 : index
    %c0_256 = arith.constant 0 : index
    %230 = vector.load %arg6[%c7_254, %c0_255, %c0_256] : memref<9x8x16xbf16, #tpu.memory_space<vmem>>, vector<1x8x16xbf16>
    %231 = vector.shape_cast %230 : vector<1x8x16xbf16> to vector<8x16xbf16>
    %cst_257 = arith.constant dense<0.000000e+00> : vector<64x16xf32>
    %232 = tpu.matmul %229, %231, %cst_257 {dimension_numbers = #tpu.dot_dimension_numbers<[1], [0], [0], [1], [0, 0, 1, 1], [], []>} : vector<64x8xbf16>, vector<8x16xbf16>, vector<64x16xf32> -> vector<64x16xf32>
    %233 = arith.addf %226, %232 : vector<64x16xf32>
    %c2_258 = arith.constant 2 : index
    %c2_259 = arith.constant 2 : index
    %c0_260 = arith.constant 0 : index
    %234 = vector.load %arg29[%c2_258, %c2_259, %c0_260] : memref<10x10x8xf32, #tpu.memory_space<vmem>>, vector<8x8x8xf32>
    %235 = vector.shape_cast %234 : vector<8x8x8xf32> to vector<64x8xf32>
    %236 = arith.truncf %235 : vector<64x8xf32> to vector<64x8xbf16>
    %c8_261 = arith.constant 8 : index
    %c0_262 = arith.constant 0 : index
    %c0_263 = arith.constant 0 : index
    %237 = vector.load %arg6[%c8_261, %c0_262, %c0_263] : memref<9x8x16xbf16, #tpu.memory_space<vmem>>, vector<1x8x16xbf16>
    %238 = vector.shape_cast %237 : vector<1x8x16xbf16> to vector<8x16xbf16>
    %cst_264 = arith.constant dense<0.000000e+00> : vector<64x16xf32>
    %239 = tpu.matmul %236, %238, %cst_264 {dimension_numbers = #tpu.dot_dimension_numbers<[1], [0], [0], [1], [0, 0, 1, 1], [], []>} : vector<64x8xbf16>, vector<8x16xbf16>, vector<64x16xf32> -> vector<64x16xf32>
    %240 = arith.addf %233, %239 : vector<64x16xf32>
    %c0_265 = arith.constant 0 : index
    %c0_266 = arith.constant 0 : index
    %241 = vector.load %arg7[%c0_265, %c0_266] : memref<1x16xf32, #tpu.memory_space<vmem>>, vector<1x16xf32>
    %242 = vector.broadcast %241 : vector<1x16xf32> to vector<64x16xf32>
    %243 = arith.addf %240, %242 : vector<64x16xf32>
    %cst_267 = arith.constant 0.000000e+00 : f32
    %244 = vector.broadcast %cst_267 : f32 to vector<64x16xf32>
    %245 = arith.maximumf %243, %244 : vector<64x16xf32>
    %246 = vector.shape_cast %245 : vector<64x16xf32> to vector<8x8x16xf32>
    %c1_268 = arith.constant 1 : index
    %c1_269 = arith.constant 1 : index
    %c0_270 = arith.constant 0 : index
    %247 = vector.load %arg30[%c1_268, %c1_269, %c0_270] : memref<10x10x16xf32, #tpu.memory_space<vmem>>, vector<8x8x16xf32>
    tpu.vector_store %arg30[%c1_268, %c1_269, %c0_270], %246 {strides = array<i32>} : memref<10x10x16xf32, #tpu.memory_space<vmem>>, vector<8x8x16xf32>,
    %c0_271 = arith.constant 0 : index
    %c0_272 = arith.constant 0 : index
    %c0_273 = arith.constant 0 : index
    %248 = vector.load %arg30[%c0_271, %c0_272, %c0_273] : memref<10x10x16xf32, #tpu.memory_space<vmem>>, vector<8x8x16xf32>
    %249 = vector.shape_cast %248 : vector<8x8x16xf32> to vector<64x16xf32>
    %250 = arith.truncf %249 : vector<64x16xf32> to vector<64x16xbf16>
    %c0_274 = arith.constant 0 : index
    %c0_275 = arith.constant 0 : index
    %c0_276 = arith.constant 0 : index
    %251 = vector.load %arg8[%c0_274, %c0_275, %c0_276] : memref<9x16x16xbf16, #tpu.memory_space<vmem>>, vector<1x16x16xbf16>
    %252 = vector.shape_cast %251 : vector<1x16x16xbf16> to vector<16x16xbf16>
    %cst_277 = arith.constant dense<0.000000e+00> : vector<64x16xf32>
    %253 = tpu.matmul %250, %252, %cst_277 {dimension_numbers = #tpu.dot_dimension_numbers<[1], [0], [0], [1], [0, 0, 1, 1], [], []>} : vector<64x16xbf16>, vector<16x16xbf16>, vector<64x16xf32> -> vector<64x16xf32>
    %c0_278 = arith.constant 0 : index
    %c1_279 = arith.constant 1 : index
    %c0_280 = arith.constant 0 : index
    %254 = vector.load %arg30[%c0_278, %c1_279, %c0_280] : memref<10x10x16xf32, #tpu.memory_space<vmem>>, vector<8x8x16xf32>
    %255 = vector.shape_cast %254 : vector<8x8x16xf32> to vector<64x16xf32>
    %256 = arith.truncf %255 : vector<64x16xf32> to vector<64x16xbf16>
    %c1_281 = arith.constant 1 : index
    %c0_282 = arith.constant 0 : index
    %c0_283 = arith.constant 0 : index
    %257 = vector.load %arg8[%c1_281, %c0_282, %c0_283] : memref<9x16x16xbf16, #tpu.memory_space<vmem>>, vector<1x16x16xbf16>
    %258 = vector.shape_cast %257 : vector<1x16x16xbf16> to vector<16x16xbf16>
    %cst_284 = arith.constant dense<0.000000e+00> : vector<64x16xf32>
    %259 = tpu.matmul %256, %258, %cst_284 {dimension_numbers = #tpu.dot_dimension_numbers<[1], [0], [0], [1], [0, 0, 1, 1], [], []>} : vector<64x16xbf16>, vector<16x16xbf16>, vector<64x16xf32> -> vector<64x16xf32>
    %260 = arith.addf %253, %259 : vector<64x16xf32>
    %c0_285 = arith.constant 0 : index
    %c2_286 = arith.constant 2 : index
    %c0_287 = arith.constant 0 : index
    %261 = vector.load %arg30[%c0_285, %c2_286, %c0_287] : memref<10x10x16xf32, #tpu.memory_space<vmem>>, vector<8x8x16xf32>
    %262 = vector.shape_cast %261 : vector<8x8x16xf32> to vector<64x16xf32>
    %263 = arith.truncf %262 : vector<64x16xf32> to vector<64x16xbf16>
    %c2_288 = arith.constant 2 : index
    %c0_289 = arith.constant 0 : index
    %c0_290 = arith.constant 0 : index
    %264 = vector.load %arg8[%c2_288, %c0_289, %c0_290] : memref<9x16x16xbf16, #tpu.memory_space<vmem>>, vector<1x16x16xbf16>
    %265 = vector.shape_cast %264 : vector<1x16x16xbf16> to vector<16x16xbf16>
    %cst_291 = arith.constant dense<0.000000e+00> : vector<64x16xf32>
    %266 = tpu.matmul %263, %265, %cst_291 {dimension_numbers = #tpu.dot_dimension_numbers<[1], [0], [0], [1], [0, 0, 1, 1], [], []>} : vector<64x16xbf16>, vector<16x16xbf16>, vector<64x16xf32> -> vector<64x16xf32>
    %267 = arith.addf %260, %266 : vector<64x16xf32>
    %c1_292 = arith.constant 1 : index
    %c0_293 = arith.constant 0 : index
    %c0_294 = arith.constant 0 : index
    %268 = vector.load %arg30[%c1_292, %c0_293, %c0_294] : memref<10x10x16xf32, #tpu.memory_space<vmem>>, vector<8x8x16xf32>
    %269 = vector.shape_cast %268 : vector<8x8x16xf32> to vector<64x16xf32>
    %270 = arith.truncf %269 : vector<64x16xf32> to vector<64x16xbf16>
    %c3_295 = arith.constant 3 : index
    %c0_296 = arith.constant 0 : index
    %c0_297 = arith.constant 0 : index
    %271 = vector.load %arg8[%c3_295, %c0_296, %c0_297] : memref<9x16x16xbf16, #tpu.memory_space<vmem>>, vector<1x16x16xbf16>
    %272 = vector.shape_cast %271 : vector<1x16x16xbf16> to vector<16x16xbf16>
    %cst_298 = arith.constant dense<0.000000e+00> : vector<64x16xf32>
    %273 = tpu.matmul %270, %272, %cst_298 {dimension_numbers = #tpu.dot_dimension_numbers<[1], [0], [0], [1], [0, 0, 1, 1], [], []>} : vector<64x16xbf16>, vector<16x16xbf16>, vector<64x16xf32> -> vector<64x16xf32>
    %274 = arith.addf %267, %273 : vector<64x16xf32>
    %c1_299 = arith.constant 1 : index
    %c1_300 = arith.constant 1 : index
    %c0_301 = arith.constant 0 : index
    %275 = vector.load %arg30[%c1_299, %c1_300, %c0_301] : memref<10x10x16xf32, #tpu.memory_space<vmem>>, vector<8x8x16xf32>
    %276 = vector.shape_cast %275 : vector<8x8x16xf32> to vector<64x16xf32>
    %277 = arith.truncf %276 : vector<64x16xf32> to vector<64x16xbf16>
    %c4_302 = arith.constant 4 : index
    %c0_303 = arith.constant 0 : index
    %c0_304 = arith.constant 0 : index
    %278 = vector.load %arg8[%c4_302, %c0_303, %c0_304] : memref<9x16x16xbf16, #tpu.memory_space<vmem>>, vector<1x16x16xbf16>
    %279 = vector.shape_cast %278 : vector<1x16x16xbf16> to vector<16x16xbf16>
    %cst_305 = arith.constant dense<0.000000e+00> : vector<64x16xf32>
    %280 = tpu.matmul %277, %279, %cst_305 {dimension_numbers = #tpu.dot_dimension_numbers<[1], [0], [0], [1], [0, 0, 1, 1], [], []>} : vector<64x16xbf16>, vector<16x16xbf16>, vector<64x16xf32> -> vector<64x16xf32>
    %281 = arith.addf %274, %280 : vector<64x16xf32>
    %c1_306 = arith.constant 1 : index
    %c2_307 = arith.constant 2 : index
    %c0_308 = arith.constant 0 : index
    %282 = vector.load %arg30[%c1_306, %c2_307, %c0_308] : memref<10x10x16xf32, #tpu.memory_space<vmem>>, vector<8x8x16xf32>
    %283 = vector.shape_cast %282 : vector<8x8x16xf32> to vector<64x16xf32>
    %284 = arith.truncf %283 : vector<64x16xf32> to vector<64x16xbf16>
    %c5_309 = arith.constant 5 : index
    %c0_310 = arith.constant 0 : index
    %c0_311 = arith.constant 0 : index
    %285 = vector.load %arg8[%c5_309, %c0_310, %c0_311] : memref<9x16x16xbf16, #tpu.memory_space<vmem>>, vector<1x16x16xbf16>
    %286 = vector.shape_cast %285 : vector<1x16x16xbf16> to vector<16x16xbf16>
    %cst_312 = arith.constant dense<0.000000e+00> : vector<64x16xf32>
    %287 = tpu.matmul %284, %286, %cst_312 {dimension_numbers = #tpu.dot_dimension_numbers<[1], [0], [0], [1], [0, 0, 1, 1], [], []>} : vector<64x16xbf16>, vector<16x16xbf16>, vector<64x16xf32> -> vector<64x16xf32>
    %288 = arith.addf %281, %287 : vector<64x16xf32>
    %c2_313 = arith.constant 2 : index
    %c0_314 = arith.constant 0 : index
    %c0_315 = arith.constant 0 : index
    %289 = vector.load %arg30[%c2_313, %c0_314, %c0_315] : memref<10x10x16xf32, #tpu.memory_space<vmem>>, vector<8x8x16xf32>
    %290 = vector.shape_cast %289 : vector<8x8x16xf32> to vector<64x16xf32>
    %291 = arith.truncf %290 : vector<64x16xf32> to vector<64x16xbf16>
    %c6_316 = arith.constant 6 : index
    %c0_317 = arith.constant 0 : index
    %c0_318 = arith.constant 0 : index
    %292 = vector.load %arg8[%c6_316, %c0_317, %c0_318] : memref<9x16x16xbf16, #tpu.memory_space<vmem>>, vector<1x16x16xbf16>
    %293 = vector.shape_cast %292 : vector<1x16x16xbf16> to vector<16x16xbf16>
    %cst_319 = arith.constant dense<0.000000e+00> : vector<64x16xf32>
    %294 = tpu.matmul %291, %293, %cst_319 {dimension_numbers = #tpu.dot_dimension_numbers<[1], [0], [0], [1], [0, 0, 1, 1], [], []>} : vector<64x16xbf16>, vector<16x16xbf16>, vector<64x16xf32> -> vector<64x16xf32>
    %295 = arith.addf %288, %294 : vector<64x16xf32>
    %c2_320 = arith.constant 2 : index
    %c1_321 = arith.constant 1 : index
    %c0_322 = arith.constant 0 : index
    %296 = vector.load %arg30[%c2_320, %c1_321, %c0_322] : memref<10x10x16xf32, #tpu.memory_space<vmem>>, vector<8x8x16xf32>
    %297 = vector.shape_cast %296 : vector<8x8x16xf32> to vector<64x16xf32>
    %298 = arith.truncf %297 : vector<64x16xf32> to vector<64x16xbf16>
    %c7_323 = arith.constant 7 : index
    %c0_324 = arith.constant 0 : index
    %c0_325 = arith.constant 0 : index
    %299 = vector.load %arg8[%c7_323, %c0_324, %c0_325] : memref<9x16x16xbf16, #tpu.memory_space<vmem>>, vector<1x16x16xbf16>
    %300 = vector.shape_cast %299 : vector<1x16x16xbf16> to vector<16x16xbf16>
    %cst_326 = arith.constant dense<0.000000e+00> : vector<64x16xf32>
    %301 = tpu.matmul %298, %300, %cst_326 {dimension_numbers = #tpu.dot_dimension_numbers<[1], [0], [0], [1], [0, 0, 1, 1], [], []>} : vector<64x16xbf16>, vector<16x16xbf16>, vector<64x16xf32> -> vector<64x16xf32>
    %302 = arith.addf %295, %301 : vector<64x16xf32>
    %c2_327 = arith.constant 2 : index
    %c2_328 = arith.constant 2 : index
    %c0_329 = arith.constant 0 : index
    %303 = vector.load %arg30[%c2_327, %c2_328, %c0_329] : memref<10x10x16xf32, #tpu.memory_space<vmem>>, vector<8x8x16xf32>
    %304 = vector.shape_cast %303 : vector<8x8x16xf32> to vector<64x16xf32>
    %305 = arith.truncf %304 : vector<64x16xf32> to vector<64x16xbf16>
    %c8_330 = arith.constant 8 : index
    %c0_331 = arith.constant 0 : index
    %c0_332 = arith.constant 0 : index
    %306 = vector.load %arg8[%c8_330, %c0_331, %c0_332] : memref<9x16x16xbf16, #tpu.memory_space<vmem>>, vector<1x16x16xbf16>
    %307 = vector.shape_cast %306 : vector<1x16x16xbf16> to vector<16x16xbf16>
    %cst_333 = arith.constant dense<0.000000e+00> : vector<64x16xf32>
    %308 = tpu.matmul %305, %307, %cst_333 {dimension_numbers = #tpu.dot_dimension_numbers<[1], [0], [0], [1], [0, 0, 1, 1], [], []>} : vector<64x16xbf16>, vector<16x16xbf16>, vector<64x16xf32> -> vector<64x16xf32>
    %309 = arith.addf %302, %308 : vector<64x16xf32>
    %c0_334 = arith.constant 0 : index
    %c0_335 = arith.constant 0 : index
    %310 = vector.load %arg9[%c0_334, %c0_335] : memref<1x16xf32, #tpu.memory_space<vmem>>, vector<1x16xf32>
    %311 = vector.broadcast %310 : vector<1x16xf32> to vector<64x16xf32>
    %312 = arith.addf %309, %311 : vector<64x16xf32>
    %cst_336 = arith.constant 0.000000e+00 : f32
    %313 = vector.broadcast %cst_336 : f32 to vector<64x16xf32>
    %314 = arith.maximumf %312, %313 : vector<64x16xf32>
    %315 = vector.shape_cast %314 : vector<64x16xf32> to vector<8x8x16xf32>
    %316 = arith.truncf %315 : vector<8x8x16xf32> to vector<8x8x16xbf16>
    %c0_337 = arith.constant 0 : index
    %c0_338 = arith.constant 0 : index
    %c0_339 = arith.constant 0 : index
    %c0_340 = arith.constant 0 : index
    %317 = vector.load %arg23[%c0_337, %c0_338, %c0_339, %c0_340] : memref<1x8x8x16xbf16, #tpu.memory_space<vmem>>, vector<1x8x8x16xbf16>
    %318 = vector.shape_cast %317 : vector<1x8x8x16xbf16> to vector<8x8x16xbf16>
    %319 = vector.shape_cast %316 : vector<8x8x16xbf16> to vector<1x8x8x16xbf16>
    tpu.vector_store %arg23[%c0_337, %c0_338, %c0_339, %c0_340], %319 {strides = array<i32>} : memref<1x8x8x16xbf16, #tpu.memory_space<vmem>>, vector<1x8x8x16xbf16>,
    %320 = vector.shape_cast %315 : vector<8x8x16xf32> to vector<4x2x8x16xf32>
    %321 = vector.extract_strided_slice %320 {offsets = [0, 0, 0, 0], sizes = [4, 1, 8, 16], strides = [1, 1, 1, 1]} : vector<4x2x8x16xf32> to vector<4x1x8x16xf32>
    %322 = vector.shape_cast %321 : vector<4x1x8x16xf32> to vector<4x8x16xf32>
    %323 = vector.extract_strided_slice %320 {offsets = [0, 1, 0, 0], sizes = [4, 1, 8, 16], strides = [1, 1, 1, 1]} : vector<4x2x8x16xf32> to vector<4x1x8x16xf32>
    %324 = vector.shape_cast %323 : vector<4x1x8x16xf32> to vector<4x8x16xf32>
    %325 = arith.maximumf %322, %324 : vector<4x8x16xf32>
    %c0_341 = arith.constant 0 : index
    %c0_342 = arith.constant 0 : index
    %c0_343 = arith.constant 0 : index
    %326 = vector.load %arg38[%c0_341, %c0_342, %c0_343] : memref<4x8x16xf32, #tpu.memory_space<vmem>>, vector<4x8x16xf32>
    tpu.vector_store %arg38[%c0_341, %c0_342, %c0_343], %325 {strides = array<i32>} : memref<4x8x16xf32, #tpu.memory_space<vmem>>, vector<4x8x16xf32>,
    %c0_344 = arith.constant 0 : index
    %c0_345 = arith.constant 0 : index
    %c0_346 = arith.constant 0 : index
    %327 = tpu.strided_load %arg38[%c0_344, %c0_345, %c0_346] {strides = array<i32: 1, 2, 1>} : memref<4x8x16xf32, #tpu.memory_space<vmem>>, vector<4x4x16xf32>
    %c0_347 = arith.constant 0 : index
    %c1_348 = arith.constant 1 : index
    %c0_349 = arith.constant 0 : index
    %328 = tpu.strided_load %arg38[%c0_347, %c1_348, %c0_349] {strides = array<i32: 1, 2, 1>} : memref<4x8x16xf32, #tpu.memory_space<vmem>>, vector<4x4x16xf32>
    %329 = arith.maximumf %327, %328 : vector<4x4x16xf32>
    %cst_350 = arith.constant 0.000000e+00 : f32
    %330 = vector.broadcast %cst_350 : f32 to vector<1x6x16xf32>
    %cst_351 = arith.constant 0.000000e+00 : f32
    %331 = vector.broadcast %cst_351 : f32 to vector<6x1x16xf32>
    %c0_352 = arith.constant 0 : index
    %c0_353 = arith.constant 0 : index
    %c0_354 = arith.constant 0 : index
    %332 = vector.load %arg31[%c0_352, %c0_353, %c0_354] : memref<6x6x16xf32, #tpu.memory_space<vmem>>, vector<1x6x16xf32>
    tpu.vector_store %arg31[%c0_352, %c0_353, %c0_354], %330 {strides = array<i32>} : memref<6x6x16xf32, #tpu.memory_space<vmem>>, vector<1x6x16xf32>,
    %c5_355 = arith.constant 5 : index
    %c0_356 = arith.constant 0 : index
    %c0_357 = arith.constant 0 : index
    %333 = vector.load %arg31[%c5_355, %c0_356, %c0_357] : memref<6x6x16xf32, #tpu.memory_space<vmem>>, vector<1x6x16xf32>
    tpu.vector_store %arg31[%c5_355, %c0_356, %c0_357], %330 {strides = array<i32>} : memref<6x6x16xf32, #tpu.memory_space<vmem>>, vector<1x6x16xf32>,
    %c0_358 = arith.constant 0 : index
    %c0_359 = arith.constant 0 : index
    %c0_360 = arith.constant 0 : index
    %334 = vector.load %arg31[%c0_358, %c0_359, %c0_360] : memref<6x6x16xf32, #tpu.memory_space<vmem>>, vector<6x1x16xf32>
    tpu.vector_store %arg31[%c0_358, %c0_359, %c0_360], %331 {strides = array<i32>} : memref<6x6x16xf32, #tpu.memory_space<vmem>>, vector<6x1x16xf32>,
    %c0_361 = arith.constant 0 : index
    %c5_362 = arith.constant 5 : index
    %c0_363 = arith.constant 0 : index
    %335 = vector.load %arg31[%c0_361, %c5_362, %c0_363] : memref<6x6x16xf32, #tpu.memory_space<vmem>>, vector<6x1x16xf32>
    tpu.vector_store %arg31[%c0_361, %c5_362, %c0_363], %331 {strides = array<i32>} : memref<6x6x16xf32, #tpu.memory_space<vmem>>, vector<6x1x16xf32>,
    %cst_364 = arith.constant 0.000000e+00 : f32
    %336 = vector.broadcast %cst_364 : f32 to vector<1x6x32xf32>
    %cst_365 = arith.constant 0.000000e+00 : f32
    %337 = vector.broadcast %cst_365 : f32 to vector<6x1x32xf32>
    %c0_366 = arith.constant 0 : index
    %c0_367 = arith.constant 0 : index
    %c0_368 = arith.constant 0 : index
    %338 = vector.load %arg32[%c0_366, %c0_367, %c0_368] : memref<6x6x32xf32, #tpu.memory_space<vmem>>, vector<1x6x32xf32>
    tpu.vector_store %arg32[%c0_366, %c0_367, %c0_368], %336 {strides = array<i32>} : memref<6x6x32xf32, #tpu.memory_space<vmem>>, vector<1x6x32xf32>,
    %c5_369 = arith.constant 5 : index
    %c0_370 = arith.constant 0 : index
    %c0_371 = arith.constant 0 : index
    %339 = vector.load %arg32[%c5_369, %c0_370, %c0_371] : memref<6x6x32xf32, #tpu.memory_space<vmem>>, vector<1x6x32xf32>
    tpu.vector_store %arg32[%c5_369, %c0_370, %c0_371], %336 {strides = array<i32>} : memref<6x6x32xf32, #tpu.memory_space<vmem>>, vector<1x6x32xf32>,
    %c0_372 = arith.constant 0 : index
    %c0_373 = arith.constant 0 : index
    %c0_374 = arith.constant 0 : index
    %340 = vector.load %arg32[%c0_372, %c0_373, %c0_374] : memref<6x6x32xf32, #tpu.memory_space<vmem>>, vector<6x1x32xf32>
    tpu.vector_store %arg32[%c0_372, %c0_373, %c0_374], %337 {strides = array<i32>} : memref<6x6x32xf32, #tpu.memory_space<vmem>>, vector<6x1x32xf32>,
    %c0_375 = arith.constant 0 : index
    %c5_376 = arith.constant 5 : index
    %c0_377 = arith.constant 0 : index
    %341 = vector.load %arg32[%c0_375, %c5_376, %c0_377] : memref<6x6x32xf32, #tpu.memory_space<vmem>>, vector<6x1x32xf32>
    tpu.vector_store %arg32[%c0_375, %c5_376, %c0_377], %337 {strides = array<i32>} : memref<6x6x32xf32, #tpu.memory_space<vmem>>, vector<6x1x32xf32>,
    %c1_378 = arith.constant 1 : index
    %c1_379 = arith.constant 1 : index
    %c0_380 = arith.constant 0 : index
    %342 = vector.load %arg31[%c1_378, %c1_379, %c0_380] : memref<6x6x16xf32, #tpu.memory_space<vmem>>, vector<4x4x16xf32>
    tpu.vector_store %arg31[%c1_378, %c1_379, %c0_380], %329 {strides = array<i32>} : memref<6x6x16xf32, #tpu.memory_space<vmem>>, vector<4x4x16xf32>,
    %c0_381 = arith.constant 0 : index
    %c0_382 = arith.constant 0 : index
    %c0_383 = arith.constant 0 : index
    %343 = vector.load %arg31[%c0_381, %c0_382, %c0_383] : memref<6x6x16xf32, #tpu.memory_space<vmem>>, vector<4x4x16xf32>
    %344 = vector.shape_cast %343 : vector<4x4x16xf32> to vector<16x16xf32>
    %345 = arith.truncf %344 : vector<16x16xf32> to vector<16x16xbf16>
    %c0_384 = arith.constant 0 : index
    %c0_385 = arith.constant 0 : index
    %c0_386 = arith.constant 0 : index
    %346 = vector.load %arg10[%c0_384, %c0_385, %c0_386] : memref<9x16x32xbf16, #tpu.memory_space<vmem>>, vector<1x16x32xbf16>
    %347 = vector.shape_cast %346 : vector<1x16x32xbf16> to vector<16x32xbf16>
    %cst_387 = arith.constant dense<0.000000e+00> : vector<16x32xf32>
    %348 = tpu.matmul %345, %347, %cst_387 {dimension_numbers = #tpu.dot_dimension_numbers<[1], [0], [0], [1], [0, 0, 1, 1], [], []>} : vector<16x16xbf16>, vector<16x32xbf16>, vector<16x32xf32> -> vector<16x32xf32>
    %c0_388 = arith.constant 0 : index
    %c1_389 = arith.constant 1 : index
    %c0_390 = arith.constant 0 : index
    %349 = vector.load %arg31[%c0_388, %c1_389, %c0_390] : memref<6x6x16xf32, #tpu.memory_space<vmem>>, vector<4x4x16xf32>
    %350 = vector.shape_cast %349 : vector<4x4x16xf32> to vector<16x16xf32>
    %351 = arith.truncf %350 : vector<16x16xf32> to vector<16x16xbf16>
    %c1_391 = arith.constant 1 : index
    %c0_392 = arith.constant 0 : index
    %c0_393 = arith.constant 0 : index
    %352 = vector.load %arg10[%c1_391, %c0_392, %c0_393] : memref<9x16x32xbf16, #tpu.memory_space<vmem>>, vector<1x16x32xbf16>
    %353 = vector.shape_cast %352 : vector<1x16x32xbf16> to vector<16x32xbf16>
    %cst_394 = arith.constant dense<0.000000e+00> : vector<16x32xf32>
    %354 = tpu.matmul %351, %353, %cst_394 {dimension_numbers = #tpu.dot_dimension_numbers<[1], [0], [0], [1], [0, 0, 1, 1], [], []>} : vector<16x16xbf16>, vector<16x32xbf16>, vector<16x32xf32> -> vector<16x32xf32>
    %355 = arith.addf %348, %354 : vector<16x32xf32>
    %c0_395 = arith.constant 0 : index
    %c2_396 = arith.constant 2 : index
    %c0_397 = arith.constant 0 : index
    %356 = vector.load %arg31[%c0_395, %c2_396, %c0_397] : memref<6x6x16xf32, #tpu.memory_space<vmem>>, vector<4x4x16xf32>
    %357 = vector.shape_cast %356 : vector<4x4x16xf32> to vector<16x16xf32>
    %358 = arith.truncf %357 : vector<16x16xf32> to vector<16x16xbf16>
    %c2_398 = arith.constant 2 : index
    %c0_399 = arith.constant 0 : index
    %c0_400 = arith.constant 0 : index
    %359 = vector.load %arg10[%c2_398, %c0_399, %c0_400] : memref<9x16x32xbf16, #tpu.memory_space<vmem>>, vector<1x16x32xbf16>
    %360 = vector.shape_cast %359 : vector<1x16x32xbf16> to vector<16x32xbf16>
    %cst_401 = arith.constant dense<0.000000e+00> : vector<16x32xf32>
    %361 = tpu.matmul %358, %360, %cst_401 {dimension_numbers = #tpu.dot_dimension_numbers<[1], [0], [0], [1], [0, 0, 1, 1], [], []>} : vector<16x16xbf16>, vector<16x32xbf16>, vector<16x32xf32> -> vector<16x32xf32>
    %362 = arith.addf %355, %361 : vector<16x32xf32>
    %c1_402 = arith.constant 1 : index
    %c0_403 = arith.constant 0 : index
    %c0_404 = arith.constant 0 : index
    %363 = vector.load %arg31[%c1_402, %c0_403, %c0_404] : memref<6x6x16xf32, #tpu.memory_space<vmem>>, vector<4x4x16xf32>
    %364 = vector.shape_cast %363 : vector<4x4x16xf32> to vector<16x16xf32>
    %365 = arith.truncf %364 : vector<16x16xf32> to vector<16x16xbf16>
    %c3_405 = arith.constant 3 : index
    %c0_406 = arith.constant 0 : index
    %c0_407 = arith.constant 0 : index
    %366 = vector.load %arg10[%c3_405, %c0_406, %c0_407] : memref<9x16x32xbf16, #tpu.memory_space<vmem>>, vector<1x16x32xbf16>
    %367 = vector.shape_cast %366 : vector<1x16x32xbf16> to vector<16x32xbf16>
    %cst_408 = arith.constant dense<0.000000e+00> : vector<16x32xf32>
    %368 = tpu.matmul %365, %367, %cst_408 {dimension_numbers = #tpu.dot_dimension_numbers<[1], [0], [0], [1], [0, 0, 1, 1], [], []>} : vector<16x16xbf16>, vector<16x32xbf16>, vector<16x32xf32> -> vector<16x32xf32>
    %369 = arith.addf %362, %368 : vector<16x32xf32>
    %c1_409 = arith.constant 1 : index
    %c1_410 = arith.constant 1 : index
    %c0_411 = arith.constant 0 : index
    %370 = vector.load %arg31[%c1_409, %c1_410, %c0_411] : memref<6x6x16xf32, #tpu.memory_space<vmem>>, vector<4x4x16xf32>
    %371 = vector.shape_cast %370 : vector<4x4x16xf32> to vector<16x16xf32>
    %372 = arith.truncf %371 : vector<16x16xf32> to vector<16x16xbf16>
    %c4_412 = arith.constant 4 : index
    %c0_413 = arith.constant 0 : index
    %c0_414 = arith.constant 0 : index
    %373 = vector.load %arg10[%c4_412, %c0_413, %c0_414] : memref<9x16x32xbf16, #tpu.memory_space<vmem>>, vector<1x16x32xbf16>
    %374 = vector.shape_cast %373 : vector<1x16x32xbf16> to vector<16x32xbf16>
    %cst_415 = arith.constant dense<0.000000e+00> : vector<16x32xf32>
    %375 = tpu.matmul %372, %374, %cst_415 {dimension_numbers = #tpu.dot_dimension_numbers<[1], [0], [0], [1], [0, 0, 1, 1], [], []>} : vector<16x16xbf16>, vector<16x32xbf16>, vector<16x32xf32> -> vector<16x32xf32>
    %376 = arith.addf %369, %375 : vector<16x32xf32>
    %c1_416 = arith.constant 1 : index
    %c2_417 = arith.constant 2 : index
    %c0_418 = arith.constant 0 : index
    %377 = vector.load %arg31[%c1_416, %c2_417, %c0_418] : memref<6x6x16xf32, #tpu.memory_space<vmem>>, vector<4x4x16xf32>
    %378 = vector.shape_cast %377 : vector<4x4x16xf32> to vector<16x16xf32>
    %379 = arith.truncf %378 : vector<16x16xf32> to vector<16x16xbf16>
    %c5_419 = arith.constant 5 : index
    %c0_420 = arith.constant 0 : index
    %c0_421 = arith.constant 0 : index
    %380 = vector.load %arg10[%c5_419, %c0_420, %c0_421] : memref<9x16x32xbf16, #tpu.memory_space<vmem>>, vector<1x16x32xbf16>
    %381 = vector.shape_cast %380 : vector<1x16x32xbf16> to vector<16x32xbf16>
    %cst_422 = arith.constant dense<0.000000e+00> : vector<16x32xf32>
    %382 = tpu.matmul %379, %381, %cst_422 {dimension_numbers = #tpu.dot_dimension_numbers<[1], [0], [0], [1], [0, 0, 1, 1], [], []>} : vector<16x16xbf16>, vector<16x32xbf16>, vector<16x32xf32> -> vector<16x32xf32>
    %383 = arith.addf %376, %382 : vector<16x32xf32>
    %c2_423 = arith.constant 2 : index
    %c0_424 = arith.constant 0 : index
    %c0_425 = arith.constant 0 : index
    %384 = vector.load %arg31[%c2_423, %c0_424, %c0_425] : memref<6x6x16xf32, #tpu.memory_space<vmem>>, vector<4x4x16xf32>
    %385 = vector.shape_cast %384 : vector<4x4x16xf32> to vector<16x16xf32>
    %386 = arith.truncf %385 : vector<16x16xf32> to vector<16x16xbf16>
    %c6_426 = arith.constant 6 : index
    %c0_427 = arith.constant 0 : index
    %c0_428 = arith.constant 0 : index
    %387 = vector.load %arg10[%c6_426, %c0_427, %c0_428] : memref<9x16x32xbf16, #tpu.memory_space<vmem>>, vector<1x16x32xbf16>
    %388 = vector.shape_cast %387 : vector<1x16x32xbf16> to vector<16x32xbf16>
    %cst_429 = arith.constant dense<0.000000e+00> : vector<16x32xf32>
    %389 = tpu.matmul %386, %388, %cst_429 {dimension_numbers = #tpu.dot_dimension_numbers<[1], [0], [0], [1], [0, 0, 1, 1], [], []>} : vector<16x16xbf16>, vector<16x32xbf16>, vector<16x32xf32> -> vector<16x32xf32>
    %390 = arith.addf %383, %389 : vector<16x32xf32>
    %c2_430 = arith.constant 2 : index
    %c1_431 = arith.constant 1 : index
    %c0_432 = arith.constant 0 : index
    %391 = vector.load %arg31[%c2_430, %c1_431, %c0_432] : memref<6x6x16xf32, #tpu.memory_space<vmem>>, vector<4x4x16xf32>
    %392 = vector.shape_cast %391 : vector<4x4x16xf32> to vector<16x16xf32>
    %393 = arith.truncf %392 : vector<16x16xf32> to vector<16x16xbf16>
    %c7_433 = arith.constant 7 : index
    %c0_434 = arith.constant 0 : index
    %c0_435 = arith.constant 0 : index
    %394 = vector.load %arg10[%c7_433, %c0_434, %c0_435] : memref<9x16x32xbf16, #tpu.memory_space<vmem>>, vector<1x16x32xbf16>
    %395 = vector.shape_cast %394 : vector<1x16x32xbf16> to vector<16x32xbf16>
    %cst_436 = arith.constant dense<0.000000e+00> : vector<16x32xf32>
    %396 = tpu.matmul %393, %395, %cst_436 {dimension_numbers = #tpu.dot_dimension_numbers<[1], [0], [0], [1], [0, 0, 1, 1], [], []>} : vector<16x16xbf16>, vector<16x32xbf16>, vector<16x32xf32> -> vector<16x32xf32>
    %397 = arith.addf %390, %396 : vector<16x32xf32>
    %c2_437 = arith.constant 2 : index
    %c2_438 = arith.constant 2 : index
    %c0_439 = arith.constant 0 : index
    %398 = vector.load %arg31[%c2_437, %c2_438, %c0_439] : memref<6x6x16xf32, #tpu.memory_space<vmem>>, vector<4x4x16xf32>
    %399 = vector.shape_cast %398 : vector<4x4x16xf32> to vector<16x16xf32>
    %400 = arith.truncf %399 : vector<16x16xf32> to vector<16x16xbf16>
    %c8_440 = arith.constant 8 : index
    %c0_441 = arith.constant 0 : index
    %c0_442 = arith.constant 0 : index
    %401 = vector.load %arg10[%c8_440, %c0_441, %c0_442] : memref<9x16x32xbf16, #tpu.memory_space<vmem>>, vector<1x16x32xbf16>
    %402 = vector.shape_cast %401 : vector<1x16x32xbf16> to vector<16x32xbf16>
    %cst_443 = arith.constant dense<0.000000e+00> : vector<16x32xf32>
    %403 = tpu.matmul %400, %402, %cst_443 {dimension_numbers = #tpu.dot_dimension_numbers<[1], [0], [0], [1], [0, 0, 1, 1], [], []>} : vector<16x16xbf16>, vector<16x32xbf16>, vector<16x32xf32> -> vector<16x32xf32>
    %404 = arith.addf %397, %403 : vector<16x32xf32>
    %c0_444 = arith.constant 0 : index
    %c0_445 = arith.constant 0 : index
    %405 = vector.load %arg11[%c0_444, %c0_445] : memref<1x32xf32, #tpu.memory_space<vmem>>, vector<1x32xf32>
    %406 = vector.broadcast %405 : vector<1x32xf32> to vector<16x32xf32>
    %407 = arith.addf %404, %406 : vector<16x32xf32>
    %cst_446 = arith.constant 0.000000e+00 : f32
    %408 = vector.broadcast %cst_446 : f32 to vector<16x32xf32>
    %409 = arith.maximumf %407, %408 : vector<16x32xf32>
    %410 = vector.shape_cast %409 : vector<16x32xf32> to vector<4x4x32xf32>
    %c1_447 = arith.constant 1 : index
    %c1_448 = arith.constant 1 : index
    %c0_449 = arith.constant 0 : index
    %411 = vector.load %arg32[%c1_447, %c1_448, %c0_449] : memref<6x6x32xf32, #tpu.memory_space<vmem>>, vector<4x4x32xf32>
    tpu.vector_store %arg32[%c1_447, %c1_448, %c0_449], %410 {strides = array<i32>} : memref<6x6x32xf32, #tpu.memory_space<vmem>>, vector<4x4x32xf32>,
    %c0_450 = arith.constant 0 : index
    %c0_451 = arith.constant 0 : index
    %c0_452 = arith.constant 0 : index
    %412 = vector.load %arg32[%c0_450, %c0_451, %c0_452] : memref<6x6x32xf32, #tpu.memory_space<vmem>>, vector<4x4x32xf32>
    %413 = vector.shape_cast %412 : vector<4x4x32xf32> to vector<16x32xf32>
    %414 = arith.truncf %413 : vector<16x32xf32> to vector<16x32xbf16>
    %c0_453 = arith.constant 0 : index
    %c0_454 = arith.constant 0 : index
    %c0_455 = arith.constant 0 : index
    %415 = vector.load %arg12[%c0_453, %c0_454, %c0_455] : memref<9x32x32xbf16, #tpu.memory_space<vmem>>, vector<1x32x32xbf16>
    %416 = vector.shape_cast %415 : vector<1x32x32xbf16> to vector<32x32xbf16>
    %cst_456 = arith.constant dense<0.000000e+00> : vector<16x32xf32>
    %417 = tpu.matmul %414, %416, %cst_456 {dimension_numbers = #tpu.dot_dimension_numbers<[1], [0], [0], [1], [0, 0, 1, 1], [], []>} : vector<16x32xbf16>, vector<32x32xbf16>, vector<16x32xf32> -> vector<16x32xf32>
    %c0_457 = arith.constant 0 : index
    %c1_458 = arith.constant 1 : index
    %c0_459 = arith.constant 0 : index
    %418 = vector.load %arg32[%c0_457, %c1_458, %c0_459] : memref<6x6x32xf32, #tpu.memory_space<vmem>>, vector<4x4x32xf32>
    %419 = vector.shape_cast %418 : vector<4x4x32xf32> to vector<16x32xf32>
    %420 = arith.truncf %419 : vector<16x32xf32> to vector<16x32xbf16>
    %c1_460 = arith.constant 1 : index
    %c0_461 = arith.constant 0 : index
    %c0_462 = arith.constant 0 : index
    %421 = vector.load %arg12[%c1_460, %c0_461, %c0_462] : memref<9x32x32xbf16, #tpu.memory_space<vmem>>, vector<1x32x32xbf16>
    %422 = vector.shape_cast %421 : vector<1x32x32xbf16> to vector<32x32xbf16>
    %cst_463 = arith.constant dense<0.000000e+00> : vector<16x32xf32>
    %423 = tpu.matmul %420, %422, %cst_463 {dimension_numbers = #tpu.dot_dimension_numbers<[1], [0], [0], [1], [0, 0, 1, 1], [], []>} : vector<16x32xbf16>, vector<32x32xbf16>, vector<16x32xf32> -> vector<16x32xf32>
    %424 = arith.addf %417, %423 : vector<16x32xf32>
    %c0_464 = arith.constant 0 : index
    %c2_465 = arith.constant 2 : index
    %c0_466 = arith.constant 0 : index
    %425 = vector.load %arg32[%c0_464, %c2_465, %c0_466] : memref<6x6x32xf32, #tpu.memory_space<vmem>>, vector<4x4x32xf32>
    %426 = vector.shape_cast %425 : vector<4x4x32xf32> to vector<16x32xf32>
    %427 = arith.truncf %426 : vector<16x32xf32> to vector<16x32xbf16>
    %c2_467 = arith.constant 2 : index
    %c0_468 = arith.constant 0 : index
    %c0_469 = arith.constant 0 : index
    %428 = vector.load %arg12[%c2_467, %c0_468, %c0_469] : memref<9x32x32xbf16, #tpu.memory_space<vmem>>, vector<1x32x32xbf16>
    %429 = vector.shape_cast %428 : vector<1x32x32xbf16> to vector<32x32xbf16>
    %cst_470 = arith.constant dense<0.000000e+00> : vector<16x32xf32>
    %430 = tpu.matmul %427, %429, %cst_470 {dimension_numbers = #tpu.dot_dimension_numbers<[1], [0], [0], [1], [0, 0, 1, 1], [], []>} : vector<16x32xbf16>, vector<32x32xbf16>, vector<16x32xf32> -> vector<16x32xf32>
    %431 = arith.addf %424, %430 : vector<16x32xf32>
    %c1_471 = arith.constant 1 : index
    %c0_472 = arith.constant 0 : index
    %c0_473 = arith.constant 0 : index
    %432 = vector.load %arg32[%c1_471, %c0_472, %c0_473] : memref<6x6x32xf32, #tpu.memory_space<vmem>>, vector<4x4x32xf32>
    %433 = vector.shape_cast %432 : vector<4x4x32xf32> to vector<16x32xf32>
    %434 = arith.truncf %433 : vector<16x32xf32> to vector<16x32xbf16>
    %c3_474 = arith.constant 3 : index
    %c0_475 = arith.constant 0 : index
    %c0_476 = arith.constant 0 : index
    %435 = vector.load %arg12[%c3_474, %c0_475, %c0_476] : memref<9x32x32xbf16, #tpu.memory_space<vmem>>, vector<1x32x32xbf16>
    %436 = vector.shape_cast %435 : vector<1x32x32xbf16> to vector<32x32xbf16>
    %cst_477 = arith.constant dense<0.000000e+00> : vector<16x32xf32>
    %437 = tpu.matmul %434, %436, %cst_477 {dimension_numbers = #tpu.dot_dimension_numbers<[1], [0], [0], [1], [0, 0, 1, 1], [], []>} : vector<16x32xbf16>, vector<32x32xbf16>, vector<16x32xf32> -> vector<16x32xf32>
    %438 = arith.addf %431, %437 : vector<16x32xf32>
    %c1_478 = arith.constant 1 : index
    %c1_479 = arith.constant 1 : index
    %c0_480 = arith.constant 0 : index
    %439 = vector.load %arg32[%c1_478, %c1_479, %c0_480] : memref<6x6x32xf32, #tpu.memory_space<vmem>>, vector<4x4x32xf32>
    %440 = vector.shape_cast %439 : vector<4x4x32xf32> to vector<16x32xf32>
    %441 = arith.truncf %440 : vector<16x32xf32> to vector<16x32xbf16>
    %c4_481 = arith.constant 4 : index
    %c0_482 = arith.constant 0 : index
    %c0_483 = arith.constant 0 : index
    %442 = vector.load %arg12[%c4_481, %c0_482, %c0_483] : memref<9x32x32xbf16, #tpu.memory_space<vmem>>, vector<1x32x32xbf16>
    %443 = vector.shape_cast %442 : vector<1x32x32xbf16> to vector<32x32xbf16>
    %cst_484 = arith.constant dense<0.000000e+00> : vector<16x32xf32>
    %444 = tpu.matmul %441, %443, %cst_484 {dimension_numbers = #tpu.dot_dimension_numbers<[1], [0], [0], [1], [0, 0, 1, 1], [], []>} : vector<16x32xbf16>, vector<32x32xbf16>, vector<16x32xf32> -> vector<16x32xf32>
    %445 = arith.addf %438, %444 : vector<16x32xf32>
    %c1_485 = arith.constant 1 : index
    %c2_486 = arith.constant 2 : index
    %c0_487 = arith.constant 0 : index
    %446 = vector.load %arg32[%c1_485, %c2_486, %c0_487] : memref<6x6x32xf32, #tpu.memory_space<vmem>>, vector<4x4x32xf32>
    %447 = vector.shape_cast %446 : vector<4x4x32xf32> to vector<16x32xf32>
    %448 = arith.truncf %447 : vector<16x32xf32> to vector<16x32xbf16>
    %c5_488 = arith.constant 5 : index
    %c0_489 = arith.constant 0 : index
    %c0_490 = arith.constant 0 : index
    %449 = vector.load %arg12[%c5_488, %c0_489, %c0_490] : memref<9x32x32xbf16, #tpu.memory_space<vmem>>, vector<1x32x32xbf16>
    %450 = vector.shape_cast %449 : vector<1x32x32xbf16> to vector<32x32xbf16>
    %cst_491 = arith.constant dense<0.000000e+00> : vector<16x32xf32>
    %451 = tpu.matmul %448, %450, %cst_491 {dimension_numbers = #tpu.dot_dimension_numbers<[1], [0], [0], [1], [0, 0, 1, 1], [], []>} : vector<16x32xbf16>, vector<32x32xbf16>, vector<16x32xf32> -> vector<16x32xf32>
    %452 = arith.addf %445, %451 : vector<16x32xf32>
    %c2_492 = arith.constant 2 : index
    %c0_493 = arith.constant 0 : index
    %c0_494 = arith.constant 0 : index
    %453 = vector.load %arg32[%c2_492, %c0_493, %c0_494] : memref<6x6x32xf32, #tpu.memory_space<vmem>>, vector<4x4x32xf32>
    %454 = vector.shape_cast %453 : vector<4x4x32xf32> to vector<16x32xf32>
    %455 = arith.truncf %454 : vector<16x32xf32> to vector<16x32xbf16>
    %c6_495 = arith.constant 6 : index
    %c0_496 = arith.constant 0 : index
    %c0_497 = arith.constant 0 : index
    %456 = vector.load %arg12[%c6_495, %c0_496, %c0_497] : memref<9x32x32xbf16, #tpu.memory_space<vmem>>, vector<1x32x32xbf16>
    %457 = vector.shape_cast %456 : vector<1x32x32xbf16> to vector<32x32xbf16>
    %cst_498 = arith.constant dense<0.000000e+00> : vector<16x32xf32>
    %458 = tpu.matmul %455, %457, %cst_498 {dimension_numbers = #tpu.dot_dimension_numbers<[1], [0], [0], [1], [0, 0, 1, 1], [], []>} : vector<16x32xbf16>, vector<32x32xbf16>, vector<16x32xf32> -> vector<16x32xf32>
    %459 = arith.addf %452, %458 : vector<16x32xf32>
    %c2_499 = arith.constant 2 : index
    %c1_500 = arith.constant 1 : index
    %c0_501 = arith.constant 0 : index
    %460 = vector.load %arg32[%c2_499, %c1_500, %c0_501] : memref<6x6x32xf32, #tpu.memory_space<vmem>>, vector<4x4x32xf32>
    %461 = vector.shape_cast %460 : vector<4x4x32xf32> to vector<16x32xf32>
    %462 = arith.truncf %461 : vector<16x32xf32> to vector<16x32xbf16>
    %c7_502 = arith.constant 7 : index
    %c0_503 = arith.constant 0 : index
    %c0_504 = arith.constant 0 : index
    %463 = vector.load %arg12[%c7_502, %c0_503, %c0_504] : memref<9x32x32xbf16, #tpu.memory_space<vmem>>, vector<1x32x32xbf16>
    %464 = vector.shape_cast %463 : vector<1x32x32xbf16> to vector<32x32xbf16>
    %cst_505 = arith.constant dense<0.000000e+00> : vector<16x32xf32>
    %465 = tpu.matmul %462, %464, %cst_505 {dimension_numbers = #tpu.dot_dimension_numbers<[1], [0], [0], [1], [0, 0, 1, 1], [], []>} : vector<16x32xbf16>, vector<32x32xbf16>, vector<16x32xf32> -> vector<16x32xf32>
    %466 = arith.addf %459, %465 : vector<16x32xf32>
    %c2_506 = arith.constant 2 : index
    %c2_507 = arith.constant 2 : index
    %c0_508 = arith.constant 0 : index
    %467 = vector.load %arg32[%c2_506, %c2_507, %c0_508] : memref<6x6x32xf32, #tpu.memory_space<vmem>>, vector<4x4x32xf32>
    %468 = vector.shape_cast %467 : vector<4x4x32xf32> to vector<16x32xf32>
    %469 = arith.truncf %468 : vector<16x32xf32> to vector<16x32xbf16>
    %c8_509 = arith.constant 8 : index
    %c0_510 = arith.constant 0 : index
    %c0_511 = arith.constant 0 : index
    %470 = vector.load %arg12[%c8_509, %c0_510, %c0_511] : memref<9x32x32xbf16, #tpu.memory_space<vmem>>, vector<1x32x32xbf16>
    %471 = vector.shape_cast %470 : vector<1x32x32xbf16> to vector<32x32xbf16>
    %cst_512 = arith.constant dense<0.000000e+00> : vector<16x32xf32>
    %472 = tpu.matmul %469, %471, %cst_512 {dimension_numbers = #tpu.dot_dimension_numbers<[1], [0], [0], [1], [0, 0, 1, 1], [], []>} : vector<16x32xbf16>, vector<32x32xbf16>, vector<16x32xf32> -> vector<16x32xf32>
    %473 = arith.addf %466, %472 : vector<16x32xf32>
    %c0_513 = arith.constant 0 : index
    %c0_514 = arith.constant 0 : index
    %474 = vector.load %arg13[%c0_513, %c0_514] : memref<1x32xf32, #tpu.memory_space<vmem>>, vector<1x32xf32>
    %475 = vector.broadcast %474 : vector<1x32xf32> to vector<16x32xf32>
    %476 = arith.addf %473, %475 : vector<16x32xf32>
    %cst_515 = arith.constant 0.000000e+00 : f32
    %477 = vector.broadcast %cst_515 : f32 to vector<16x32xf32>
    %478 = arith.maximumf %476, %477 : vector<16x32xf32>
    %479 = vector.shape_cast %478 : vector<16x32xf32> to vector<4x4x32xf32>
    %480 = arith.truncf %479 : vector<4x4x32xf32> to vector<4x4x32xbf16>
    %c0_516 = arith.constant 0 : index
    %c0_517 = arith.constant 0 : index
    %c0_518 = arith.constant 0 : index
    %c0_519 = arith.constant 0 : index
    %481 = vector.load %arg24[%c0_516, %c0_517, %c0_518, %c0_519] : memref<1x4x4x32xbf16, #tpu.memory_space<vmem>>, vector<1x4x4x32xbf16>
    %482 = vector.shape_cast %481 : vector<1x4x4x32xbf16> to vector<4x4x32xbf16>
    %483 = vector.shape_cast %480 : vector<4x4x32xbf16> to vector<1x4x4x32xbf16>
    tpu.vector_store %arg24[%c0_516, %c0_517, %c0_518, %c0_519], %483 {strides = array<i32>} : memref<1x4x4x32xbf16, #tpu.memory_space<vmem>>, vector<1x4x4x32xbf16>,
    %484 = vector.shape_cast %479 : vector<4x4x32xf32> to vector<2x2x4x32xf32>
    %485 = vector.extract_strided_slice %484 {offsets = [0, 0, 0, 0], sizes = [2, 1, 4, 32], strides = [1, 1, 1, 1]} : vector<2x2x4x32xf32> to vector<2x1x4x32xf32>
    %486 = vector.shape_cast %485 : vector<2x1x4x32xf32> to vector<2x4x32xf32>
    %487 = vector.extract_strided_slice %484 {offsets = [0, 1, 0, 0], sizes = [2, 1, 4, 32], strides = [1, 1, 1, 1]} : vector<2x2x4x32xf32> to vector<2x1x4x32xf32>
    %488 = vector.shape_cast %487 : vector<2x1x4x32xf32> to vector<2x4x32xf32>
    %489 = arith.maximumf %486, %488 : vector<2x4x32xf32>
    %c0_520 = arith.constant 0 : index
    %c0_521 = arith.constant 0 : index
    %c0_522 = arith.constant 0 : index
    %490 = vector.load %arg39[%c0_520, %c0_521, %c0_522] : memref<2x4x32xf32, #tpu.memory_space<vmem>>, vector<2x4x32xf32>
    tpu.vector_store %arg39[%c0_520, %c0_521, %c0_522], %489 {strides = array<i32>} : memref<2x4x32xf32, #tpu.memory_space<vmem>>, vector<2x4x32xf32>,
    %c0_523 = arith.constant 0 : index
    %c0_524 = arith.constant 0 : index
    %c0_525 = arith.constant 0 : index
    %491 = tpu.strided_load %arg39[%c0_523, %c0_524, %c0_525] {strides = array<i32: 1, 2, 1>} : memref<2x4x32xf32, #tpu.memory_space<vmem>>, vector<2x2x32xf32>
    %c0_526 = arith.constant 0 : index
    %c1_527 = arith.constant 1 : index
    %c0_528 = arith.constant 0 : index
    %492 = tpu.strided_load %arg39[%c0_526, %c1_527, %c0_528] {strides = array<i32: 1, 2, 1>} : memref<2x4x32xf32, #tpu.memory_space<vmem>>, vector<2x2x32xf32>
    %493 = arith.maximumf %491, %492 : vector<2x2x32xf32>
    %cst_529 = arith.constant 0.000000e+00 : f32
    %494 = vector.broadcast %cst_529 : f32 to vector<1x4x32xf32>
    %cst_530 = arith.constant 0.000000e+00 : f32
    %495 = vector.broadcast %cst_530 : f32 to vector<4x1x32xf32>
    %c0_531 = arith.constant 0 : index
    %c0_532 = arith.constant 0 : index
    %c0_533 = arith.constant 0 : index
    %496 = vector.load %arg33[%c0_531, %c0_532, %c0_533] : memref<4x4x32xf32, #tpu.memory_space<vmem>>, vector<1x4x32xf32>
    tpu.vector_store %arg33[%c0_531, %c0_532, %c0_533], %494 {strides = array<i32>} : memref<4x4x32xf32, #tpu.memory_space<vmem>>, vector<1x4x32xf32>,
    %c3_534 = arith.constant 3 : index
    %c0_535 = arith.constant 0 : index
    %c0_536 = arith.constant 0 : index
    %497 = vector.load %arg33[%c3_534, %c0_535, %c0_536] : memref<4x4x32xf32, #tpu.memory_space<vmem>>, vector<1x4x32xf32>
    tpu.vector_store %arg33[%c3_534, %c0_535, %c0_536], %494 {strides = array<i32>} : memref<4x4x32xf32, #tpu.memory_space<vmem>>, vector<1x4x32xf32>,
    %c0_537 = arith.constant 0 : index
    %c0_538 = arith.constant 0 : index
    %c0_539 = arith.constant 0 : index
    %498 = vector.load %arg33[%c0_537, %c0_538, %c0_539] : memref<4x4x32xf32, #tpu.memory_space<vmem>>, vector<4x1x32xf32>
    tpu.vector_store %arg33[%c0_537, %c0_538, %c0_539], %495 {strides = array<i32>} : memref<4x4x32xf32, #tpu.memory_space<vmem>>, vector<4x1x32xf32>,
    %c0_540 = arith.constant 0 : index
    %c3_541 = arith.constant 3 : index
    %c0_542 = arith.constant 0 : index
    %499 = vector.load %arg33[%c0_540, %c3_541, %c0_542] : memref<4x4x32xf32, #tpu.memory_space<vmem>>, vector<4x1x32xf32>
    tpu.vector_store %arg33[%c0_540, %c3_541, %c0_542], %495 {strides = array<i32>} : memref<4x4x32xf32, #tpu.memory_space<vmem>>, vector<4x1x32xf32>,
    %cst_543 = arith.constant 0.000000e+00 : f32
    %500 = vector.broadcast %cst_543 : f32 to vector<1x4x64xf32>
    %cst_544 = arith.constant 0.000000e+00 : f32
    %501 = vector.broadcast %cst_544 : f32 to vector<4x1x64xf32>
    %c0_545 = arith.constant 0 : index
    %c0_546 = arith.constant 0 : index
    %c0_547 = arith.constant 0 : index
    %502 = vector.load %arg34[%c0_545, %c0_546, %c0_547] : memref<4x4x64xf32, #tpu.memory_space<vmem>>, vector<1x4x64xf32>
    tpu.vector_store %arg34[%c0_545, %c0_546, %c0_547], %500 {strides = array<i32>} : memref<4x4x64xf32, #tpu.memory_space<vmem>>, vector<1x4x64xf32>,
    %c3_548 = arith.constant 3 : index
    %c0_549 = arith.constant 0 : index
    %c0_550 = arith.constant 0 : index
    %503 = vector.load %arg34[%c3_548, %c0_549, %c0_550] : memref<4x4x64xf32, #tpu.memory_space<vmem>>, vector<1x4x64xf32>
    tpu.vector_store %arg34[%c3_548, %c0_549, %c0_550], %500 {strides = array<i32>} : memref<4x4x64xf32, #tpu.memory_space<vmem>>, vector<1x4x64xf32>,
    %c0_551 = arith.constant 0 : index
    %c0_552 = arith.constant 0 : index
    %c0_553 = arith.constant 0 : index
    %504 = vector.load %arg34[%c0_551, %c0_552, %c0_553] : memref<4x4x64xf32, #tpu.memory_space<vmem>>, vector<4x1x64xf32>
    tpu.vector_store %arg34[%c0_551, %c0_552, %c0_553], %501 {strides = array<i32>} : memref<4x4x64xf32, #tpu.memory_space<vmem>>, vector<4x1x64xf32>,
    %c0_554 = arith.constant 0 : index
    %c3_555 = arith.constant 3 : index
    %c0_556 = arith.constant 0 : index
    %505 = vector.load %arg34[%c0_554, %c3_555, %c0_556] : memref<4x4x64xf32, #tpu.memory_space<vmem>>, vector<4x1x64xf32>
    tpu.vector_store %arg34[%c0_554, %c3_555, %c0_556], %501 {strides = array<i32>} : memref<4x4x64xf32, #tpu.memory_space<vmem>>, vector<4x1x64xf32>,
    %c1_557 = arith.constant 1 : index
    %c1_558 = arith.constant 1 : index
    %c0_559 = arith.constant 0 : index
    %506 = vector.load %arg33[%c1_557, %c1_558, %c0_559] : memref<4x4x32xf32, #tpu.memory_space<vmem>>, vector<2x2x32xf32>
    tpu.vector_store %arg33[%c1_557, %c1_558, %c0_559], %493 {strides = array<i32>} : memref<4x4x32xf32, #tpu.memory_space<vmem>>, vector<2x2x32xf32>,
    %c0_560 = arith.constant 0 : index
    %c0_561 = arith.constant 0 : index
    %c0_562 = arith.constant 0 : index
    %507 = vector.load %arg33[%c0_560, %c0_561, %c0_562] : memref<4x4x32xf32, #tpu.memory_space<vmem>>, vector<2x2x32xf32>
    %508 = vector.shape_cast %507 : vector<2x2x32xf32> to vector<4x32xf32>
    %509 = arith.truncf %508 : vector<4x32xf32> to vector<4x32xbf16>
    %c0_563 = arith.constant 0 : index
    %c0_564 = arith.constant 0 : index
    %c0_565 = arith.constant 0 : index
    %510 = vector.load %arg14[%c0_563, %c0_564, %c0_565] : memref<9x32x64xbf16, #tpu.memory_space<vmem>>, vector<1x32x64xbf16>
    %511 = vector.shape_cast %510 : vector<1x32x64xbf16> to vector<32x64xbf16>
    %cst_566 = arith.constant dense<0.000000e+00> : vector<4x64xf32>
    %512 = tpu.matmul %509, %511, %cst_566 {dimension_numbers = #tpu.dot_dimension_numbers<[1], [0], [0], [1], [0, 0, 1, 1], [], []>} : vector<4x32xbf16>, vector<32x64xbf16>, vector<4x64xf32> -> vector<4x64xf32>
    %c0_567 = arith.constant 0 : index
    %c1_568 = arith.constant 1 : index
    %c0_569 = arith.constant 0 : index
    %513 = vector.load %arg33[%c0_567, %c1_568, %c0_569] : memref<4x4x32xf32, #tpu.memory_space<vmem>>, vector<2x2x32xf32>
    %514 = vector.shape_cast %513 : vector<2x2x32xf32> to vector<4x32xf32>
    %515 = arith.truncf %514 : vector<4x32xf32> to vector<4x32xbf16>
    %c1_570 = arith.constant 1 : index
    %c0_571 = arith.constant 0 : index
    %c0_572 = arith.constant 0 : index
    %516 = vector.load %arg14[%c1_570, %c0_571, %c0_572] : memref<9x32x64xbf16, #tpu.memory_space<vmem>>, vector<1x32x64xbf16>
    %517 = vector.shape_cast %516 : vector<1x32x64xbf16> to vector<32x64xbf16>
    %cst_573 = arith.constant dense<0.000000e+00> : vector<4x64xf32>
    %518 = tpu.matmul %515, %517, %cst_573 {dimension_numbers = #tpu.dot_dimension_numbers<[1], [0], [0], [1], [0, 0, 1, 1], [], []>} : vector<4x32xbf16>, vector<32x64xbf16>, vector<4x64xf32> -> vector<4x64xf32>
    %519 = arith.addf %512, %518 : vector<4x64xf32>
    %c0_574 = arith.constant 0 : index
    %c2_575 = arith.constant 2 : index
    %c0_576 = arith.constant 0 : index
    %520 = vector.load %arg33[%c0_574, %c2_575, %c0_576] : memref<4x4x32xf32, #tpu.memory_space<vmem>>, vector<2x2x32xf32>
    %521 = vector.shape_cast %520 : vector<2x2x32xf32> to vector<4x32xf32>
    %522 = arith.truncf %521 : vector<4x32xf32> to vector<4x32xbf16>
    %c2_577 = arith.constant 2 : index
    %c0_578 = arith.constant 0 : index
    %c0_579 = arith.constant 0 : index
    %523 = vector.load %arg14[%c2_577, %c0_578, %c0_579] : memref<9x32x64xbf16, #tpu.memory_space<vmem>>, vector<1x32x64xbf16>
    %524 = vector.shape_cast %523 : vector<1x32x64xbf16> to vector<32x64xbf16>
    %cst_580 = arith.constant dense<0.000000e+00> : vector<4x64xf32>
    %525 = tpu.matmul %522, %524, %cst_580 {dimension_numbers = #tpu.dot_dimension_numbers<[1], [0], [0], [1], [0, 0, 1, 1], [], []>} : vector<4x32xbf16>, vector<32x64xbf16>, vector<4x64xf32> -> vector<4x64xf32>
    %526 = arith.addf %519, %525 : vector<4x64xf32>
    %c1_581 = arith.constant 1 : index
    %c0_582 = arith.constant 0 : index
    %c0_583 = arith.constant 0 : index
    %527 = vector.load %arg33[%c1_581, %c0_582, %c0_583] : memref<4x4x32xf32, #tpu.memory_space<vmem>>, vector<2x2x32xf32>
    %528 = vector.shape_cast %527 : vector<2x2x32xf32> to vector<4x32xf32>
    %529 = arith.truncf %528 : vector<4x32xf32> to vector<4x32xbf16>
    %c3_584 = arith.constant 3 : index
    %c0_585 = arith.constant 0 : index
    %c0_586 = arith.constant 0 : index
    %530 = vector.load %arg14[%c3_584, %c0_585, %c0_586] : memref<9x32x64xbf16, #tpu.memory_space<vmem>>, vector<1x32x64xbf16>
    %531 = vector.shape_cast %530 : vector<1x32x64xbf16> to vector<32x64xbf16>
    %cst_587 = arith.constant dense<0.000000e+00> : vector<4x64xf32>
    %532 = tpu.matmul %529, %531, %cst_587 {dimension_numbers = #tpu.dot_dimension_numbers<[1], [0], [0], [1], [0, 0, 1, 1], [], []>} : vector<4x32xbf16>, vector<32x64xbf16>, vector<4x64xf32> -> vector<4x64xf32>
    %533 = arith.addf %526, %532 : vector<4x64xf32>
    %c1_588 = arith.constant 1 : index
    %c1_589 = arith.constant 1 : index
    %c0_590 = arith.constant 0 : index
    %534 = vector.load %arg33[%c1_588, %c1_589, %c0_590] : memref<4x4x32xf32, #tpu.memory_space<vmem>>, vector<2x2x32xf32>
    %535 = vector.shape_cast %534 : vector<2x2x32xf32> to vector<4x32xf32>
    %536 = arith.truncf %535 : vector<4x32xf32> to vector<4x32xbf16>
    %c4_591 = arith.constant 4 : index
    %c0_592 = arith.constant 0 : index
    %c0_593 = arith.constant 0 : index
    %537 = vector.load %arg14[%c4_591, %c0_592, %c0_593] : memref<9x32x64xbf16, #tpu.memory_space<vmem>>, vector<1x32x64xbf16>
    %538 = vector.shape_cast %537 : vector<1x32x64xbf16> to vector<32x64xbf16>
    %cst_594 = arith.constant dense<0.000000e+00> : vector<4x64xf32>
    %539 = tpu.matmul %536, %538, %cst_594 {dimension_numbers = #tpu.dot_dimension_numbers<[1], [0], [0], [1], [0, 0, 1, 1], [], []>} : vector<4x32xbf16>, vector<32x64xbf16>, vector<4x64xf32> -> vector<4x64xf32>
    %540 = arith.addf %533, %539 : vector<4x64xf32>
    %c1_595 = arith.constant 1 : index
    %c2_596 = arith.constant 2 : index
    %c0_597 = arith.constant 0 : index
    %541 = vector.load %arg33[%c1_595, %c2_596, %c0_597] : memref<4x4x32xf32, #tpu.memory_space<vmem>>, vector<2x2x32xf32>
    %542 = vector.shape_cast %541 : vector<2x2x32xf32> to vector<4x32xf32>
    %543 = arith.truncf %542 : vector<4x32xf32> to vector<4x32xbf16>
    %c5_598 = arith.constant 5 : index
    %c0_599 = arith.constant 0 : index
    %c0_600 = arith.constant 0 : index
    %544 = vector.load %arg14[%c5_598, %c0_599, %c0_600] : memref<9x32x64xbf16, #tpu.memory_space<vmem>>, vector<1x32x64xbf16>
    %545 = vector.shape_cast %544 : vector<1x32x64xbf16> to vector<32x64xbf16>
    %cst_601 = arith.constant dense<0.000000e+00> : vector<4x64xf32>
    %546 = tpu.matmul %543, %545, %cst_601 {dimension_numbers = #tpu.dot_dimension_numbers<[1], [0], [0], [1], [0, 0, 1, 1], [], []>} : vector<4x32xbf16>, vector<32x64xbf16>, vector<4x64xf32> -> vector<4x64xf32>
    %547 = arith.addf %540, %546 : vector<4x64xf32>
    %c2_602 = arith.constant 2 : index
    %c0_603 = arith.constant 0 : index
    %c0_604 = arith.constant 0 : index
    %548 = vector.load %arg33[%c2_602, %c0_603, %c0_604] : memref<4x4x32xf32, #tpu.memory_space<vmem>>, vector<2x2x32xf32>
    %549 = vector.shape_cast %548 : vector<2x2x32xf32> to vector<4x32xf32>
    %550 = arith.truncf %549 : vector<4x32xf32> to vector<4x32xbf16>
    %c6_605 = arith.constant 6 : index
    %c0_606 = arith.constant 0 : index
    %c0_607 = arith.constant 0 : index
    %551 = vector.load %arg14[%c6_605, %c0_606, %c0_607] : memref<9x32x64xbf16, #tpu.memory_space<vmem>>, vector<1x32x64xbf16>
    %552 = vector.shape_cast %551 : vector<1x32x64xbf16> to vector<32x64xbf16>
    %cst_608 = arith.constant dense<0.000000e+00> : vector<4x64xf32>
    %553 = tpu.matmul %550, %552, %cst_608 {dimension_numbers = #tpu.dot_dimension_numbers<[1], [0], [0], [1], [0, 0, 1, 1], [], []>} : vector<4x32xbf16>, vector<32x64xbf16>, vector<4x64xf32> -> vector<4x64xf32>
    %554 = arith.addf %547, %553 : vector<4x64xf32>
    %c2_609 = arith.constant 2 : index
    %c1_610 = arith.constant 1 : index
    %c0_611 = arith.constant 0 : index
    %555 = vector.load %arg33[%c2_609, %c1_610, %c0_611] : memref<4x4x32xf32, #tpu.memory_space<vmem>>, vector<2x2x32xf32>
    %556 = vector.shape_cast %555 : vector<2x2x32xf32> to vector<4x32xf32>
    %557 = arith.truncf %556 : vector<4x32xf32> to vector<4x32xbf16>
    %c7_612 = arith.constant 7 : index
    %c0_613 = arith.constant 0 : index
    %c0_614 = arith.constant 0 : index
    %558 = vector.load %arg14[%c7_612, %c0_613, %c0_614] : memref<9x32x64xbf16, #tpu.memory_space<vmem>>, vector<1x32x64xbf16>
    %559 = vector.shape_cast %558 : vector<1x32x64xbf16> to vector<32x64xbf16>
    %cst_615 = arith.constant dense<0.000000e+00> : vector<4x64xf32>
    %560 = tpu.matmul %557, %559, %cst_615 {dimension_numbers = #tpu.dot_dimension_numbers<[1], [0], [0], [1], [0, 0, 1, 1], [], []>} : vector<4x32xbf16>, vector<32x64xbf16>, vector<4x64xf32> -> vector<4x64xf32>
    %561 = arith.addf %554, %560 : vector<4x64xf32>
    %c2_616 = arith.constant 2 : index
    %c2_617 = arith.constant 2 : index
    %c0_618 = arith.constant 0 : index
    %562 = vector.load %arg33[%c2_616, %c2_617, %c0_618] : memref<4x4x32xf32, #tpu.memory_space<vmem>>, vector<2x2x32xf32>
    %563 = vector.shape_cast %562 : vector<2x2x32xf32> to vector<4x32xf32>
    %564 = arith.truncf %563 : vector<4x32xf32> to vector<4x32xbf16>
    %c8_619 = arith.constant 8 : index
    %c0_620 = arith.constant 0 : index
    %c0_621 = arith.constant 0 : index
    %565 = vector.load %arg14[%c8_619, %c0_620, %c0_621] : memref<9x32x64xbf16, #tpu.memory_space<vmem>>, vector<1x32x64xbf16>
    %566 = vector.shape_cast %565 : vector<1x32x64xbf16> to vector<32x64xbf16>
    %cst_622 = arith.constant dense<0.000000e+00> : vector<4x64xf32>
    %567 = tpu.matmul %564, %566, %cst_622 {dimension_numbers = #tpu.dot_dimension_numbers<[1], [0], [0], [1], [0, 0, 1, 1], [], []>} : vector<4x32xbf16>, vector<32x64xbf16>, vector<4x64xf32> -> vector<4x64xf32>
    %568 = arith.addf %561, %567 : vector<4x64xf32>
    %c0_623 = arith.constant 0 : index
    %c0_624 = arith.constant 0 : index
    %569 = vector.load %arg15[%c0_623, %c0_624] : memref<1x64xf32, #tpu.memory_space<vmem>>, vector<1x64xf32>
    %570 = vector.broadcast %569 : vector<1x64xf32> to vector<4x64xf32>
    %571 = arith.addf %568, %570 : vector<4x64xf32>
    %cst_625 = arith.constant 0.000000e+00 : f32
    %572 = vector.broadcast %cst_625 : f32 to vector<4x64xf32>
    %573 = arith.maximumf %571, %572 : vector<4x64xf32>
    %574 = vector.shape_cast %573 : vector<4x64xf32> to vector<2x2x64xf32>
    %c1_626 = arith.constant 1 : index
    %c1_627 = arith.constant 1 : index
    %c0_628 = arith.constant 0 : index
    %575 = vector.load %arg34[%c1_626, %c1_627, %c0_628] : memref<4x4x64xf32, #tpu.memory_space<vmem>>, vector<2x2x64xf32>
    tpu.vector_store %arg34[%c1_626, %c1_627, %c0_628], %574 {strides = array<i32>} : memref<4x4x64xf32, #tpu.memory_space<vmem>>, vector<2x2x64xf32>,
    %c0_629 = arith.constant 0 : index
    %c0_630 = arith.constant 0 : index
    %c0_631 = arith.constant 0 : index
    %576 = vector.load %arg34[%c0_629, %c0_630, %c0_631] : memref<4x4x64xf32, #tpu.memory_space<vmem>>, vector<2x2x64xf32>
    %577 = vector.shape_cast %576 : vector<2x2x64xf32> to vector<4x64xf32>
    %578 = arith.truncf %577 : vector<4x64xf32> to vector<4x64xbf16>
    %c0_632 = arith.constant 0 : index
    %c0_633 = arith.constant 0 : index
    %c0_634 = arith.constant 0 : index
    %579 = vector.load %arg16[%c0_632, %c0_633, %c0_634] : memref<9x64x64xbf16, #tpu.memory_space<vmem>>, vector<1x64x64xbf16>
    %580 = vector.shape_cast %579 : vector<1x64x64xbf16> to vector<64x64xbf16>
    %cst_635 = arith.constant dense<0.000000e+00> : vector<4x64xf32>
    %581 = tpu.matmul %578, %580, %cst_635 {dimension_numbers = #tpu.dot_dimension_numbers<[1], [0], [0], [1], [0, 0, 1, 1], [], []>} : vector<4x64xbf16>, vector<64x64xbf16>, vector<4x64xf32> -> vector<4x64xf32>
    %c0_636 = arith.constant 0 : index
    %c1_637 = arith.constant 1 : index
    %c0_638 = arith.constant 0 : index
    %582 = vector.load %arg34[%c0_636, %c1_637, %c0_638] : memref<4x4x64xf32, #tpu.memory_space<vmem>>, vector<2x2x64xf32>
    %583 = vector.shape_cast %582 : vector<2x2x64xf32> to vector<4x64xf32>
    %584 = arith.truncf %583 : vector<4x64xf32> to vector<4x64xbf16>
    %c1_639 = arith.constant 1 : index
    %c0_640 = arith.constant 0 : index
    %c0_641 = arith.constant 0 : index
    %585 = vector.load %arg16[%c1_639, %c0_640, %c0_641] : memref<9x64x64xbf16, #tpu.memory_space<vmem>>, vector<1x64x64xbf16>
    %586 = vector.shape_cast %585 : vector<1x64x64xbf16> to vector<64x64xbf16>
    %cst_642 = arith.constant dense<0.000000e+00> : vector<4x64xf32>
    %587 = tpu.matmul %584, %586, %cst_642 {dimension_numbers = #tpu.dot_dimension_numbers<[1], [0], [0], [1], [0, 0, 1, 1], [], []>} : vector<4x64xbf16>, vector<64x64xbf16>, vector<4x64xf32> -> vector<4x64xf32>
    %588 = arith.addf %581, %587 : vector<4x64xf32>
    %c0_643 = arith.constant 0 : index
    %c2_644 = arith.constant 2 : index
    %c0_645 = arith.constant 0 : index
    %589 = vector.load %arg34[%c0_643, %c2_644, %c0_645] : memref<4x4x64xf32, #tpu.memory_space<vmem>>, vector<2x2x64xf32>
    %590 = vector.shape_cast %589 : vector<2x2x64xf32> to vector<4x64xf32>
    %591 = arith.truncf %590 : vector<4x64xf32> to vector<4x64xbf16>
    %c2_646 = arith.constant 2 : index
    %c0_647 = arith.constant 0 : index
    %c0_648 = arith.constant 0 : index
    %592 = vector.load %arg16[%c2_646, %c0_647, %c0_648] : memref<9x64x64xbf16, #tpu.memory_space<vmem>>, vector<1x64x64xbf16>
    %593 = vector.shape_cast %592 : vector<1x64x64xbf16> to vector<64x64xbf16>
    %cst_649 = arith.constant dense<0.000000e+00> : vector<4x64xf32>
    %594 = tpu.matmul %591, %593, %cst_649 {dimension_numbers = #tpu.dot_dimension_numbers<[1], [0], [0], [1], [0, 0, 1, 1], [], []>} : vector<4x64xbf16>, vector<64x64xbf16>, vector<4x64xf32> -> vector<4x64xf32>
    %595 = arith.addf %588, %594 : vector<4x64xf32>
    %c1_650 = arith.constant 1 : index
    %c0_651 = arith.constant 0 : index
    %c0_652 = arith.constant 0 : index
    %596 = vector.load %arg34[%c1_650, %c0_651, %c0_652] : memref<4x4x64xf32, #tpu.memory_space<vmem>>, vector<2x2x64xf32>
    %597 = vector.shape_cast %596 : vector<2x2x64xf32> to vector<4x64xf32>
    %598 = arith.truncf %597 : vector<4x64xf32> to vector<4x64xbf16>
    %c3_653 = arith.constant 3 : index
    %c0_654 = arith.constant 0 : index
    %c0_655 = arith.constant 0 : index
    %599 = vector.load %arg16[%c3_653, %c0_654, %c0_655] : memref<9x64x64xbf16, #tpu.memory_space<vmem>>, vector<1x64x64xbf16>
    %600 = vector.shape_cast %599 : vector<1x64x64xbf16> to vector<64x64xbf16>
    %cst_656 = arith.constant dense<0.000000e+00> : vector<4x64xf32>
    %601 = tpu.matmul %598, %600, %cst_656 {dimension_numbers = #tpu.dot_dimension_numbers<[1], [0], [0], [1], [0, 0, 1, 1], [], []>} : vector<4x64xbf16>, vector<64x64xbf16>, vector<4x64xf32> -> vector<4x64xf32>
    %602 = arith.addf %595, %601 : vector<4x64xf32>
    %c1_657 = arith.constant 1 : index
    %c1_658 = arith.constant 1 : index
    %c0_659 = arith.constant 0 : index
    %603 = vector.load %arg34[%c1_657, %c1_658, %c0_659] : memref<4x4x64xf32, #tpu.memory_space<vmem>>, vector<2x2x64xf32>
    %604 = vector.shape_cast %603 : vector<2x2x64xf32> to vector<4x64xf32>
    %605 = arith.truncf %604 : vector<4x64xf32> to vector<4x64xbf16>
    %c4_660 = arith.constant 4 : index
    %c0_661 = arith.constant 0 : index
    %c0_662 = arith.constant 0 : index
    %606 = vector.load %arg16[%c4_660, %c0_661, %c0_662] : memref<9x64x64xbf16, #tpu.memory_space<vmem>>, vector<1x64x64xbf16>
    %607 = vector.shape_cast %606 : vector<1x64x64xbf16> to vector<64x64xbf16>
    %cst_663 = arith.constant dense<0.000000e+00> : vector<4x64xf32>
    %608 = tpu.matmul %605, %607, %cst_663 {dimension_numbers = #tpu.dot_dimension_numbers<[1], [0], [0], [1], [0, 0, 1, 1], [], []>} : vector<4x64xbf16>, vector<64x64xbf16>, vector<4x64xf32> -> vector<4x64xf32>
    %609 = arith.addf %602, %608 : vector<4x64xf32>
    %c1_664 = arith.constant 1 : index
    %c2_665 = arith.constant 2 : index
    %c0_666 = arith.constant 0 : index
    %610 = vector.load %arg34[%c1_664, %c2_665, %c0_666] : memref<4x4x64xf32, #tpu.memory_space<vmem>>, vector<2x2x64xf32>
    %611 = vector.shape_cast %610 : vector<2x2x64xf32> to vector<4x64xf32>
    %612 = arith.truncf %611 : vector<4x64xf32> to vector<4x64xbf16>
    %c5_667 = arith.constant 5 : index
    %c0_668 = arith.constant 0 : index
    %c0_669 = arith.constant 0 : index
    %613 = vector.load %arg16[%c5_667, %c0_668, %c0_669] : memref<9x64x64xbf16, #tpu.memory_space<vmem>>, vector<1x64x64xbf16>
    %614 = vector.shape_cast %613 : vector<1x64x64xbf16> to vector<64x64xbf16>
    %cst_670 = arith.constant dense<0.000000e+00> : vector<4x64xf32>
    %615 = tpu.matmul %612, %614, %cst_670 {dimension_numbers = #tpu.dot_dimension_numbers<[1], [0], [0], [1], [0, 0, 1, 1], [], []>} : vector<4x64xbf16>, vector<64x64xbf16>, vector<4x64xf32> -> vector<4x64xf32>
    %616 = arith.addf %609, %615 : vector<4x64xf32>
    %c2_671 = arith.constant 2 : index
    %c0_672 = arith.constant 0 : index
    %c0_673 = arith.constant 0 : index
    %617 = vector.load %arg34[%c2_671, %c0_672, %c0_673] : memref<4x4x64xf32, #tpu.memory_space<vmem>>, vector<2x2x64xf32>
    %618 = vector.shape_cast %617 : vector<2x2x64xf32> to vector<4x64xf32>
    %619 = arith.truncf %618 : vector<4x64xf32> to vector<4x64xbf16>
    %c6_674 = arith.constant 6 : index
    %c0_675 = arith.constant 0 : index
    %c0_676 = arith.constant 0 : index
    %620 = vector.load %arg16[%c6_674, %c0_675, %c0_676] : memref<9x64x64xbf16, #tpu.memory_space<vmem>>, vector<1x64x64xbf16>
    %621 = vector.shape_cast %620 : vector<1x64x64xbf16> to vector<64x64xbf16>
    %cst_677 = arith.constant dense<0.000000e+00> : vector<4x64xf32>
    %622 = tpu.matmul %619, %621, %cst_677 {dimension_numbers = #tpu.dot_dimension_numbers<[1], [0], [0], [1], [0, 0, 1, 1], [], []>} : vector<4x64xbf16>, vector<64x64xbf16>, vector<4x64xf32> -> vector<4x64xf32>
    %623 = arith.addf %616, %622 : vector<4x64xf32>
    %c2_678 = arith.constant 2 : index
    %c1_679 = arith.constant 1 : index
    %c0_680 = arith.constant 0 : index
    %624 = vector.load %arg34[%c2_678, %c1_679, %c0_680] : memref<4x4x64xf32, #tpu.memory_space<vmem>>, vector<2x2x64xf32>
    %625 = vector.shape_cast %624 : vector<2x2x64xf32> to vector<4x64xf32>
    %626 = arith.truncf %625 : vector<4x64xf32> to vector<4x64xbf16>
    %c7_681 = arith.constant 7 : index
    %c0_682 = arith.constant 0 : index
    %c0_683 = arith.constant 0 : index
    %627 = vector.load %arg16[%c7_681, %c0_682, %c0_683] : memref<9x64x64xbf16, #tpu.memory_space<vmem>>, vector<1x64x64xbf16>
    %628 = vector.shape_cast %627 : vector<1x64x64xbf16> to vector<64x64xbf16>
    %cst_684 = arith.constant dense<0.000000e+00> : vector<4x64xf32>
    %629 = tpu.matmul %626, %628, %cst_684 {dimension_numbers = #tpu.dot_dimension_numbers<[1], [0], [0], [1], [0, 0, 1, 1], [], []>} : vector<4x64xbf16>, vector<64x64xbf16>, vector<4x64xf32> -> vector<4x64xf32>
    %630 = arith.addf %623, %629 : vector<4x64xf32>
    %c2_685 = arith.constant 2 : index
    %c2_686 = arith.constant 2 : index
    %c0_687 = arith.constant 0 : index
    %631 = vector.load %arg34[%c2_685, %c2_686, %c0_687] : memref<4x4x64xf32, #tpu.memory_space<vmem>>, vector<2x2x64xf32>
    %632 = vector.shape_cast %631 : vector<2x2x64xf32> to vector<4x64xf32>
    %633 = arith.truncf %632 : vector<4x64xf32> to vector<4x64xbf16>
    %c8_688 = arith.constant 8 : index
    %c0_689 = arith.constant 0 : index
    %c0_690 = arith.constant 0 : index
    %634 = vector.load %arg16[%c8_688, %c0_689, %c0_690] : memref<9x64x64xbf16, #tpu.memory_space<vmem>>, vector<1x64x64xbf16>
    %635 = vector.shape_cast %634 : vector<1x64x64xbf16> to vector<64x64xbf16>
    %cst_691 = arith.constant dense<0.000000e+00> : vector<4x64xf32>
    %636 = tpu.matmul %633, %635, %cst_691 {dimension_numbers = #tpu.dot_dimension_numbers<[1], [0], [0], [1], [0, 0, 1, 1], [], []>} : vector<4x64xbf16>, vector<64x64xbf16>, vector<4x64xf32> -> vector<4x64xf32>
    %637 = arith.addf %630, %636 : vector<4x64xf32>
    %c0_692 = arith.constant 0 : index
    %c0_693 = arith.constant 0 : index
    %638 = vector.load %arg17[%c0_692, %c0_693] : memref<1x64xf32, #tpu.memory_space<vmem>>, vector<1x64xf32>
    %639 = vector.broadcast %638 : vector<1x64xf32> to vector<4x64xf32>
    %640 = arith.addf %637, %639 : vector<4x64xf32>
    %cst_694 = arith.constant 0.000000e+00 : f32
    %641 = vector.broadcast %cst_694 : f32 to vector<4x64xf32>
    %642 = arith.maximumf %640, %641 : vector<4x64xf32>
    %643 = vector.shape_cast %642 : vector<4x64xf32> to vector<2x2x64xf32>
    %644 = arith.truncf %643 : vector<2x2x64xf32> to vector<2x2x64xbf16>
    %c0_695 = arith.constant 0 : index
    %c0_696 = arith.constant 0 : index
    %c0_697 = arith.constant 0 : index
    %c0_698 = arith.constant 0 : index
    %645 = vector.load %arg25[%c0_695, %c0_696, %c0_697, %c0_698] : memref<1x2x2x64xbf16, #tpu.memory_space<vmem>>, vector<1x2x2x64xbf16>
    %646 = vector.shape_cast %645 : vector<1x2x2x64xbf16> to vector<2x2x64xbf16>
    %647 = vector.shape_cast %644 : vector<2x2x64xbf16> to vector<1x2x2x64xbf16>
    tpu.vector_store %arg25[%c0_695, %c0_696, %c0_697, %c0_698], %647 {strides = array<i32>} : memref<1x2x2x64xbf16, #tpu.memory_space<vmem>>, vector<1x2x2x64xbf16>,
    %648 = vector.shape_cast %643 : vector<2x2x64xf32> to vector<1x2x2x64xf32>
    %649 = vector.extract_strided_slice %648 {offsets = [0, 0, 0, 0], sizes = [1, 1, 2, 64], strides = [1, 1, 1, 1]} : vector<1x2x2x64xf32> to vector<1x1x2x64xf32>
    %650 = vector.shape_cast %649 : vector<1x1x2x64xf32> to vector<1x2x64xf32>
    %651 = vector.extract_strided_slice %648 {offsets = [0, 1, 0, 0], sizes = [1, 1, 2, 64], strides = [1, 1, 1, 1]} : vector<1x2x2x64xf32> to vector<1x1x2x64xf32>
    %652 = vector.shape_cast %651 : vector<1x1x2x64xf32> to vector<1x2x64xf32>
    %653 = arith.maximumf %650, %652 : vector<1x2x64xf32>
    %c0_699 = arith.constant 0 : index
    %c0_700 = arith.constant 0 : index
    %c0_701 = arith.constant 0 : index
    %654 = vector.load %arg40[%c0_699, %c0_700, %c0_701] : memref<1x2x64xf32, #tpu.memory_space<vmem>>, vector<1x2x64xf32>
    tpu.vector_store %arg40[%c0_699, %c0_700, %c0_701], %653 {strides = array<i32>} : memref<1x2x64xf32, #tpu.memory_space<vmem>>, vector<1x2x64xf32>,
    %c0_702 = arith.constant 0 : index
    %c0_703 = arith.constant 0 : index
    %c0_704 = arith.constant 0 : index
    %655 = tpu.strided_load %arg40[%c0_702, %c0_703, %c0_704] {strides = array<i32: 1, 2, 1>} : memref<1x2x64xf32, #tpu.memory_space<vmem>>, vector<1x1x64xf32>
    %c0_705 = arith.constant 0 : index
    %c1_706 = arith.constant 1 : index
    %c0_707 = arith.constant 0 : index
    %656 = tpu.strided_load %arg40[%c0_705, %c1_706, %c0_707] {strides = array<i32: 1, 2, 1>} : memref<1x2x64xf32, #tpu.memory_space<vmem>>, vector<1x1x64xf32>
    %657 = arith.maximumf %655, %656 : vector<1x1x64xf32>
    %cst_708 = arith.constant 0.000000e+00 : f32
    %658 = vector.broadcast %cst_708 : f32 to vector<1x3x64xf32>
    %cst_709 = arith.constant 0.000000e+00 : f32
    %659 = vector.broadcast %cst_709 : f32 to vector<3x1x64xf32>
    %c0_710 = arith.constant 0 : index
    %c0_711 = arith.constant 0 : index
    %c0_712 = arith.constant 0 : index
    %660 = vector.load %arg35[%c0_710, %c0_711, %c0_712] : memref<3x3x64xf32, #tpu.memory_space<vmem>>, vector<1x3x64xf32>
    tpu.vector_store %arg35[%c0_710, %c0_711, %c0_712], %658 {strides = array<i32>} : memref<3x3x64xf32, #tpu.memory_space<vmem>>, vector<1x3x64xf32>,
    %c2_713 = arith.constant 2 : index
    %c0_714 = arith.constant 0 : index
    %c0_715 = arith.constant 0 : index
    %661 = vector.load %arg35[%c2_713, %c0_714, %c0_715] : memref<3x3x64xf32, #tpu.memory_space<vmem>>, vector<1x3x64xf32>
    tpu.vector_store %arg35[%c2_713, %c0_714, %c0_715], %658 {strides = array<i32>} : memref<3x3x64xf32, #tpu.memory_space<vmem>>, vector<1x3x64xf32>,
    %c0_716 = arith.constant 0 : index
    %c0_717 = arith.constant 0 : index
    %c0_718 = arith.constant 0 : index
    %662 = vector.load %arg35[%c0_716, %c0_717, %c0_718] : memref<3x3x64xf32, #tpu.memory_space<vmem>>, vector<3x1x64xf32>
    tpu.vector_store %arg35[%c0_716, %c0_717, %c0_718], %659 {strides = array<i32>} : memref<3x3x64xf32, #tpu.memory_space<vmem>>, vector<3x1x64xf32>,
    %c0_719 = arith.constant 0 : index
    %c2_720 = arith.constant 2 : index
    %c0_721 = arith.constant 0 : index
    %663 = vector.load %arg35[%c0_719, %c2_720, %c0_721] : memref<3x3x64xf32, #tpu.memory_space<vmem>>, vector<3x1x64xf32>
    tpu.vector_store %arg35[%c0_719, %c2_720, %c0_721], %659 {strides = array<i32>} : memref<3x3x64xf32, #tpu.memory_space<vmem>>, vector<3x1x64xf32>,
    %cst_722 = arith.constant 0.000000e+00 : f32
    %664 = vector.broadcast %cst_722 : f32 to vector<1x3x64xf32>
    %cst_723 = arith.constant 0.000000e+00 : f32
    %665 = vector.broadcast %cst_723 : f32 to vector<3x1x64xf32>
    %c0_724 = arith.constant 0 : index
    %c0_725 = arith.constant 0 : index
    %c0_726 = arith.constant 0 : index
    %666 = vector.load %arg36[%c0_724, %c0_725, %c0_726] : memref<3x3x64xf32, #tpu.memory_space<vmem>>, vector<1x3x64xf32>
    tpu.vector_store %arg36[%c0_724, %c0_725, %c0_726], %664 {strides = array<i32>} : memref<3x3x64xf32, #tpu.memory_space<vmem>>, vector<1x3x64xf32>,
    %c2_727 = arith.constant 2 : index
    %c0_728 = arith.constant 0 : index
    %c0_729 = arith.constant 0 : index
    %667 = vector.load %arg36[%c2_727, %c0_728, %c0_729] : memref<3x3x64xf32, #tpu.memory_space<vmem>>, vector<1x3x64xf32>
    tpu.vector_store %arg36[%c2_727, %c0_728, %c0_729], %664 {strides = array<i32>} : memref<3x3x64xf32, #tpu.memory_space<vmem>>, vector<1x3x64xf32>,
    %c0_730 = arith.constant 0 : index
    %c0_731 = arith.constant 0 : index
    %c0_732 = arith.constant 0 : index
    %668 = vector.load %arg36[%c0_730, %c0_731, %c0_732] : memref<3x3x64xf32, #tpu.memory_space<vmem>>, vector<3x1x64xf32>
    tpu.vector_store %arg36[%c0_730, %c0_731, %c0_732], %665 {strides = array<i32>} : memref<3x3x64xf32, #tpu.memory_space<vmem>>, vector<3x1x64xf32>,
    %c0_733 = arith.constant 0 : index
    %c2_734 = arith.constant 2 : index
    %c0_735 = arith.constant 0 : index
    %669 = vector.load %arg36[%c0_733, %c2_734, %c0_735] : memref<3x3x64xf32, #tpu.memory_space<vmem>>, vector<3x1x64xf32>
    tpu.vector_store %arg36[%c0_733, %c2_734, %c0_735], %665 {strides = array<i32>} : memref<3x3x64xf32, #tpu.memory_space<vmem>>, vector<3x1x64xf32>,
    %c1_736 = arith.constant 1 : index
    %c1_737 = arith.constant 1 : index
    %c0_738 = arith.constant 0 : index
    %670 = vector.load %arg35[%c1_736, %c1_737, %c0_738] : memref<3x3x64xf32, #tpu.memory_space<vmem>>, vector<1x1x64xf32>
    tpu.vector_store %arg35[%c1_736, %c1_737, %c0_738], %657 {strides = array<i32>} : memref<3x3x64xf32, #tpu.memory_space<vmem>>, vector<1x1x64xf32>,
    %c0_739 = arith.constant 0 : index
    %c0_740 = arith.constant 0 : index
    %c0_741 = arith.constant 0 : index
    %671 = vector.load %arg35[%c0_739, %c0_740, %c0_741] : memref<3x3x64xf32, #tpu.memory_space<vmem>>, vector<1x1x64xf32>
    %672 = vector.shape_cast %671 : vector<1x1x64xf32> to vector<1x64xf32>
    %673 = arith.truncf %672 : vector<1x64xf32> to vector<1x64xbf16>
    %c0_742 = arith.constant 0 : index
    %c0_743 = arith.constant 0 : index
    %c0_744 = arith.constant 0 : index
    %674 = vector.load %arg18[%c0_742, %c0_743, %c0_744] : memref<9x64x64xbf16, #tpu.memory_space<vmem>>, vector<1x64x64xbf16>
    %675 = vector.shape_cast %674 : vector<1x64x64xbf16> to vector<64x64xbf16>
    %cst_745 = arith.constant dense<0.000000e+00> : vector<1x64xf32>
    %676 = tpu.matmul %673, %675, %cst_745 {dimension_numbers = #tpu.dot_dimension_numbers<[1], [0], [0], [1], [0, 0, 1, 1], [], []>} : vector<1x64xbf16>, vector<64x64xbf16>, vector<1x64xf32> -> vector<1x64xf32>
    %c0_746 = arith.constant 0 : index
    %c1_747 = arith.constant 1 : index
    %c0_748 = arith.constant 0 : index
    %677 = vector.load %arg35[%c0_746, %c1_747, %c0_748] : memref<3x3x64xf32, #tpu.memory_space<vmem>>, vector<1x1x64xf32>
    %678 = vector.shape_cast %677 : vector<1x1x64xf32> to vector<1x64xf32>
    %679 = arith.truncf %678 : vector<1x64xf32> to vector<1x64xbf16>
    %c1_749 = arith.constant 1 : index
    %c0_750 = arith.constant 0 : index
    %c0_751 = arith.constant 0 : index
    %680 = vector.load %arg18[%c1_749, %c0_750, %c0_751] : memref<9x64x64xbf16, #tpu.memory_space<vmem>>, vector<1x64x64xbf16>
    %681 = vector.shape_cast %680 : vector<1x64x64xbf16> to vector<64x64xbf16>
    %cst_752 = arith.constant dense<0.000000e+00> : vector<1x64xf32>
    %682 = tpu.matmul %679, %681, %cst_752 {dimension_numbers = #tpu.dot_dimension_numbers<[1], [0], [0], [1], [0, 0, 1, 1], [], []>} : vector<1x64xbf16>, vector<64x64xbf16>, vector<1x64xf32> -> vector<1x64xf32>
    %683 = arith.addf %676, %682 : vector<1x64xf32>
    %c0_753 = arith.constant 0 : index
    %c2_754 = arith.constant 2 : index
    %c0_755 = arith.constant 0 : index
    %684 = vector.load %arg35[%c0_753, %c2_754, %c0_755] : memref<3x3x64xf32, #tpu.memory_space<vmem>>, vector<1x1x64xf32>
    %685 = vector.shape_cast %684 : vector<1x1x64xf32> to vector<1x64xf32>
    %686 = arith.truncf %685 : vector<1x64xf32> to vector<1x64xbf16>
    %c2_756 = arith.constant 2 : index
    %c0_757 = arith.constant 0 : index
    %c0_758 = arith.constant 0 : index
    %687 = vector.load %arg18[%c2_756, %c0_757, %c0_758] : memref<9x64x64xbf16, #tpu.memory_space<vmem>>, vector<1x64x64xbf16>
    %688 = vector.shape_cast %687 : vector<1x64x64xbf16> to vector<64x64xbf16>
    %cst_759 = arith.constant dense<0.000000e+00> : vector<1x64xf32>
    %689 = tpu.matmul %686, %688, %cst_759 {dimension_numbers = #tpu.dot_dimension_numbers<[1], [0], [0], [1], [0, 0, 1, 1], [], []>} : vector<1x64xbf16>, vector<64x64xbf16>, vector<1x64xf32> -> vector<1x64xf32>
    %690 = arith.addf %683, %689 : vector<1x64xf32>
    %c1_760 = arith.constant 1 : index
    %c0_761 = arith.constant 0 : index
    %c0_762 = arith.constant 0 : index
    %691 = vector.load %arg35[%c1_760, %c0_761, %c0_762] : memref<3x3x64xf32, #tpu.memory_space<vmem>>, vector<1x1x64xf32>
    %692 = vector.shape_cast %691 : vector<1x1x64xf32> to vector<1x64xf32>
    %693 = arith.truncf %692 : vector<1x64xf32> to vector<1x64xbf16>
    %c3_763 = arith.constant 3 : index
    %c0_764 = arith.constant 0 : index
    %c0_765 = arith.constant 0 : index
    %694 = vector.load %arg18[%c3_763, %c0_764, %c0_765] : memref<9x64x64xbf16, #tpu.memory_space<vmem>>, vector<1x64x64xbf16>
    %695 = vector.shape_cast %694 : vector<1x64x64xbf16> to vector<64x64xbf16>
    %cst_766 = arith.constant dense<0.000000e+00> : vector<1x64xf32>
    %696 = tpu.matmul %693, %695, %cst_766 {dimension_numbers = #tpu.dot_dimension_numbers<[1], [0], [0], [1], [0, 0, 1, 1], [], []>} : vector<1x64xbf16>, vector<64x64xbf16>, vector<1x64xf32> -> vector<1x64xf32>
    %697 = arith.addf %690, %696 : vector<1x64xf32>
    %c1_767 = arith.constant 1 : index
    %c1_768 = arith.constant 1 : index
    %c0_769 = arith.constant 0 : index
    %698 = vector.load %arg35[%c1_767, %c1_768, %c0_769] : memref<3x3x64xf32, #tpu.memory_space<vmem>>, vector<1x1x64xf32>
    %699 = vector.shape_cast %698 : vector<1x1x64xf32> to vector<1x64xf32>
    %700 = arith.truncf %699 : vector<1x64xf32> to vector<1x64xbf16>
    %c4_770 = arith.constant 4 : index
    %c0_771 = arith.constant 0 : index
    %c0_772 = arith.constant 0 : index
    %701 = vector.load %arg18[%c4_770, %c0_771, %c0_772] : memref<9x64x64xbf16, #tpu.memory_space<vmem>>, vector<1x64x64xbf16>
    %702 = vector.shape_cast %701 : vector<1x64x64xbf16> to vector<64x64xbf16>
    %cst_773 = arith.constant dense<0.000000e+00> : vector<1x64xf32>
    %703 = tpu.matmul %700, %702, %cst_773 {dimension_numbers = #tpu.dot_dimension_numbers<[1], [0], [0], [1], [0, 0, 1, 1], [], []>} : vector<1x64xbf16>, vector<64x64xbf16>, vector<1x64xf32> -> vector<1x64xf32>
    %704 = arith.addf %697, %703 : vector<1x64xf32>
    %c1_774 = arith.constant 1 : index
    %c2_775 = arith.constant 2 : index
    %c0_776 = arith.constant 0 : index
    %705 = vector.load %arg35[%c1_774, %c2_775, %c0_776] : memref<3x3x64xf32, #tpu.memory_space<vmem>>, vector<1x1x64xf32>
    %706 = vector.shape_cast %705 : vector<1x1x64xf32> to vector<1x64xf32>
    %707 = arith.truncf %706 : vector<1x64xf32> to vector<1x64xbf16>
    %c5_777 = arith.constant 5 : index
    %c0_778 = arith.constant 0 : index
    %c0_779 = arith.constant 0 : index
    %708 = vector.load %arg18[%c5_777, %c0_778, %c0_779] : memref<9x64x64xbf16, #tpu.memory_space<vmem>>, vector<1x64x64xbf16>
    %709 = vector.shape_cast %708 : vector<1x64x64xbf16> to vector<64x64xbf16>
    %cst_780 = arith.constant dense<0.000000e+00> : vector<1x64xf32>
    %710 = tpu.matmul %707, %709, %cst_780 {dimension_numbers = #tpu.dot_dimension_numbers<[1], [0], [0], [1], [0, 0, 1, 1], [], []>} : vector<1x64xbf16>, vector<64x64xbf16>, vector<1x64xf32> -> vector<1x64xf32>
    %711 = arith.addf %704, %710 : vector<1x64xf32>
    %c2_781 = arith.constant 2 : index
    %c0_782 = arith.constant 0 : index
    %c0_783 = arith.constant 0 : index
    %712 = vector.load %arg35[%c2_781, %c0_782, %c0_783] : memref<3x3x64xf32, #tpu.memory_space<vmem>>, vector<1x1x64xf32>
    %713 = vector.shape_cast %712 : vector<1x1x64xf32> to vector<1x64xf32>
    %714 = arith.truncf %713 : vector<1x64xf32> to vector<1x64xbf16>
    %c6_784 = arith.constant 6 : index
    %c0_785 = arith.constant 0 : index
    %c0_786 = arith.constant 0 : index
    %715 = vector.load %arg18[%c6_784, %c0_785, %c0_786] : memref<9x64x64xbf16, #tpu.memory_space<vmem>>, vector<1x64x64xbf16>
    %716 = vector.shape_cast %715 : vector<1x64x64xbf16> to vector<64x64xbf16>
    %cst_787 = arith.constant dense<0.000000e+00> : vector<1x64xf32>
    %717 = tpu.matmul %714, %716, %cst_787 {dimension_numbers = #tpu.dot_dimension_numbers<[1], [0], [0], [1], [0, 0, 1, 1], [], []>} : vector<1x64xbf16>, vector<64x64xbf16>, vector<1x64xf32> -> vector<1x64xf32>
    %718 = arith.addf %711, %717 : vector<1x64xf32>
    %c2_788 = arith.constant 2 : index
    %c1_789 = arith.constant 1 : index
    %c0_790 = arith.constant 0 : index
    %719 = vector.load %arg35[%c2_788, %c1_789, %c0_790] : memref<3x3x64xf32, #tpu.memory_space<vmem>>, vector<1x1x64xf32>
    %720 = vector.shape_cast %719 : vector<1x1x64xf32> to vector<1x64xf32>
    %721 = arith.truncf %720 : vector<1x64xf32> to vector<1x64xbf16>
    %c7_791 = arith.constant 7 : index
    %c0_792 = arith.constant 0 : index
    %c0_793 = arith.constant 0 : index
    %722 = vector.load %arg18[%c7_791, %c0_792, %c0_793] : memref<9x64x64xbf16, #tpu.memory_space<vmem>>, vector<1x64x64xbf16>
    %723 = vector.shape_cast %722 : vector<1x64x64xbf16> to vector<64x64xbf16>
    %cst_794 = arith.constant dense<0.000000e+00> : vector<1x64xf32>
    %724 = tpu.matmul %721, %723, %cst_794 {dimension_numbers = #tpu.dot_dimension_numbers<[1], [0], [0], [1], [0, 0, 1, 1], [], []>} : vector<1x64xbf16>, vector<64x64xbf16>, vector<1x64xf32> -> vector<1x64xf32>
    %725 = arith.addf %718, %724 : vector<1x64xf32>
    %c2_795 = arith.constant 2 : index
    %c2_796 = arith.constant 2 : index
    %c0_797 = arith.constant 0 : index
    %726 = vector.load %arg35[%c2_795, %c2_796, %c0_797] : memref<3x3x64xf32, #tpu.memory_space<vmem>>, vector<1x1x64xf32>
    %727 = vector.shape_cast %726 : vector<1x1x64xf32> to vector<1x64xf32>
    %728 = arith.truncf %727 : vector<1x64xf32> to vector<1x64xbf16>
    %c8_798 = arith.constant 8 : index
    %c0_799 = arith.constant 0 : index
    %c0_800 = arith.constant 0 : index
    %729 = vector.load %arg18[%c8_798, %c0_799, %c0_800] : memref<9x64x64xbf16, #tpu.memory_space<vmem>>, vector<1x64x64xbf16>
    %730 = vector.shape_cast %729 : vector<1x64x64xbf16> to vector<64x64xbf16>
    %cst_801 = arith.constant dense<0.000000e+00> : vector<1x64xf32>
    %731 = tpu.matmul %728, %730, %cst_801 {dimension_numbers = #tpu.dot_dimension_numbers<[1], [0], [0], [1], [0, 0, 1, 1], [], []>} : vector<1x64xbf16>, vector<64x64xbf16>, vector<1x64xf32> -> vector<1x64xf32>
    %732 = arith.addf %725, %731 : vector<1x64xf32>
    %c0_802 = arith.constant 0 : index
    %c0_803 = arith.constant 0 : index
    %733 = vector.load %arg19[%c0_802, %c0_803] : memref<1x64xf32, #tpu.memory_space<vmem>>, vector<1x64xf32>
    %734 = arith.addf %732, %733 : vector<1x64xf32>
    %cst_804 = arith.constant 0.000000e+00 : f32
    %735 = vector.broadcast %cst_804 : f32 to vector<1x64xf32>
    %736 = arith.maximumf %734, %735 : vector<1x64xf32>
    %737 = vector.shape_cast %736 : vector<1x64xf32> to vector<1x1x64xf32>
    %c1_805 = arith.constant 1 : index
    %c1_806 = arith.constant 1 : index
    %c0_807 = arith.constant 0 : index
    %738 = vector.load %arg36[%c1_805, %c1_806, %c0_807] : memref<3x3x64xf32, #tpu.memory_space<vmem>>, vector<1x1x64xf32>
    tpu.vector_store %arg36[%c1_805, %c1_806, %c0_807], %737 {strides = array<i32>} : memref<3x3x64xf32, #tpu.memory_space<vmem>>, vector<1x1x64xf32>,
    %c0_808 = arith.constant 0 : index
    %c0_809 = arith.constant 0 : index
    %c0_810 = arith.constant 0 : index
    %739 = vector.load %arg36[%c0_808, %c0_809, %c0_810] : memref<3x3x64xf32, #tpu.memory_space<vmem>>, vector<1x1x64xf32>
    %740 = vector.shape_cast %739 : vector<1x1x64xf32> to vector<1x64xf32>
    %741 = arith.truncf %740 : vector<1x64xf32> to vector<1x64xbf16>
    %c0_811 = arith.constant 0 : index
    %c0_812 = arith.constant 0 : index
    %c0_813 = arith.constant 0 : index
    %742 = vector.load %arg20[%c0_811, %c0_812, %c0_813] : memref<9x64x64xbf16, #tpu.memory_space<vmem>>, vector<1x64x64xbf16>
    %743 = vector.shape_cast %742 : vector<1x64x64xbf16> to vector<64x64xbf16>
    %cst_814 = arith.constant dense<0.000000e+00> : vector<1x64xf32>
    %744 = tpu.matmul %741, %743, %cst_814 {dimension_numbers = #tpu.dot_dimension_numbers<[1], [0], [0], [1], [0, 0, 1, 1], [], []>} : vector<1x64xbf16>, vector<64x64xbf16>, vector<1x64xf32> -> vector<1x64xf32>
    %c0_815 = arith.constant 0 : index
    %c1_816 = arith.constant 1 : index
    %c0_817 = arith.constant 0 : index
    %745 = vector.load %arg36[%c0_815, %c1_816, %c0_817] : memref<3x3x64xf32, #tpu.memory_space<vmem>>, vector<1x1x64xf32>
    %746 = vector.shape_cast %745 : vector<1x1x64xf32> to vector<1x64xf32>
    %747 = arith.truncf %746 : vector<1x64xf32> to vector<1x64xbf16>
    %c1_818 = arith.constant 1 : index
    %c0_819 = arith.constant 0 : index
    %c0_820 = arith.constant 0 : index
    %748 = vector.load %arg20[%c1_818, %c0_819, %c0_820] : memref<9x64x64xbf16, #tpu.memory_space<vmem>>, vector<1x64x64xbf16>
    %749 = vector.shape_cast %748 : vector<1x64x64xbf16> to vector<64x64xbf16>
    %cst_821 = arith.constant dense<0.000000e+00> : vector<1x64xf32>
    %750 = tpu.matmul %747, %749, %cst_821 {dimension_numbers = #tpu.dot_dimension_numbers<[1], [0], [0], [1], [0, 0, 1, 1], [], []>} : vector<1x64xbf16>, vector<64x64xbf16>, vector<1x64xf32> -> vector<1x64xf32>
    %751 = arith.addf %744, %750 : vector<1x64xf32>
    %c0_822 = arith.constant 0 : index
    %c2_823 = arith.constant 2 : index
    %c0_824 = arith.constant 0 : index
    %752 = vector.load %arg36[%c0_822, %c2_823, %c0_824] : memref<3x3x64xf32, #tpu.memory_space<vmem>>, vector<1x1x64xf32>
    %753 = vector.shape_cast %752 : vector<1x1x64xf32> to vector<1x64xf32>
    %754 = arith.truncf %753 : vector<1x64xf32> to vector<1x64xbf16>
    %c2_825 = arith.constant 2 : index
    %c0_826 = arith.constant 0 : index
    %c0_827 = arith.constant 0 : index
    %755 = vector.load %arg20[%c2_825, %c0_826, %c0_827] : memref<9x64x64xbf16, #tpu.memory_space<vmem>>, vector<1x64x64xbf16>
    %756 = vector.shape_cast %755 : vector<1x64x64xbf16> to vector<64x64xbf16>
    %cst_828 = arith.constant dense<0.000000e+00> : vector<1x64xf32>
    %757 = tpu.matmul %754, %756, %cst_828 {dimension_numbers = #tpu.dot_dimension_numbers<[1], [0], [0], [1], [0, 0, 1, 1], [], []>} : vector<1x64xbf16>, vector<64x64xbf16>, vector<1x64xf32> -> vector<1x64xf32>
    %758 = arith.addf %751, %757 : vector<1x64xf32>
    %c1_829 = arith.constant 1 : index
    %c0_830 = arith.constant 0 : index
    %c0_831 = arith.constant 0 : index
    %759 = vector.load %arg36[%c1_829, %c0_830, %c0_831] : memref<3x3x64xf32, #tpu.memory_space<vmem>>, vector<1x1x64xf32>
    %760 = vector.shape_cast %759 : vector<1x1x64xf32> to vector<1x64xf32>
    %761 = arith.truncf %760 : vector<1x64xf32> to vector<1x64xbf16>
    %c3_832 = arith.constant 3 : index
    %c0_833 = arith.constant 0 : index
    %c0_834 = arith.constant 0 : index
    %762 = vector.load %arg20[%c3_832, %c0_833, %c0_834] : memref<9x64x64xbf16, #tpu.memory_space<vmem>>, vector<1x64x64xbf16>
    %763 = vector.shape_cast %762 : vector<1x64x64xbf16> to vector<64x64xbf16>
    %cst_835 = arith.constant dense<0.000000e+00> : vector<1x64xf32>
    %764 = tpu.matmul %761, %763, %cst_835 {dimension_numbers = #tpu.dot_dimension_numbers<[1], [0], [0], [1], [0, 0, 1, 1], [], []>} : vector<1x64xbf16>, vector<64x64xbf16>, vector<1x64xf32> -> vector<1x64xf32>
    %765 = arith.addf %758, %764 : vector<1x64xf32>
    %c1_836 = arith.constant 1 : index
    %c1_837 = arith.constant 1 : index
    %c0_838 = arith.constant 0 : index
    %766 = vector.load %arg36[%c1_836, %c1_837, %c0_838] : memref<3x3x64xf32, #tpu.memory_space<vmem>>, vector<1x1x64xf32>
    %767 = vector.shape_cast %766 : vector<1x1x64xf32> to vector<1x64xf32>
    %768 = arith.truncf %767 : vector<1x64xf32> to vector<1x64xbf16>
    %c4_839 = arith.constant 4 : index
    %c0_840 = arith.constant 0 : index
    %c0_841 = arith.constant 0 : index
    %769 = vector.load %arg20[%c4_839, %c0_840, %c0_841] : memref<9x64x64xbf16, #tpu.memory_space<vmem>>, vector<1x64x64xbf16>
    %770 = vector.shape_cast %769 : vector<1x64x64xbf16> to vector<64x64xbf16>
    %cst_842 = arith.constant dense<0.000000e+00> : vector<1x64xf32>
    %771 = tpu.matmul %768, %770, %cst_842 {dimension_numbers = #tpu.dot_dimension_numbers<[1], [0], [0], [1], [0, 0, 1, 1], [], []>} : vector<1x64xbf16>, vector<64x64xbf16>, vector<1x64xf32> -> vector<1x64xf32>
    %772 = arith.addf %765, %771 : vector<1x64xf32>
    %c1_843 = arith.constant 1 : index
    %c2_844 = arith.constant 2 : index
    %c0_845 = arith.constant 0 : index
    %773 = vector.load %arg36[%c1_843, %c2_844, %c0_845] : memref<3x3x64xf32, #tpu.memory_space<vmem>>, vector<1x1x64xf32>
    %774 = vector.shape_cast %773 : vector<1x1x64xf32> to vector<1x64xf32>
    %775 = arith.truncf %774 : vector<1x64xf32> to vector<1x64xbf16>
    %c5_846 = arith.constant 5 : index
    %c0_847 = arith.constant 0 : index
    %c0_848 = arith.constant 0 : index
    %776 = vector.load %arg20[%c5_846, %c0_847, %c0_848] : memref<9x64x64xbf16, #tpu.memory_space<vmem>>, vector<1x64x64xbf16>
    %777 = vector.shape_cast %776 : vector<1x64x64xbf16> to vector<64x64xbf16>
    %cst_849 = arith.constant dense<0.000000e+00> : vector<1x64xf32>
    %778 = tpu.matmul %775, %777, %cst_849 {dimension_numbers = #tpu.dot_dimension_numbers<[1], [0], [0], [1], [0, 0, 1, 1], [], []>} : vector<1x64xbf16>, vector<64x64xbf16>, vector<1x64xf32> -> vector<1x64xf32>
    %779 = arith.addf %772, %778 : vector<1x64xf32>
    %c2_850 = arith.constant 2 : index
    %c0_851 = arith.constant 0 : index
    %c0_852 = arith.constant 0 : index
    %780 = vector.load %arg36[%c2_850, %c0_851, %c0_852] : memref<3x3x64xf32, #tpu.memory_space<vmem>>, vector<1x1x64xf32>
    %781 = vector.shape_cast %780 : vector<1x1x64xf32> to vector<1x64xf32>
    %782 = arith.truncf %781 : vector<1x64xf32> to vector<1x64xbf16>
    %c6_853 = arith.constant 6 : index
    %c0_854 = arith.constant 0 : index
    %c0_855 = arith.constant 0 : index
    %783 = vector.load %arg20[%c6_853, %c0_854, %c0_855] : memref<9x64x64xbf16, #tpu.memory_space<vmem>>, vector<1x64x64xbf16>
    %784 = vector.shape_cast %783 : vector<1x64x64xbf16> to vector<64x64xbf16>
    %cst_856 = arith.constant dense<0.000000e+00> : vector<1x64xf32>
    %785 = tpu.matmul %782, %784, %cst_856 {dimension_numbers = #tpu.dot_dimension_numbers<[1], [0], [0], [1], [0, 0, 1, 1], [], []>} : vector<1x64xbf16>, vector<64x64xbf16>, vector<1x64xf32> -> vector<1x64xf32>
    %786 = arith.addf %779, %785 : vector<1x64xf32>
    %c2_857 = arith.constant 2 : index
    %c1_858 = arith.constant 1 : index
    %c0_859 = arith.constant 0 : index
    %787 = vector.load %arg36[%c2_857, %c1_858, %c0_859] : memref<3x3x64xf32, #tpu.memory_space<vmem>>, vector<1x1x64xf32>
    %788 = vector.shape_cast %787 : vector<1x1x64xf32> to vector<1x64xf32>
    %789 = arith.truncf %788 : vector<1x64xf32> to vector<1x64xbf16>
    %c7_860 = arith.constant 7 : index
    %c0_861 = arith.constant 0 : index
    %c0_862 = arith.constant 0 : index
    %790 = vector.load %arg20[%c7_860, %c0_861, %c0_862] : memref<9x64x64xbf16, #tpu.memory_space<vmem>>, vector<1x64x64xbf16>
    %791 = vector.shape_cast %790 : vector<1x64x64xbf16> to vector<64x64xbf16>
    %cst_863 = arith.constant dense<0.000000e+00> : vector<1x64xf32>
    %792 = tpu.matmul %789, %791, %cst_863 {dimension_numbers = #tpu.dot_dimension_numbers<[1], [0], [0], [1], [0, 0, 1, 1], [], []>} : vector<1x64xbf16>, vector<64x64xbf16>, vector<1x64xf32> -> vector<1x64xf32>
    %793 = arith.addf %786, %792 : vector<1x64xf32>
    %c2_864 = arith.constant 2 : index
    %c2_865 = arith.constant 2 : index
    %c0_866 = arith.constant 0 : index
    %794 = vector.load %arg36[%c2_864, %c2_865, %c0_866] : memref<3x3x64xf32, #tpu.memory_space<vmem>>, vector<1x1x64xf32>
    %795 = vector.shape_cast %794 : vector<1x1x64xf32> to vector<1x64xf32>
    %796 = arith.truncf %795 : vector<1x64xf32> to vector<1x64xbf16>
    %c8_867 = arith.constant 8 : index
    %c0_868 = arith.constant 0 : index
    %c0_869 = arith.constant 0 : index
    %797 = vector.load %arg20[%c8_867, %c0_868, %c0_869] : memref<9x64x64xbf16, #tpu.memory_space<vmem>>, vector<1x64x64xbf16>
    %798 = vector.shape_cast %797 : vector<1x64x64xbf16> to vector<64x64xbf16>
    %cst_870 = arith.constant dense<0.000000e+00> : vector<1x64xf32>
    %799 = tpu.matmul %796, %798, %cst_870 {dimension_numbers = #tpu.dot_dimension_numbers<[1], [0], [0], [1], [0, 0, 1, 1], [], []>} : vector<1x64xbf16>, vector<64x64xbf16>, vector<1x64xf32> -> vector<1x64xf32>
    %800 = arith.addf %793, %799 : vector<1x64xf32>
    %c0_871 = arith.constant 0 : index
    %c0_872 = arith.constant 0 : index
    %801 = vector.load %arg21[%c0_871, %c0_872] : memref<1x64xf32, #tpu.memory_space<vmem>>, vector<1x64xf32>
    %802 = arith.addf %800, %801 : vector<1x64xf32>
    %cst_873 = arith.constant 0.000000e+00 : f32
    %803 = vector.broadcast %cst_873 : f32 to vector<1x64xf32>
    %804 = arith.maximumf %802, %803 : vector<1x64xf32>
    %805 = vector.shape_cast %804 : vector<1x64xf32> to vector<1x1x64xf32>
    %806 = arith.truncf %805 : vector<1x1x64xf32> to vector<1x1x64xbf16>
    %c0_874 = arith.constant 0 : index
    %c0_875 = arith.constant 0 : index
    %c0_876 = arith.constant 0 : index
    %c0_877 = arith.constant 0 : index
    %807 = vector.load %arg26[%c0_874, %c0_875, %c0_876, %c0_877] : memref<1x1x1x64xbf16, #tpu.memory_space<vmem>>, vector<1x1x1x64xbf16>
    %808 = vector.shape_cast %807 : vector<1x1x1x64xbf16> to vector<1x1x64xbf16>
    %809 = vector.shape_cast %806 : vector<1x1x64xbf16> to vector<1x1x1x64xbf16>
    tpu.vector_store %arg26[%c0_874, %c0_875, %c0_876, %c0_877], %809 {strides = array<i32>} : memref<1x1x1x64xbf16, #tpu.memory_space<vmem>>, vector<1x1x1x64xbf16>,
    return
  }
  func.func @transform_0(%arg0: i32) -> (i32, i32, i32, i32) {
    %c0_i32 = arith.constant 0 : i32
    %c0_i32_0 = arith.constant 0 : i32
    %c0_i32_1 = arith.constant 0 : i32
    %c0_i32_2 = arith.constant 0 : i32
    return %arg0, %c0_i32, %c0_i32_0, %c0_i32_1 : i32, i32, i32, i32
  }
  func.func @transform_1(%arg0: i32) -> (i32, i32, i32) {
    %c0_i32 = arith.constant 0 : i32
    %c0_i32_0 = arith.constant 0 : i32
    %c0_i32_1 = arith.constant 0 : i32
    %c0_i32_2 = arith.constant 0 : i32
    return %c0_i32, %c0_i32_0, %c0_i32_1 : i32, i32, i32
  }
  func.func @transform_2(%arg0: i32) -> (i32, i32) {
    %c0_i32 = arith.constant 0 : i32
    %c0_i32_0 = arith.constant 0 : i32
    %c0_i32_1 = arith.constant 0 : i32
    return %c0_i32, %c0_i32_0 : i32, i32
  }
  func.func @transform_3(%arg0: i32) -> (i32, i32, i32) {
    %c0_i32 = arith.constant 0 : i32
    %c0_i32_0 = arith.constant 0 : i32
    %c0_i32_1 = arith.constant 0 : i32
    %c0_i32_2 = arith.constant 0 : i32
    return %c0_i32, %c0_i32_0, %c0_i32_1 : i32, i32, i32
  }
  func.func @transform_4(%arg0: i32) -> (i32, i32) {
    %c0_i32 = arith.constant 0 : i32
    %c0_i32_0 = arith.constant 0 : i32
    %c0_i32_1 = arith.constant 0 : i32
    return %c0_i32, %c0_i32_0 : i32, i32
  }
  func.func @transform_5(%arg0: i32) -> (i32, i32, i32) {
    %c0_i32 = arith.constant 0 : i32
    %c0_i32_0 = arith.constant 0 : i32
    %c0_i32_1 = arith.constant 0 : i32
    %c0_i32_2 = arith.constant 0 : i32
    return %c0_i32, %c0_i32_0, %c0_i32_1 : i32, i32, i32
  }
  func.func @transform_6(%arg0: i32) -> (i32, i32) {
    %c0_i32 = arith.constant 0 : i32
    %c0_i32_0 = arith.constant 0 : i32
    %c0_i32_1 = arith.constant 0 : i32
    return %c0_i32, %c0_i32_0 : i32, i32
  }
  func.func @transform_7(%arg0: i32) -> (i32, i32, i32) {
    %c0_i32 = arith.constant 0 : i32
    %c0_i32_0 = arith.constant 0 : i32
    %c0_i32_1 = arith.constant 0 : i32
    %c0_i32_2 = arith.constant 0 : i32
    return %c0_i32, %c0_i32_0, %c0_i32_1 : i32, i32, i32
  }
  func.func @transform_8(%arg0: i32) -> (i32, i32) {
    %c0_i32 = arith.constant 0 : i32
    %c0_i32_0 = arith.constant 0 : i32
    %c0_i32_1 = arith.constant 0 : i32
    return %c0_i32, %c0_i32_0 : i32, i32
  }
  func.func @transform_9(%arg0: i32) -> (i32, i32, i32) {
    %c0_i32 = arith.constant 0 : i32
    %c0_i32_0 = arith.constant 0 : i32
    %c0_i32_1 = arith.constant 0 : i32
    %c0_i32_2 = arith.constant 0 : i32
    return %c0_i32, %c0_i32_0, %c0_i32_1 : i32, i32, i32
  }
  func.func @transform_10(%arg0: i32) -> (i32, i32) {
    %c0_i32 = arith.constant 0 : i32
    %c0_i32_0 = arith.constant 0 : i32
    %c0_i32_1 = arith.constant 0 : i32
    return %c0_i32, %c0_i32_0 : i32, i32
  }
  func.func @transform_11(%arg0: i32) -> (i32, i32, i32) {
    %c0_i32 = arith.constant 0 : i32
    %c0_i32_0 = arith.constant 0 : i32
    %c0_i32_1 = arith.constant 0 : i32
    %c0_i32_2 = arith.constant 0 : i32
    return %c0_i32, %c0_i32_0, %c0_i32_1 : i32, i32, i32
  }
  func.func @transform_12(%arg0: i32) -> (i32, i32) {
    %c0_i32 = arith.constant 0 : i32
    %c0_i32_0 = arith.constant 0 : i32
    %c0_i32_1 = arith.constant 0 : i32
    return %c0_i32, %c0_i32_0 : i32, i32
  }
  func.func @transform_13(%arg0: i32) -> (i32, i32, i32) {
    %c0_i32 = arith.constant 0 : i32
    %c0_i32_0 = arith.constant 0 : i32
    %c0_i32_1 = arith.constant 0 : i32
    %c0_i32_2 = arith.constant 0 : i32
    return %c0_i32, %c0_i32_0, %c0_i32_1 : i32, i32, i32
  }
  func.func @transform_14(%arg0: i32) -> (i32, i32) {
    %c0_i32 = arith.constant 0 : i32
    %c0_i32_0 = arith.constant 0 : i32
    %c0_i32_1 = arith.constant 0 : i32
    return %c0_i32, %c0_i32_0 : i32, i32
  }
  func.func @transform_15(%arg0: i32) -> (i32, i32, i32) {
    %c0_i32 = arith.constant 0 : i32
    %c0_i32_0 = arith.constant 0 : i32
    %c0_i32_1 = arith.constant 0 : i32
    %c0_i32_2 = arith.constant 0 : i32
    return %c0_i32, %c0_i32_0, %c0_i32_1 : i32, i32, i32
  }
  func.func @transform_16(%arg0: i32) -> (i32, i32) {
    %c0_i32 = arith.constant 0 : i32
    %c0_i32_0 = arith.constant 0 : i32
    %c0_i32_1 = arith.constant 0 : i32
    return %c0_i32, %c0_i32_0 : i32, i32
  }
  func.func @transform_17(%arg0: i32) -> (i32, i32, i32) {
    %c0_i32 = arith.constant 0 : i32
    %c0_i32_0 = arith.constant 0 : i32
    %c0_i32_1 = arith.constant 0 : i32
    %c0_i32_2 = arith.constant 0 : i32
    return %c0_i32, %c0_i32_0, %c0_i32_1 : i32, i32, i32
  }
  func.func @transform_18(%arg0: i32) -> (i32, i32) {
    %c0_i32 = arith.constant 0 : i32
    %c0_i32_0 = arith.constant 0 : i32
    %c0_i32_1 = arith.constant 0 : i32
    return %c0_i32, %c0_i32_0 : i32, i32
  }
  func.func @transform_19(%arg0: i32) -> (i32, i32, i32) {
    %c0_i32 = arith.constant 0 : i32
    %c0_i32_0 = arith.constant 0 : i32
    %c0_i32_1 = arith.constant 0 : i32
    %c0_i32_2 = arith.constant 0 : i32
    return %c0_i32, %c0_i32_0, %c0_i32_1 : i32, i32, i32
  }
  func.func @transform_20(%arg0: i32) -> (i32, i32) {
    %c0_i32 = arith.constant 0 : i32
    %c0_i32_0 = arith.constant 0 : i32
    %c0_i32_1 = arith.constant 0 : i32
    return %c0_i32, %c0_i32_0 : i32, i32
  }
  func.func @transform_21(%arg0: i32) -> (i32, i32, i32, i32) {
    %c0_i32 = arith.constant 0 : i32
    %c0_i32_0 = arith.constant 0 : i32
    %c0_i32_1 = arith.constant 0 : i32
    %c0_i32_2 = arith.constant 0 : i32
    return %arg0, %c0_i32, %c0_i32_0, %c0_i32_1 : i32, i32, i32, i32
  }
  func.func @transform_22(%arg0: i32) -> (i32, i32, i32, i32) {
    %c0_i32 = arith.constant 0 : i32
    %c0_i32_0 = arith.constant 0 : i32
    %c0_i32_1 = arith.constant 0 : i32
    %c0_i32_2 = arith.constant 0 : i32
    return %arg0, %c0_i32, %c0_i32_0, %c0_i32_1 : i32, i32, i32, i32
  }
  func.func @transform_23(%arg0: i32) -> (i32, i32, i32, i32) {
    %c0_i32 = arith.constant 0 : i32
    %c0_i32_0 = arith.constant 0 : i32
    %c0_i32_1 = arith.constant 0 : i32
    %c0_i32_2 = arith.constant 0 : i32
    return %arg0, %c0_i32, %c0_i32_0, %c0_i32_1 : i32, i32, i32, i32
  }
  func.func @transform_24(%arg0: i32) -> (i32, i32, i32, i32) {
    %c0_i32 = arith.constant 0 : i32
    %c0_i32_0 = arith.constant 0 : i32
    %c0_i32_1 = arith.constant 0 : i32
    %c0_i32_2 = arith.constant 0 : i32
    return %arg0, %c0_i32, %c0_i32_0, %c0_i32_1 : i32, i32, i32, i32
  }
  func.func @transform_25(%arg0: i32) -> (i32, i32, i32, i32) {
    %c0_i32 = arith.constant 0 : i32
    %c0_i32_0 = arith.constant 0 : i32
    %c0_i32_1 = arith.constant 0 : i32
    %c0_i32_2 = arith.constant 0 : i32
    return %arg0, %c0_i32, %c0_i32_0, %c0_i32_1 : i32, i32, i32, i32
  }
}

</mosaic_0001>

<bundles_post_ra>
// kernel: unet_encoder_forward.1
= control target key start
LH: loop header
LB: loop body
LE: loop exit
PB: predicated region body
PF: predicated region fallthrough
CT: control target
= control target key end

     0   :  { %s15152_s0 = inlined_call_operand.vmem [shape: f32[2,16,16,4], index: 0, kind: input, shape index: {}]   ;;  %s15153_s1 = inlined_call_operand.vmem [shape: bf16[9,4,8], index: 1, kind: input, shape index: {}]   ;;  %s15154_s2 = inlined_call_operand.vmem [shape: f32[1,8], index: 2, kind: input, shape index: {}]   ;;  %s15155_s3 = inlined_call_operand.vmem [shape: bf16[9,8,8], index: 3, kind: input, shape index: {}]   ;;  %s15156_s4 = inlined_call_operand.vmem [shape: f32[1,8], index: 4, kind: input, shape index: {}]   ;;  %s15157_s5 = inlined_call_operand.vmem [shape: bf16[9,8,16], index: 5, kind: input, shape index: {}]   ;;  %s15158_s6 = inlined_call_operand.vmem [shape: f32[1,16], index: 6, kind: input, shape index: {}]   ;;  %s15159_s7 = inlined_call_operand.vmem [shape: bf16[9,16,16], index: 7, kind: input, shape index: {}]   ;;  %s15160_s8 = inlined_call_operand.vmem [shape: f32[1,16], index: 8, kind: input, shape index: {}]   ;;  %s15161_s9 = inlined_call_operand.vmem [shape: bf16[9,16,32], index: 9, kind: input, shape index: {}]   ;;  %s15162_s10 = inlined_call_operand.vmem [shape: f32[1,32], index: 10, kind: input, shape index: {}]   ;;  %s15163_s11 = inlined_call_operand.vmem [shape: bf16[9,32,32], index: 11, kind: input, shape index: {}]   ;;  %s15164_s12 = inlined_call_operand.vmem [shape: f32[1,32], index: 12, kind: input, shape index: {}]   ;;  %s15165_s13 = inlined_call_operand.vmem [shape: bf16[9,32,64], index: 13, kind: input, shape index: {}]   ;;  %s15166_s14 = inlined_call_operand.vmem [shape: f32[1,64], index: 14, kind: input, shape index: {}]   ;;  %s15167_s15 = inlined_call_operand.vmem [shape: bf16[9,64,64], index: 15, kind: input, shape index: {}]   ;;  %s15168_s16 = inlined_call_operand.vmem [shape: f32[1,64], index: 16, kind: input, shape index: {}]   ;;  %s15169_s17 = inlined_call_operand.vmem [shape: bf16[9,64,64], index: 17, kind: input, shape index: {}]   ;;  %s15170_s18 = inlined_call_operand.vmem [shape: f32[1,64], index: 18, kind: input, shape index: {}]   ;;  %s15171_s19 = inlined_call_operand.vmem [shape: bf16[9,64,64], index: 19, kind: input, shape index: {}]   ;;  %s15172_s20 = inlined_call_operand.vmem [shape: f32[1,64], index: 20, kind: input, shape index: {}]   ;;  %s15173_s21 = inlined_call_operand.vmem [shape: bf16[2,16,16,8], index: 21, kind: output, shape index: {0}]   ;;  %s15174_s22 = inlined_call_operand.hbm [shape: bf16[2,8,8,16], index: 22, kind: output, shape index: {1}]   ;;  %s15175_s23 = inlined_call_operand.hbm [shape: bf16[2,4,4,32], index: 23, kind: output, shape index: {2}]   ;;  %s15176_s24 = inlined_call_operand.hbm [shape: bf16[2,2,2,64], index: 24, kind: output, shape index: {3}]   ;;  %s15177_s25 = inlined_call_operand.vmem [shape: bf16[2,1,1,64], index: 25, kind: output, shape index: {4}]  }
   0x1   :  { %15216 = sst [smem:[#allocation47_spill]] %s15152_s0 }
   0x2   :  { %15217 = sst [smem:[#allocation48_spill]] %s15153_s1 }
   0x3   :  { %15218 = sst [smem:[#allocation49_spill]] %s15154_s2 }
   0x4   :  { %15219 = sst [smem:[#allocation50_spill]] %s15155_s3 }
   0x5   :  { %15220 = sst [smem:[#allocation51_spill]] %s15156_s4 }
   0x6   :  { %15221 = sst [smem:[#allocation52_spill]] %s15157_s5 }
   0x7   :  { %15222 = sst [smem:[#allocation53_spill]] %s15158_s6 }
   0x8   :  { %15223 = sst [smem:[#allocation54_spill]] %s15159_s7 }
   0x9   :  { %15224 = sst [smem:[#allocation55_spill]] %s15160_s8 }
   0xa   :  { %15225 = sst [smem:[#allocation56_spill]] %s15161_s9 }
   0xb   :  { %15226 = sst [smem:[#allocation57_spill]] %s15162_s10 }
   0xc   :  { %15227 = sst [smem:[#allocation58_spill]] %s15163_s11 }
   0xd   :  { %15228 = sst [smem:[#allocation59_spill]] %s15164_s12 }
   0xe   :  { %15229 = sst [smem:[#allocation60_spill]] %s15165_s13 }
   0xf   :  { %15230 = sst [smem:[#allocation61_spill]] %s15166_s14 }
  0x10   :  { %15231 = sst [smem:[#allocation62_spill]] %s15167_s15 }
  0x11   :  { %15232 = sst [smem:[#allocation63_spill]] %s15168_s16 }
  0x12   :  { %15233 = sst [smem:[#allocation64_spill]] %s15169_s17 }
  0x13   :  { %15234 = sst [smem:[#allocation65_spill]] %s15170_s18 }
  0x14   :  { %15235 = sst [smem:[#allocation66_spill]] %s15171_s19 }
  0x15   :  { %15236 = sst [smem:[#allocation67_spill]] %s15173_s21 }
  0x16   :  { %15237 = sst [smem:[#allocation68_spill]] %s15175_s23 }
  0x17   :  { %31 = vsyncpa [#allocation17], 0 }
  0x18   :  { %33 = vsyncpa [#allocation17 + $0x1], 0 }
  0x19   :  { %34 = vsyncpa [#allocation19], 0 }
  0x1a   :  { %36 = vsyncpa [#allocation19 + $0x1], 0  ;;  %s11591_s29 = smov 0   ;;  %s11593_s2 = smov 0  }
  0x1b   :  { %s11595_s6 = smov 0   ;;  %s11597_s30 = smov 0  }
  0x1c LB: > { %15238 = sst [smem:[#allocation23_spill]] %s11448_s6  ;;  %s11612_s7 = sadd.s32 4294967295, %s11452_s30   ;;  %s11452_s30 = sphi %s11597_s30, %s15359_s30   ;;  %s11448_s6 = sphi %s11595_s6, %s15361_s6   ;;  %s11444_s2 = sphi %s11593_s2, %s15363_s2   ;;  %s11440_s29 = sphi %s11591_s29, %s15362_s29  }
  0x1d   : > { %s15184_s3 = sadd.s32 4294967294, %s11452_s30   ;;  %s11616_s26 = sadd.s32 1, %s11452_s30  }
  0x1e   : > { %15239 = sst [smem:[#allocation24_spill]] %s11616_s26  ;;  %s521_s1 = sadd.s32 1, %s11448_s6 }
  0x1f   : > { %s518_s8 = ssub.s32 %s11452_s30, %s11616_s26  ;;  %p531_p0 = scmp.ne.s32.totalorder %s11448_s6, %s11444_s2 }
  0x20   : > { %p519_p1 = scmp.eq.s32.totalorder %s518_s8, 0  ;;  %p532_p2 = scmp.eq.s32.totalorder %s11612_s7, 1 }
  0x21   : > { %p537_p3 = scmp.ne.s32.totalorder %s11444_s2, %s11440_s29  ;;  %p538_p4 = scmp.eq.s32.totalorder %s15184_s3, 1 }
  0x22   : > { %s11629_s27 = scalar_select %p519_p1, %s11448_s6, %s521_s1  }
  0x23   : > { %p11631_p5 = por %p532_p2, %p531_p0  ;;  %p11635_p6 = por %p538_p4, %p537_p3 }
  0x24   : > { %15240 = sst [smem:[#allocation25_spill]] %s11629_s27  ;;  %p9707_p7 = scmp.ge.s32.totalorder %s11452_s30, 1 }
  0x25   : > { %p702_p8 = scmp.lt.s32.totalorder %s11452_s30, 3 }
  0x27   : > { %p703_p9 = pnand %p9707_p7, %p702_p8 }
  0x29   : > { %706 = sbr.rel (%p703_p9) target bundleno = 3500 (0xdac), region = 104 }
  0x2e   : > { %s15243_s0 = sld [smem:[#allocation48_spill]]  ;;  %vm1106_vm0 = vcmask 1041408   ;;  %vm834_vm1 = vcmask 31744   ;;  %vm837_vm2 = vcmask 25600   ;;  %v15185_v6 = vmov 0.0   ;;  %p788_p10 = scmp.lt.s32.totalorder %s11612_s7, 1 }
  0x2f   : > { %835 = vst.msk [vmem:[#allocation2] sm:$0xff] %vm834_vm1, %v15185_v6  ;;  %vm843_vm3 = vcmask 24576   ;;  %s15244_s3 = sld [smem:[#allocation47_spill]]  ;;  %vm3142_vm4 = vcmask 1043456   ;;  %vm880_vm5 = vcmask 64512   ;;  %vm889_vm6 = vcmask 57344  }
  0x30   : > { %836 = vst.msk [vmem:[#allocation2 + $0x8] sm:$0xff] %vm834_vm1, %v15185_v6  ;;  %s11723_s8 = scalar_select %p788_p10, %s11612_s7, 1  ;;  %vm883_vm7 = vcmask 58368   ;;  %vm5030_vm8 = vcmask 60416   ;;  %vm5159_vm9 = vcmask 130048   ;;  %vm5161_vm10 = vcmask 123904  }
  0x31   : > { %838 = vst.msk [vmem:[#allocation2 + $0x10] sm:$0x3] %vm837_vm2, %v15185_v6  ;;  %s15332_s5 = sld [smem:[#allocation51_spill]]  ;;  %vm5166_vm11 = vcmask 122880   ;;  %vm6481_vm12 = vcmask 128000   ;;  %vm6445_vm13 = vcmask 125952  }
  0x32   : > { %842 = vst.msk [vmem:[#allocation2 + $0x1a8] sm:$0x3] %vm837_vm2, %v15185_v6  ;;  %s11099_s1 = sshll.u32 %s11723_s8, 8  ;;  %s15333_s21 = sld [smem:[#allocation67_spill]]  ;;  %vm6497_vm14 = vcmask 259072   ;;  %vm6501_vm15 = vcmask 253952  }
  0x33   : > { %840 = vst.msk [vmem:[#allocation2 + $0x198] sm:$0xff] %vm834_vm1, %v15185_v6  ;;  %s15341_s6 = sld [smem:[#allocation54_spill]]  ;;  %vm7486_vm2 = vcmask 254976  }
  0x34   : > { %v9715_v0 = vld [vmem:[%s15243_s0 + $0x2] sm:$0x3]  ;;  %v1007_v1 = vld [vmem:[%s15243_s0] sm:$0x3]  ;;  %v9748_v4 = vld [vmem:[%s15243_s0 + $0x4] sm:$0x3] }
  0x35   : > { %v1108_v2 = vsel %vm1106_vm0, %v9715_v0, 0  ;;  %v1248_v3 = vsel %vm1106_vm0, %v1007_v1, 0  ;;  %v1438_v5 = vsel %vm1106_vm0, %v9748_v4, 0  ;;  %v9782_v7 = vld [vmem:[%s15243_s0 + $0x8] sm:$0x3]  ;;  %841 = vst.msk [vmem:[#allocation2 + $0x1a0] sm:$0xff] %vm834_vm1, %v15185_v6  ;;  %s11744_s27 = scalar_lea.vmem %s15244_s3, %s11099_s1 }
  0x36   : > { %1117 = vmatpush.bf16.msra.mxu0 %v1108_v2  ;;  %1257 = vmatpush.bf16.msra.mxu1 %v1248_v3  ;;  %v1882_v8 = vsel %vm1106_vm0, %v9782_v7, 0  ;;  %v9765_v9 = vld [vmem:[%s15243_s0 + $0x6] sm:$0x3]  ;;  %844 = vst.msk [vmem:[#allocation2] sm:$0x1] %vm843_vm3, %v15185_v6  ;;  %v803_v21 = vld [vmem:[%s11744_s27 + $0x8] sm:$0xff] }
  0x37   : > { %1447 = vmatpush.bf16.msra.mxu2 %v1438_v5  ;;  %v1660_v10 = vsel %vm1106_vm0, %v9765_v9, 0  ;;  %845 = vst.msk [vmem:[#allocation2 + $0x18] sm:$0x1] %vm843_vm3, %v15185_v6  ;;  %v1008_v11 = vld [vmem:[#allocation2 + $0x1] sm:$0xff]  ;;  %v802_v20 = vld [vmem:[%s11744_s27] sm:$0xff]  ;;  %v805_v23 = vld [vmem:[%s11744_s27 + $0x18] sm:$0xff] }
  0x38   : > { %1669 = vmatpush.bf16.msra.mxu3 %v1660_v10  ;;  %846 = vst.msk [vmem:[#allocation2 + $0x30] sm:$0x1] %vm843_vm3, %v15185_v6  ;;  %v1009_v12 = vld [vmem:[#allocation2 + $0x9] sm:$0xff]  ;;  %v806_v24 = vld [vmem:[%s11744_s27 + $0x20] sm:$0xff]  ;;  %v807_v25 = vld [vmem:[%s11744_s27 + $0x28] sm:$0xff]  ;;  %s15257_s1 = sld [smem:[#allocation50_spill]] }
  0x39   : > { %847 = vst.msk [vmem:[#allocation2 + $0x48] sm:$0x1] %vm843_vm3, %v15185_v6  ;;  %v1040_v13 = vpack.c.bf16 %v1009_v12, %v1008_v11  ;;  %v960_v14 = vld [vmem:[#allocation2 + $0x8] sm:$0xff]  ;;  %v809_v36 = vld [vmem:[%s11744_s27 + $0x38] sm:$0xff]  ;;  %v810_v46 = vld [vmem:[%s11744_s27 + $0x40] sm:$0xff]  ;;  %s15287_s3 = sld [smem:[#allocation49_spill]] }
  0x3a   : > { %1891 = vmatpush.bf16.msrb.mxu0 %v1882_v8  ;;  %848 = vst.msk [vmem:[#allocation2 + $0x60] sm:$0x1] %vm843_vm3, %v15185_v6  ;;  %v1339_v17 = vld [vmem:[#allocation2 + $0x2] sm:$0xff]  ;;  %v813_v58 = vld [vmem:[%s11744_s27 + $0x58] sm:$0xff]  ;;  %v814_v4 = vld [vmem:[%s11744_s27 + $0x60] sm:$0xff]  ;;  %s15344_s9 = sld [smem:[#allocation53_spill]] }
  0x3b   : > { %849 = vst.msk [vmem:[#allocation2 + $0x78] sm:$0x1] %vm843_vm3, %v15185_v6  ;;  %9716 = vmatmul.msk.bf16.vlgmr.msra.gmra.mxu0 %vm834_vm1, %v1040_v13  ;;  %v804_v22 = vld [vmem:[%s11744_s27 + $0x10] sm:$0xff]  ;;  %v811_v47 = vld [vmem:[%s11744_s27 + $0x48] sm:$0xff]  ;;  %s15347_s10 = sld [smem:[#allocation57_spill]] }
  0x3c   : > { %850 = vst.msk [vmem:[#allocation2 + $0x90] sm:$0x1] %vm843_vm3, %v15185_v6  ;;  %v808_v35 = vld [vmem:[%s11744_s27 + $0x30] sm:$0xff]  ;;  %v815_v5 = vld [vmem:[%s11744_s27 + $0x68] sm:$0xff]  ;;  %s15348_s11 = sld [smem:[#allocation58_spill]] }
  0x3d   : > { %v959_v15 = vld [vmem:[#allocation2] sm:$0xff]  ;;  %851 = vst.msk [vmem:[#allocation2 + $0xa8] sm:$0x1] %vm843_vm3, %v15185_v6  ;;  %v812_v57 = vld [vmem:[%s11744_s27 + $0x50] sm:$0xff]  ;;  %s15349_s12 = sld [smem:[#allocation59_spill]] }
  0x3e   : > { %v991_v16 = vpack.c.bf16 %v960_v14, %v959_v15  ;;  %852 = vst.msk [vmem:[#allocation2 + $0xc0] sm:$0x1] %vm843_vm3, %v15185_v6  ;;  %s15350_s13 = sld [smem:[#allocation60_spill]] }
  0x3f   : > { %853 = vst.msk [vmem:[#allocation2 + $0xd8] sm:$0x1] %vm843_vm3, %v15185_v6  ;;  %s15351_s15 = sld [smem:[#allocation62_spill]] }
  0x40   : > { %9732 = vmatmul.msk.bf16.vlgmr.msra.gmra.mxu1 %vm834_vm1, %v991_v16  ;;  %854 = vst.msk [vmem:[#allocation2 + $0xf0] sm:$0x1] %vm843_vm3, %v15185_v6  ;;  %v816_v16 = vld [vmem:[%s11744_s27 + $0x70] sm:$0xff]  ;;  %s15352_s14 = sld [smem:[#allocation61_spill]] }
  0x41   : > { %855 = vst.msk [vmem:[#allocation2 + $0x108] sm:$0x1] %vm843_vm3, %v15185_v6  ;;  %s15353_s17 = sld [smem:[#allocation64_spill]] }
  0x42   : > { %856 = vst.msk [vmem:[#allocation2 + $0x120] sm:$0x1] %vm843_vm3, %v15185_v6  ;;  %s15354_s16 = sld [smem:[#allocation63_spill]] }
  0x43   : > { %857 = vst.msk [vmem:[#allocation2 + $0x138] sm:$0x1] %vm843_vm3, %v15185_v6  ;;  %s15355_s19 = sld [smem:[#allocation66_spill]] }
  0x44   : > { %858 = vst.msk [vmem:[#allocation2 + $0x150] sm:$0x1] %vm843_vm3, %v15185_v6  ;;  %s15356_s18 = sld [smem:[#allocation65_spill]] }
  0x45   : > { %859 = vst.msk [vmem:[#allocation2 + $0x168] sm:$0x1] %vm843_vm3, %v15185_v6  ;;  %s15357_s23 = sld [smem:[#allocation68_spill]] }
  0x46   : > { %860 = vst.msk [vmem:[#allocation2 + $0x180] sm:$0x1] %vm843_vm3, %v15185_v6 }
  0x47   : > { %861 = vst.msk [vmem:[#allocation2 + $0x198] sm:$0x1] %vm843_vm3, %v15185_v6 }
  0x48   : > { %862 = vst.msk [vmem:[#allocation2 + $0x11] sm:$0x1] %vm843_vm3, %v15185_v6 }
  0x49   : > { %863 = vst.msk [vmem:[#allocation2 + $0x29] sm:$0x1] %vm843_vm3, %v15185_v6 }
  0x4a   : > { %864 = vst.msk [vmem:[#allocation2 + $0x41] sm:$0x1] %vm843_vm3, %v15185_v6 }
  0x4b   : > { %865 = vst.msk [vmem:[#allocation2 + $0x59] sm:$0x1] %vm843_vm3, %v15185_v6 }
  0x4c   : > { %866 = vst.msk [vmem:[#allocation2 + $0x71] sm:$0x1] %vm843_vm3, %v15185_v6 }
  0x4d   : > { %867 = vst.msk [vmem:[#allocation2 + $0x89] sm:$0x1] %vm843_vm3, %v15185_v6 }
  0x4e   : > { %868 = vst.msk [vmem:[#allocation2 + $0xa1] sm:$0x1] %vm843_vm3, %v15185_v6 }
  0x4f   : > { %869 = vst.msk [vmem:[#allocation2 + $0xb9] sm:$0x1] %vm843_vm3, %v15185_v6  ;;  %v1340_v18 = vld [vmem:[#allocation2 + $0xa] sm:$0xff] }
  0x50   : > { %870 = vst.msk [vmem:[#allocation2 + $0xd1] sm:$0x1] %vm843_vm3, %v15185_v6  ;;  %v1371_v19 = vpack.c.bf16 %v1340_v18, %v1339_v17  ;;  %v817_v17 = vld [vmem:[%s11744_s27 + $0x78] sm:$0xff] }
  0x51   : > { %871 = vst.msk [vmem:[#allocation2 + $0xe9] sm:$0x1] %vm843_vm3, %v15185_v6 }
  0x52   : > { %872 = vst.msk [vmem:[#allocation2 + $0x101] sm:$0x1] %vm843_vm3, %v15185_v6  ;;  %9749 = vmatmul.msk.bf16.vlgmr.msra.gmra.mxu2 %vm834_vm1, %v1371_v19 }
  0x53   : > { %873 = vst.msk [vmem:[#allocation2 + $0x119] sm:$0x1] %vm843_vm3, %v15185_v6 }
  0x54   : > { %874 = vst.msk [vmem:[#allocation2 + $0x131] sm:$0x1] %vm843_vm3, %v15185_v6 }
  0x55   : > { %875 = vst.msk [vmem:[#allocation2 + $0x149] sm:$0x1] %vm843_vm3, %v15185_v6 }
  0x56   : > { %876 = vst.msk [vmem:[#allocation2 + $0x161] sm:$0x1] %vm843_vm3, %v15185_v6 }
  0x57   : > { %877 = vst.msk [vmem:[#allocation2 + $0x179] sm:$0x1] %vm843_vm3, %v15185_v6 }
  0x58   : > { %878 = vst.msk [vmem:[#allocation2 + $0x191] sm:$0x1] %vm843_vm3, %v15185_v6 }
  0x59   : > { %879 = vst.msk [vmem:[#allocation2 + $0x1a9] sm:$0x1] %vm843_vm3, %v15185_v6  ;;  %vm7519_vm3 = vcmask 516096  }
  0x5a   : > { %927 = vst.msk [vmem:[#allocation2 + $0x19] sm:$0xff] %vm834_vm1, %v802_v20 }
  0x5b   : > { %928 = vst.msk [vmem:[#allocation2 + $0x21] sm:$0xff] %vm834_vm1, %v803_v21 }
  0x5c   : > { %929 = vst.msk [vmem:[#allocation2 + $0x31] sm:$0xff] %vm834_vm1, %v804_v22 }
  0x5d   : > { %930 = vst.msk [vmem:[#allocation2 + $0x39] sm:$0xff] %vm834_vm1, %v805_v23 }
  0x5e   : > { %931 = vst.msk [vmem:[#allocation2 + $0x49] sm:$0xff] %vm834_vm1, %v806_v24 }
  0x5f   : > { %932 = vst.msk [vmem:[#allocation2 + $0x51] sm:$0xff] %vm834_vm1, %v807_v25 }
  0x60   : > { %933 = vst.msk [vmem:[#allocation2 + $0x61] sm:$0xff] %vm834_vm1, %v808_v35 }
  0x61   : > { %v1561_v26 = vld [vmem:[#allocation2 + $0x18] sm:$0xff]  ;;  %934 = vst.msk [vmem:[#allocation2 + $0x69] sm:$0xff] %vm834_vm1, %v809_v36 }
  0x62   : > { %v1010_v27 = vld [vmem:[#allocation2 + $0x19] sm:$0xff]  ;;  %v1011_v29 = vld [vmem:[#allocation2 + $0x21] sm:$0xff]  ;;  %935 = vst.msk [vmem:[#allocation2 + $0x79] sm:$0xff] %vm834_vm1, %v810_v46 }
  0x63   : > { %v1562_v28 = vld [vmem:[#allocation2 + $0x20] sm:$0xff]  ;;  %v11768_v32 = vpack.c.bf16 %v1011_v29, %v1010_v27  ;;  %v1563_v37 = vld [vmem:[#allocation2 + $0x30] sm:$0xff]  ;;  %936 = vst.msk [vmem:[#allocation2 + $0x81] sm:$0xff] %vm834_vm1, %v811_v47  ;;  %v818_v27 = vld [vmem:[%s11744_s27 + $0x80] sm:$0xff] }
  0x64   : > { %v1341_v30 = vld [vmem:[#allocation2 + $0x1a] sm:$0xff]  ;;  %v1593_v31 = vpack.c.bf16 %v1562_v28, %v1561_v26  ;;  %v1342_v33 = vld [vmem:[#allocation2 + $0x22] sm:$0xff]  ;;  %v1012_v39 = vld [vmem:[#allocation2 + $0x31] sm:$0xff]  ;;  %937 = vst.msk [vmem:[#allocation2 + $0x91] sm:$0xff] %vm834_vm1, %v812_v57 }
  0x65   : > { %v11770_v34 = vpack.c.bf16 %v1342_v33, %v1341_v30  ;;  %9717 = vmatmul.msk.bf16.gmra.mxu0 %vm834_vm1, %v11768_v32  ;;  %v1564_v38 = vld [vmem:[#allocation2 + $0x38] sm:$0xff]  ;;  %v1565_v48 = vld [vmem:[#allocation2 + $0x48] sm:$0xff]  ;;  %938 = vst.msk [vmem:[#allocation2 + $0x99] sm:$0xff] %vm834_vm1, %v813_v58  ;;  %v819_v28 = vld [vmem:[%s11744_s27 + $0x88] sm:$0xff] }
  0x66   : > { %9766 = vmatmul.msk.bf16.vlgmr.msra.gmra.mxu3 %vm834_vm1, %v1593_v31  ;;  %9733 = vmatmul.msk.bf16.gmra.mxu1 %vm834_vm1, %v1593_v31  ;;  %v1013_v40 = vld [vmem:[#allocation2 + $0x39] sm:$0xff]  ;;  %v11782_v43 = vpack.c.bf16 %v1564_v38, %v1563_v37  ;;  %v1566_v49 = vld [vmem:[#allocation2 + $0x50] sm:$0xff]  ;;  %939 = vst.msk [vmem:[#allocation2 + $0xa9] sm:$0xff] %vm834_vm1, %v814_v4  ;;  %v9799_v46 = vld [vmem:[%s15243_s0 + $0xa] sm:$0x3] }
  0x67   : > { %9750 = vmatmul.msk.bf16.gmra.mxu2 %vm834_vm1, %v11770_v34  ;;  %v1343_v41 = vld [vmem:[#allocation2 + $0x32] sm:$0xff]  ;;  %v1344_v42 = vld [vmem:[#allocation2 + $0x3a] sm:$0xff]  ;;  %v11784_v44 = vpack.c.bf16 %v1013_v40, %v1012_v39  ;;  %v1014_v50 = vld [vmem:[#allocation2 + $0x49] sm:$0xff]  ;;  %v11800_v54 = vpack.c.bf16 %v1566_v49, %v1565_v48  ;;  %940 = vst.msk [vmem:[#allocation2 + $0xb1] sm:$0xff] %vm834_vm1, %v815_v5  ;;  %v2104_v47 = vsel %vm1106_vm0, %v9799_v46, 0 }
  0x68   : > { %v11786_v45 = vpack.c.bf16 %v1344_v42, %v1343_v41  ;;  %v1015_v51 = vld [vmem:[#allocation2 + $0x51] sm:$0xff]  ;;  %v1567_v59 = vld [vmem:[#allocation2 + $0x60] sm:$0xff]  ;;  %v1568_v60 = vld [vmem:[#allocation2 + $0x68] sm:$0xff]  ;;  %941 = vst.msk [vmem:[#allocation2 + $0xc1] sm:$0xff] %vm834_vm1, %v816_v16  ;;  %2113 = vmatpush.bf16.msrb.mxu1 %v2104_v47 }
  0x69   : > { %v1345_v52 = vld [vmem:[#allocation2 + $0x4a] sm:$0xff]  ;;  %v1346_v53 = vld [vmem:[#allocation2 + $0x52] sm:$0xff]  ;;  %v11802_v55 = vpack.c.bf16 %v1015_v51, %v1014_v50  ;;  %v1016_v61 = vld [vmem:[#allocation2 + $0x61] sm:$0xff]  ;;  %v11818_v1 = vpack.c.bf16 %v1568_v60, %v1567_v59  ;;  %942 = vst.msk [vmem:[#allocation2 + $0xc9] sm:$0xff] %vm834_vm1, %v817_v17 }
  0x6a   : > { %v11804_v56 = vpack.c.bf16 %v1346_v53, %v1345_v52  ;;  %v1017_v62 = vld [vmem:[#allocation2 + $0x69] sm:$0xff]  ;;  %v1569_v7 = vld [vmem:[#allocation2 + $0x78] sm:$0xff]  ;;  %v1570_v8 = vld [vmem:[#allocation2 + $0x80] sm:$0xff]  ;;  %943 = vst.msk [vmem:[#allocation2 + $0xd9] sm:$0xff] %vm834_vm1, %v818_v27 }
  0x6b   : > { %v1347_v63 = vld [vmem:[#allocation2 + $0x62] sm:$0xff]  ;;  %v1348_v0 = vld [vmem:[#allocation2 + $0x6a] sm:$0xff]  ;;  %v11820_v2 = vpack.c.bf16 %v1017_v62, %v1016_v61  ;;  %v1018_v9 = vld [vmem:[#allocation2 + $0x79] sm:$0xff]  ;;  %v11836_v13 = vpack.c.bf16 %v1570_v8, %v1569_v7  ;;  %944 = vst.msk [vmem:[#allocation2 + $0xe1] sm:$0xff] %vm834_vm1, %v819_v28 }
  0x6c   : > { %v11822_v3 = vpack.c.bf16 %v1348_v0, %v1347_v63  ;;  %v1019_v10 = vld [vmem:[#allocation2 + $0x81] sm:$0xff]  ;;  %v1571_v18 = vld [vmem:[#allocation2 + $0x90] sm:$0xff]  ;;  %v1572_v19 = vld [vmem:[#allocation2 + $0x98] sm:$0xff] }
  0x6d   : > { %v1349_v11 = vld [vmem:[#allocation2 + $0x7a] sm:$0xff]  ;;  %v1350_v12 = vld [vmem:[#allocation2 + $0x82] sm:$0xff]  ;;  %v11838_v14 = vpack.c.bf16 %v1019_v10, %v1018_v9  ;;  %v1020_v20 = vld [vmem:[#allocation2 + $0x91] sm:$0xff]  ;;  %v11854_v24 = vpack.c.bf16 %v1572_v19, %v1571_v18 }
  0x6e   : > { %v11840_v15 = vpack.c.bf16 %v1350_v12, %v1349_v11  ;;  %v1021_v21 = vld [vmem:[#allocation2 + $0x99] sm:$0xff]  ;;  %v1573_v30 = vld [vmem:[#allocation2 + $0xa8] sm:$0xff]  ;;  %v1574_v33 = vld [vmem:[#allocation2 + $0xb0] sm:$0xff] }
  0x6f   : > { %v1351_v22 = vld [vmem:[#allocation2 + $0x92] sm:$0xff]  ;;  %v1352_v23 = vld [vmem:[#allocation2 + $0x9a] sm:$0xff]  ;;  %v11856_v25 = vpack.c.bf16 %v1021_v21, %v1020_v20  ;;  %v1022_v35 = vld [vmem:[#allocation2 + $0xa9] sm:$0xff]  ;;  %v11872_v40 = vpack.c.bf16 %v1574_v33, %v1573_v30 }
  0x70   : > { %v11858_v26 = vpack.c.bf16 %v1352_v23, %v1351_v22  ;;  %v1023_v36 = vld [vmem:[#allocation2 + $0xb1] sm:$0xff]  ;;  %v820_v48 = vld [vmem:[%s11744_s27 + $0x90] sm:$0xff]  ;;  %v1575_v50 = vld [vmem:[#allocation2 + $0xc0] sm:$0xff] }
  0x71   : > { %v1353_v38 = vld [vmem:[#allocation2 + $0xaa] sm:$0xff]  ;;  %v1354_v39 = vld [vmem:[#allocation2 + $0xb2] sm:$0xff]  ;;  %v11874_v41 = vpack.c.bf16 %v1023_v36, %v1022_v35  ;;  %945 = vst.msk [vmem:[#allocation2 + $0xf1] sm:$0xff] %vm834_vm1, %v820_v48  ;;  %v1024_v52 = vld [vmem:[#allocation2 + $0xc1] sm:$0xff] }
  0x72   : > { %v11876_v42 = vpack.c.bf16 %v1354_v39, %v1353_v38  ;;  %v821_v49 = vld [vmem:[%s11744_s27 + $0x98] sm:$0xff]  ;;  %v1576_v51 = vld [vmem:[#allocation2 + $0xc8] sm:$0xff]  ;;  %v822_v5 = vld [vmem:[%s11744_s27 + $0xa0] sm:$0xff] }
  0x73   : > { %946 = vst.msk [vmem:[#allocation2 + $0xf9] sm:$0xff] %vm834_vm1, %v821_v49  ;;  %v1025_v53 = vld [vmem:[#allocation2 + $0xc9] sm:$0xff]  ;;  %v11894_v59 = vpack.c.bf16 %v1576_v51, %v1575_v50  ;;  %v823_v7 = vld [vmem:[%s11744_s27 + $0xa8] sm:$0xff]  ;;  %v1577_v8 = vld [vmem:[#allocation2 + $0xd8] sm:$0xff] }
  0x74   : > { %v1355_v57 = vld [vmem:[#allocation2 + $0xc2] sm:$0xff]  ;;  %v1356_v58 = vld [vmem:[#allocation2 + $0xca] sm:$0xff]  ;;  %v11896_v60 = vpack.c.bf16 %v1025_v53, %v1024_v52  ;;  %947 = vst.msk [vmem:[#allocation2 + $0x109] sm:$0xff] %vm834_vm1, %v822_v5  ;;  %v1026_v10 = vld [vmem:[#allocation2 + $0xd9] sm:$0xff] }
  0x75   : > { %9718 = vmatmul.msk.bf16.gmra.mxu0 %vm834_vm1, %v11784_v44  ;;  %v11898_v61 = vpack.c.bf16 %v1356_v58, %v1355_v57  ;;  %948 = vst.msk [vmem:[#allocation2 + $0x111] sm:$0xff] %vm834_vm1, %v823_v7  ;;  %v1578_v9 = vld [vmem:[#allocation2 + $0xe0] sm:$0xff]  ;;  %v824_v33 = vld [vmem:[%s11744_s27 + $0xb0] sm:$0xff]  ;;  %v825_v35 = vld [vmem:[%s11744_s27 + $0xb8] sm:$0xff] }
  0x76   : > { %9767 = vmatmul.msk.bf16.gmra.mxu3 %vm834_vm1, %v11782_v43  ;;  %9734 = vmatmul.msk.bf16.gmra.mxu1 %vm834_vm1, %v11782_v43  ;;  %v1027_v11 = vld [vmem:[#allocation2 + $0xe1] sm:$0xff]  ;;  %v11912_v18 = vpack.c.bf16 %v1578_v9, %v1577_v8  ;;  %949 = vst.msk [vmem:[#allocation2 + $0x121] sm:$0xff] %vm834_vm1, %v824_v33 }
  0x77   : > { %9751 = vmatmul.msk.bf16.gmra.mxu2 %vm834_vm1, %v11786_v45  ;;  %v1357_v16 = vld [vmem:[#allocation2 + $0xda] sm:$0xff]  ;;  %v1358_v17 = vld [vmem:[#allocation2 + $0xe2] sm:$0xff]  ;;  %v11914_v19 = vpack.c.bf16 %v1027_v11, %v1026_v10  ;;  %950 = vst.msk [vmem:[#allocation2 + $0x129] sm:$0xff] %vm834_vm1, %v825_v35 }
  0x78   : > { %v11916_v21 = vpack.c.bf16 %v1358_v17, %v1357_v16  ;;  %v1579_v39 = vld [vmem:[#allocation2 + $0xf0] sm:$0xff]  ;;  %v826_v16 = vld [vmem:[%s11744_s27 + $0xc0] sm:$0xff]  ;;  %v827_v17 = vld [vmem:[%s11744_s27 + $0xc8] sm:$0xff] }
  0x79   : > { %v1028_v47 = vld [vmem:[#allocation2 + $0xf1] sm:$0xff]  ;;  %951 = vst.msk [vmem:[#allocation2 + $0x139] sm:$0xff] %vm834_vm1, %v826_v16 }
  0x7a   : > { %v1580_v46 = vld [vmem:[#allocation2 + $0xf8] sm:$0xff]  ;;  %952 = vst.msk [vmem:[#allocation2 + $0x141] sm:$0xff] %vm834_vm1, %v827_v17 }
  0x7b   : > { %v1029_v48 = vld [vmem:[#allocation2 + $0xf9] sm:$0xff]  ;;  %v11934_v57 = vpack.c.bf16 %v1580_v46, %v1579_v39 }
  0x7c   : > { %v1359_v50 = vld [vmem:[#allocation2 + $0xf2] sm:$0xff]  ;;  %v1360_v51 = vld [vmem:[#allocation2 + $0xfa] sm:$0xff]  ;;  %v1361_v33 = vld [vmem:[#allocation2 + $0x10a] sm:$0xff] }
  0x7d   : > { %v1362_v35 = vld [vmem:[#allocation2 + $0x112] sm:$0xff]  ;;  %v1032_v17 = vld [vmem:[#allocation2 + $0x121] sm:$0xff] }
  0x7e   : > { %v1584_v16 = vld [vmem:[#allocation2 + $0x128] sm:$0xff] }
  0x85   : > { %9719 = vmatmul.msk.bf16.gmra.mxu0 %vm834_vm1, %v11802_v55 }
  0x86   : > { %9768 = vmatmul.msk.bf16.gmra.mxu3 %vm834_vm1, %v11800_v54  ;;  %9735 = vmatmul.msk.bf16.gmra.mxu1 %vm834_vm1, %v11800_v54 }
  0x87   : > { %9752 = vmatmul.msk.bf16.gmra.mxu2 %vm834_vm1, %v11804_v56 }
  0x95   : > { %9720 = vmatmul.msk.bf16.gmra.mxu0 %vm834_vm1, %v11820_v2 }
  0x96   : > { %9769 = vmatmul.msk.bf16.gmra.mxu3 %vm834_vm1, %v11818_v1  ;;  %9736 = vmatmul.msk.bf16.gmra.mxu1 %vm834_vm1, %v11818_v1 }
  0x97   : > { %9753 = vmatmul.msk.bf16.gmra.mxu2 %vm834_vm1, %v11822_v3 }
  0xa5   : > { %9721 = vmatmul.msk.bf16.gmra.mxu0 %vm834_vm1, %v11838_v14 }
  0xa6   : > { %9770 = vmatmul.msk.bf16.gmra.mxu3 %vm834_vm1, %v11836_v13  ;;  %9737 = vmatmul.msk.bf16.gmra.mxu1 %vm834_vm1, %v11836_v13 }
  0xa7   : > { %9754 = vmatmul.msk.bf16.gmra.mxu2 %vm834_vm1, %v11840_v15 }
  0xb5   : > { %9722 = vmatmul.msk.bf16.gmra.mxu0 %vm834_vm1, %v11856_v25 }
  0xb6   : > { %9771 = vmatmul.msk.bf16.gmra.mxu3 %vm834_vm1, %v11854_v24  ;;  %9738 = vmatmul.msk.bf16.gmra.mxu1 %vm834_vm1, %v11854_v24 }
  0xb7   : > { %9755 = vmatmul.msk.bf16.gmra.mxu2 %vm834_vm1, %v11858_v26 }
  0xb8   : > { %v1119_v29 = vpop.f32.mrf.mxu0 }
  0xbd   : > { %v1259_v31 = vpop.f32.mrf.mxu1 }
  0xbe   : > { %v1260_v37 = vadd.f32 %v1259_v31, %v1119_v29 }
  0xc0   : > { %v1121_v0 = vpop.f32.mrf.mxu0 }
  0xc5   : > { %9723 = vmatmul.msk.bf16.gmra.mxu0 %vm834_vm1, %v11874_v41  ;;  %v1261_v4 = vpop.f32.mrf.mxu1 }
  0xc6   : > { %9772 = vmatmul.msk.bf16.gmra.mxu3 %vm834_vm1, %v11872_v40  ;;  %9739 = vmatmul.msk.bf16.gmra.mxu1 %vm834_vm1, %v11872_v40  ;;  %v1262_v38 = vadd.f32 %v1261_v4, %v1121_v0  ;;  %v11938_v0 = vpack.c.bf16 %v1360_v51, %v1359_v50 }
  0xc7   : > { %9756 = vmatmul.msk.bf16.gmra.mxu2 %vm834_vm1, %v11876_v42 }
  0xd5   : > { %9724 = vmatmul.msk.bf16.gmra.mxu0 %vm834_vm1, %v11896_v60  ;;  %v1449_v62 = vpop.f32.mrf.mxu2 }
  0xd6   : > { %9773 = vmatmul.msk.bf16.gmra.mxu3 %vm834_vm1, %v11894_v59  ;;  %9740 = vmatmul.msk.bf16.gmra.mxu1 %vm834_vm1, %v11894_v59  ;;  %v1529_v63 = vadd.f32 %v1449_v62, %v1260_v37  ;;  %v11936_v62 = vpack.c.bf16 %v1029_v48, %v1028_v47  ;;  %v11960_v48 = vpack.c.bf16 %v1362_v35, %v1361_v33 }
  0xd7   : > { %9757 = vmatmul.msk.bf16.gmra.mxu2 %vm834_vm1, %v11898_v61 }
  0xdd   : > { %v1451_v12 = vpop.f32.mrf.mxu2 }
  0xde   : > { %v1530_v49 = vadd.f32 %v1451_v12, %v1262_v38 }
  0xe2   : > { %v1124_v20 = vpop.f32.mrf.mxu0 }
  0xe3   : > { %v1264_v22 = vpop.f32.mrf.mxu1 }
  0xe4   : > { %v1265_v23 = vadd.f32 %v1264_v22, %v1124_v20 }
  0xe5   : > { %9725 = vmatmul.msk.bf16.gmra.mxu0 %vm834_vm1, %v11914_v19 }
  0xe6   : > { %9774 = vmatmul.msk.bf16.gmra.mxu3 %vm834_vm1, %v11912_v18  ;;  %9741 = vmatmul.msk.bf16.gmra.mxu1 %vm834_vm1, %v11912_v18 }
  0xe7   : > { %9758 = vmatmul.msk.bf16.gmra.mxu2 %vm834_vm1, %v11916_v21 }
  0xe9   : > { %v1671_v27 = vpop.f32.mrf.mxu3 }
  0xea   : > { %v11926_v28 = vadd.f32 %v1671_v27, %v1529_v63  ;;  %v1454_v29 = vpop.f32.mrf.mxu2  ;;  %v1126_v31 = vpop.f32.mrf.mxu0  ;;  %v1582_v27 = vld [vmem:[#allocation2 + $0x110] sm:$0xff] }
  0xeb   : > { %v1531_v30 = vadd.f32 %v1454_v29, %v1265_v23  ;;  %v1266_v36 = vpop.f32.mrf.mxu1  ;;  %v1581_v23 = vld [vmem:[#allocation2 + $0x108] sm:$0xff] }
  0xec   : > { %v1267_v37 = vadd.f32 %v1266_v36, %v1126_v31  ;;  %v1030_v29 = vld [vmem:[#allocation2 + $0x109] sm:$0xff]  ;;  %v1031_v31 = vld [vmem:[#allocation2 + $0x111] sm:$0xff] }
  0xed   : > { %v11958_v39 = vpack.c.bf16 %v1031_v31, %v1030_v29 }
  0xf1   : > { %v1673_v52 = vpop.f32.mrf.mxu3 }
  0xf2   : > { %v11932_v53 = vadd.f32 %v1673_v52, %v1530_v49  ;;  %v1456_v58 = vpop.f32.mrf.mxu2  ;;  %v1129_v5 = vpop.f32.mrf.mxu0 }
  0xf3   : > { %v1532_v63 = vadd.f32 %v1456_v58, %v1267_v37  ;;  %v1269_v4 = vpop.f32.mrf.mxu1  ;;  %v11956_v37 = vpack.c.bf16 %v1582_v27, %v1581_v23  ;;  %v1364_v23 = vld [vmem:[#allocation2 + $0x12a] sm:$0xff] }
  0xf4   : > { %v1270_v7 = vadd.f32 %v1269_v4, %v1129_v5  ;;  %v828_v4 = vld [vmem:[%s11744_s27 + $0xd0] sm:$0xff] }
  0xf5   : > { %9726 = vmatmul.msk.bf16.gmra.mxu0 %vm834_vm1, %v11936_v62  ;;  %953 = vst.msk [vmem:[#allocation2 + $0x151] sm:$0xff] %vm834_vm1, %v828_v4  ;;  %v830_v4 = vld [vmem:[%s11744_s27 + $0xe0] sm:$0xff] }
  0xf6   : > { %9775 = vmatmul.msk.bf16.gmra.mxu3 %vm834_vm1, %v11934_v57  ;;  %9742 = vmatmul.msk.bf16.gmra.mxu1 %vm834_vm1, %v11934_v57  ;;  %955 = vst.msk [vmem:[#allocation2 + $0x169] sm:$0xff] %vm834_vm1, %v830_v4 }
  0xf7   : > { %9759 = vmatmul.msk.bf16.gmra.mxu2 %vm834_vm1, %v11938_v0 }
  0xf9   : > { %v1676_v8 = vpop.f32.mrf.mxu3 }
  0xfa   : > { %v11948_v9 = vadd.f32 %v1676_v8, %v1531_v30  ;;  %v1459_v10 = vpop.f32.mrf.mxu2  ;;  %v1131_v12 = vpop.f32.mrf.mxu0 }
  0xfb   : > { %v1533_v11 = vadd.f32 %v1459_v10, %v1270_v7  ;;  %v1271_v20 = vpop.f32.mrf.mxu1  ;;  %v829_v7 = vld [vmem:[%s11744_s27 + $0xd8] sm:$0xff] }
  0xfc   : > { %v1272_v22 = vadd.f32 %v1271_v20, %v1131_v12  ;;  %954 = vst.msk [vmem:[#allocation2 + $0x159] sm:$0xff] %vm834_vm1, %v829_v7  ;;  %v1583_v12 = vld [vmem:[#allocation2 + $0x120] sm:$0xff]  ;;  %v1033_v20 = vld [vmem:[#allocation2 + $0x129] sm:$0xff] }
  0xfd   : > { %v11978_v29 = vpack.c.bf16 %v1584_v16, %v1583_v12  ;;  %v11980_v33 = vpack.c.bf16 %v1033_v20, %v1032_v17  ;;  %v831_v7 = vld [vmem:[%s11744_s27 + $0xe8] sm:$0xff]  ;;  %v1585_v12 = vld [vmem:[#allocation2 + $0x138] sm:$0xff] }
  0xfe   : > { %956 = vst.msk [vmem:[#allocation2 + $0x171] sm:$0xff] %vm834_vm1, %v831_v7  ;;  %v1586_v16 = vld [vmem:[#allocation2 + $0x140] sm:$0xff] }
  0xff   : > { %v1034_v17 = vld [vmem:[#allocation2 + $0x139] sm:$0xff]  ;;  %v1035_v20 = vld [vmem:[#allocation2 + $0x141] sm:$0xff] }
 0x101   : > { %v1678_v36 = vpop.f32.mrf.mxu3 }
 0x102   : > { %v11954_v30 = vadd.f32 %v1678_v36, %v1532_v63  ;;  %v1461_v38 = vpop.f32.mrf.mxu2  ;;  %v1134_v47 = vpop.f32.mrf.mxu0 }
 0x103   : > { %v1534_v46 = vadd.f32 %v1461_v38, %v1272_v22  ;;  %v1274_v49 = vpop.f32.mrf.mxu1  ;;  %v1363_v22 = vld [vmem:[#allocation2 + $0x122] sm:$0xff]  ;;  %v1368_v6 = vld [vmem:[#allocation2 + $0x15a] sm:$0xff] }
 0x104   : > { %v1275_v50 = vadd.f32 %v1274_v49, %v1134_v47  ;;  %v11982_v38 = vpack.c.bf16 %v1364_v23, %v1363_v22  ;;  %v1365_v22 = vld [vmem:[#allocation2 + $0x13a] sm:$0xff]  ;;  %v1366_v23 = vld [vmem:[#allocation2 + $0x142] sm:$0xff] }
 0x105   : > { %9727 = vmatmul.msk.bf16.gmra.mxu0 %vm834_vm1, %v11958_v39 }
 0x106   : > { %9776 = vmatmul.msk.bf16.gmra.mxu3 %vm834_vm1, %v11956_v37  ;;  %9743 = vmatmul.msk.bf16.gmra.mxu1 %vm834_vm1, %v11956_v37 }
 0x107   : > { %9760 = vmatmul.msk.bf16.gmra.mxu2 %vm834_vm1, %v11960_v48 }
 0x109   : > { %v1681_v51 = vpop.f32.mrf.mxu3 }
 0x10a   : > { %v11970_v52 = vadd.f32 %v1681_v51, %v1533_v11  ;;  %v1464_v58 = vpop.f32.mrf.mxu2  ;;  %v1136_v5 = vpop.f32.mrf.mxu0 }
 0x10b   : > { %v1535_v63 = vadd.f32 %v1464_v58, %v1275_v50  ;;  %v1276_v8 = vpop.f32.mrf.mxu1 }
 0x10c   : > { %v1277_v10 = vadd.f32 %v1276_v8, %v1136_v5 }
 0x111   : > { %v1683_v27 = vpop.f32.mrf.mxu3 }
 0x112   : > { %v11976_v11 = vadd.f32 %v1683_v27, %v1534_v46  ;;  %v1466_v31 = vpop.f32.mrf.mxu2  ;;  %v1139_v36 = vpop.f32.mrf.mxu0 }
 0x113   : > { %v1536_v35 = vadd.f32 %v1466_v31, %v1277_v10  ;;  %v1279_v47 = vpop.f32.mrf.mxu1  ;;  %v12000_v31 = vpack.c.bf16 %v1586_v16, %v1585_v12  ;;  %v832_v16 = vld [vmem:[%s11744_s27 + $0xf0] sm:$0xff] }
 0x114   : > { %v1280_v49 = vadd.f32 %v1279_v47, %v1139_v36  ;;  %v12002_v47 = vpack.c.bf16 %v1035_v20, %v1034_v17  ;;  %v833_v17 = vld [vmem:[%s11744_s27 + $0xf8] sm:$0xff]  ;;  %957 = vst.msk [vmem:[#allocation2 + $0x181] sm:$0xff] %vm834_vm1, %v832_v16  ;;  %s11100_s27 = sshll.u32 %s11723_s8, 7 }
 0x115   : > { %9728 = vmatmul.msk.bf16.gmra.mxu0 %vm834_vm1, %v11980_v33  ;;  %958 = vst.msk [vmem:[#allocation2 + $0x189] sm:$0xff] %vm834_vm1, %v833_v17  ;;  %s13458_s26 = scalar_lea.vmem %s15333_s21, %s11100_s27 }
 0x116   : > { %9777 = vmatmul.msk.bf16.gmra.mxu3 %vm834_vm1, %v11978_v29  ;;  %9744 = vmatmul.msk.bf16.gmra.mxu1 %vm834_vm1, %v11978_v29  ;;  %15245 = vst [vmem:[#allocation26_spill] sm:$0xff] %v12002_v47 }
 0x117   : > { %9761 = vmatmul.msk.bf16.gmra.mxu2 %vm834_vm1, %v11982_v38 }
 0x119   : > { %v1686_v46 = vpop.f32.mrf.mxu3 }
 0x11a   : > { %v11992_v50 = vadd.f32 %v1686_v46, %v1535_v63  ;;  %v1469_v51 = vpop.f32.mrf.mxu2  ;;  %v1141_v5 = vpop.f32.mrf.mxu0 }
 0x11b   : > { %v1537_v58 = vadd.f32 %v1469_v51, %v1280_v49  ;;  %v1281_v8 = vpop.f32.mrf.mxu1  ;;  %v12004_v51 = vpack.c.bf16 %v1366_v23, %v1365_v22  ;;  %v1587_v23 = vld [vmem:[#allocation2 + $0x150] sm:$0xff] }
 0x11c   : > { %v1282_v10 = vadd.f32 %v1281_v8, %v1141_v5 }
 0x11d   : > { %15246 = vst [vmem:[#allocation27_spill] sm:$0xff] %v12004_v51 }
 0x121   : > { %v1688_v27 = vpop.f32.mrf.mxu3 }
 0x122   : > { %v11998_v63 = vadd.f32 %v1688_v27, %v1536_v35  ;;  %v1471_v36 = vpop.f32.mrf.mxu2  ;;  %v1144_v46 = vpop.f32.mrf.mxu0  ;;  %v1588_v27 = vld [vmem:[#allocation2 + $0x158] sm:$0xff] }
 0x123   : > { %v1538_v49 = vadd.f32 %v1471_v36, %v1282_v10  ;;  %v1284_v5 = vpop.f32.mrf.mxu1  ;;  %v1036_v36 = vld [vmem:[#allocation2 + $0x151] sm:$0xff] }
 0x124   : > { %v1285_v4 = vadd.f32 %v1284_v5, %v1144_v46  ;;  %v1037_v46 = vld [vmem:[#allocation2 + $0x159] sm:$0xff] }
 0x125   : > { %9729 = vmatmul.msk.bf16.gmra.mxu0 %vm834_vm1, %v12002_v47  ;;  %v1367_v5 = vld [vmem:[#allocation2 + $0x152] sm:$0xff] }
 0x126   : > { %9778 = vmatmul.msk.bf16.gmra.mxu3 %vm834_vm1, %v12000_v31  ;;  %9745 = vmatmul.msk.bf16.gmra.mxu1 %vm834_vm1, %v12000_v31  ;;  %v12026_v16 = vpack.c.bf16 %v1368_v6, %v1367_v5 }
 0x127   : > { %9762 = vmatmul.msk.bf16.gmra.mxu2 %vm834_vm1, %v12004_v51 }
 0x128   : > { %15251 = vst [vmem:[#allocation32_spill] sm:$0xff] %v12026_v16 }
 0x129   : > { %v1691_v35 = vpop.f32.mrf.mxu3 }
 0x12a   : > { %v12014_v7 = vadd.f32 %v1691_v35, %v1537_v58  ;;  %v1474_v8 = vpop.f32.mrf.mxu2  ;;  %v1146_v12 = vpop.f32.mrf.mxu0  ;;  %v12022_v35 = vpack.c.bf16 %v1588_v27, %v1587_v23  ;;  %v9850_v27 = vld [vmem:[%s15243_s0 + $0x10] sm:$0x3] }
 0x12b   : > { %v1539_v10 = vadd.f32 %v1474_v8, %v1285_v4  ;;  %v1286_v20 = vpop.f32.mrf.mxu1  ;;  %v12024_v8 = vpack.c.bf16 %v1037_v46, %v1036_v36  ;;  %v2771_v5 = vsel %vm1106_vm0, %v9850_v27, 0 }
 0x12c   : > { %15247 = vst [vmem:[#allocation28_spill] sm:$0xff] %v12014_v7  ;;  %v1287_v22 = vadd.f32 %v1286_v20, %v1146_v12  ;;  %2780 = vmatpush.bf16.msra.mxu0 %v2771_v5 }
 0x12d   : > { %15249 = vst [vmem:[#allocation30_spill] sm:$0xff] %v12022_v35 }
 0x12e   : > { %15250 = vst [vmem:[#allocation31_spill] sm:$0xff] %v12024_v8 }
 0x131   : > { %v1693_v51 = vpop.f32.mrf.mxu3 }
 0x132   : > { %v12020_v58 = vadd.f32 %v1693_v51, %v1538_v49  ;;  %v1476_v4 = vpop.f32.mrf.mxu2  ;;  %v1149_v7 = vpop.f32.mrf.mxu0  ;;  %v9816_v49 = vld [vmem:[%s15243_s0 + $0xc] sm:$0x3]  ;;  %v9833_v51 = vld [vmem:[%s15243_s0 + $0xe] sm:$0x3]  ;;  %s15324_s0 = sld [smem:[#allocation52_spill]] }
 0x133   : > { %v1540_v47 = vadd.f32 %v1476_v4, %v1287_v22  ;;  %v1289_v12 = vpop.f32.mrf.mxu1  ;;  %v2327_v6 = vsel %vm1106_vm0, %v9816_v49, 0  ;;  %v1589_v49 = vld [vmem:[#allocation2 + $0x168] sm:$0xff] }
 0x134   : > { %15248 = vst [vmem:[#allocation29_spill] sm:$0xff] %v12020_v58  ;;  %v1290_v17 = vadd.f32 %v1289_v12, %v1149_v7  ;;  %v2549_v7 = vsel %vm1106_vm0, %v9833_v51, 0  ;;  %2336 = vmatpush.bf16.msrb.mxu2 %v2327_v6  ;;  %v1038_v51 = vld [vmem:[#allocation2 + $0x169] sm:$0xff]  ;;  %v1039_v6 = vld [vmem:[#allocation2 + $0x171] sm:$0xff]  ;;  %vm6962_vm0 = vcmask 257024  }
 0x135   : > { %9730 = vmatmul.msk.bf16.gmra.mxu0 %vm834_vm1, %v12024_v8  ;;  %2558 = vmatpush.bf16.msrb.mxu3 %v2549_v7  ;;  %v1369_v7 = vld [vmem:[#allocation2 + $0x16a] sm:$0xff]  ;;  %v1370_v8 = vld [vmem:[#allocation2 + $0x172] sm:$0xff] }
 0x136   : > { %9779 = vmatmul.msk.bf16.gmra.mxu3 %vm834_vm1, %v12022_v35  ;;  %9746 = vmatmul.msk.bf16.gmra.mxu1 %vm834_vm1, %v12022_v35  ;;  %v12054_v35 = vpack.c.bf16 %v1039_v6, %v1038_v51  ;;  %v12056_v27 = vpack.c.bf16 %v1370_v8, %v1369_v7  ;;  %v1591_v51 = vld [vmem:[#allocation2 + $0x180] sm:$0xff]  ;;  %v1592_v6 = vld [vmem:[#allocation2 + $0x188] sm:$0xff] }
 0x137   : > { %9763 = vmatmul.msk.bf16.gmra.mxu2 %vm834_vm1, %v12026_v16  ;;  %v1590_v16 = vld [vmem:[#allocation2 + $0x170] sm:$0xff] }
 0x138   : > { %15255 = vst [vmem:[#allocation36_spill] sm:$0xff] %v12054_v35 }
 0x139   : > { %v1696_v20 = vpop.f32.mrf.mxu3  ;;  %15256 = vst [vmem:[#allocation37_spill] sm:$0xff] %v12056_v27 }
 0x13a   : > { %v12044_v22 = vadd.f32 %v1696_v20, %v1539_v10  ;;  %v1479_v23 = vpop.f32.mrf.mxu2  ;;  %v1151_v46 = vpop.f32.mrf.mxu0 }
 0x13b   : > { %v1541_v36 = vadd.f32 %v1479_v23, %v1290_v17  ;;  %v1291_v4 = vpop.f32.mrf.mxu1 }
 0x13c   : > { %15252 = vst [vmem:[#allocation33_spill] sm:$0xff] %v12044_v22  ;;  %v1292_v12 = vadd.f32 %v1291_v4, %v1151_v46  ;;  %v12052_v22 = vpack.c.bf16 %v1590_v16, %v1589_v49 }
 0x13e   : > { %15254 = vst [vmem:[#allocation35_spill] sm:$0xff] %v12052_v22 }
 0x141   : > { %v1698_v10 = vpop.f32.mrf.mxu3 }
 0x142   : > { %v12050_v20 = vadd.f32 %v1698_v10, %v1540_v47  ;;  %v1481_v58 = vpop.f32.mrf.mxu2  ;;  %v1154_v23 = vpop.f32.mrf.mxu0 }
 0x143   : > { %v1542_v17 = vadd.f32 %v1481_v58, %v1292_v12  ;;  %v1294_v5 = vpop.f32.mrf.mxu1 }
 0x144   : > { %15253 = vst [vmem:[#allocation34_spill] sm:$0xff] %v12050_v20  ;;  %v1295_v46 = vadd.f32 %v1294_v5, %v1154_v23  ;;  %v12070_v23 = vpack.c.bf16 %v1592_v6, %v1591_v51 }
 0x145   : > { %9731 = vmatmul.msk.bf16.gmra.mxu0 %vm834_vm1, %v12054_v35 }
 0x146   : > { %9780 = vmatmul.msk.bf16.gmra.mxu3 %vm834_vm1, %v12052_v22  ;;  %9747 = vmatmul.msk.bf16.gmra.mxu1 %vm834_vm1, %v12052_v22 }
 0x147   : > { %9764 = vmatmul.msk.bf16.gmra.mxu2 %vm834_vm1, %v12056_v27 }
 0x149   : > { %v1701_v47 = vpop.f32.mrf.mxu3 }
 0x14a   : > { %v12066_v16 = vadd.f32 %v1701_v47, %v1541_v36  ;;  %v1484_v58 = vpop.f32.mrf.mxu2  ;;  %v1156_v4 = vpop.f32.mrf.mxu0 }
 0x14b   : > { %v1543_v8 = vadd.f32 %v1484_v58, %v1295_v46  ;;  %v1296_v12 = vpop.f32.mrf.mxu1 }
 0x14c   : > { %v1297_v49 = vadd.f32 %v1296_v12, %v1156_v4 }
 0x151   : > { %v1703_v7 = vpop.f32.mrf.mxu3 }
 0x152   : > { %v12068_v10 = vadd.f32 %v1703_v7, %v1542_v17  ;;  %v1486_v5 = vpop.f32.mrf.mxu2  ;;  %v1159_v20 = vpop.f32.mrf.mxu0 }
 0x153   : > { %v1544_v35 = vadd.f32 %v1486_v5, %v1297_v49  ;;  %v1299_v22 = vpop.f32.mrf.mxu1 }
 0x154   : > { %v1300_v27 = vadd.f32 %v1299_v22, %v1159_v20 }
 0x155   : > { %9783 = vmatmul.msk.bf16.vlgmr.msrb.gmra.mxu0 %vm834_vm1, %v11768_v32 }
 0x156   : > { %9781 = vmatmul.msk.bf16.gmra.mxu3 %vm834_vm1, %v12070_v23  ;;  %9800 = vmatmul.msk.bf16.vlgmr.msrb.gmra.mxu1 %vm834_vm1, %v11770_v34 }
 0x157   : > { %9817 = vmatmul.msk.bf16.vlgmr.msrb.gmra.mxu2 %vm834_vm1, %v11782_v43 }
 0x159   : > { %v1706_v36 = vpop.f32.mrf.mxu3 }
 0x15a   : > { %v12080_v17 = vadd.f32 %v1706_v36, %v1543_v8  ;;  %v1489_v46 = vpop.f32.mrf.mxu2  ;;  %v1161_v58 = vpop.f32.mrf.mxu0 }
 0x15b   : > { %v1545_v47 = vadd.f32 %v1489_v46, %v1300_v27  ;;  %v1301_v4 = vpop.f32.mrf.mxu1 }
 0x15c   : > { %v1302_v22 = vadd.f32 %v1301_v4, %v1161_v58 }
 0x161   : > { %v1708_v20 = vpop.f32.mrf.mxu3 }
 0x162   : > { %v12082_v12 = vadd.f32 %v1708_v20, %v1544_v35  ;;  %v1491_v49 = vpop.f32.mrf.mxu2  ;;  %v1164_v32 = vpop.f32.mrf.mxu0 }
 0x163   : > { %v1546_v51 = vadd.f32 %v1491_v49, %v1302_v22  ;;  %v1304_v6 = vpop.f32.mrf.mxu1 }
 0x164   : > { %v1305_v7 = vadd.f32 %v1304_v6, %v1164_v32 }
 0x165   : > { %9784 = vmatmul.msk.bf16.gmra.mxu0 %vm834_vm1, %v11784_v44 }
 0x166   : > { %9834 = vmatmul.msk.bf16.vlgmr.msrb.gmra.mxu3 %vm834_vm1, %v11784_v44  ;;  %9801 = vmatmul.msk.bf16.gmra.mxu1 %vm834_vm1, %v11786_v45 }
 0x167   : > { %9818 = vmatmul.msk.bf16.gmra.mxu2 %vm834_vm1, %v11800_v54 }
 0x169   : > { %v1711_v34 = vpop.f32.mrf.mxu3 }
 0x16a   : > { %v12092_v43 = vadd.f32 %v1711_v34, %v1545_v47  ;;  %v1494_v35 = vpop.f32.mrf.mxu2  ;;  %v1166_v8 = vpop.f32.mrf.mxu0 }
 0x16b   : > { %v1547_v27 = vadd.f32 %v1494_v35, %v1305_v7  ;;  %v1306_v5 = vpop.f32.mrf.mxu1 }
 0x16c   : > { %v1307_v36 = vadd.f32 %v1306_v5, %v1166_v8 }
 0x171   : > { %v1713_v46 = vpop.f32.mrf.mxu3 }
 0x172   : > { %v12094_v58 = vadd.f32 %v1713_v46, %v1546_v51  ;;  %v1496_v4 = vpop.f32.mrf.mxu2  ;;  %v1169_v44 = vpop.f32.mrf.mxu0 }
 0x173   : > { %v1548_v22 = vadd.f32 %v1496_v4, %v1307_v36  ;;  %v1309_v20 = vpop.f32.mrf.mxu1 }
 0x174   : > { %v1310_v49 = vadd.f32 %v1309_v20, %v1169_v44 }
 0x175   : > { %9785 = vmatmul.msk.bf16.gmra.mxu0 %vm834_vm1, %v11802_v55 }
 0x176   : > { %9835 = vmatmul.msk.bf16.gmra.mxu3 %vm834_vm1, %v11802_v55  ;;  %9802 = vmatmul.msk.bf16.gmra.mxu1 %vm834_vm1, %v11804_v56 }
 0x177   : > { %9819 = vmatmul.msk.bf16.gmra.mxu2 %vm834_vm1, %v11818_v1 }
 0x179   : > { %v1716_v45 = vpop.f32.mrf.mxu3 }
 0x17a   : > { %v12104_v54 = vadd.f32 %v1716_v45, %v1547_v27  ;;  %v1499_v47 = vpop.f32.mrf.mxu2  ;;  %v1171_v32 = vpop.f32.mrf.mxu0 }
 0x17b   : > { %v1549_v51 = vadd.f32 %v1499_v47, %v1310_v49  ;;  %v1311_v6 = vpop.f32.mrf.mxu1 }
 0x17c   : > { %v1312_v7 = vadd.f32 %v1311_v6, %v1171_v32 }
 0x181   : > { %v1718_v34 = vpop.f32.mrf.mxu3 }
 0x182   : > { %v12106_v35 = vadd.f32 %v1718_v34, %v1548_v22  ;;  %v1501_v8 = vpop.f32.mrf.mxu2  ;;  %v1174_v55 = vpop.f32.mrf.mxu0 }
 0x183   : > { %v1550_v5 = vadd.f32 %v1501_v8, %v1312_v7  ;;  %v1314_v36 = vpop.f32.mrf.mxu1 }
 0x184   : > { %v1315_v46 = vadd.f32 %v1314_v36, %v1174_v55 }
 0x185   : > { %9786 = vmatmul.msk.bf16.gmra.mxu0 %vm834_vm1, %v11820_v2 }
 0x186   : > { %9836 = vmatmul.msk.bf16.gmra.mxu3 %vm834_vm1, %v11820_v2  ;;  %9803 = vmatmul.msk.bf16.gmra.mxu1 %vm834_vm1, %v11822_v3 }
 0x187   : > { %9820 = vmatmul.msk.bf16.gmra.mxu2 %vm834_vm1, %v11836_v13 }
 0x189   : > { %v1721_v56 = vpop.f32.mrf.mxu3 }
 0x18a   : > { %v12116_v1 = vadd.f32 %v1721_v56, %v1549_v51  ;;  %v1504_v27 = vpop.f32.mrf.mxu2  ;;  %v1176_v22 = vpop.f32.mrf.mxu0 }
 0x18b   : > { %v1551_v4 = vadd.f32 %v1504_v27, %v1315_v46  ;;  %v1316_v44 = vpop.f32.mrf.mxu1 }
 0x18c   : > { %v1317_v20 = vadd.f32 %v1316_v44, %v1176_v22 }
 0x191   : > { %v1723_v49 = vpop.f32.mrf.mxu3 }
 0x192   : > { %v12118_v45 = vadd.f32 %v1723_v49, %v1550_v5  ;;  %v1506_v47 = vpop.f32.mrf.mxu2  ;;  %v1179_v2 = vpop.f32.mrf.mxu0 }
 0x193   : > { %v1552_v32 = vadd.f32 %v1506_v47, %v1317_v20  ;;  %v1319_v6 = vpop.f32.mrf.mxu1 }
 0x194   : > { %v1320_v7 = vadd.f32 %v1319_v6, %v1179_v2 }
 0x195   : > { %9787 = vmatmul.msk.bf16.gmra.mxu0 %vm834_vm1, %v11838_v14 }
 0x196   : > { %9837 = vmatmul.msk.bf16.gmra.mxu3 %vm834_vm1, %v11838_v14  ;;  %9804 = vmatmul.msk.bf16.gmra.mxu1 %vm834_vm1, %v11840_v15 }
 0x197   : > { %9821 = vmatmul.msk.bf16.gmra.mxu2 %vm834_vm1, %v11854_v24 }
 0x199   : > { %v1726_v3 = vpop.f32.mrf.mxu3 }
 0x19a   : > { %v12128_v13 = vadd.f32 %v1726_v3, %v1551_v4  ;;  %v1509_v51 = vpop.f32.mrf.mxu2  ;;  %v1181_v8 = vpop.f32.mrf.mxu0 }
 0x19b   : > { %v1553_v34 = vadd.f32 %v1509_v51, %v1320_v7  ;;  %v1321_v5 = vpop.f32.mrf.mxu1 }
 0x19c   : > { %v1322_v55 = vadd.f32 %v1321_v5, %v1181_v8 }
 0x1a1   : > { %v1728_v36 = vpop.f32.mrf.mxu3 }
 0x1a2   : > { %v12130_v46 = vadd.f32 %v1728_v36, %v1552_v32  ;;  %v1511_v56 = vpop.f32.mrf.mxu2  ;;  %v1184_v14 = vpop.f32.mrf.mxu0 }
 0x1a3   : > { %v1554_v27 = vadd.f32 %v1511_v56, %v1322_v55  ;;  %v1324_v22 = vpop.f32.mrf.mxu1 }
 0x1a4   : > { %v1325_v44 = vadd.f32 %v1324_v22, %v1184_v14 }
 0x1a5   : > { %9788 = vmatmul.msk.bf16.gmra.mxu0 %vm834_vm1, %v11856_v25 }
 0x1a6   : > { %9838 = vmatmul.msk.bf16.gmra.mxu3 %vm834_vm1, %v11856_v25  ;;  %9805 = vmatmul.msk.bf16.gmra.mxu1 %vm834_vm1, %v11858_v26 }
 0x1a7   : > { %9822 = vmatmul.msk.bf16.gmra.mxu2 %vm834_vm1, %v11872_v40 }
 0x1a9   : > { %v1731_v15 = vpop.f32.mrf.mxu3 }
 0x1aa   : > { %v12140_v24 = vadd.f32 %v1731_v15, %v1553_v34  ;;  %v1514_v4 = vpop.f32.mrf.mxu2  ;;  %v1186_v49 = vpop.f32.mrf.mxu0 }
 0x1ab   : > { %v1555_v20 = vadd.f32 %v1514_v4, %v1325_v44  ;;  %v1326_v47 = vpop.f32.mrf.mxu1 }
 0x1ac   : > { %v1327_v32 = vadd.f32 %v1326_v47, %v1186_v49 }
 0x1b1   : > { %v1733_v2 = vpop.f32.mrf.mxu3 }
 0x1b2   : > { %v12142_v6 = vadd.f32 %v1733_v2, %v1554_v27  ;;  %v1516_v7 = vpop.f32.mrf.mxu2  ;;  %v1189_v25 = vpop.f32.mrf.mxu0 }
 0x1b3   : > { %v1556_v3 = vadd.f32 %v1516_v7, %v1327_v32  ;;  %v1329_v51 = vpop.f32.mrf.mxu1 }
 0x1b4   : > { %v1330_v8 = vadd.f32 %v1329_v51, %v1189_v25 }
 0x1b5   : > { %9789 = vmatmul.msk.bf16.gmra.mxu0 %vm834_vm1, %v11874_v41 }
 0x1b6   : > { %9839 = vmatmul.msk.bf16.gmra.mxu3 %vm834_vm1, %v11874_v41  ;;  %9806 = vmatmul.msk.bf16.gmra.mxu1 %vm834_vm1, %v11876_v42  ;;  %v9867_v42 = vld [vmem:[%s15257_s1 + $0x4] sm:$0xf] }
 0x1b7   : > { %9823 = vmatmul.msk.bf16.gmra.mxu2 %vm834_vm1, %v11894_v59  ;;  %v3144_v59 = vsel %vm3142_vm4, %v9867_v42, 0 }
 0x1b8   : > { %3153 = vmatpush.bf16.msra.mxu1 %v3144_v59 }
 0x1b9   : > { %v1736_v26 = vpop.f32.mrf.mxu3 }
 0x1ba   : > { %v12152_v40 = vadd.f32 %v1736_v26, %v1555_v20  ;;  %v1519_v34 = vpop.f32.mrf.mxu2  ;;  %v1191_v55 = vpop.f32.mrf.mxu0 }
 0x1bb   : > { %v1557_v5 = vadd.f32 %v1519_v34, %v1330_v8  ;;  %v1331_v36 = vpop.f32.mrf.mxu1 }
 0x1bc   : > { %v1332_v56 = vadd.f32 %v1331_v36, %v1191_v55 }
 0x1c1   : > { %v1738_v27 = vpop.f32.mrf.mxu3 }
 0x1c2   : > { %v12154_v14 = vadd.f32 %v1738_v27, %v1556_v3  ;;  %v1521_v22 = vpop.f32.mrf.mxu2  ;;  %v1194_v41 = vpop.f32.mrf.mxu0 }
 0x1c3   : > { %v1558_v44 = vadd.f32 %v1521_v22, %v1332_v56  ;;  %v1334_v15 = vpop.f32.mrf.mxu1 }
 0x1c4   : > { %v1335_v4 = vadd.f32 %v1334_v15, %v1194_v41 }
 0x1c5   : > { %9790 = vmatmul.msk.bf16.gmra.mxu0 %vm834_vm1, %v11896_v60 }
 0x1c6   : > { %9840 = vmatmul.msk.bf16.gmra.mxu3 %vm834_vm1, %v11896_v60  ;;  %9807 = vmatmul.msk.bf16.gmra.mxu1 %vm834_vm1, %v11898_v61 }
 0x1c7   : > { %9824 = vmatmul.msk.bf16.gmra.mxu2 %vm834_vm1, %v11912_v18 }
 0x1c9   : > { %v1741_v20 = vpop.f32.mrf.mxu3 }
 0x1ca   : > { %v12168_v49 = vadd.f32 %v1741_v20, %v1557_v5  ;;  %v1524_v47 = vpop.f32.mrf.mxu2  ;;  %v1196_v60 = vpop.f32.mrf.mxu0 }
 0x1cb   : > { %v1559_v32 = vadd.f32 %v1524_v47, %v1335_v4  ;;  %v1336_v2 = vpop.f32.mrf.mxu1 }
 0x1cc   : > { %v1337_v7 = vadd.f32 %v1336_v2, %v1196_v60 }
 0x1d1   : > { %v1743_v3 = vpop.f32.mrf.mxu3 }
 0x1d2   : > { %v12170_v25 = vadd.f32 %v1743_v3, %v1558_v44  ;;  %v1526_v51 = vpop.f32.mrf.mxu2  ;;  %v1893_v18 = vpop.f32.mrf.mxu0 }
 0x1d3   : > { %v1560_v8 = vadd.f32 %v1526_v51, %v1337_v7  ;;  %v1973_v26 = vadd.f32 %v1893_v18, %v11926_v28  ;;  %v2115_v61 = vpop.f32.mrf.mxu1 }
 0x1d5   : > { %v2195_v34 = vadd.f32 %v2115_v61, %v1973_v26  ;;  %9791 = vmatmul.msk.bf16.gmra.mxu0 %vm834_vm1, %v11914_v19 }
 0x1d6   : > { %9841 = vmatmul.msk.bf16.gmra.mxu3 %vm834_vm1, %v11914_v19  ;;  %9808 = vmatmul.msk.bf16.gmra.mxu1 %vm834_vm1, %v11916_v21 }
 0x1d7   : > { %9825 = vmatmul.msk.bf16.gmra.mxu2 %vm834_vm1, %v11934_v57 }
 0x1d9   : > { %v1746_v5 = vpop.f32.mrf.mxu3 }
 0x1da   : > { %v12181_v55 = vadd.f32 %v1746_v5, %v1559_v32  ;;  %v2338_v36 = vpop.f32.mrf.mxu2  ;;  %v1895_v28 = vpop.f32.mrf.mxu0 }
 0x1db   : > { %v2418_v56 = vadd.f32 %v2338_v36, %v2195_v34  ;;  %v1974_v27 = vadd.f32 %v1895_v28, %v11932_v53  ;;  %v2117_v22 = vpop.f32.mrf.mxu1 }
 0x1dd   : > { %v2196_v44 = vadd.f32 %v2117_v22, %v1974_v27 }
 0x1e1   : > { %v1748_v41 = vpop.f32.mrf.mxu3 }
 0x1e2   : > { %v12184_v15 = vadd.f32 %v1748_v41, %v1560_v8  ;;  %v2340_v19 = vpop.f32.mrf.mxu2  ;;  %v1898_v42 = vpop.f32.mrf.mxu0 }
 0x1e3   : > { %v2419_v4 = vadd.f32 %v2340_v19, %v2196_v44  ;;  %v1975_v57 = vadd.f32 %v1898_v42, %v11948_v9  ;;  %v2120_v59 = vpop.f32.mrf.mxu1 }
 0x1e5   : > { %v2197_v21 = vadd.f32 %v2120_v59, %v1975_v57  ;;  %9792 = vmatmul.msk.bf16.gmra.mxu0 %vm834_vm1, %v11936_v62 }
 0x1e6   : > { %9842 = vmatmul.msk.bf16.gmra.mxu3 %vm834_vm1, %v11936_v62  ;;  %9809 = vmatmul.msk.bf16.gmra.mxu1 %vm834_vm1, %v11938_v0 }
 0x1e7   : > { %9826 = vmatmul.msk.bf16.gmra.mxu2 %vm834_vm1, %v11956_v37 }
 0x1e9   : > { %v2560_v53 = vpop.f32.mrf.mxu3 }
 0x1ea   : > { %v12195_v20 = vadd.f32 %v2560_v53, %v2418_v56  ;;  %v2343_v47 = vpop.f32.mrf.mxu2  ;;  %v1900_v9 = vpop.f32.mrf.mxu0 }
 0x1eb   : > { %v2420_v32 = vadd.f32 %v2343_v47, %v2197_v21  ;;  %v1976_v60 = vadd.f32 %v1900_v9, %v11954_v30  ;;  %v2122_v2 = vpop.f32.mrf.mxu1 }
 0x1ed   : > { %v2198_v7 = vadd.f32 %v2122_v2, %v1976_v60 }
 0x1f1   : > { %v2562_v3 = vpop.f32.mrf.mxu3 }
 0x1f2   : > { %v12198_v51 = vadd.f32 %v2562_v3, %v2419_v4  ;;  %v2345_v62 = vpop.f32.mrf.mxu2  ;;  %v1903_v18 = vpop.f32.mrf.mxu0 }
 0x1f3   : > { %v2421_v8 = vadd.f32 %v2345_v62, %v2198_v7  ;;  %v1977_v37 = vadd.f32 %v1903_v18, %v11970_v52  ;;  %v2125_v26 = vpop.f32.mrf.mxu1  ;;  %v15260_v62 = vld [vmem:[#allocation30_spill] sm:$0xff] }
 0x1f5   : > { %v2199_v0 = vadd.f32 %v2125_v26, %v1977_v37  ;;  %9793 = vmatmul.msk.bf16.gmra.mxu0 %vm834_vm1, %v11958_v39 }
 0x1f6   : > { %9843 = vmatmul.msk.bf16.gmra.mxu3 %vm834_vm1, %v11958_v39  ;;  %9810 = vmatmul.msk.bf16.gmra.mxu1 %vm834_vm1, %v11960_v48 }
 0x1f7   : > { %9827 = vmatmul.msk.bf16.gmra.mxu2 %vm834_vm1, %v11978_v29 }
 0x1f9   : > { %v2565_v30 = vpop.f32.mrf.mxu3 }
 0x1fa   : > { %v12209_v61 = vadd.f32 %v2565_v30, %v2420_v32  ;;  %v2348_v34 = vpop.f32.mrf.mxu2  ;;  %v1905_v52 = vpop.f32.mrf.mxu0  ;;  %v15262_v30 = vld [vmem:[#allocation29_spill] sm:$0xff] }
 0x1fb   : > { %v2422_v5 = vadd.f32 %v2348_v34, %v2199_v0  ;;  %v1978_v36 = vadd.f32 %v1905_v52, %v11976_v11  ;;  %v2127_v56 = vpop.f32.mrf.mxu1 }
 0x1fd   : > { %v2200_v28 = vadd.f32 %v2127_v56, %v1978_v36 }
 0x201   : > { %v2567_v27 = vpop.f32.mrf.mxu3 }
 0x202   : > { %v12212_v22 = vadd.f32 %v2567_v27, %v2421_v8  ;;  %v2350_v39 = vpop.f32.mrf.mxu2  ;;  %v1908_v41 = vpop.f32.mrf.mxu0 }
 0x203   : > { %v2423_v44 = vadd.f32 %v2350_v39, %v2200_v28  ;;  %v1979_v29 = vadd.f32 %v1908_v41, %v11992_v50  ;;  %v2130_v19 = vpop.f32.mrf.mxu1  ;;  %v15263_v28 = vld [vmem:[#allocation33_spill] sm:$0xff] }
 0x205   : > { %v2201_v48 = vadd.f32 %v2130_v19, %v1979_v29  ;;  %9794 = vmatmul.msk.bf16.gmra.mxu0 %vm834_vm1, %v11980_v33  ;;  %v15265_v29 = vld [vmem:[#allocation35_spill] sm:$0xff]  ;;  %v15266_v19 = vld [vmem:[#allocation32_spill] sm:$0xff] }
 0x206   : > { %9844 = vmatmul.msk.bf16.gmra.mxu3 %vm834_vm1, %v11980_v33  ;;  %9811 = vmatmul.msk.bf16.gmra.mxu1 %vm834_vm1, %v11982_v38  ;;  %v15259_v38 = vld [vmem:[#allocation26_spill] sm:$0xff] }
 0x207   : > { %9828 = vmatmul.msk.bf16.gmra.mxu2 %vm834_vm1, %v12000_v31  ;;  %v15258_v31 = vld [vmem:[#allocation28_spill] sm:$0xff] }
 0x209   : > { %v2570_v11 = vpop.f32.mrf.mxu3 }
 0x20a   : > { %v12223_v4 = vadd.f32 %v2570_v11, %v2422_v5  ;;  %v2353_v42 = vpop.f32.mrf.mxu2  ;;  %v1910_v50 = vpop.f32.mrf.mxu0  ;;  %v15267_v11 = vld [vmem:[#allocation34_spill] sm:$0xff] }
 0x20b   : > { %v2424_v57 = vadd.f32 %v2353_v42, %v2201_v48  ;;  %v1980_v59 = vadd.f32 %v1910_v50, %v11998_v63  ;;  %v2132_v21 = vpop.f32.mrf.mxu1  ;;  %v15261_v63 = vld [vmem:[#allocation27_spill] sm:$0xff] }
 0x20d   : > { %v2202_v53 = vadd.f32 %v2132_v21, %v1980_v59 }
 0x211   : > { %v2572_v47 = vpop.f32.mrf.mxu3 }
 0x212   : > { %v12226_v32 = vadd.f32 %v2572_v47, %v2423_v44  ;;  %v2355_v33 = vpop.f32.mrf.mxu2  ;;  %v1913_v60 = vpop.f32.mrf.mxu0  ;;  %v15264_v44 = vld [vmem:[#allocation31_spill] sm:$0xff] }
 0x213   : > { %v2425_v9 = vadd.f32 %v2355_v33, %v2202_v53  ;;  %v1981_v2 = vadd.f32 %v1913_v60, %v15258_v31  ;;  %v2135_v7 = vpop.f32.mrf.mxu1  ;;  %v15268_v53 = vld [vmem:[#allocation36_spill] sm:$0xff]  ;;  %v15269_v33 = vld [vmem:[#allocation37_spill] sm:$0xff] }
 0x214   : > { %v2478_v31 = vld [vmem:[#allocation2 + $0x181] sm:$0xff] }
 0x215   : > { %v2203_v3 = vadd.f32 %v2135_v7, %v1981_v2  ;;  %9795 = vmatmul.msk.bf16.gmra.mxu0 %vm834_vm1, %v15259_v38  ;;  %v2479_v2 = vld [vmem:[#allocation2 + $0x189] sm:$0xff]  ;;  %v2258_v7 = vld [vmem:[#allocation2 + $0x198] sm:$0xff] }
 0x216   : > { %9845 = vmatmul.msk.bf16.gmra.mxu3 %vm834_vm1, %v15259_v38  ;;  %9812 = vmatmul.msk.bf16.gmra.mxu1 %vm834_vm1, %v15261_v63  ;;  %v2259_v38 = vld [vmem:[#allocation2 + $0x1a0] sm:$0xff]  ;;  %v2496_v63 = vpack.c.bf16 %v2479_v2, %v2478_v31 }
 0x217   : > { %9829 = vmatmul.msk.bf16.gmra.mxu2 %vm834_vm1, %v15260_v62  ;;  %v2036_v62 = vld [vmem:[#allocation2 + $0x18a] sm:$0xff] }
 0x219   : > { %v2575_v8 = vpop.f32.mrf.mxu3 }
 0x21a   : > { %v12237_v18 = vadd.f32 %v2575_v8, %v2424_v57  ;;  %v2358_v37 = vpop.f32.mrf.mxu2  ;;  %v1915_v0 = vpop.f32.mrf.mxu0 }
 0x21b   : > { %v12239_v26 = vadd.f32 %v2358_v37, %v2203_v3  ;;  %v12242_v34 = vadd.f32 %v1915_v0, %v15262_v30  ;;  %v12244_v5 = vpop.f32.mrf.mxu1  ;;  %v2035_v3 = vld [vmem:[#allocation2 + $0x182] sm:$0xff]  ;;  %v2275_v37 = vpack.c.bf16 %v2259_v38, %v2258_v7 }
 0x21c   : > { %v12280_v0 = vpack.c.bf16 %v2036_v62, %v2035_v3 }
 0x221   : > { %v2577_v52 = vpop.f32.mrf.mxu3 }
 0x222   : > { %v12246_v36 = vadd.f32 %v2577_v52, %v2425_v9  ;;  %v1918_v56 = vpop.f32.mrf.mxu0 }
 0x223   : > { %v1983_v27 = vadd.f32 %v1918_v56, %v15263_v28  ;;  %v2140_v39 = vpop.f32.mrf.mxu1 }
 0x225   : > { %v12251_v41 = vadd.f32 %v2140_v39, %v1983_v27  ;;  %9796 = vmatmul.msk.bf16.gmra.mxu0 %vm834_vm1, %v15264_v44  ;;  %v2480_v27 = vld [vmem:[#allocation2 + $0x199] sm:$0xff] }
 0x226   : > { %9846 = vmatmul.msk.bf16.gmra.mxu3 %vm834_vm1, %v15264_v44  ;;  %9813 = vmatmul.msk.bf16.gmra.mxu1 %vm834_vm1, %v15266_v19  ;;  %v2672_v39 = vld [vmem:[#allocation2 + $0x32] sm:$0xff]  ;;  %v2673_v44 = vld [vmem:[#allocation2 + $0x3a] sm:$0xff] }
 0x227   : > { %9830 = vmatmul.msk.bf16.gmra.mxu2 %vm834_vm1, %v15265_v29  ;;  %v2704_v19 = vpack.c.bf16 %v2673_v44, %v2672_v39  ;;  %v2679_v44 = vld [vmem:[#allocation2 + $0x82] sm:$0xff] }
 0x22a   : > { %v1920_v48 = vpop.f32.mrf.mxu0 }
 0x22b   : > { %v12260_v42 = vadd.f32 %v1920_v48, %v15267_v11  ;;  %v12262_v57 = vpop.f32.mrf.mxu1 }
 0x232   : > { %v1923_v50 = vpop.f32.mrf.mxu0 }
 0x233   : > { %v1985_v59 = vadd.f32 %v1923_v50, %v12066_v16  ;;  %v2145_v21 = vpop.f32.mrf.mxu1 }
 0x235   : > { %v12267_v47 = vadd.f32 %v2145_v21, %v1985_v59  ;;  %9797 = vmatmul.msk.bf16.gmra.mxu0 %vm834_vm1, %v15268_v53 }
 0x236   : > { %9847 = vmatmul.msk.bf16.gmra.mxu3 %vm834_vm1, %v15268_v53  ;;  %9814 = vmatmul.msk.bf16.gmra.mxu1 %vm834_vm1, %v15269_v33  ;;  %v2674_v33 = vld [vmem:[#allocation2 + $0x4a] sm:$0xff] }
 0x237   : > { %9831 = vmatmul.msk.bf16.gmra.mxu2 %vm834_vm1, %v12070_v23 }
 0x23a   : > { %v1925_v9 = vpop.f32.mrf.mxu0 }
 0x23b   : > { %v12276_v60 = vadd.f32 %v1925_v9, %v12068_v10  ;;  %v12278_v16 = vpop.f32.mrf.mxu1  ;;  %v2675_v9 = vld [vmem:[#allocation2 + $0x52] sm:$0xff] }
 0x23c   : > { %v2705_v31 = vpack.c.bf16 %v2675_v9, %v2674_v33 }
 0x242   : > { %v1928_v8 = vpop.f32.mrf.mxu0 }
 0x243   : > { %v1987_v23 = vadd.f32 %v1928_v8, %v12080_v17  ;;  %v2150_v30 = vpop.f32.mrf.mxu1  ;;  %v2481_v17 = vld [vmem:[#allocation2 + $0x1a1] sm:$0xff]  ;;  %v2677_v8 = vld [vmem:[#allocation2 + $0x6a] sm:$0xff] }
 0x244   : > { %v2497_v29 = vpack.c.bf16 %v2481_v17, %v2480_v27 }
 0x245   : > { %v12284_v10 = vadd.f32 %v2150_v30, %v1987_v23  ;;  %9798 = vmatmul.msk.bf16.gmra.mxu0 %vm834_vm1, %v2496_v63 }
 0x246   : > { %9848 = vmatmul.msk.bf16.gmra.mxu3 %vm834_vm1, %v2496_v63  ;;  %9815 = vmatmul.msk.bf16.gmra.mxu1 %vm834_vm1, %v12280_v0 }
 0x247   : > { %9832 = vmatmul.msk.bf16.gmra.mxu2 %vm834_vm1, %v2275_v37 }
 0x24a   : > { %v1930_v52 = vpop.f32.mrf.mxu0 }
 0x24b   : > { %v12291_v56 = vadd.f32 %v1930_v52, %v12082_v12  ;;  %v12293_v28 = vpop.f32.mrf.mxu1 }
 0x252   : > { %v1933_v48 = vpop.f32.mrf.mxu0 }
 0x253   : > { %v1989_v11 = vadd.f32 %v1933_v48, %v12092_v43  ;;  %v2155_v50 = vpop.f32.mrf.mxu1 }
 0x255   : > { %v12297_v59 = vadd.f32 %v2155_v50, %v1989_v11  ;;  %9851 = vmatmul.msk.bf16.vlgmr.msra.gmra.mxu0 %vm834_vm1, %v2704_v19  ;;  %v12324_v50 = vpop.f32.mrf.mxu2 }
 0x256   : > { %9849 = vmatmul.msk.bf16.gmra.mxu3 %vm834_vm1, %v2497_v29 }
 0x25a   : > { %v1935_v12 = vpop.f32.mrf.mxu0 }
 0x25b   : > { %v12301_v21 = vadd.f32 %v1935_v12, %v12094_v58  ;;  %v12303_v53 = vpop.f32.mrf.mxu1  ;;  %v2676_v58 = vld [vmem:[#allocation2 + $0x62] sm:$0xff]  ;;  %v12329_v12 = vpop.f32.mrf.mxu3 }
 0x25c   : > { %v2706_v37 = vpack.c.bf16 %v2677_v8, %v2676_v58 }
 0x262   : > { %v1938_v2 = vpop.f32.mrf.mxu0 }
 0x263   : > { %v1991_v7 = vadd.f32 %v1938_v2, %v12104_v54  ;;  %v2160_v43 = vpop.f32.mrf.mxu1  ;;  %v2681_v2 = vld [vmem:[#allocation2 + $0x9a] sm:$0xff] }
 0x265   : > { %v12306_v38 = vadd.f32 %v2160_v43, %v1991_v7  ;;  %9852 = vmatmul.msk.bf16.gmra.mxu0 %vm834_vm1, %v2705_v31  ;;  %v2680_v31 = vld [vmem:[#allocation2 + $0x92] sm:$0xff]  ;;  %v12336_v7 = vpop.f32.mrf.mxu2 }
 0x266   : > { %v2708_v43 = vpack.c.bf16 %v2681_v2, %v2680_v31 }
 0x26a   : > { %v1940_v3 = vpop.f32.mrf.mxu0 }
 0x26b   : > { %v12310_v62 = vadd.f32 %v1940_v3, %v12106_v35  ;;  %v12312_v63 = vpop.f32.mrf.mxu1  ;;  %v2678_v35 = vld [vmem:[#allocation2 + $0x7a] sm:$0xff] }
 0x26c   : > { %v2707_v29 = vpack.c.bf16 %v2679_v44, %v2678_v35  ;;  %v2682_v35 = vld [vmem:[#allocation2 + $0xaa] sm:$0xff]  ;;  %v2683_v44 = vld [vmem:[#allocation2 + $0xb2] sm:$0xff] }
 0x272   : > { %v1943_v23 = vpop.f32.mrf.mxu0 }
 0x273   : > { %v1993_v30 = vadd.f32 %v1943_v23, %v12116_v1  ;;  %v2165_v52 = vpop.f32.mrf.mxu1  ;;  %v12344_v23 = vpop.f32.mrf.mxu2 }
 0x275   : > { %v12315_v27 = vadd.f32 %v2165_v52, %v1993_v30  ;;  %9853 = vmatmul.msk.bf16.gmra.mxu0 %vm834_vm1, %v2706_v37 }
 0x27a   : > { %v1945_v54 = vpop.f32.mrf.mxu0 }
 0x27b   : > { %v12319_v17 = vadd.f32 %v1945_v54, %v12118_v45  ;;  %v12321_v39 = vpop.f32.mrf.mxu1 }
 0x27c   : > { %15271 = vst [vmem:[#allocation26_spill] sm:$0xff] %v12321_v39  ;;  %v2692_v39 = vld [vmem:[#allocation2 + $0x122] sm:$0xff] }
 0x27d   : > { %15270 = vst [vmem:[#allocation28_spill] sm:$0xff] %v12319_v17  ;;  %v2693_v17 = vld [vmem:[#allocation2 + $0x12a] sm:$0xff] }
 0x282   : > { %v1948_v19 = vpop.f32.mrf.mxu0 }
 0x283   : > { %v1995_v48 = vadd.f32 %v1948_v19, %v12128_v13  ;;  %v2170_v11 = vpop.f32.mrf.mxu1  ;;  %v12338_v13 = vpop.f32.mrf.mxu3 }
 0x285   : > { %v12326_v1 = vadd.f32 %v2170_v11, %v1995_v48  ;;  %9854 = vmatmul.msk.bf16.gmra.mxu0 %vm834_vm1, %v2707_v29  ;;  %v2709_v29 = vpack.c.bf16 %v2683_v44, %v2682_v35  ;;  %v3043_v35 = vld [vmem:[%s15257_s1] sm:$0xf]  ;;  %v9900_v44 = vld [vmem:[%s15257_s1 + $0x8] sm:$0xf] }
 0x287   : > { %15272 = vst [vmem:[#allocation30_spill] sm:$0xff] %v12326_v1 }
 0x28a   : > { %v1950_v33 = vpop.f32.mrf.mxu0 }
 0x28b   : > { %v12332_v45 = vadd.f32 %v1950_v33, %v12130_v46  ;;  %v12334_v9 = vpop.f32.mrf.mxu1  ;;  %v12346_v46 = vpop.f32.mrf.mxu3 }
 0x28c   : > { %15274 = vst [vmem:[#allocation29_spill] sm:$0xff] %v12334_v9 }
 0x28d   : > { %15273 = vst [vmem:[#allocation27_spill] sm:$0xff] %v12332_v45 }
 0x292   : > { %v1953_v3 = vpop.f32.mrf.mxu0 }
 0x293   : > { %v1997_v58 = vadd.f32 %v1953_v3, %v12140_v24  ;;  %v2175_v8 = vpop.f32.mrf.mxu1  ;;  %v12353_v24 = vpop.f32.mrf.mxu2  ;;  %v15281_v3 = vmov 0.0  }
 0x294   : > { %v12356_v33 = vpop.f32.mrf.mxu3  ;;  %881 = vst.msk [vmem:[#allocation3] sm:$0xff] %vm880_vm5, %v15281_v3 }
 0x295   : > { %v12341_v37 = vadd.f32 %v2175_v8, %v1997_v58  ;;  %9855 = vmatmul.msk.bf16.gmra.mxu0 %vm834_vm1, %v2708_v43  ;;  %882 = vst.msk [vmem:[#allocation3 + $0x8] sm:$0xff] %vm880_vm5, %v15281_v3  ;;  %v2684_v8 = vld [vmem:[#allocation2 + $0xc2] sm:$0xff] }
 0x296   : > { %890 = vst.msk [vmem:[#allocation3] sm:$0x1] %vm889_vm6, %v15281_v3 }
 0x297   : > { %15275 = vst [vmem:[#allocation33_spill] sm:$0xff] %v12341_v37 }
 0x298   : > { %886 = vst.msk [vmem:[#allocation3 + $0x198] sm:$0xff] %vm880_vm5, %v15281_v3 }
 0x299   : > { %887 = vst.msk [vmem:[#allocation3 + $0x1a0] sm:$0xff] %vm880_vm5, %v15281_v3 }
 0x29a   : > { %v1955_v30 = vpop.f32.mrf.mxu0  ;;  %891 = vst.msk [vmem:[#allocation3 + $0x18] sm:$0x1] %vm889_vm6, %v15281_v3 }
 0x29b   : > { %v12349_v52 = vadd.f32 %v1955_v30, %v12142_v6  ;;  %v12351_v54 = vpop.f32.mrf.mxu1  ;;  %v12368_v58 = vpop.f32.mrf.mxu2  ;;  %v2685_v30 = vld [vmem:[#allocation2 + $0xca] sm:$0xff]  ;;  %892 = vst.msk [vmem:[#allocation3 + $0x30] sm:$0x1] %vm889_vm6, %v15281_v3 }
 0x29c   : > { %15277 = vst [vmem:[#allocation35_spill] sm:$0xff] %v12351_v54  ;;  %v3375_v37 = vld [vmem:[#allocation3 + $0x2] sm:$0xff] }
 0x29d   : > { %15276 = vst [vmem:[#allocation31_spill] sm:$0xff] %v12349_v52 }
 0x29e   : > { %893 = vst.msk [vmem:[#allocation3 + $0x48] sm:$0x1] %vm889_vm6, %v15281_v3 }
 0x29f   : > { %894 = vst.msk [vmem:[#allocation3 + $0x60] sm:$0x1] %vm889_vm6, %v15281_v3 }
 0x2a0   : > { %895 = vst.msk [vmem:[#allocation3 + $0x78] sm:$0x1] %vm889_vm6, %v15281_v3 }
 0x2a1   : > { %896 = vst.msk [vmem:[#allocation3 + $0x90] sm:$0x1] %vm889_vm6, %v15281_v3 }
 0x2a2   : > { %v1958_v19 = vpop.f32.mrf.mxu0  ;;  %897 = vst.msk [vmem:[#allocation3 + $0xa8] sm:$0x1] %vm889_vm6, %v15281_v3 }
 0x2a3   : > { %v1999_v48 = vadd.f32 %v1958_v19, %v12152_v40  ;;  %v2180_v11 = vpop.f32.mrf.mxu1  ;;  %v12372_v40 = vpop.f32.mrf.mxu3  ;;  %v3284_v19 = vsel %vm3142_vm4, %v3043_v35, 0  ;;  %v2995_v35 = vld [vmem:[#allocation3] sm:$0xff]  ;;  %898 = vst.msk [vmem:[#allocation3 + $0xc0] sm:$0x1] %vm889_vm6, %v15281_v3 }
 0x2a4   : > { %3293 = vmatpush.bf16.msra.mxu2 %v3284_v19  ;;  %899 = vst.msk [vmem:[#allocation3 + $0xd8] sm:$0x1] %vm889_vm6, %v15281_v3 }
 0x2a5   : > { %v12358_v31 = vadd.f32 %v2180_v11, %v1999_v48  ;;  %9856 = vmatmul.msk.bf16.gmra.mxu0 %vm834_vm1, %v2709_v29  ;;  %v3474_v48 = vsel %vm3142_vm4, %v9900_v44, 0  ;;  %900 = vst.msk [vmem:[#allocation3 + $0xf0] sm:$0x1] %vm889_vm6, %v15281_v3 }
 0x2a6   : > { %3483 = vmatpush.bf16.msra.mxu3 %v3474_v48  ;;  %901 = vst.msk [vmem:[#allocation3 + $0x108] sm:$0x1] %vm889_vm6, %v15281_v3 }
 0x2a7   : > { %15278 = vst [vmem:[#allocation32_spill] sm:$0xff] %v12358_v31  ;;  %v12538_v31 = vld [vmem:[%s15287_s3] ss:$0 sm:$0xff] }
 0x2a8   : > { %902 = vst.msk [vmem:[#allocation3 + $0x120] sm:$0x1] %vm889_vm6, %v15281_v3 }
 0x2a9   : > { %903 = vst.msk [vmem:[#allocation3 + $0x138] sm:$0x1] %vm889_vm6, %v15281_v3 }
 0x2aa   : > { %v1960_v2 = vpop.f32.mrf.mxu0  ;;  %904 = vst.msk [vmem:[#allocation3 + $0x150] sm:$0x1] %vm889_vm6, %v15281_v3 }
 0x2ab   : > { %v12362_v6 = vadd.f32 %v1960_v2, %v12154_v14  ;;  %v12364_v43 = vpop.f32.mrf.mxu1  ;;  %v2710_v14 = vpack.c.bf16 %v2685_v30, %v2684_v8  ;;  %v2996_v8 = vld [vmem:[#allocation3 + $0x8] sm:$0xff]  ;;  %905 = vst.msk [vmem:[#allocation3 + $0x168] sm:$0x1] %vm889_vm6, %v15281_v3 }
 0x2ac   : > { %15280 = vst [vmem:[#allocation36_spill] sm:$0xff] %v12364_v43  ;;  %v3027_v44 = vpack.c.bf16 %v2996_v8, %v2995_v35 }
 0x2ad   : > { %15279 = vst [vmem:[#allocation34_spill] sm:$0xff] %v12362_v6 }
 0x2ae   : > { %9884 = vmatmul.msk.bf16.vlgmr.msra.gmra.mxu2 %vm880_vm5, %v3027_v44  ;;  %906 = vst.msk [vmem:[#allocation3 + $0x180] sm:$0x1] %vm889_vm6, %v15281_v3 }
 0x2af   : > { %909 = vst.msk [vmem:[#allocation3 + $0x29] sm:$0x1] %vm889_vm6, %v15281_v3 }
 0x2b0   : > { %910 = vst.msk [vmem:[#allocation3 + $0x41] sm:$0x1] %vm889_vm6, %v15281_v3 }
 0x2b1   : > { %911 = vst.msk [vmem:[#allocation3 + $0x59] sm:$0x1] %vm889_vm6, %v15281_v3 }
 0x2b2   : > { %v1963_v29 = vpop.f32.mrf.mxu0  ;;  %912 = vst.msk [vmem:[#allocation3 + $0x71] sm:$0x1] %vm889_vm6, %v15281_v3 }
 0x2b3   : > { %v2001_v11 = vadd.f32 %v1963_v29, %v12168_v49  ;;  %v2185_v2 = vpop.f32.mrf.mxu1  ;;  %v12404_v49 = vpop.f32.mrf.mxu2  ;;  %913 = vst.msk [vmem:[#allocation3 + $0x89] sm:$0x1] %vm889_vm6, %v15281_v3 }
 0x2b4   : > { %v12408_v29 = vpop.f32.mrf.mxu3  ;;  %914 = vst.msk [vmem:[#allocation3 + $0xa1] sm:$0x1] %vm889_vm6, %v15281_v3 }
 0x2b5   : > { %v12397_v30 = vadd.f32 %v2185_v2, %v2001_v11  ;;  %9857 = vmatmul.msk.bf16.gmra.mxu0 %vm834_vm1, %v2710_v14  ;;  %v2686_v11 = vld [vmem:[#allocation2 + $0xda] sm:$0xff]  ;;  %v2687_v2 = vld [vmem:[#allocation2 + $0xe2] sm:$0xff]  ;;  %915 = vst.msk [vmem:[#allocation3 + $0xb9] sm:$0x1] %vm889_vm6, %v15281_v3 }
 0x2b6   : > { %v2711_v8 = vpack.c.bf16 %v2687_v2, %v2686_v11  ;;  %916 = vst.msk [vmem:[#allocation3 + $0xd1] sm:$0x1] %vm889_vm6, %v15281_v3 }
 0x2b7   : > { %15282 = vst [vmem:[#allocation37_spill] sm:$0xff] %v12397_v30 }
 0x2b8   : > { %917 = vst.msk [vmem:[#allocation3 + $0xe9] sm:$0x1] %vm889_vm6, %v15281_v3 }
 0x2b9   : > { %918 = vst.msk [vmem:[#allocation3 + $0x101] sm:$0x1] %vm889_vm6, %v15281_v3 }
 0x2ba   : > { %v1965_v14 = vpop.f32.mrf.mxu0  ;;  %919 = vst.msk [vmem:[#allocation3 + $0x119] sm:$0x1] %vm889_vm6, %v15281_v3 }
 0x2bb   : > { %v12418_v19 = vadd.f32 %v1965_v14, %v12170_v25  ;;  %v12420_v48 = vpop.f32.mrf.mxu1  ;;  %v12434_v25 = vpop.f32.mrf.mxu2  ;;  %920 = vst.msk [vmem:[#allocation3 + $0x131] sm:$0x1] %vm889_vm6, %v15281_v3 }
 0x2bc   : > { %15284 = vst [vmem:[#allocation39_spill] sm:$0xff] %v12420_v48  ;;  %v12438_v35 = vpop.f32.mrf.mxu3 }
 0x2bd   : > { %15283 = vst [vmem:[#allocation38_spill] sm:$0xff] %v12418_v19 }
 0x2be   : > { %921 = vst.msk [vmem:[#allocation3 + $0x149] sm:$0x1] %vm889_vm6, %v15281_v3 }
 0x2bf   : > { %922 = vst.msk [vmem:[#allocation3 + $0x161] sm:$0x1] %vm889_vm6, %v15281_v3 }
 0x2c0   : > { %923 = vst.msk [vmem:[#allocation3 + $0x179] sm:$0x1] %vm889_vm6, %v15281_v3 }
 0x2c1   : > { %924 = vst.msk [vmem:[#allocation3 + $0x191] sm:$0x1] %vm889_vm6, %v15281_v3 }
 0x2c2   : > { %v1968_v44 = vpop.f32.mrf.mxu0  ;;  %5134 = vst.msk [vmem:[#allocation4] sm:$0xff] %vm880_vm5, %v15281_v3 }
 0x2c3   : > { %v2003_v14 = vadd.f32 %v1968_v44, %v12181_v55  ;;  %v2190_v48 = vpop.f32.mrf.mxu1  ;;  %5137 = vst.msk [vmem:[#allocation4 + $0x90] sm:$0xff] %vm880_vm5, %v15281_v3  ;;  %v2689_v44 = vld [vmem:[#allocation2 + $0xfa] sm:$0xff] }
 0x2c4   : > { %v12469_v2 = vpop.f32.mrf.mxu3  ;;  %5140 = vst.msk [vmem:[#allocation4 + $0x10] sm:$0x1] %vm889_vm6, %v15281_v3 }
 0x2c5   : > { %v12447_v19 = vadd.f32 %v2190_v48, %v2003_v14  ;;  %9858 = vmatmul.msk.bf16.gmra.mxu0 %vm834_vm1, %v2711_v8  ;;  %v12462_v48 = vpop.f32.mrf.mxu2  ;;  %v9917_v14 = vld [vmem:[%s15257_s1 + $0xc] sm:$0xf]  ;;  %5141 = vst.msk [vmem:[#allocation4 + $0x20] sm:$0x1] %vm889_vm6, %v15281_v3 }
 0x2c6   : > { %5142 = vst.msk [vmem:[#allocation4 + $0x30] sm:$0x1] %vm889_vm6, %v15281_v3 }
 0x2c7   : > { %15285 = vst [vmem:[#allocation40_spill] sm:$0xff] %v12447_v19  ;;  %v3696_v19 = vsel %vm3142_vm4, %v9917_v14, 0 }
 0x2c8   : > { %3705 = vmatpush.bf16.msrb.mxu0 %v3696_v19  ;;  %5143 = vst.msk [vmem:[#allocation4 + $0x40] sm:$0x1] %vm889_vm6, %v15281_v3  ;;  %v2690_v19 = vld [vmem:[#allocation2 + $0x10a] sm:$0xff] }
 0x2c9   : > { %5144 = vst.msk [vmem:[#allocation4 + $0x50] sm:$0x1] %vm889_vm6, %v15281_v3 }
 0x2ca   : > { %v1970_v55 = vpop.f32.mrf.mxu0  ;;  %5145 = vst.msk [vmem:[#allocation4 + $0x60] sm:$0x1] %vm889_vm6, %v15281_v3 }
 0x2cb   : > { %v12465_v11 = vadd.f32 %v1970_v55, %v12184_v15  ;;  %v2688_v15 = vld [vmem:[#allocation2 + $0xf2] sm:$0xff]  ;;  %v9934_v55 = vld [vmem:[%s15257_s1 + $0x10] sm:$0xf]  ;;  %5146 = vst.msk [vmem:[#allocation4 + $0x70] sm:$0x1] %vm889_vm6, %v15281_v3 }
 0x2cc   : > { %v3918_v30 = vsel %vm3142_vm4, %v9934_v55, 0  ;;  %v12502_v6 = vpop.f32.mrf.mxu3  ;;  %5147 = vst.msk [vmem:[#allocation4 + $0x80] sm:$0x1] %vm889_vm6, %v15281_v3 }
 0x2cd   : > { %15286 = vst [vmem:[#allocation41_spill] sm:$0xff] %v12465_v11  ;;  %v2712_v11 = vpack.c.bf16 %v2689_v44, %v2688_v15  ;;  %3927 = vmatpush.bf16.msrb.mxu1 %v3918_v30  ;;  %v12497_v43 = vpop.f32.mrf.mxu2 }
 0x2ce   : > { %5150 = vst.msk [vmem:[#allocation4 + $0x19] sm:$0x1] %vm889_vm6, %v15281_v3 }
 0x2cf   : > { %5151 = vst.msk [vmem:[#allocation4 + $0x29] sm:$0x1] %vm889_vm6, %v15281_v3 }
 0x2d0   : > { %5152 = vst.msk [vmem:[#allocation4 + $0x39] sm:$0x1] %vm889_vm6, %v15281_v3 }
 0x2d1   : > { %5153 = vst.msk [vmem:[#allocation4 + $0x49] sm:$0x1] %vm889_vm6, %v15281_v3 }
 0x2d2   : > { %v2782_v8 = vpop.f32.mrf.mxu0  ;;  %5154 = vst.msk [vmem:[#allocation4 + $0x59] sm:$0x1] %vm889_vm6, %v15281_v3 }
 0x2d3   : > { %5155 = vst.msk [vmem:[#allocation4 + $0x69] sm:$0x1] %vm889_vm6, %v15281_v3  ;;  %v2862_v55 = vadd.f32 %v2782_v8, %v12195_v20 }
 0x2d4   : > { %v12526_v44 = vpop.f32.mrf.mxu3  ;;  %5156 = vst.msk [vmem:[#allocation4 + $0x79] sm:$0x1] %vm889_vm6, %v15281_v3 }
 0x2d5   : > { %9859 = vmatmul.msk.bf16.gmra.mxu0 %vm834_vm1, %v2712_v11  ;;  %v2691_v11 = vld [vmem:[#allocation2 + $0x112] sm:$0xff]  ;;  %v12522_v15 = vpop.f32.mrf.mxu2  ;;  %5157 = vst.msk [vmem:[#allocation4 + $0x89] sm:$0x1] %vm889_vm6, %v15281_v3  ;;  %v2898_v20 = vadd.f32 %v12538_v31, %v2862_v55 }
 0x2d6   : > { %v2713_v14 = vpack.c.bf16 %v2691_v11, %v2690_v19  ;;  %907 = vst.msk [vmem:[#allocation3 + $0x198] sm:$0x1] %vm889_vm6, %v15281_v3 }
 0x2d7   : > { %5139 = vst.msk [vmem:[#allocation4] sm:$0x1] %vm889_vm6, %v15281_v3 }
 0x2d8   : > { %5148 = vst.msk [vmem:[#allocation4 + $0x90] sm:$0x1] %vm889_vm6, %v15281_v3 }
 0x2d9   : > { %884 = vst.msk [vmem:[#allocation3 + $0x10] sm:$0x3] %vm883_vm7, %v15281_v3 }
 0x2da   : > { %v2784_v30 = vpop.f32.mrf.mxu0  ;;  %908 = vst.msk [vmem:[#allocation3 + $0x11] sm:$0x1] %vm889_vm6, %v15281_v3 }
 0x2db   : > { %v2863_v52 = vadd.f32 %v2784_v30, %v12198_v51  ;;  %888 = vst.msk [vmem:[#allocation3 + $0x1a8] sm:$0x3] %vm883_vm7, %v15281_v3 }
 0x2dc   : > { %5135 = vst.msk [vmem:[#allocation4 + $0x8] sm:$0x3] %vm883_vm7, %v15281_v3 }
 0x2dd   : > { %v2899_v8 = vadd.f32 %v12538_v31, %v2863_v52  ;;  %v12556_v30 = vpop.f32.mrf.mxu2  ;;  %5138 = vst.msk [vmem:[#allocation4 + $0x98] sm:$0x3] %vm883_vm7, %v15281_v3  ;;  %vm8496_vm7 = vcmask 518144  }
 0x2de   : > { %925 = vst.msk [vmem:[#allocation3 + $0x1a9] sm:$0x1] %vm889_vm6, %v15281_v3 }
 0x2df   : > { %v2931_v55 = vmax.f32 %v2899_v8, 0.0  ;;  %5149 = vst.msk [vmem:[#allocation4 + $0x9] sm:$0x1] %vm889_vm6, %v15281_v3 }
 0x2e0   : > { %5158 = vst.msk [vmem:[#allocation4 + $0x99] sm:$0x1] %vm889_vm6, %v15281_v3  ;;  %v3045_v9 = vld [vmem:[#allocation3 + $0x9] sm:$0xff]  ;;  %vm7999_vm6 = vcmask 523264  }
 0x2e1   : > { %2964 = vst.msk [vmem:[#allocation3 + $0x21] sm:$0xff] %vm880_vm5, %v2931_v55 }
 0x2e2   : > { %v2787_v54 = vpop.f32.mrf.mxu0 }
 0x2e3   : > { %v2864_v19 = vadd.f32 %v2787_v54, %v12209_v61  ;;  %v12559_v61 = vpop.f32.mrf.mxu3  ;;  %v2930_v54 = vmax.f32 %v2898_v20, 0.0  ;;  %v3376_v20 = vld [vmem:[#allocation3 + $0xa] sm:$0xff] }
 0x2e4   : > { %v3407_v8 = vpack.c.bf16 %v3376_v20, %v3375_v37 }
 0x2e5   : > { %9860 = vmatmul.msk.bf16.gmra.mxu0 %vm834_vm1, %v2713_v14  ;;  %v2900_v51 = vadd.f32 %v12538_v31, %v2864_v19  ;;  %v3044_v14 = vld [vmem:[#allocation3 + $0x1] sm:$0xff]  ;;  %2963 = vst.msk [vmem:[#allocation3 + $0x19] sm:$0xff] %vm880_vm5, %v2930_v54 }
 0x2e6   : > { %v3076_v1 = vpack.c.bf16 %v3045_v9, %v3044_v14  ;;  %9901 = vmatmul.msk.bf16.vlgmr.msra.gmra.mxu3 %vm880_vm5, %v3407_v8 }
 0x2e7   : > { %v2932_v19 = vmax.f32 %v2900_v51, 0.0  ;;  %v2714_v51 = vpack.c.bf16 %v2693_v17, %v2692_v39 }
 0x2e8   : > { %9868 = vmatmul.msk.bf16.vlgmr.msra.gmra.mxu1 %vm880_vm5, %v3076_v1  ;;  %v3378_v39 = vld [vmem:[#allocation3 + $0x22] sm:$0xff] }
 0x2e9   : > { %2965 = vst.msk [vmem:[#allocation3 + $0x31] sm:$0xff] %vm880_vm5, %v2932_v19  ;;  %v3047_v19 = vld [vmem:[#allocation3 + $0x21] sm:$0xff] }
 0x2ea   : > { %v2789_v11 = vpop.f32.mrf.mxu0 }
 0x2eb   : > { %v2865_v52 = vadd.f32 %v2789_v11, %v12212_v22  ;;  %v12579_v54 = vpop.f32.mrf.mxu3 }
 0x2ec   : > { %v2998_v1 = vld [vmem:[#allocation3 + $0x20] sm:$0xff] }
 0x2ed   : > { %v2901_v45 = vadd.f32 %v12538_v31, %v2865_v52  ;;  %v12576_v52 = vpop.f32.mrf.mxu2  ;;  %v3377_v17 = vld [vmem:[#allocation3 + $0x1a] sm:$0xff] }
 0x2ee   : > { %v3046_v20 = vld [vmem:[#allocation3 + $0x19] sm:$0xff] }
 0x2ef   : > { %v2933_v22 = vmax.f32 %v2901_v45, 0.0  ;;  %v2997_v45 = vld [vmem:[#allocation3 + $0x18] sm:$0xff] }
 0x2f0   : > { %v12583_v14 = vpack.c.bf16 %v2998_v1, %v2997_v45  ;;  %v2694_v45 = vld [vmem:[#allocation2 + $0x13a] sm:$0xff]  ;;  %v2695_v1 = vld [vmem:[#allocation2 + $0x142] sm:$0xff] }
 0x2f1   : > { %2966 = vst.msk [vmem:[#allocation3 + $0x39] sm:$0xff] %vm880_vm5, %v2933_v22  ;;  %v12589_v22 = vpack.c.bf16 %v3047_v19, %v3046_v20 }
 0x2f2   : > { %v2792_v11 = vpop.f32.mrf.mxu0  ;;  %9885 = vmatmul.msk.bf16.gmra.mxu2 %vm880_vm5, %v12583_v14 }
 0x2f3   : > { %v2866_v9 = vadd.f32 %v2792_v11, %v12223_v4  ;;  %15288 = vst [vmem:[#allocation42_spill] sm:$0xff] %v12589_v22  ;;  %v12593_v11 = vpack.c.bf16 %v3378_v39, %v3377_v17  ;;  %v2999_v39 = vld [vmem:[#allocation3 + $0x30] sm:$0xff] }
 0x2f5   : > { %v2902_v37 = vadd.f32 %v12538_v31, %v2866_v9  ;;  %9861 = vmatmul.msk.bf16.gmra.mxu0 %vm834_vm1, %v2714_v51  ;;  %v12591_v51 = vpop.f32.mrf.mxu2  ;;  %15289 = vst [vmem:[#allocation43_spill] sm:$0xff] %v12593_v11 }
 0x2f6   : > { %9902 = vmatmul.msk.bf16.gmra.mxu3 %vm880_vm5, %v12593_v11 }
 0x2f7   : > { %v2934_v55 = vmax.f32 %v2902_v37, 0.0  ;;  %v12596_v37 = vpop.f32.mrf.mxu3 }
 0x2f8   : > { %9869 = vmatmul.msk.bf16.gmra.mxu1 %vm880_vm5, %v12589_v22  ;;  %v3049_v11 = vld [vmem:[#allocation3 + $0x39] sm:$0xff] }
 0x2f9   : > { %2967 = vst.msk [vmem:[#allocation3 + $0x49] sm:$0xff] %vm880_vm5, %v2934_v55  ;;  %v3000_v55 = vld [vmem:[#allocation3 + $0x38] sm:$0xff] }
 0x2fa   : > { %v2794_v4 = vpop.f32.mrf.mxu0 }
 0x2fb   : > { %v2867_v8 = vadd.f32 %v2794_v4, %v12226_v32  ;;  %v2715_v32 = vpack.c.bf16 %v2695_v1, %v2694_v45  ;;  %v12604_v4 = vpack.c.bf16 %v3000_v55, %v2999_v39  ;;  %v3048_v1 = vld [vmem:[#allocation3 + $0x31] sm:$0xff]  ;;  %v2696_v39 = vld [vmem:[#allocation2 + $0x152] sm:$0xff] }
 0x2fd   : > { %v2903_v9 = vadd.f32 %v12538_v31, %v2867_v8  ;;  %v12608_v8 = vpop.f32.mrf.mxu2 }
 0x2fe   : > { %15290 = vst [vmem:[#allocation44_spill] sm:$0xff] %v12608_v8 }
 0x2ff   : > { %v2935_v3 = vmax.f32 %v2903_v9, 0.0  ;;  %v12610_v22 = vpop.f32.mrf.mxu3 }
 0x300   : > { %15291 = vst [vmem:[#allocation45_spill] sm:$0xff] %v12610_v22 }
 0x301   : > { %2968 = vst.msk [vmem:[#allocation3 + $0x51] sm:$0xff] %vm880_vm5, %v2935_v3  ;;  %v3379_v3 = vld [vmem:[#allocation3 + $0x32] sm:$0xff] }
 0x302   : > { %v2797_v19 = vpop.f32.mrf.mxu0  ;;  %9886 = vmatmul.msk.bf16.gmra.mxu2 %vm880_vm5, %v12604_v4 }
 0x303   : > { %v2868_v17 = vadd.f32 %v2797_v19, %v12237_v18  ;;  %v3380_v18 = vld [vmem:[#allocation3 + $0x3a] sm:$0xff]  ;;  %v12616_v19 = vpack.c.bf16 %v3049_v11, %v3048_v1  ;;  %v3001_v1 = vld [vmem:[#allocation3 + $0x48] sm:$0xff] }
 0x305   : > { %v2904_v20 = vadd.f32 %v12538_v31, %v2868_v17  ;;  %9862 = vmatmul.msk.bf16.gmra.mxu0 %vm834_vm1, %v2715_v32  ;;  %15292 = vst [vmem:[#allocation46_spill] sm:$0xff] %v12616_v19  ;;  %v12618_v32 = vpack.c.bf16 %v3380_v18, %v3379_v3  ;;  %v12625_v22 = vpop.f32.mrf.mxu2 }
 0x307   : > { %v2936_v9 = vmax.f32 %v2904_v20, 0.0  ;;  %v2697_v20 = vld [vmem:[#allocation2 + $0x15a] sm:$0xff]  ;;  %9903 = vmatmul.msk.bf16.gmra.mxu3 %vm880_vm5, %v12618_v32  ;;  %v12630_v11 = vpop.f32.mrf.mxu3 }
 0x308   : > { %9870 = vmatmul.msk.bf16.gmra.mxu1 %vm880_vm5, %v12616_v19  ;;  %v3002_v3 = vld [vmem:[#allocation3 + $0x50] sm:$0xff] }
 0x309   : > { %2969 = vst.msk [vmem:[#allocation3 + $0x61] sm:$0xff] %vm880_vm5, %v2936_v9  ;;  %v2648_v9 = vadd.f32 %v12329_v12, %v12239_v26 }
 0x30a   : > { %v2799_v45 = vpop.f32.mrf.mxu0 }
 0x30b   : > { %v2869_v55 = vadd.f32 %v2799_v45, %v12246_v36  ;;  %v2716_v36 = vpack.c.bf16 %v2697_v20, %v2696_v39  ;;  %v3051_v39 = vld [vmem:[#allocation3 + $0x51] sm:$0xff] }
 0x30c   : > { %v3381_v20 = vld [vmem:[#allocation3 + $0x4a] sm:$0xff] }
 0x30d   : > { %v2905_v17 = vadd.f32 %v12538_v31, %v2869_v55  ;;  %v2204_v55 = vadd.f32 %v12244_v5, %v12242_v34  ;;  %v12643_v5 = vpop.f32.mrf.mxu2 }
 0x30f   : > { %v2937_v8 = vmax.f32 %v2905_v17, 0.0  ;;  %v12634_v17 = vpack.c.bf16 %v3002_v3, %v3001_v1  ;;  %v2427_v12 = vadd.f32 %v12324_v50, %v2204_v55  ;;  %v3050_v3 = vld [vmem:[#allocation3 + $0x49] sm:$0xff]  ;;  %v2698_v1 = vld [vmem:[#allocation2 + $0x16a] sm:$0xff] }
 0x310   : > { %v2699_v55 = vld [vmem:[#allocation2 + $0x172] sm:$0xff] }
 0x311   : > { %2970 = vst.msk [vmem:[#allocation3 + $0x69] sm:$0xff] %vm880_vm5, %v2937_v8  ;;  %v2649_v8 = vadd.f32 %v12338_v13, %v2427_v12 }
 0x312   : > { %v2802_v18 = vpop.f32.mrf.mxu0  ;;  %9887 = vmatmul.msk.bf16.gmra.mxu2 %vm880_vm5, %v12634_v17 }
 0x313   : > { %v2870_v45 = vadd.f32 %v2802_v18, %v2648_v9  ;;  %v3382_v9 = vld [vmem:[#allocation3 + $0x52] sm:$0xff] }
 0x314   : > { %v12649_v50 = vpack.c.bf16 %v3382_v9, %v3381_v20 }
 0x315   : > { %v2906_v26 = vadd.f32 %v12538_v31, %v2870_v45  ;;  %9863 = vmatmul.msk.bf16.gmra.mxu0 %vm834_vm1, %v2716_v36  ;;  %v12645_v45 = vpop.f32.mrf.mxu3  ;;  %v12647_v36 = vpack.c.bf16 %v3051_v39, %v3050_v3  ;;  %v2206_v3 = vadd.f32 %v12262_v57, %v12260_v42 }
 0x317   : > { %v2938_v19 = vmax.f32 %v2906_v26, 0.0  ;;  %9904 = vmatmul.msk.bf16.gmra.mxu3 %vm880_vm5, %v12649_v50 }
 0x318   : > { %9871 = vmatmul.msk.bf16.gmra.mxu1 %vm880_vm5, %v12647_v36  ;;  %v3004_v39 = vld [vmem:[#allocation3 + $0x68] sm:$0xff] }
 0x319   : > { %2971 = vst.msk [vmem:[#allocation3 + $0x79] sm:$0xff] %vm880_vm5, %v2938_v19  ;;  %v2428_v19 = vadd.f32 %v12336_v7, %v12251_v41  ;;  %v12662_v41 = vpop.f32.mrf.mxu2  ;;  %v3383_v42 = vld [vmem:[#allocation3 + $0x62] sm:$0xff]  ;;  %v3384_v57 = vld [vmem:[#allocation3 + $0x6a] sm:$0xff] }
 0x31a   : > { %v2804_v34 = vpop.f32.mrf.mxu0 }
 0x31b   : > { %v2871_v18 = vadd.f32 %v2804_v34, %v2649_v8  ;;  %v2650_v12 = vadd.f32 %v12346_v46, %v2428_v19  ;;  %v2717_v8 = vpack.c.bf16 %v2699_v55, %v2698_v1  ;;  %v3003_v34 = vld [vmem:[#allocation3 + $0x60] sm:$0xff]  ;;  %v3053_v19 = vld [vmem:[#allocation3 + $0x69] sm:$0xff] }
 0x31c   : > { %v12664_v7 = vpack.c.bf16 %v3004_v39, %v3003_v34 }
 0x31d   : > { %v2907_v13 = vadd.f32 %v12538_v31, %v2871_v18  ;;  %v12668_v46 = vpop.f32.mrf.mxu3 }
 0x31f   : > { %v2939_v26 = vmax.f32 %v2907_v13, 0.0  ;;  %v2429_v13 = vadd.f32 %v12344_v23, %v2206_v3 }
 0x321   : > { %2972 = vst.msk [vmem:[#allocation3 + $0x81] sm:$0xff] %vm880_vm5, %v2939_v26  ;;  %v2651_v55 = vadd.f32 %v12356_v33, %v2429_v13  ;;  %v2430_v33 = vadd.f32 %v12353_v24, %v12267_v47  ;;  %v2208_v47 = vadd.f32 %v12278_v16, %v12276_v60 }
 0x322   : > { %v2807_v20 = vpop.f32.mrf.mxu0  ;;  %9888 = vmatmul.msk.bf16.gmra.mxu2 %vm880_vm5, %v12664_v7 }
 0x323   : > { %v2872_v9 = vadd.f32 %v2807_v20, %v2650_v12  ;;  %v3052_v12 = vld [vmem:[#allocation3 + $0x61] sm:$0xff] }
 0x324   : > { %v12675_v20 = vpack.c.bf16 %v3053_v19, %v3052_v12  ;;  %v3005_v19 = vld [vmem:[#allocation3 + $0x78] sm:$0xff] }
 0x325   : > { %v2908_v18 = vadd.f32 %v12538_v31, %v2872_v9  ;;  %9864 = vmatmul.msk.bf16.gmra.mxu0 %vm834_vm1, %v2717_v8  ;;  %v12677_v8 = vpack.c.bf16 %v3384_v57, %v3383_v42  ;;  %v12682_v9 = vpop.f32.mrf.mxu2  ;;  %v12684_v3 = vpop.f32.mrf.mxu3 }
 0x327   : > { %v2940_v1 = vmax.f32 %v2908_v18, 0.0  ;;  %v2652_v18 = vadd.f32 %v12372_v40, %v2430_v33  ;;  %9905 = vmatmul.msk.bf16.gmra.mxu3 %vm880_vm5, %v12677_v8  ;;  %v2431_v40 = vadd.f32 %v12368_v58, %v2208_v47 }
 0x328   : > { %9872 = vmatmul.msk.bf16.gmra.mxu1 %vm880_vm5, %v12675_v20  ;;  %v3006_v13 = vld [vmem:[#allocation3 + $0x80] sm:$0xff] }
 0x329   : > { %2973 = vst.msk [vmem:[#allocation3 + $0x91] sm:$0xff] %vm880_vm5, %v2940_v1  ;;  %v12694_v24 = vpack.c.bf16 %v3006_v13, %v3005_v19  ;;  %v3385_v16 = vld [vmem:[#allocation3 + $0x7a] sm:$0xff]  ;;  %v2702_v13 = vld [vmem:[#allocation2 + $0x19a] sm:$0xff] }
 0x32a   : > { %v2809_v26 = vpop.f32.mrf.mxu0 }
 0x32b   : > { %v2873_v39 = vadd.f32 %v2809_v26, %v2651_v55  ;;  %v2653_v26 = vadd.f32 %v12408_v29, %v2431_v40 }
 0x32d   : > { %v2909_v23 = vadd.f32 %v12538_v31, %v2873_v39  ;;  %v12701_v12 = vpop.f32.mrf.mxu2  ;;  %v3055_v39 = vld [vmem:[#allocation3 + $0x81] sm:$0xff]  ;;  %v12706_v60 = vpop.f32.mrf.mxu3 }
 0x32f   : > { %v2941_v34 = vmax.f32 %v2909_v23, 0.0  ;;  %v3386_v23 = vld [vmem:[#allocation3 + $0x82] sm:$0xff] }
 0x330   : > { %v12710_v58 = vpack.c.bf16 %v3386_v23, %v3385_v16 }
 0x331   : > { %2974 = vst.msk [vmem:[#allocation3 + $0x99] sm:$0xff] %vm880_vm5, %v2941_v34  ;;  %v3054_v34 = vld [vmem:[#allocation3 + $0x79] sm:$0xff] }
 0x332   : > { %v2812_v1 = vpop.f32.mrf.mxu0  ;;  %9889 = vmatmul.msk.bf16.gmra.mxu2 %vm880_vm5, %v12694_v24 }
 0x333   : > { %v2874_v55 = vadd.f32 %v2812_v1, %v2652_v18  ;;  %v12708_v18 = vpack.c.bf16 %v3055_v39, %v3054_v34  ;;  %v2703_v1 = vld [vmem:[#allocation2 + $0x1a2] sm:$0xff] }
 0x335   : > { %v2910_v42 = vadd.f32 %v12538_v31, %v2874_v55  ;;  %9865 = vmatmul.msk.bf16.gmra.mxu0 %vm834_vm1, %v12280_v0  ;;  %v2432_v55 = vadd.f32 %v12404_v49, %v12284_v10  ;;  %v12723_v16 = vpop.f32.mrf.mxu3  ;;  %v3007_v10 = vld [vmem:[#allocation3 + $0x90] sm:$0xff]  ;;  %v2210_v49 = vadd.f32 %v12293_v28, %v12291_v56 }
 0x336   : > { %v3056_v28 = vld [vmem:[#allocation3 + $0x91] sm:$0xff] }
 0x337   : > { %v2942_v57 = vmax.f32 %v2910_v42, 0.0  ;;  %v2654_v47 = vadd.f32 %v12438_v35, %v2432_v55  ;;  %9906 = vmatmul.msk.bf16.gmra.mxu3 %vm880_vm5, %v12710_v58  ;;  %v2719_v42 = vpack.c.bf16 %v2703_v1, %v2702_v13 }
 0x338   : > { %9873 = vmatmul.msk.bf16.gmra.mxu1 %vm880_vm5, %v12708_v18  ;;  %v3008_v40 = vld [vmem:[#allocation3 + $0x98] sm:$0xff] }
 0x339   : > { %2975 = vst.msk [vmem:[#allocation3 + $0xa9] sm:$0xff] %vm880_vm5, %v2942_v57  ;;  %v12727_v23 = vpack.c.bf16 %v3008_v40, %v3007_v10  ;;  %v3387_v13 = vld [vmem:[#allocation3 + $0x92] sm:$0xff]  ;;  %v3388_v1 = vld [vmem:[#allocation3 + $0x9a] sm:$0xff]  ;;  %v2434_v40 = vadd.f32 %v12462_v48, %v12297_v59 }
 0x33a   : > { %v2814_v33 = vpop.f32.mrf.mxu0 }
 0x33b   : > { %v2875_v0 = vadd.f32 %v2814_v33, %v2653_v26  ;;  %v12721_v26 = vpop.f32.mrf.mxu2  ;;  %v2433_v33 = vadd.f32 %v12434_v25, %v2210_v49 }
 0x33d   : > { %v2911_v29 = vadd.f32 %v12538_v31, %v2875_v0  ;;  %v2655_v0 = vadd.f32 %v12469_v2, %v2433_v33  ;;  %v12743_v2 = vpop.f32.mrf.mxu3 }
 0x33f   : > { %v2943_v19 = vmax.f32 %v2911_v29, 0.0  ;;  %v3057_v29 = vld [vmem:[#allocation3 + $0x99] sm:$0xff] }
 0x340   : > { %v3009_v33 = vld [vmem:[#allocation3 + $0xa8] sm:$0xff] }
 0x341   : > { %2976 = vst.msk [vmem:[#allocation3 + $0xb1] sm:$0xff] %vm880_vm5, %v2943_v19  ;;  %v12736_v19 = vpack.c.bf16 %v3057_v29, %v3056_v28 }
 0x342   : > { %v2817_v57 = vpop.f32.mrf.mxu0  ;;  %9890 = vmatmul.msk.bf16.gmra.mxu2 %vm880_vm5, %v12727_v23 }
 0x343   : > { %v2876_v39 = vadd.f32 %v2817_v57, %v2654_v47  ;;  %v12738_v47 = vpop.f32.mrf.mxu2 }
 0x345   : > { %v2912_v35 = vadd.f32 %v12538_v31, %v2876_v39  ;;  %9866 = vmatmul.msk.bf16.gmra.mxu0 %vm834_vm1, %v2719_v42  ;;  %v12740_v42 = vpack.c.bf16 %v3388_v1, %v3387_v13  ;;  %v2656_v39 = vadd.f32 %v12502_v6, %v2434_v40  ;;  %v12763_v13 = vpop.f32.mrf.mxu3  ;;  %vm7028_vm1 = vcmask 261120  }
 0x347   : > { %v2944_v34 = vmax.f32 %v2912_v35, 0.0  ;;  %9907 = vmatmul.msk.bf16.gmra.mxu3 %vm880_vm5, %v12740_v42 }
 0x348   : > { %9874 = vmatmul.msk.bf16.gmra.mxu1 %vm880_vm5, %v12736_v19  ;;  %v3010_v10 = vld [vmem:[#allocation3 + $0xb0] sm:$0xff] }
 0x349   : > { %2977 = vst.msk [vmem:[#allocation3 + $0xc1] sm:$0xff] %vm880_vm5, %v2944_v34  ;;  %v2212_v34 = vadd.f32 %v12303_v53, %v12301_v21  ;;  %v3389_v21 = vld [vmem:[#allocation3 + $0xaa] sm:$0xff]  ;;  %v3390_v53 = vld [vmem:[#allocation3 + $0xb2] sm:$0xff] }
 0x34a   : > { %v2819_v56 = vpop.f32.mrf.mxu0 }
 0x34b   : > { %v2877_v55 = vadd.f32 %v2819_v56, %v2655_v0  ;;  %v12755_v0 = vpack.c.bf16 %v3010_v10, %v3009_v33  ;;  %v2435_v6 = vadd.f32 %v12497_v43, %v2212_v34  ;;  %v12761_v48 = vpop.f32.mrf.mxu2  ;;  %v3059_v56 = vld [vmem:[#allocation3 + $0xb1] sm:$0xff]  ;;  %v12771_v43 = vpack.c.bf16 %v3390_v53, %v3389_v21 }
 0x34d   : > { %v2913_v25 = vadd.f32 %v12538_v31, %v2877_v55  ;;  %v2657_v1 = vadd.f32 %v12526_v44, %v2435_v6  ;;  %v3058_v55 = vld [vmem:[#allocation3 + $0xa9] sm:$0xff]  ;;  %v2436_v44 = vadd.f32 %v12522_v15, %v12306_v38  ;;  %v2214_v38 = vadd.f32 %v12312_v63, %v12310_v62  ;;  %v12788_v15 = vpop.f32.mrf.mxu1 }
 0x34f   : > { %v2945_v57 = vmax.f32 %v2913_v25, 0.0  ;;  %v12769_v25 = vpack.c.bf16 %v3059_v56, %v3058_v55 }
 0x350   : > { %v3060_v55 = vld [vmem:[#allocation3 + $0xc1] sm:$0xff] }
 0x351   : > { %2978 = vst.msk [vmem:[#allocation3 + $0xc9] sm:$0xff] %vm880_vm5, %v2945_v57 }
 0x352   : > { %v2822_v49 = vpop.f32.mrf.mxu0  ;;  %9891 = vmatmul.msk.bf16.gmra.mxu2 %vm880_vm5, %v12755_v0 }
 0x353   : > { %v2878_v35 = vadd.f32 %v2822_v49, %v2656_v39  ;;  %v2658_v39 = vadd.f32 %v12559_v61, %v2436_v44  ;;  %v12779_v10 = vpop.f32.mrf.mxu2  ;;  %v12784_v49 = vpop.f32.mrf.mxu3 }
 0x355   : > { %v2914_v59 = vadd.f32 %v12538_v31, %v2878_v35  ;;  %9918 = vmatmul.msk.bf16.vlgmr.msrb.gmra.mxu0 %vm880_vm5, %v12583_v14 }
 0x357   : > { %v2946_v29 = vmax.f32 %v2914_v59, 0.0  ;;  %9908 = vmatmul.msk.bf16.gmra.mxu3 %vm880_vm5, %v12771_v43  ;;  %v3011_v59 = vld [vmem:[#allocation3 + $0xc0] sm:$0xff] }
 0x358   : > { %9875 = vmatmul.msk.bf16.gmra.mxu1 %vm880_vm5, %v12769_v25  ;;  %v3012_v35 = vld [vmem:[#allocation3 + $0xc8] sm:$0xff] }
 0x359   : > { %2979 = vst.msk [vmem:[#allocation3 + $0xd9] sm:$0xff] %vm880_vm5, %v2946_v29  ;;  %v12790_v6 = vpack.c.bf16 %v3012_v35, %v3011_v59  ;;  %v2437_v29 = vadd.f32 %v12556_v30, %v2214_v38  ;;  %v3061_v53 = vld [vmem:[#allocation3 + $0xc9] sm:$0xff]  ;;  %v2438_v35 = vadd.f32 %v12576_v52, %v12315_v27 }
 0x35a   : > { %v2824_v28 = vpop.f32.mrf.mxu0  ;;  %v3391_v62 = vld [vmem:[#allocation3 + $0xc2] sm:$0xff]  ;;  %v3392_v63 = vld [vmem:[#allocation3 + $0xca] sm:$0xff]  ;;  %v12802_v44 = vpack.c.bf16 %v3061_v53, %v3060_v55 }
 0x35b   : > { %v2879_v14 = vadd.f32 %v2824_v28, %v2657_v1  ;;  %v2659_v56 = vadd.f32 %v12579_v54, %v2437_v29  ;;  %v3295_v21 = vpop.f32.mrf.mxu2  ;;  %v15294_v53 = vld [vmem:[#allocation26_spill] sm:$0xff] }
 0x35d   : > { %v2915_v40 = vadd.f32 %v12538_v31, %v2879_v14 }
 0x35f   : > { %v2947_v57 = vmax.f32 %v2915_v40, 0.0  ;;  %v12800_v40 = vpop.f32.mrf.mxu3 }
 0x361   : > { %2980 = vst.msk [vmem:[#allocation3 + $0xe1] sm:$0xff] %vm880_vm5, %v2947_v57  ;;  %v12804_v57 = vpack.c.bf16 %v3392_v63, %v3391_v62 }
 0x362   : > { %v2827_v33 = vpop.f32.mrf.mxu0  ;;  %9892 = vmatmul.msk.bf16.gmra.mxu2 %vm880_vm5, %v12790_v6 }
 0x363   : > { %v2880_v34 = vadd.f32 %v2827_v33, %v2658_v39 }
 0x365   : > { %v2916_v61 = vadd.f32 %v12538_v31, %v2880_v34  ;;  %9919 = vmatmul.msk.bf16.gmra.mxu0 %vm880_vm5, %v12604_v4  ;;  %v3155_v30 = vpop.f32.mrf.mxu1  ;;  %v2660_v34 = vadd.f32 %v12596_v37, %v2438_v35 }
 0x366   : > { %v3296_v39 = vadd.f32 %v3295_v21, %v3155_v30  ;;  %v15293_v21 = vld [vmem:[#allocation28_spill] sm:$0xff]  ;;  %v15295_v30 = vld [vmem:[#allocation45_spill] sm:$0xff] }
 0x367   : > { %v2948_v1 = vmax.f32 %v2916_v61, 0.0  ;;  %9909 = vmatmul.msk.bf16.gmra.mxu3 %vm880_vm5, %v12804_v57  ;;  %v3297_v61 = vpop.f32.mrf.mxu2  ;;  %v2216_v27 = vadd.f32 %v15294_v53, %v15293_v21 }
 0x368   : > { %9876 = vmatmul.msk.bf16.gmra.mxu1 %vm880_vm5, %v12802_v44  ;;  %v3014_v59 = vld [vmem:[#allocation3 + $0xe0] sm:$0xff] }
 0x369   : > { %2981 = vst.msk [vmem:[#allocation3 + $0xf1] sm:$0xff] %vm880_vm5, %v2948_v1  ;;  %v3485_v1 = vpop.f32.mrf.mxu3  ;;  %v2439_v55 = vadd.f32 %v12591_v51, %v2216_v27  ;;  %v3063_v35 = vld [vmem:[#allocation3 + $0xe1] sm:$0xff] }
 0x36a   : > { %v2829_v28 = vpop.f32.mrf.mxu0  ;;  %v12817_v52 = vadd.f32 %v3485_v1, %v3296_v39  ;;  %v3393_v39 = vld [vmem:[#allocation3 + $0xda] sm:$0xff] }
 0x36b   : > { %v2881_v14 = vadd.f32 %v2829_v28, %v2659_v56  ;;  %v3013_v56 = vld [vmem:[#allocation3 + $0xd8] sm:$0xff] }
 0x36c   : > { %v12819_v63 = vpack.c.bf16 %v3014_v59, %v3013_v56  ;;  %v3062_v59 = vld [vmem:[#allocation3 + $0xd9] sm:$0xff] }
 0x36d   : > { %v2917_v54 = vadd.f32 %v12538_v31, %v2881_v14  ;;  %v3157_v62 = vpop.f32.mrf.mxu1  ;;  %v12829_v1 = vpack.c.bf16 %v3063_v35, %v3062_v59  ;;  %v15298_v59 = vld [vmem:[#allocation27_spill] sm:$0xff] }
 0x36e   : > { %v3298_v28 = vadd.f32 %v3297_v61, %v3157_v62  ;;  %v15296_v62 = vld [vmem:[#allocation30_spill] sm:$0xff] }
 0x36f   : > { %v2949_v33 = vmax.f32 %v2917_v54, 0.0  ;;  %v2661_v54 = vadd.f32 %v15295_v30, %v2439_v55 }
 0x371   : > { %2982 = vst.msk [vmem:[#allocation3 + $0xf9] sm:$0xff] %vm880_vm5, %v2949_v33  ;;  %v3394_v33 = vld [vmem:[#allocation3 + $0xe2] sm:$0xff] }
 0x372   : > { %v2832_v38 = vpop.f32.mrf.mxu0  ;;  %9893 = vmatmul.msk.bf16.gmra.mxu2 %vm880_vm5, %v12819_v63  ;;  %v12833_v21 = vpack.c.bf16 %v3394_v33, %v3393_v39 }
 0x373   : > { %v2882_v29 = vadd.f32 %v2832_v38, %v2660_v34 }
 0x375   : > { %v2918_v37 = vadd.f32 %v12538_v31, %v2882_v29  ;;  %9920 = vmatmul.msk.bf16.gmra.mxu0 %vm880_vm5, %v12634_v17  ;;  %v3487_v29 = vpop.f32.mrf.mxu3  ;;  %v3300_v61 = vpop.f32.mrf.mxu2 }
 0x376   : > { %v12831_v56 = vadd.f32 %v3487_v29, %v3298_v28  ;;  %v3160_v51 = vpop.f32.mrf.mxu1 }
 0x377   : > { %v2950_v14 = vmax.f32 %v2918_v37, 0.0  ;;  %v3301_v27 = vadd.f32 %v3300_v61, %v3160_v51  ;;  %v15297_v37 = vld [vmem:[#allocation44_spill] sm:$0xff]  ;;  %9910 = vmatmul.msk.bf16.gmra.mxu3 %vm880_vm5, %v12833_v21 }
 0x378   : > { %v2440_v55 = vadd.f32 %v15297_v37, %v15296_v62  ;;  %9877 = vmatmul.msk.bf16.gmra.mxu1 %vm880_vm5, %v12829_v1  ;;  %v3016_v28 = vld [vmem:[#allocation3 + $0xf8] sm:$0xff] }
 0x379   : > { %2983 = vst.msk [vmem:[#allocation3 + $0x109] sm:$0xff] %vm880_vm5, %v2950_v14 }
 0x37a   : > { %v2834_v34 = vpop.f32.mrf.mxu0  ;;  %v2662_v30 = vadd.f32 %v12630_v11, %v2440_v55 }
 0x37b   : > { %v2883_v38 = vadd.f32 %v2834_v34, %v2661_v54  ;;  %v3015_v34 = vld [vmem:[#allocation3 + $0xf0] sm:$0xff] }
 0x37d   : > { %v2919_v53 = vadd.f32 %v12538_v31, %v2883_v38  ;;  %v3490_v39 = vpop.f32.mrf.mxu3  ;;  %v3302_v33 = vpop.f32.mrf.mxu2  ;;  %v15299_v38 = vld [vmem:[#allocation29_spill] sm:$0xff] }
 0x37e   : > { %v2218_v29 = vadd.f32 %v15299_v38, %v15298_v59  ;;  %v12846_v61 = vadd.f32 %v3490_v39, %v3301_v27  ;;  %v3162_v51 = vpop.f32.mrf.mxu1  ;;  %v3395_v27 = vld [vmem:[#allocation3 + $0xf2] sm:$0xff] }
 0x37f   : > { %v2951_v14 = vmax.f32 %v2919_v53, 0.0  ;;  %v12848_v53 = vpack.c.bf16 %v3016_v28, %v3015_v34  ;;  %v3303_v62 = vadd.f32 %v3302_v33, %v3162_v51  ;;  %v3396_v28 = vld [vmem:[#allocation3 + $0xfa] sm:$0xff]  ;;  %v3064_v39 = vld [vmem:[#allocation3 + $0xf1] sm:$0xff] }
 0x380   : > { %v2441_v37 = vadd.f32 %v12625_v22, %v2218_v29  ;;  %v12862_v29 = vpack.c.bf16 %v3396_v28, %v3395_v27 }
 0x381   : > { %2984 = vst.msk [vmem:[#allocation3 + $0x111] sm:$0xff] %vm880_vm5, %v2951_v14 }
 0x382   : > { %v2837_v54 = vpop.f32.mrf.mxu0  ;;  %v2663_v14 = vadd.f32 %v12645_v45, %v2441_v37  ;;  %9894 = vmatmul.msk.bf16.gmra.mxu2 %vm880_vm5, %v12848_v53 }
 0x383   : > { %v2884_v35 = vadd.f32 %v2837_v54, %v2662_v30  ;;  %v3065_v30 = vld [vmem:[#allocation3 + $0xf9] sm:$0xff] }
 0x384   : > { %v12858_v59 = vpack.c.bf16 %v3065_v30, %v3064_v39  ;;  %v3017_v39 = vld [vmem:[#allocation3 + $0x108] sm:$0xff] }
 0x385   : > { %v2920_v11 = vadd.f32 %v12538_v31, %v2884_v35  ;;  %9921 = vmatmul.msk.bf16.gmra.mxu0 %vm880_vm5, %v12664_v7  ;;  %v3492_v34 = vpop.f32.mrf.mxu3  ;;  %v3305_v33 = vpop.f32.mrf.mxu2 }
 0x386   : > { %15300 = vst [vmem:[#allocation28_spill] sm:$0xff] %v12858_v59  ;;  %v12860_v38 = vadd.f32 %v3492_v34, %v3303_v62  ;;  %v3165_v22 = vpop.f32.mrf.mxu1  ;;  %v15303_v34 = vld [vmem:[#allocation35_spill] sm:$0xff] }
 0x387   : > { %v2952_v55 = vmax.f32 %v2920_v11, 0.0  ;;  %v3306_v51 = vadd.f32 %v3305_v33, %v3165_v22  ;;  %v15301_v11 = vld [vmem:[#allocation33_spill] sm:$0xff]  ;;  %9911 = vmatmul.msk.bf16.gmra.mxu3 %vm880_vm5, %v12862_v29 }
 0x388   : > { %v2442_v37 = vadd.f32 %v12643_v5, %v15301_v11  ;;  %9878 = vmatmul.msk.bf16.gmra.mxu1 %vm880_vm5, %v12858_v59  ;;  %v3018_v62 = vld [vmem:[#allocation3 + $0x110] sm:$0xff] }
 0x389   : > { %2985 = vst.msk [vmem:[#allocation3 + $0x121] sm:$0xff] %vm880_vm5, %v2952_v55 }
 0x38a   : > { %v2839_v54 = vpop.f32.mrf.mxu0 }
 0x38b   : > { %v2885_v35 = vadd.f32 %v2839_v54, %v2663_v14  ;;  %v2664_v14 = vadd.f32 %v12668_v46, %v2442_v37 }
 0x38d   : > { %v2921_v45 = vadd.f32 %v12538_v31, %v2885_v35  ;;  %v3495_v28 = vpop.f32.mrf.mxu3  ;;  %v3307_v54 = vpop.f32.mrf.mxu2  ;;  %v15302_v35 = vld [vmem:[#allocation31_spill] sm:$0xff] }
 0x38e   : > { %v2220_v5 = vadd.f32 %v15303_v34, %v15302_v35  ;;  %v12875_v33 = vadd.f32 %v3495_v28, %v3306_v51  ;;  %v3167_v22 = vpop.f32.mrf.mxu1  ;;  %v3397_v51 = vld [vmem:[#allocation3 + $0x10a] sm:$0xff] }
 0x38f   : > { %v2953_v55 = vmax.f32 %v2921_v45, 0.0  ;;  %v12877_v45 = vpack.c.bf16 %v3018_v62, %v3017_v39  ;;  %v3308_v11 = vadd.f32 %v3307_v54, %v3167_v22  ;;  %v3398_v62 = vld [vmem:[#allocation3 + $0x112] sm:$0xff]  ;;  %v3066_v39 = vld [vmem:[#allocation3 + $0x109] sm:$0xff] }
 0x390   : > { %v2443_v37 = vadd.f32 %v12662_v41, %v2220_v5  ;;  %v12891_v5 = vpack.c.bf16 %v3398_v62, %v3397_v51 }
 0x391   : > { %2986 = vst.msk [vmem:[#allocation3 + $0x129] sm:$0xff] %vm880_vm5, %v2953_v55 }
 0x392   : > { %v2842_v30 = vpop.f32.mrf.mxu0  ;;  %9895 = vmatmul.msk.bf16.gmra.mxu2 %vm880_vm5, %v12877_v45 }
 0x393   : > { %v2886_v27 = vadd.f32 %v2842_v30, %v2664_v14  ;;  %v2665_v14 = vadd.f32 %v12684_v3, %v2443_v37  ;;  %v3067_v30 = vld [vmem:[#allocation3 + $0x111] sm:$0xff] }
 0x394   : > { %v12887_v34 = vpack.c.bf16 %v3067_v30, %v3066_v39  ;;  %v15305_v37 = vld [vmem:[#allocation32_spill] sm:$0xff]  ;;  %v3019_v39 = vld [vmem:[#allocation3 + $0x120] sm:$0xff] }
 0x395   : > { %v2922_v46 = vadd.f32 %v12538_v31, %v2886_v27  ;;  %9922 = vmatmul.msk.bf16.gmra.mxu0 %vm880_vm5, %v12694_v24  ;;  %v3497_v35 = vpop.f32.mrf.mxu3  ;;  %v3310_v54 = vpop.f32.mrf.mxu2 }
 0x396   : > { %15304 = vst [vmem:[#allocation26_spill] sm:$0xff] %v12887_v34  ;;  %v12889_v22 = vadd.f32 %v3497_v35, %v3308_v11  ;;  %v3170_v41 = vpop.f32.mrf.mxu1  ;;  %v15307_v35 = vld [vmem:[#allocation36_spill] sm:$0xff] }
 0x397   : > { %v2954_v55 = vmax.f32 %v2922_v46, 0.0  ;;  %v3311_v46 = vadd.f32 %v3310_v54, %v3170_v41  ;;  %9912 = vmatmul.msk.bf16.gmra.mxu3 %vm880_vm5, %v12891_v5 }
 0x398   : > { %9879 = vmatmul.msk.bf16.gmra.mxu1 %vm880_vm5, %v12887_v34  ;;  %v3020_v11 = vld [vmem:[#allocation3 + $0x128] sm:$0xff] }
 0x399   : > { %2987 = vst.msk [vmem:[#allocation3 + $0x139] sm:$0xff] %vm880_vm5, %v2954_v55  ;;  %v2444_v55 = vadd.f32 %v12682_v9, %v15305_v37 }
 0x39a   : > { %v2844_v28 = vpop.f32.mrf.mxu0 }
 0x39b   : > { %v2887_v27 = vadd.f32 %v2844_v28, %v2665_v14  ;;  %v2666_v14 = vadd.f32 %v12706_v60, %v2444_v55 }
 0x39d   : > { %v2923_v3 = vadd.f32 %v12538_v31, %v2887_v27  ;;  %v3500_v62 = vpop.f32.mrf.mxu3  ;;  %v3312_v28 = vpop.f32.mrf.mxu2  ;;  %v15306_v27 = vld [vmem:[#allocation34_spill] sm:$0xff] }
 0x39e   : > { %v2222_v9 = vadd.f32 %v15307_v35, %v15306_v27  ;;  %v12904_v54 = vadd.f32 %v3500_v62, %v3311_v46  ;;  %v3172_v41 = vpop.f32.mrf.mxu1  ;;  %v3399_v46 = vld [vmem:[#allocation3 + $0x122] sm:$0xff] }
 0x39f   : > { %v2955_v59 = vmax.f32 %v2923_v3, 0.0  ;;  %v12906_v3 = vpack.c.bf16 %v3020_v11, %v3019_v39  ;;  %v3400_v11 = vld [vmem:[#allocation3 + $0x12a] sm:$0xff]  ;;  %v3068_v39 = vld [vmem:[#allocation3 + $0x121] sm:$0xff] }
 0x3a0   : > { %v2445_v37 = vadd.f32 %v12701_v12, %v2222_v9  ;;  %v12920_v9 = vpack.c.bf16 %v3400_v11, %v3399_v46 }
 0x3a1   : > { %2988 = vst.msk [vmem:[#allocation3 + $0x141] sm:$0xff] %vm880_vm5, %v2955_v59  ;;  %v3313_v59 = vadd.f32 %v3312_v28, %v3172_v41 }
 0x3a2   : > { %v2847_v30 = vpop.f32.mrf.mxu0  ;;  %9896 = vmatmul.msk.bf16.gmra.mxu2 %vm880_vm5, %v12906_v3 }
 0x3a3   : > { %v2888_v51 = vadd.f32 %v2847_v30, %v2666_v14  ;;  %v2667_v14 = vadd.f32 %v12723_v16, %v2445_v37  ;;  %v3069_v30 = vld [vmem:[#allocation3 + $0x129] sm:$0xff]  ;;  %v15309_v37 = vld [vmem:[#allocation37_spill] sm:$0xff] }
 0x3a4   : > { %v12916_v35 = vpack.c.bf16 %v3069_v30, %v3068_v39  ;;  %v3021_v39 = vld [vmem:[#allocation3 + $0x138] sm:$0xff] }
 0x3a5   : > { %v2924_v60 = vadd.f32 %v12538_v31, %v2888_v51  ;;  %9923 = vmatmul.msk.bf16.gmra.mxu0 %vm880_vm5, %v12727_v23  ;;  %v3502_v27 = vpop.f32.mrf.mxu3  ;;  %v3315_v28 = vpop.f32.mrf.mxu2 }
 0x3a6   : > { %15308 = vst [vmem:[#allocation45_spill] sm:$0xff] %v12916_v35  ;;  %v12918_v41 = vadd.f32 %v3502_v27, %v3313_v59  ;;  %v3175_v12 = vpop.f32.mrf.mxu1  ;;  %v15311_v27 = vld [vmem:[#allocation39_spill] sm:$0xff] }
 0x3a7   : > { %v2956_v55 = vmax.f32 %v2924_v60, 0.0  ;;  %v3316_v60 = vadd.f32 %v3315_v28, %v3175_v12  ;;  %9913 = vmatmul.msk.bf16.gmra.mxu3 %vm880_vm5, %v12920_v9 }
 0x3a8   : > { %9880 = vmatmul.msk.bf16.gmra.mxu1 %vm880_vm5, %v12916_v35  ;;  %v3022_v59 = vld [vmem:[#allocation3 + $0x140] sm:$0xff] }
 0x3a9   : > { %2989 = vst.msk [vmem:[#allocation3 + $0x151] sm:$0xff] %vm880_vm5, %v2956_v55  ;;  %v2446_v55 = vadd.f32 %v12721_v26, %v15309_v37 }
 0x3aa   : > { %v2849_v62 = vpop.f32.mrf.mxu0 }
 0x3ab   : > { %v2889_v51 = vadd.f32 %v2849_v62, %v2667_v14  ;;  %v2668_v14 = vadd.f32 %v12743_v2, %v2446_v55 }
 0x3ad   : > { %v2925_v16 = vadd.f32 %v12538_v31, %v2889_v51  ;;  %v3505_v11 = vpop.f32.mrf.mxu3  ;;  %v3317_v62 = vpop.f32.mrf.mxu2  ;;  %v15310_v51 = vld [vmem:[#allocation38_spill] sm:$0xff] }
 0x3ae   : > { %v2224_v26 = vadd.f32 %v15311_v27, %v15310_v51  ;;  %v12933_v28 = vadd.f32 %v3505_v11, %v3316_v60  ;;  %v3177_v12 = vpop.f32.mrf.mxu1  ;;  %v3401_v60 = vld [vmem:[#allocation3 + $0x13a] sm:$0xff] }
 0x3af   : > { %v2957_v34 = vmax.f32 %v2925_v16, 0.0  ;;  %v12935_v16 = vpack.c.bf16 %v3022_v59, %v3021_v39  ;;  %v3402_v59 = vld [vmem:[#allocation3 + $0x142] sm:$0xff]  ;;  %v3070_v39 = vld [vmem:[#allocation3 + $0x139] sm:$0xff] }
 0x3b0   : > { %v2447_v37 = vadd.f32 %v12738_v47, %v2224_v26  ;;  %v12949_v26 = vpack.c.bf16 %v3402_v59, %v3401_v60 }
 0x3b1   : > { %2990 = vst.msk [vmem:[#allocation3 + $0x159] sm:$0xff] %vm880_vm5, %v2957_v34  ;;  %v3318_v34 = vadd.f32 %v3317_v62, %v3177_v12 }
 0x3b2   : > { %v2852_v30 = vpop.f32.mrf.mxu0  ;;  %9897 = vmatmul.msk.bf16.gmra.mxu2 %vm880_vm5, %v12935_v16 }
 0x3b3   : > { %v2890_v46 = vadd.f32 %v2852_v30, %v2668_v14  ;;  %v2669_v14 = vadd.f32 %v12763_v13, %v2447_v37  ;;  %v3071_v30 = vld [vmem:[#allocation3 + $0x141] sm:$0xff]  ;;  %v15312_v37 = vld [vmem:[#allocation40_spill] sm:$0xff] }
 0x3b4   : > { %v12945_v27 = vpack.c.bf16 %v3071_v30, %v3070_v39  ;;  %v3023_v39 = vld [vmem:[#allocation3 + $0x150] sm:$0xff] }
 0x3b5   : > { %v2926_v2 = vadd.f32 %v12538_v31, %v2890_v46  ;;  %9924 = vmatmul.msk.bf16.gmra.mxu0 %vm880_vm5, %v12755_v0  ;;  %v3507_v51 = vpop.f32.mrf.mxu3  ;;  %v3320_v62 = vpop.f32.mrf.mxu2 }
 0x3b6   : > { %v12947_v12 = vadd.f32 %v3507_v51, %v3318_v34  ;;  %v3180_v47 = vpop.f32.mrf.mxu1 }
 0x3b7   : > { %v2958_v55 = vmax.f32 %v2926_v2, 0.0  ;;  %v3321_v2 = vadd.f32 %v3320_v62, %v3180_v47  ;;  %9914 = vmatmul.msk.bf16.gmra.mxu3 %vm880_vm5, %v12949_v26 }
 0x3b8   : > { %9881 = vmatmul.msk.bf16.gmra.mxu1 %vm880_vm5, %v12945_v27  ;;  %v3024_v34 = vld [vmem:[#allocation3 + $0x158] sm:$0xff] }
 0x3b9   : > { %2991 = vst.msk [vmem:[#allocation3 + $0x169] sm:$0xff] %vm880_vm5, %v2958_v55  ;;  %v2448_v55 = vadd.f32 %v12761_v48, %v15312_v37  ;;  %v12964_v47 = vpack.c.bf16 %v3024_v34, %v3023_v39  ;;  %v3073_v34 = vld [vmem:[#allocation3 + $0x159] sm:$0xff] }
 0x3ba   : > { %v2854_v11 = vpop.f32.mrf.mxu0 }
 0x3bb   : > { %v2891_v46 = vadd.f32 %v2854_v11, %v2669_v14  ;;  %v2670_v14 = vadd.f32 %v12784_v49, %v2448_v55 }
 0x3bd   : > { %v2927_v13 = vadd.f32 %v12538_v31, %v2891_v46  ;;  %v3510_v59 = vpop.f32.mrf.mxu3  ;;  %v3322_v11 = vpop.f32.mrf.mxu2  ;;  %v15313_v46 = vld [vmem:[#allocation41_spill] sm:$0xff] }
 0x3be   : > { %v2226_v48 = vadd.f32 %v12788_v15, %v15313_v46  ;;  %v12962_v51 = vadd.f32 %v3510_v59, %v3321_v2  ;;  %v3182_v62 = vpop.f32.mrf.mxu1 }
 0x3bf   : > { %v2959_v35 = vmax.f32 %v2927_v13, 0.0  ;;  %v9968_v13 = vld [vmem:[%s15257_s1 + $0x18] sm:$0xf]  ;;  %v3323_v37 = vadd.f32 %v3322_v11, %v3182_v62  ;;  %v3072_v11 = vld [vmem:[#allocation3 + $0x151] sm:$0xff] }
 0x3c0   : > { %v4363_v2 = vsel %vm3142_vm4, %v9968_v13, 0  ;;  %v2449_v55 = vadd.f32 %v12779_v10, %v2226_v48  ;;  %v12982_v62 = vpack.c.bf16 %v3073_v34, %v3072_v11 }
 0x3c1   : > { %2992 = vst.msk [vmem:[#allocation3 + $0x171] sm:$0xff] %vm880_vm5, %v2959_v35  ;;  %v9951_v35 = vld [vmem:[%s15257_s1 + $0x14] sm:$0xf]  ;;  %4372 = vmatpush.bf16.msrb.mxu3 %v4363_v2 }
 0x3c2   : > { %v2857_v30 = vpop.f32.mrf.mxu0  ;;  %v4140_v15 = vsel %vm3142_vm4, %v9951_v35, 0  ;;  %9898 = vmatmul.msk.bf16.gmra.mxu2 %vm880_vm5, %v12964_v47 }
 0x3c3   : > { %v2892_v60 = vadd.f32 %v2857_v30, %v2670_v14  ;;  %4149 = vmatpush.bf16.msrb.mxu2 %v4140_v15  ;;  %v3403_v30 = vld [vmem:[#allocation3 + $0x152] sm:$0xff]  ;;  %v9985_v15 = vld [vmem:[%s15257_s1 + $0x1c] sm:$0xf] }
 0x3c5   : > { %v2928_v49 = vadd.f32 %v12538_v31, %v2892_v60  ;;  %9925 = vmatmul.msk.bf16.gmra.mxu0 %vm880_vm5, %v12790_v6  ;;  %v2671_v31 = vadd.f32 %v12800_v40, %v2449_v55  ;;  %v3404_v60 = vld [vmem:[#allocation3 + $0x15a] sm:$0xff]  ;;  %v3512_v46 = vpop.f32.mrf.mxu3  ;;  %v3325_v10 = vpop.f32.mrf.mxu2  ;;  %v11329_v40 = vld [vmem:[%s15287_s3] ss:$0 sm:$0xff]  ;;  %v4585_v55 = vsel %vm3142_vm4, %v9985_v15, 0  ;;  %s15342_s3 = smov %s15341_s6 }
 0x3c6   : > { %v12984_v48 = vadd.f32 %v3512_v46, %v3323_v37  ;;  %v12986_v35 = vpack.c.bf16 %v3404_v60, %v3403_v30  ;;  %4594 = vmatpush.bf16.msra.mxu0 %v4585_v55  ;;  %v10002_v37 = vld [vmem:[%s15257_s1 + $0x20] sm:$0xf]  ;;  %s15345_s1 = sld [smem:[#allocation55_spill]] }
 0x3c7   : > { %v2960_v14 = vmax.f32 %v2928_v49, 0.0  ;;  %v3185_v49 = vpop.f32.mrf.mxu1  ;;  %v4807_v30 = vsel %vm3142_vm4, %v10002_v37, 0 }
 0x3c8   : > { %v3326_v2 = vadd.f32 %v3325_v10, %v3185_v49  ;;  %9882 = vmatmul.msk.bf16.gmra.mxu1 %vm880_vm5, %v12982_v62  ;;  %9915 = vmatmul.msk.bf16.gmra.mxu3 %vm880_vm5, %v12986_v35  ;;  %v3405_v15 = vld [vmem:[#allocation3 + $0x16a] sm:$0xff] }
 0x3c9   : > { %2993 = vst.msk [vmem:[#allocation3 + $0x181] sm:$0xff] %vm880_vm5, %v2960_v14  ;;  %4816 = vmatpush.bf16.msra.mxu1 %v4807_v30 }
 0x3ca   : > { %v2859_v59 = vpop.f32.mrf.mxu0 }
 0x3cb   : > { %v2893_v39 = vadd.f32 %v2859_v59, %v2671_v31  ;;  %v3026_v31 = vld [vmem:[#allocation3 + $0x170] sm:$0xff] }
 0x3cd   : > { %v2929_v13 = vadd.f32 %v11329_v40, %v2893_v39  ;;  %v3515_v59 = vpop.f32.mrf.mxu3  ;;  %v3327_v11 = vpop.f32.mrf.mxu2  ;;  %v3025_v39 = vld [vmem:[#allocation3 + $0x168] sm:$0xff] }
 0x3ce   : > { %v13007_v46 = vadd.f32 %v3515_v59, %v3326_v2  ;;  %v13009_v49 = vpack.c.bf16 %v3026_v31, %v3025_v39 }
 0x3cf   : > { %v2961_v14 = vmax.f32 %v2929_v13, 0.0  ;;  %v3187_v10 = vpop.f32.mrf.mxu1  ;;  %v3075_v13 = vld [vmem:[#allocation3 + $0x171] sm:$0xff] }
 0x3d0   : > { %v3328_v40 = vadd.f32 %v3327_v11, %v3187_v10 }
 0x3d1   : > { %2994 = vst.msk [vmem:[#allocation3 + $0x189] sm:$0xff] %vm880_vm5, %v2961_v14  ;;  %v3074_v14 = vld [vmem:[#allocation3 + $0x169] sm:$0xff] }
 0x3d2   : > { %v3707_v34 = vpop.f32.mrf.mxu0  ;;  %9899 = vmatmul.msk.bf16.gmra.mxu2 %vm880_vm5, %v13009_v49 }
 0x3d3   : > { %v13005_v60 = vadd.f32 %v3707_v34, %v12817_v52  ;;  %v3406_v52 = vld [vmem:[#allocation3 + $0x172] sm:$0xff]  ;;  %v13018_v34 = vpack.c.bf16 %v3075_v13, %v3074_v14 }
 0x3d4   : > { %v13022_v39 = vpack.c.bf16 %v3406_v52, %v3405_v15  ;;  %v15316_v52 = vld [vmem:[#allocation43_spill] sm:$0xff] }
 0x3d5   : > { %9926 = vmatmul.msk.bf16.gmra.mxu0 %vm880_vm5, %v12819_v63  ;;  %v3517_v2 = vpop.f32.mrf.mxu3  ;;  %15314 = vst [vmem:[#allocation30_spill] sm:$0xff] %v13018_v34  ;;  %v3330_v31 = vpop.f32.mrf.mxu2 }
 0x3d6   : > { %v13020_v30 = vadd.f32 %v3517_v2, %v3328_v40  ;;  %15315 = vst [vmem:[#allocation44_spill] sm:$0xff] %v13022_v39 }
 0x3d7   : > { %v3190_v59 = vpop.f32.mrf.mxu1 }
 0x3d8   : > { %v3331_v11 = vadd.f32 %v3330_v31, %v3190_v59  ;;  %9883 = vmatmul.msk.bf16.gmra.mxu1 %vm880_vm5, %v13018_v34  ;;  %9916 = vmatmul.msk.bf16.gmra.mxu3 %vm880_vm5, %v13022_v39 }
 0x3da   : > { %v3709_v55 = vpop.f32.mrf.mxu0 }
 0x3db   : > { %v13016_v37 = vadd.f32 %v3709_v55, %v12831_v56 }
 0x3dd   : > { %v3520_v55 = vpop.f32.mrf.mxu3  ;;  %v3332_v13 = vpop.f32.mrf.mxu2 }
 0x3de   : > { %v13031_v14 = vadd.f32 %v3520_v55, %v3331_v11  ;;  %v15317_v11 = vld [vmem:[#allocation42_spill] sm:$0xff] }
 0x3df   : > { %v3192_v40 = vpop.f32.mrf.mxu1 }
 0x3e0   : > { %v3333_v15 = vadd.f32 %v3332_v13, %v3192_v40 }
 0x3e2   : > { %v3712_v10 = vpop.f32.mrf.mxu0  ;;  %9952 = vmatmul.msk.bf16.vlgmr.msrb.gmra.mxu2 %vm880_vm5, %v15316_v52 }
 0x3e3   : > { %v13029_v56 = vadd.f32 %v3712_v10, %v12846_v61 }
 0x3e5   : > { %9927 = vmatmul.msk.bf16.gmra.mxu0 %vm880_vm5, %v12848_v53  ;;  %v3522_v59 = vpop.f32.mrf.mxu3  ;;  %v3335_v34 = vpop.f32.mrf.mxu2 }
 0x3e6   : > { %v13040_v61 = vadd.f32 %v3522_v59, %v3333_v15 }
 0x3e7   : > { %v3195_v10 = vpop.f32.mrf.mxu1 }
 0x3e8   : > { %v3336_v39 = vadd.f32 %v3335_v34, %v3195_v10  ;;  %9935 = vmatmul.msk.bf16.vlgmr.msrb.gmra.mxu1 %vm880_vm5, %v15317_v11  ;;  %9969 = vmatmul.msk.bf16.vlgmr.msrb.gmra.mxu3 %vm880_vm5, %v12604_v4 }
 0x3ea   : > { %v3714_v2 = vpop.f32.mrf.mxu0 }
 0x3eb   : > { %v13038_v31 = vadd.f32 %v3714_v2, %v12860_v38 }
 0x3ed   : > { %v3525_v40 = vpop.f32.mrf.mxu3  ;;  %v3337_v52 = vpop.f32.mrf.mxu2 }
 0x3ee   : > { %v13049_v38 = vadd.f32 %v3525_v40, %v3336_v39  ;;  %v15318_v39 = vld [vmem:[#allocation46_spill] sm:$0xff] }
 0x3ef   : > { %v3197_v2 = vpop.f32.mrf.mxu1 }
 0x3f0   : > { %v3338_v15 = vadd.f32 %v3337_v52, %v3197_v2 }
 0x3f2   : > { %v3717_v55 = vpop.f32.mrf.mxu0  ;;  %9953 = vmatmul.msk.bf16.gmra.mxu2 %vm880_vm5, %v12618_v32 }
 0x3f3   : > { %v13047_v13 = vadd.f32 %v3717_v55, %v12875_v33 }
 0x3f5   : > { %9928 = vmatmul.msk.bf16.gmra.mxu0 %vm880_vm5, %v12877_v45  ;;  %v3527_v4 = vpop.f32.mrf.mxu3  ;;  %v3340_v10 = vpop.f32.mrf.mxu2 }
 0x3f6   : > { %v13058_v33 = vadd.f32 %v3527_v4, %v3338_v15 }
 0x3f7   : > { %v3200_v11 = vpop.f32.mrf.mxu1 }
 0x3f8   : > { %v3341_v55 = vadd.f32 %v3340_v10, %v3200_v11  ;;  %9936 = vmatmul.msk.bf16.gmra.mxu1 %vm880_vm5, %v15318_v39  ;;  %9970 = vmatmul.msk.bf16.gmra.mxu3 %vm880_vm5, %v12634_v17 }
 0x3fa   : > { %v3719_v34 = vpop.f32.mrf.mxu0 }
 0x3fb   : > { %v13056_v59 = vadd.f32 %v3719_v34, %v12889_v22 }
 0x3fd   : > { %v3530_v32 = vpop.f32.mrf.mxu3  ;;  %v3342_v2 = vpop.f32.mrf.mxu2 }
 0x3fe   : > { %v13067_v22 = vadd.f32 %v3530_v32, %v3341_v55 }
 0x3ff   : > { %v3202_v34 = vpop.f32.mrf.mxu1 }
 0x400   : > { %v3343_v15 = vadd.f32 %v3342_v2, %v3202_v34 }
 0x402   : > { %v3722_v40 = vpop.f32.mrf.mxu0  ;;  %9954 = vmatmul.msk.bf16.gmra.mxu2 %vm880_vm5, %v12649_v50 }
 0x403   : > { %v13065_v52 = vadd.f32 %v3722_v40, %v12904_v54 }
 0x405   : > { %9929 = vmatmul.msk.bf16.gmra.mxu0 %vm880_vm5, %v12906_v3  ;;  %v3532_v17 = vpop.f32.mrf.mxu3  ;;  %v3345_v11 = vpop.f32.mrf.mxu2 }
 0x406   : > { %v13076_v54 = vadd.f32 %v3532_v17, %v3343_v15 }
 0x407   : > { %v3205_v39 = vpop.f32.mrf.mxu1 }
 0x408   : > { %v3346_v40 = vadd.f32 %v3345_v11, %v3205_v39  ;;  %9937 = vmatmul.msk.bf16.gmra.mxu1 %vm880_vm5, %v12647_v36  ;;  %9971 = vmatmul.msk.bf16.gmra.mxu3 %vm880_vm5, %v12664_v7 }
 0x40a   : > { %v3724_v4 = vpop.f32.mrf.mxu0 }
 0x40b   : > { %v13074_v10 = vadd.f32 %v3724_v4, %v12918_v41 }
 0x40d   : > { %v3535_v50 = vpop.f32.mrf.mxu3  ;;  %v3347_v2 = vpop.f32.mrf.mxu2 }
 0x40e   : > { %v13085_v41 = vadd.f32 %v3535_v50, %v3346_v40 }
 0x40f   : > { %v3207_v34 = vpop.f32.mrf.mxu1 }
 0x410   : > { %v3348_v15 = vadd.f32 %v3347_v2, %v3207_v34 }
 0x412   : > { %v3727_v55 = vpop.f32.mrf.mxu0  ;;  %9955 = vmatmul.msk.bf16.gmra.mxu2 %vm880_vm5, %v12677_v8 }
 0x413   : > { %v13083_v32 = vadd.f32 %v3727_v55, %v12933_v28 }
 0x415   : > { %9930 = vmatmul.msk.bf16.gmra.mxu0 %vm880_vm5, %v12935_v16  ;;  %v3537_v7 = vpop.f32.mrf.mxu3  ;;  %v3350_v17 = vpop.f32.mrf.mxu2 }
 0x416   : > { %v13094_v28 = vadd.f32 %v3537_v7, %v3348_v15 }
 0x417   : > { %v3210_v11 = vpop.f32.mrf.mxu1 }
 0x418   : > { %v3351_v39 = vadd.f32 %v3350_v17, %v3210_v11  ;;  %9938 = vmatmul.msk.bf16.gmra.mxu1 %vm880_vm5, %v12675_v20  ;;  %9972 = vmatmul.msk.bf16.gmra.mxu3 %vm880_vm5, %v12694_v24 }
 0x41a   : > { %v3729_v36 = vpop.f32.mrf.mxu0 }
 0x41b   : > { %v13092_v4 = vadd.f32 %v3729_v36, %v12947_v12 }
 0x41d   : > { %v3540_v8 = vpop.f32.mrf.mxu3  ;;  %v3352_v50 = vpop.f32.mrf.mxu2 }
 0x41e   : > { %v13103_v12 = vadd.f32 %v3540_v8, %v3351_v39 }
 0x41f   : > { %v3212_v2 = vpop.f32.mrf.mxu1 }
 0x420   : > { %v3353_v34 = vadd.f32 %v3352_v50, %v3212_v2 }
 0x422   : > { %v3732_v40 = vpop.f32.mrf.mxu0  ;;  %9956 = vmatmul.msk.bf16.gmra.mxu2 %vm880_vm5, %v12710_v58 }
 0x423   : > { %v13101_v55 = vadd.f32 %v3732_v40, %v12962_v51 }
 0x425   : > { %9931 = vmatmul.msk.bf16.gmra.mxu0 %vm880_vm5, %v12964_v47  ;;  %v3542_v24 = vpop.f32.mrf.mxu3  ;;  %v3355_v36 = vpop.f32.mrf.mxu2 }
 0x426   : > { %v13112_v51 = vadd.f32 %v3542_v24, %v3353_v34 }
 0x427   : > { %v3215_v7 = vpop.f32.mrf.mxu1 }
 0x428   : > { %v3356_v17 = vadd.f32 %v3355_v36, %v3215_v7  ;;  %9939 = vmatmul.msk.bf16.gmra.mxu1 %vm880_vm5, %v12708_v18  ;;  %9973 = vmatmul.msk.bf16.gmra.mxu3 %vm880_vm5, %v12727_v23  ;;  %v3628_v36 = vld [vmem:[#allocation3 + $0x188] sm:$0xff] }
 0x42a   : > { %v3734_v20 = vpop.f32.mrf.mxu0 }
 0x42b   : > { %v13110_v15 = vadd.f32 %v3734_v20, %v12984_v48 }
 0x42d   : > { %v3545_v58 = vpop.f32.mrf.mxu3  ;;  %v3357_v40 = vpop.f32.mrf.mxu2 }
 0x42e   : > { %v13121_v48 = vadd.f32 %v3545_v58, %v3356_v17  ;;  %v3627_v17 = vld [vmem:[#allocation3 + $0x180] sm:$0xff] }
 0x42f   : > { %v3217_v8 = vpop.f32.mrf.mxu1 }
 0x430   : > { %v3358_v50 = vadd.f32 %v3357_v40, %v3217_v8 }
 0x432   : > { %v3737_v11 = vpop.f32.mrf.mxu0  ;;  %9957 = vmatmul.msk.bf16.gmra.mxu2 %vm880_vm5, %v12740_v42 }
 0x433   : > { %v13119_v39 = vadd.f32 %v3737_v11, %v13007_v46 }
 0x435   : > { %9932 = vmatmul.msk.bf16.gmra.mxu0 %vm880_vm5, %v13009_v49  ;;  %v3547_v23 = vpop.f32.mrf.mxu3  ;;  %v3360_v34 = vpop.f32.mrf.mxu2 }
 0x436   : > { %v13130_v46 = vadd.f32 %v3547_v23, %v3358_v50 }
 0x437   : > { %v3220_v20 = vpop.f32.mrf.mxu1 }
 0x438   : > { %v3361_v24 = vadd.f32 %v3360_v34, %v3220_v20  ;;  %9940 = vmatmul.msk.bf16.gmra.mxu1 %vm880_vm5, %v12736_v19  ;;  %9974 = vmatmul.msk.bf16.gmra.mxu3 %vm880_vm5, %v12755_v0 }
 0x43a   : > { %v3739_v18 = vpop.f32.mrf.mxu0 }
 0x43b   : > { %v13128_v2 = vadd.f32 %v3739_v18, %v13020_v30  ;;  %v13139_v30 = vpack.c.bf16 %v3628_v36, %v3627_v17 }
 0x43d   : > { %v3550_v11 = vpop.f32.mrf.mxu3  ;;  %v3362_v58 = vpop.f32.mrf.mxu2 }
 0x43e   : > { %v13141_v40 = vadd.f32 %v3550_v11, %v3361_v24  ;;  %v4487_v24 = vld [vmem:[#allocation3 + $0x39] sm:$0xff] }
 0x43f   : > { %v3222_v8 = vpop.f32.mrf.mxu1 }
 0x440   : > { %v3363_v19 = vadd.f32 %v3362_v58, %v3222_v8 }
 0x442   : > { %v3742_v7 = vpop.f32.mrf.mxu0  ;;  %9958 = vmatmul.msk.bf16.gmra.mxu2 %vm880_vm5, %v12771_v43 }
 0x443   : > { %v13137_v42 = vadd.f32 %v3742_v7, %v13031_v14  ;;  %v4486_v7 = vld [vmem:[#allocation3 + $0x31] sm:$0xff] }
 0x445   : > { %9933 = vmatmul.msk.bf16.gmra.mxu0 %vm880_vm5, %v13139_v30  ;;  %v3552_v14 = vpop.f32.mrf.mxu3  ;;  %v3365_v18 = vpop.f32.mrf.mxu2 }
 0x446   : > { %v13150_v23 = vadd.f32 %v3552_v14, %v3363_v19 }
 0x447   : > { %v3225_v34 = vpop.f32.mrf.mxu1 }
 0x448   : > { %v3366_v20 = vadd.f32 %v3365_v18, %v3225_v34  ;;  %9941 = vmatmul.msk.bf16.gmra.mxu1 %vm880_vm5, %v12769_v25  ;;  %9975 = vmatmul.msk.bf16.gmra.mxu3 %vm880_vm5, %v12790_v6 }
 0x44a   : > { %v3744_v0 = vpop.f32.mrf.mxu0 }
 0x44b   : > { %v13148_v50 = vadd.f32 %v3744_v0, %v13040_v61  ;;  %v4518_v61 = vpack.c.bf16 %v4487_v24, %v4486_v7 }
 0x44d   : > { %v3555_v17 = vpop.f32.mrf.mxu3  ;;  %v3367_v11 = vpop.f32.mrf.mxu2 }
 0x44e   : > { %v13159_v58 = vadd.f32 %v3555_v17, %v3366_v20  ;;  %v4489_v20 = vld [vmem:[#allocation3 + $0x51] sm:$0xff] }
 0x44f   : > { %v3227_v8 = vpop.f32.mrf.mxu1 }
 0x450   : > { %v3368_v19 = vadd.f32 %v3367_v11, %v3227_v8 }
 0x452   : > { %v3747_v36 = vpop.f32.mrf.mxu0  ;;  %9959 = vmatmul.msk.bf16.gmra.mxu2 %vm880_vm5, %v12804_v57 }
 0x453   : > { %v13157_v43 = vadd.f32 %v3747_v36, %v13049_v38  ;;  %v4488_v36 = vld [vmem:[#allocation3 + $0x49] sm:$0xff] }
 0x455   : > { %9986 = vmatmul.msk.bf16.vlgmr.msra.gmra.mxu0 %vm880_vm5, %v4518_v61  ;;  %v3557_v0 = vpop.f32.mrf.mxu3  ;;  %v3370_v14 = vpop.f32.mrf.mxu2 }
 0x456   : > { %v13167_v38 = vadd.f32 %v3557_v0, %v3368_v19 }
 0x457   : > { %v3230_v18 = vpop.f32.mrf.mxu1 }
 0x458   : > { %v3371_v34 = vadd.f32 %v3370_v14, %v3230_v18  ;;  %9942 = vmatmul.msk.bf16.gmra.mxu1 %vm880_vm5, %v12802_v44  ;;  %9976 = vmatmul.msk.bf16.gmra.mxu3 %vm880_vm5, %v12819_v63 }
 0x45a   : > { %v3749_v25 = vpop.f32.mrf.mxu0 }
 0x45b   : > { %v13165_v6 = vadd.f32 %v3749_v25, %v13058_v33  ;;  %v4519_v33 = vpack.c.bf16 %v4489_v20, %v4488_v36  ;;  %v4490_v20 = vld [vmem:[#allocation3 + $0x61] sm:$0xff] }
 0x45d   : > { %v3560_v7 = vpop.f32.mrf.mxu3  ;;  %v3372_v61 = vpop.f32.mrf.mxu2 }
 0x45e   : > { %v13176_v17 = vadd.f32 %v3560_v7, %v3371_v34  ;;  %v4491_v34 = vld [vmem:[#allocation3 + $0x69] sm:$0xff] }
 0x45f   : > { %v3232_v11 = vpop.f32.mrf.mxu1 }
 0x460   : > { %v3373_v8 = vadd.f32 %v3372_v61, %v3232_v11 }
 0x462   : > { %v3752_v24 = vpop.f32.mrf.mxu0  ;;  %9960 = vmatmul.msk.bf16.gmra.mxu2 %vm880_vm5, %v12833_v21 }
 0x463   : > { %v13174_v57 = vadd.f32 %v3752_v24, %v13067_v22  ;;  %v4520_v24 = vpack.c.bf16 %v4491_v34, %v4490_v20 }
 0x465   : > { %9987 = vmatmul.msk.bf16.gmra.mxu0 %vm880_vm5, %v4519_v33  ;;  %v3562_v19 = vpop.f32.mrf.mxu3  ;;  %v4151_v25 = vpop.f32.mrf.mxu2 }
 0x466   : > { %v13184_v22 = vadd.f32 %v3562_v19, %v3373_v8 }
 0x467   : > { %v3929_v0 = vpop.f32.mrf.mxu1 }
 0x468   : > { %v4009_v14 = vadd.f32 %v3929_v0, %v13005_v60  ;;  %9943 = vmatmul.msk.bf16.gmra.mxu1 %vm880_vm5, %v12829_v1  ;;  %9977 = vmatmul.msk.bf16.gmra.mxu3 %vm880_vm5, %v12848_v53  ;;  %v15319_v0 = vld [vmem:[#allocation28_spill] sm:$0xff] }
 0x46a   : > { %v3754_v44 = vpop.f32.mrf.mxu0  ;;  %v4231_v18 = vadd.f32 %v4151_v25, %v4009_v14 }
 0x46b   : > { %v13182_v63 = vadd.f32 %v3754_v44, %v13076_v54 }
 0x46d   : > { %v4374_v36 = vpop.f32.mrf.mxu3  ;;  %v4153_v33 = vpop.f32.mrf.mxu2 }
 0x46e   : > { %v13194_v7 = vadd.f32 %v4374_v36, %v4231_v18  ;;  %v4492_v18 = vld [vmem:[#allocation3 + $0x79] sm:$0xff] }
 0x46f   : > { %v3931_v61 = vpop.f32.mrf.mxu1 }
 0x470   : > { %v4010_v1 = vadd.f32 %v3931_v61, %v13016_v37  ;;  %v4493_v37 = vld [vmem:[#allocation3 + $0x81] sm:$0xff] }
 0x471   : > { %v4521_v34 = vpack.c.bf16 %v4493_v37, %v4492_v18 }
 0x472   : > { %v3757_v21 = vpop.f32.mrf.mxu0  ;;  %v4232_v60 = vadd.f32 %v4153_v33, %v4010_v1  ;;  %9961 = vmatmul.msk.bf16.gmra.mxu2 %vm880_vm5, %v12862_v29 }
 0x473   : > { %v13192_v54 = vadd.f32 %v3757_v21, %v13085_v41 }
 0x475   : > { %9988 = vmatmul.msk.bf16.gmra.mxu0 %vm880_vm5, %v4520_v24  ;;  %v4376_v41 = vpop.f32.mrf.mxu3  ;;  %v4156_v8 = vpop.f32.mrf.mxu2 }
 0x476   : > { %v13203_v44 = vadd.f32 %v4376_v41, %v4232_v60 }
 0x477   : > { %v3934_v19 = vpop.f32.mrf.mxu1 }
 0x478   : > { %v4011_v25 = vadd.f32 %v3934_v19, %v13029_v56  ;;  %9944 = vmatmul.msk.bf16.gmra.mxu1 %vm880_vm5, %v15319_v0  ;;  %9978 = vmatmul.msk.bf16.gmra.mxu3 %vm880_vm5, %v12877_v45 }
 0x47a   : > { %v3759_v53 = vpop.f32.mrf.mxu0  ;;  %v4233_v14 = vadd.f32 %v4156_v8, %v4011_v25  ;;  %v15320_v8 = vld [vmem:[#allocation26_spill] sm:$0xff]  ;;  %v4494_v25 = vld [vmem:[#allocation3 + $0x91] sm:$0xff] }
 0x47b   : > { %v13201_v11 = vadd.f32 %v3759_v53, %v13094_v28 }
 0x47d   : > { %v4379_v21 = vpop.f32.mrf.mxu3  ;;  %v4158_v20 = vpop.f32.mrf.mxu2 }
 0x47e   : > { %v13213_v24 = vadd.f32 %v4379_v21, %v4233_v14 }
 0x47f   : > { %v3936_v36 = vpop.f32.mrf.mxu1 }
 0x480   : > { %v4012_v56 = vadd.f32 %v3936_v36, %v13038_v31  ;;  %v4495_v31 = vld [vmem:[#allocation3 + $0x99] sm:$0xff] }
 0x481   : > { %v4522_v0 = vpack.c.bf16 %v4495_v31, %v4494_v25 }
 0x482   : > { %v3762_v29 = vpop.f32.mrf.mxu0  ;;  %v4234_v33 = vadd.f32 %v4158_v20, %v4012_v56  ;;  %9962 = vmatmul.msk.bf16.gmra.mxu2 %vm880_vm5, %v12891_v5 }
 0x483   : > { %v13211_v28 = vadd.f32 %v3762_v29, %v13103_v12 }
 0x485   : > { %9989 = vmatmul.msk.bf16.gmra.mxu0 %vm880_vm5, %v4521_v34  ;;  %v4381_v12 = vpop.f32.mrf.mxu3  ;;  %v4161_v1 = vpop.f32.mrf.mxu2 }
 0x486   : > { %v13222_v60 = vadd.f32 %v4381_v12, %v4234_v33 }
 0x487   : > { %v3939_v53 = vpop.f32.mrf.mxu1 }
 0x488   : > { %v4013_v41 = vadd.f32 %v3939_v53, %v13047_v13  ;;  %9945 = vmatmul.msk.bf16.gmra.mxu1 %vm880_vm5, %v15320_v8  ;;  %9979 = vmatmul.msk.bf16.gmra.mxu3 %vm880_vm5, %v12906_v3 }
 0x48a   : > { %v3764_v45 = vpop.f32.mrf.mxu0  ;;  %v4235_v19 = vadd.f32 %v4161_v1, %v4013_v41  ;;  %v4496_v1 = vld [vmem:[#allocation3 + $0xa9] sm:$0xff] }
 0x48b   : > { %v13220_v61 = vadd.f32 %v3764_v45, %v13112_v51  ;;  %v15321_v45 = vld [vmem:[#allocation45_spill] sm:$0xff] }
 0x48d   : > { %v4384_v14 = vpop.f32.mrf.mxu3  ;;  %v4163_v37 = vpop.f32.mrf.mxu2 }
 0x48e   : > { %v13232_v29 = vadd.f32 %v4384_v14, %v4235_v19 }
 0x48f   : > { %v3941_v18 = vpop.f32.mrf.mxu1 }
 0x490   : > { %v4014_v13 = vadd.f32 %v3941_v18, %v13056_v59  ;;  %v4497_v59 = vld [vmem:[#allocation3 + $0xb1] sm:$0xff]  ;;  %v4499_v18 = vld [vmem:[#allocation3 + $0xc9] sm:$0xff] }
 0x491   : > { %v4523_v53 = vpack.c.bf16 %v4497_v59, %v4496_v1  ;;  %v4503_v59 = vld [vmem:[#allocation3 + $0xf9] sm:$0xff] }
 0x492   : > { %v3767_v5 = vpop.f32.mrf.mxu0  ;;  %v4236_v34 = vadd.f32 %v4163_v37, %v4014_v13  ;;  %9963 = vmatmul.msk.bf16.gmra.mxu2 %vm880_vm5, %v12920_v9 }
 0x493   : > { %v13230_v51 = vadd.f32 %v3767_v5, %v13121_v48 }
 0x495   : > { %9990 = vmatmul.msk.bf16.gmra.mxu0 %vm880_vm5, %v4522_v0  ;;  %v4386_v48 = vpop.f32.mrf.mxu3  ;;  %v4166_v20 = vpop.f32.mrf.mxu2 }
 0x496   : > { %v13241_v36 = vadd.f32 %v4386_v48, %v4236_v34 }
 0x497   : > { %v3944_v56 = vpop.f32.mrf.mxu1 }
 0x498   : > { %v4015_v33 = vadd.f32 %v3944_v56, %v13065_v52  ;;  %9946 = vmatmul.msk.bf16.gmra.mxu1 %vm880_vm5, %v15321_v45  ;;  %9980 = vmatmul.msk.bf16.gmra.mxu3 %vm880_vm5, %v12935_v16 }
 0x49a   : > { %v3769_v3 = vpop.f32.mrf.mxu0  ;;  %v4237_v12 = vadd.f32 %v4166_v20, %v4015_v33  ;;  %v4500_v20 = vld [vmem:[#allocation3 + $0xd9] sm:$0xff] }
 0x49b   : > { %v13239_v21 = vadd.f32 %v3769_v3, %v13130_v46 }
 0x49d   : > { %v4389_v41 = vpop.f32.mrf.mxu3  ;;  %v4168_v31 = vpop.f32.mrf.mxu2 }
 0x49e   : > { %v13251_v8 = vadd.f32 %v4389_v41, %v4237_v12  ;;  %v4071_v41 = vld [vmem:[#allocation3 + $0x182] sm:$0xff] }
 0x49f   : > { %v3946_v19 = vpop.f32.mrf.mxu1 }
 0x4a0   : > { %v4016_v52 = vadd.f32 %v3946_v19, %v13074_v10 }
 0x4a2   : > { %v3772_v9 = vpop.f32.mrf.mxu0  ;;  %v4238_v5 = vadd.f32 %v4168_v31, %v4016_v52  ;;  %9964 = vmatmul.msk.bf16.gmra.mxu2 %vm880_vm5, %v12949_v26  ;;  %v4498_v26 = vld [vmem:[#allocation3 + $0xc1] sm:$0xff] }
 0x4a3   : > { %v13249_v46 = vadd.f32 %v3772_v9, %v13141_v40  ;;  %v4502_v9 = vld [vmem:[#allocation3 + $0xf1] sm:$0xff]  ;;  %v4295_v52 = vld [vmem:[#allocation3 + $0x1a0] sm:$0xff] }
 0x4a5   : > { %9991 = vmatmul.msk.bf16.gmra.mxu0 %vm880_vm5, %v4523_v53  ;;  %v4391_v40 = vpop.f32.mrf.mxu3  ;;  %v4526_v53 = vpack.c.bf16 %v4503_v59, %v4502_v9 }
 0x4a6   : > { %v13260_v0 = vadd.f32 %v4391_v40, %v4238_v5 }
 0x4a7   : > { %v3949_v14 = vpop.f32.mrf.mxu1 }
 0x4a8   : > { %v13263_v37 = vadd.f32 %v3949_v14, %v13083_v32  ;;  %9947 = vmatmul.msk.bf16.gmra.mxu1 %vm880_vm5, %v12945_v27  ;;  %9981 = vmatmul.msk.bf16.gmra.mxu3 %vm880_vm5, %v12964_v47  ;;  %v3849_v14 = vld [vmem:[#allocation3 + $0x181] sm:$0xff] }
 0x4aa   : > { %v3774_v16 = vpop.f32.mrf.mxu0 }
 0x4ab   : > { %v13258_v25 = vadd.f32 %v3774_v16, %v13150_v23  ;;  %v4524_v23 = vpack.c.bf16 %v4499_v18, %v4498_v26  ;;  %v3850_v16 = vld [vmem:[#allocation3 + $0x189] sm:$0xff]  ;;  %v4505_v26 = vld [vmem:[#allocation3 + $0x111] sm:$0xff] }
 0x4af   : > { %v3951_v34 = vpop.f32.mrf.mxu1 }
 0x4b0   : > { %v13274_v3 = vadd.f32 %v3951_v34, %v13092_v4  ;;  %v4504_v34 = vld [vmem:[#allocation3 + $0x109] sm:$0xff] }
 0x4b2   : > { %v3777_v10 = vpop.f32.mrf.mxu0  ;;  %9965 = vmatmul.msk.bf16.gmra.mxu2 %vm880_vm5, %v12986_v35 }
 0x4b3   : > { %v13270_v13 = vadd.f32 %v3777_v10, %v13159_v58  ;;  %v4501_v58 = vld [vmem:[#allocation3 + $0xe1] sm:$0xff] }
 0x4b4   : > { %v4525_v35 = vpack.c.bf16 %v4501_v58, %v4500_v20  ;;  %v4709_v20 = vld [vmem:[#allocation3 + $0x3a] sm:$0xff] }
 0x4b5   : > { %9992 = vmatmul.msk.bf16.gmra.mxu0 %vm880_vm5, %v4524_v23 }
 0x4b7   : > { %v3954_v47 = vpop.f32.mrf.mxu1 }
 0x4b8   : > { %v13282_v48 = vadd.f32 %v3954_v47, %v13101_v55  ;;  %9948 = vmatmul.msk.bf16.gmra.mxu1 %vm880_vm5, %v12982_v62  ;;  %9982 = vmatmul.msk.bf16.gmra.mxu3 %vm880_vm5, %v13009_v49  ;;  %v15322_v55 = vld [vmem:[#allocation44_spill] sm:$0xff] }
 0x4ba   : > { %v3779_v27 = vpop.f32.mrf.mxu0 }
 0x4bb   : > { %v13279_v32 = vadd.f32 %v3779_v27, %v13167_v38 }
 0x4bf   : > { %v3956_v33 = vpop.f32.mrf.mxu1 }
 0x4c0   : > { %v13293_v38 = vadd.f32 %v3956_v33, %v13110_v15 }
 0x4c2   : > { %v3782_v4 = vpop.f32.mrf.mxu0  ;;  %9966 = vmatmul.msk.bf16.gmra.mxu2 %vm880_vm5, %v15322_v55 }
 0x4c3   : > { %v13289_v56 = vadd.f32 %v3782_v4, %v13176_v17  ;;  %v15323_v17 = vld [vmem:[#allocation30_spill] sm:$0xff]  ;;  %v4708_v4 = vld [vmem:[#allocation3 + $0x32] sm:$0xff] }
 0x4c5   : > { %9993 = vmatmul.msk.bf16.gmra.mxu0 %vm880_vm5, %v4525_v35 }
 0x4c7   : > { %v3959_v49 = vpop.f32.mrf.mxu1 }
 0x4c8   : > { %v13301_v12 = vadd.f32 %v3959_v49, %v13119_v39  ;;  %9949 = vmatmul.msk.bf16.gmra.mxu1 %vm880_vm5, %v15323_v17  ;;  %9983 = vmatmul.msk.bf16.gmra.mxu3 %vm880_vm5, %v13139_v30  ;;  %v4294_v30 = vld [vmem:[#allocation3 + $0x198] sm:$0xff]  ;;  %v4506_v17 = vld [vmem:[#allocation3 + $0x121] sm:$0xff] }
 0x4c9   : > { %v4311_v18 = vpack.c.bf16 %v4295_v52, %v4294_v30 }
 0x4ca   : > { %v3784_v62 = vpop.f32.mrf.mxu0 }
 0x4cb   : > { %v13298_v45 = vadd.f32 %v3784_v62, %v13184_v22  ;;  %v4072_v22 = vld [vmem:[#allocation3 + $0x18a] sm:$0xff]  ;;  %v4740_v62 = vpack.c.bf16 %v4709_v20, %v4708_v4 }
 0x4cc   : > { %v13314_v31 = vpack.c.bf16 %v4072_v22, %v4071_v41 }
 0x4cf   : > { %v3961_v19 = vpop.f32.mrf.mxu1 }
 0x4d0   : > { %v13312_v39 = vadd.f32 %v3961_v19, %v13128_v2  ;;  %v13324_v2 = vpack.c.bf16 %v3850_v16, %v3849_v14 }
 0x4d2   : > { %v4596_v15 = vpop.f32.mrf.mxu0  ;;  %9967 = vmatmul.msk.bf16.gmra.mxu2 %vm880_vm5, %v13314_v31 }
 0x4d3   : > { %v13308_v1 = vadd.f32 %v4596_v15, %v13194_v7 }
 0x4d5   : > { %9994 = vmatmul.msk.bf16.gmra.mxu0 %vm880_vm5, %v4526_v53  ;;  %v4710_v53 = vld [vmem:[#allocation3 + $0x4a] sm:$0xff] }
 0x4d7   : > { %v3964_v40 = vpop.f32.mrf.mxu1 }
 0x4d8   : > { %v13322_v10 = vadd.f32 %v3964_v40, %v13137_v42  ;;  %9950 = vmatmul.msk.bf16.gmra.mxu1 %vm880_vm5, %v13324_v2  ;;  %9984 = vmatmul.msk.bf16.gmra.mxu3 %vm880_vm5, %v4311_v18  ;;  %v4712_v18 = vld [vmem:[#allocation3 + $0x62] sm:$0xff] }
 0x4da   : > { %v4598_v5 = vpop.f32.mrf.mxu0 }
 0x4db   : > { %v13319_v7 = vadd.f32 %v4598_v5, %v13203_v44  ;;  %v4527_v44 = vpack.c.bf16 %v4505_v26, %v4504_v34  ;;  %v4508_v5 = vld [vmem:[#allocation3 + $0x139] sm:$0xff] }
 0x4df   : > { %v3966_v47 = vpop.f32.mrf.mxu1 }
 0x4e0   : > { %v13334_v42 = vadd.f32 %v3966_v47, %v13148_v50  ;;  %v10019_v47 = vld [vmem:[%s15324_s0 + $0x4] sm:$0xf] }
 0x4e2   : > { %v4601_v23 = vpop.f32.mrf.mxu0 }
 0x4e3   : > { %v13330_v27 = vadd.f32 %v4601_v23, %v13213_v24  ;;  %v4507_v24 = vld [vmem:[#allocation3 + $0x129] sm:$0xff] }
 0x4e4   : > { %v4528_v50 = vpack.c.bf16 %v4507_v24, %v4506_v17  ;;  %v4715_v24 = vld [vmem:[#allocation3 + $0x82] sm:$0xff] }
 0x4e5   : > { %9995 = vmatmul.msk.bf16.gmra.mxu0 %vm880_vm5, %v4527_v44 }
 0x4e7   : > { %v3969_v33 = vpop.f32.mrf.mxu1 }
 0x4e8   : > { %v13340_v55 = vadd.f32 %v3969_v33, %v13157_v43  ;;  %10003 = vmatmul.msk.bf16.vlgmr.msra.gmra.mxu1 %vm880_vm5, %v4740_v62  ;;  %v4711_v43 = vld [vmem:[#allocation3 + $0x52] sm:$0xff]  ;;  %v4714_v62 = vld [vmem:[#allocation3 + $0x7a] sm:$0xff] }
 0x4e9   : > { %v4741_v30 = vpack.c.bf16 %v4711_v43, %v4710_v53 }
 0x4ea   : > { %v4603_v58 = vpop.f32.mrf.mxu0 }
 0x4eb   : > { %v13337_v35 = vadd.f32 %v4603_v58, %v13222_v60  ;;  %v4510_v58 = vld [vmem:[#allocation3 + $0x151] sm:$0xff] }
 0x4ef   : > { %v3971_v15 = vpop.f32.mrf.mxu1 }
 0x4f0   : > { %v13348_v60 = vadd.f32 %v3971_v15, %v13165_v6  ;;  %v4513_v15 = vld [vmem:[#allocation3 + $0x171] sm:$0xff] }
 0x4f2   : > { %v4606_v49 = vpop.f32.mrf.mxu0 }
 0x4f3   : > { %v13344_v59 = vadd.f32 %v4606_v49, %v13232_v29  ;;  %v4509_v29 = vld [vmem:[#allocation3 + $0x141] sm:$0xff] }
 0x4f4   : > { %v4529_v6 = vpack.c.bf16 %v4509_v29, %v4508_v5 }
 0x4f5   : > { %9996 = vmatmul.msk.bf16.gmra.mxu0 %vm880_vm5, %v4528_v50  ;;  %v4743_v50 = vpack.c.bf16 %v4715_v24, %v4714_v62 }
 0x4f7   : > { %v3974_v22 = vpop.f32.mrf.mxu1 }
 0x4f8   : > { %v13354_v19 = vadd.f32 %v3974_v22, %v13174_v57  ;;  %10004 = vmatmul.msk.bf16.gmra.mxu1 %vm880_vm5, %v4741_v30  ;;  %v4713_v57 = vld [vmem:[#allocation3 + $0x6a] sm:$0xff]  ;;  %v4716_v22 = vld [vmem:[#allocation3 + $0x92] sm:$0xff]  ;;  %v4717_v30 = vld [vmem:[#allocation3 + $0x9a] sm:$0xff] }
 0x4f9   : > { %v4742_v44 = vpack.c.bf16 %v4713_v57, %v4712_v18  ;;  %v4719_v18 = vld [vmem:[#allocation3 + $0xb2] sm:$0xff] }
 0x4fa   : > { %v4608_v9 = vpop.f32.mrf.mxu0 }
 0x4fb   : > { %v13351_v41 = vadd.f32 %v4608_v9, %v13241_v36  ;;  %v4512_v9 = vld [vmem:[#allocation3 + $0x169] sm:$0xff] }
 0x4fc   : > { %v4531_v53 = vpack.c.bf16 %v4513_v15, %v4512_v9  ;;  %v4722_v9 = vld [vmem:[#allocation3 + $0xda] sm:$0xff] }
 0x4ff   : > { %v3976_v40 = vpop.f32.mrf.mxu1 }
 0x500   : > { %v13362_v36 = vadd.f32 %v3976_v40, %v13182_v63  ;;  %v5236_v63 = vsel %vm3142_vm4, %v10019_v47, 0  ;;  %v13400_v40 = vpop.f32.mrf.mxu2 }
 0x501   : > { %5245 = vmatpush.bf16.msra.mxu2 %v5236_v63 }
 0x502   : > { %v4611_v52 = vpop.f32.mrf.mxu0 }
 0x503   : > { %v13358_v16 = vadd.f32 %v4611_v52, %v13251_v8  ;;  %v4511_v8 = vld [vmem:[#allocation3 + $0x159] sm:$0xff] }
 0x504   : > { %v4530_v4 = vpack.c.bf16 %v4511_v8, %v4510_v58  ;;  %v4517_v8 = vld [vmem:[#allocation3 + $0x1a1] sm:$0xff] }
 0x505   : > { %9997 = vmatmul.msk.bf16.gmra.mxu0 %vm880_vm5, %v4529_v6 }
 0x507   : > { %v3979_v23 = vpop.f32.mrf.mxu1 }
 0x508   : > { %v13368_v34 = vadd.f32 %v3979_v23, %v13192_v54  ;;  %10005 = vmatmul.msk.bf16.gmra.mxu1 %vm880_vm5, %v4742_v44  ;;  %v5208_v54 = vld [vmem:[%s15324_s0] sm:$0xf]  ;;  %v4516_v44 = vld [vmem:[#allocation3 + $0x199] sm:$0xff] }
 0x509   : > { %v5280_v33 = vsel %vm3142_vm4, %v5208_v54, 0  ;;  %v4533_v47 = vpack.c.bf16 %v4517_v8, %v4516_v44 }
 0x50a   : > { %v4613_v14 = vpop.f32.mrf.mxu0  ;;  %5289 = vmatpush.bf16.msra.mxu3 %v5280_v33 }
 0x50b   : > { %v13365_v26 = vadd.f32 %v4613_v14, %v13260_v0  ;;  %v4718_v14 = vld [vmem:[#allocation3 + $0xaa] sm:$0xff] }
 0x50c   : > { %v4745_v23 = vpack.c.bf16 %v4719_v18, %v4718_v14  ;;  %v4724_v14 = vld [vmem:[#allocation3 + $0xf2] sm:$0xff]  ;;  %v4725_v18 = vld [vmem:[#allocation3 + $0xfa] sm:$0xff] }
 0x50d   : > { %v4748_v8 = vpack.c.bf16 %v4725_v18, %v4724_v14 }
 0x50f   : > { %v3981_v20 = vpop.f32.mrf.mxu1 }
 0x510   : > { %v13380_v0 = vadd.f32 %v3981_v20, %v13201_v11  ;;  %v4721_v20 = vld [vmem:[#allocation3 + $0xca] sm:$0xff] }
 0x515   : > { %9998 = vmatmul.msk.bf16.gmra.mxu0 %vm880_vm5, %v4530_v4  ;;  %v4720_v4 = vld [vmem:[#allocation3 + $0xc2] sm:$0xff] }
 0x516   : > { %v4746_v24 = vpack.c.bf16 %v4721_v20, %v4720_v4 }
 0x517   : > { %v3984_v49 = vpop.f32.mrf.mxu1 }
 0x518   : > { %v13384_v17 = vadd.f32 %v3984_v49, %v13211_v28  ;;  %10006 = vmatmul.msk.bf16.gmra.mxu1 %vm880_vm5, %v4743_v50  ;;  %v4744_v28 = vpack.c.bf16 %v4717_v30, %v4716_v22 }
 0x51f   : > { %v3986_v43 = vpop.f32.mrf.mxu1 }
 0x520   : > { %v13389_v11 = vadd.f32 %v3986_v43, %v13220_v61  ;;  %v13402_v61 = vpop.f32.mrf.mxu3 }
 0x525   : > { %9999 = vmatmul.msk.bf16.gmra.mxu0 %vm880_vm5, %v4531_v53  ;;  %v4723_v53 = vld [vmem:[#allocation3 + $0xe2] sm:$0xff] }
 0x527   : > { %v3989_v29 = vpop.f32.mrf.mxu1 }
 0x528   : > { %v13392_v52 = vadd.f32 %v3989_v29, %v13230_v51  ;;  %10007 = vmatmul.msk.bf16.gmra.mxu1 %vm880_vm5, %v4744_v28 }
 0x52f   : > { %v3991_v5 = vpop.f32.mrf.mxu1 }
 0x530   : > { %v13398_v6 = vadd.f32 %v3991_v5, %v13239_v21  ;;  %v13410_v21 = vpop.f32.mrf.mxu3 }
 0x532   : > { %15325 = vst [vmem:[#allocation27_spill] sm:$0xff] %v13398_v6 }
 0x535   : > { %10000 = vmatmul.msk.bf16.gmra.mxu0 %vm880_vm5, %v13324_v2  ;;  %v13408_v2 = vpop.f32.mrf.mxu2 }
 0x537   : > { %v3994_v57 = vpop.f32.mrf.mxu1 }
 0x538   : > { %v13405_v51 = vadd.f32 %v3994_v57, %v13249_v46  ;;  %10008 = vmatmul.msk.bf16.gmra.mxu1 %vm880_vm5, %v4745_v23  ;;  %v13418_v33 = vpop.f32.mrf.mxu3 }
 0x53a   : > { %15326 = vst [vmem:[#allocation29_spill] sm:$0xff] %v13405_v51 }
 0x53d   : > { %v13416_v46 = vpop.f32.mrf.mxu2 }
 0x53f   : > { %v3996_v63 = vpop.f32.mrf.mxu1 }
 0x540   : > { %v13414_v58 = vadd.f32 %v3996_v63, %v13258_v25  ;;  %v13429_v25 = vpop.f32.mrf.mxu3 }
 0x542   : > { %15327 = vst [vmem:[#allocation33_spill] sm:$0xff] %v13414_v58 }
 0x545   : > { %10001 = vmatmul.msk.bf16.gmra.mxu0 %vm880_vm5, %v4533_v47  ;;  %v13424_v50 = vpop.f32.mrf.mxu2 }
 0x547   : > { %v3999_v54 = vpop.f32.mrf.mxu1 }
 0x548   : > { %v13421_v62 = vadd.f32 %v3999_v54, %v13270_v13  ;;  %10009 = vmatmul.msk.bf16.gmra.mxu1 %vm880_vm5, %v4746_v24  ;;  %v4747_v13 = vpack.c.bf16 %v4723_v53, %v4722_v9  ;;  %v13437_v29 = vpop.f32.mrf.mxu3  ;;  %v13468_v9 = vpop.f32.mrf.mxu0  ;;  %v4726_v53 = vld [vmem:[#allocation3 + $0x10a] sm:$0xff] }
 0x54a   : > { %15328 = vst [vmem:[#allocation31_spill] sm:$0xff] %v13421_v62 }
 0x54d   : > { %v13434_v30 = vpop.f32.mrf.mxu2 }
 0x54f   : > { %v4001_v49 = vpop.f32.mrf.mxu1 }
 0x550   : > { %v13427_v15 = vadd.f32 %v4001_v49, %v13279_v32  ;;  %v13444_v57 = vpop.f32.mrf.mxu3 }
 0x552   : > { %15329 = vst [vmem:[#allocation35_spill] sm:$0xff] %v13427_v15 }
 0x555   : > { %v13442_v5 = vpop.f32.mrf.mxu2 }
 0x557   : > { %v4004_v43 = vpop.f32.mrf.mxu1 }
 0x558   : > { %v13432_v22 = vadd.f32 %v4004_v43, %v13289_v56  ;;  %10010 = vmatmul.msk.bf16.gmra.mxu1 %vm880_vm5, %v4747_v13  ;;  %v13449_v56 = vld [vmem:[%s15332_s5] ss:$0 sm:$0xff]  ;;  %v4727_v43 = vld [vmem:[#allocation3 + $0x112] sm:$0xff] }
 0x55a   : > { %15330 = vst [vmem:[#allocation32_spill] sm:$0xff] %v13432_v22 }
 0x55d   : > { %v13460_v63 = vpop.f32.mrf.mxu2 }
 0x55f   : > { %v4006_v28 = vpop.f32.mrf.mxu1 }
 0x560   : > { %v13440_v32 = vadd.f32 %v4006_v28, %v13298_v45 }
 0x562   : > { %15331 = vst [vmem:[#allocation34_spill] sm:$0xff] %v13440_v32 }
 0x565   : > { %v13470_v14 = vpop.f32.mrf.mxu2 }
 0x567   : > { %v4818_v23 = vpop.f32.mrf.mxu1 }
 0x568   : > { %v4898_v44 = vadd.f32 %v4818_v23, %v13308_v1  ;;  %10011 = vmatmul.msk.bf16.gmra.mxu1 %vm880_vm5, %v4748_v8  ;;  %v13462_v1 = vpop.f32.mrf.mxu3  ;;  %v4749_v23 = vpack.c.bf16 %v4727_v43, %v4726_v53 }
 0x56a   : > { %v4934_v47 = vadd.f32 %v13449_v56, %v4898_v44 }
 0x56c   : > { %v4966_v45 = vmax.f32 %v4934_v47, 0.0 }
 0x56e   : > { %v4998_v4 = vpack.c.bf16 %v4966_v45, %v4966_v45 }
 0x56f   : > { %v4820_v20 = vpop.f32.mrf.mxu1 }
 0x570   : > { %5031 = vst.msk [vmem:[%s13458_s26] sm:$0xf] %vm5030_vm8, %v4998_v4  ;;  %v4899_v54 = vadd.f32 %v4820_v20, %v13319_v7  ;;  %v13475_v44 = vpop.f32.mrf.mxu3  ;;  %v13479_v20 = vpop.f32.mrf.mxu0 }
 0x572   : > { %v4935_v24 = vadd.f32 %v13449_v56, %v4899_v54 }
 0x574   : > { %v4967_v49 = vmax.f32 %v4935_v24, 0.0 }
 0x576   : > { %v4999_v13 = vpack.c.bf16 %v4967_v49, %v4967_v49 }
 0x577   : > { %v4823_v28 = vpop.f32.mrf.mxu1 }
 0x578   : > { %5032 = vst.msk [vmem:[%s13458_s26 + $0x4] sm:$0xf] %vm5030_vm8, %v4999_v13  ;;  %v4900_v18 = vadd.f32 %v4823_v28, %v13330_v27  ;;  %10012 = vmatmul.msk.bf16.gmra.mxu1 %vm880_vm5, %v4749_v23  ;;  %v13485_v27 = vpop.f32.mrf.mxu2  ;;  %v13488_v43 = vpop.f32.mrf.mxu3  ;;  %v4728_v28 = vld [vmem:[#allocation3 + $0x122] sm:$0xff] }
 0x57a   : > { %v4936_v7 = vadd.f32 %v13449_v56, %v4900_v18  ;;  %v4729_v18 = vld [vmem:[#allocation3 + $0x12a] sm:$0xff] }
 0x57c   : > { %v4968_v8 = vmax.f32 %v4936_v7, 0.0 }
 0x57e   : > { %v5000_v47 = vpack.c.bf16 %v4968_v8, %v4968_v8  ;;  %v5063_v4 = vmax.f32 %v4966_v45, %v4968_v8 }
 0x57f   : > { %v4825_v54 = vpop.f32.mrf.mxu1 }
 0x580   : > { %5033 = vst.msk [vmem:[%s13458_s26 + $0x8] sm:$0xf] %vm5030_vm8, %v5000_v47  ;;  %v4901_v24 = vadd.f32 %v4825_v54, %v13337_v35  ;;  %v4750_v35 = vpack.c.bf16 %v4729_v18, %v4728_v28  ;;  %v13493_v47 = vpop.f32.mrf.mxu0  ;;  %v13498_v54 = vpop.f32.mrf.mxu2 }
 0x581   : > { %5079 = vst.msk [vmem:[#allocation12] sm:$0xff] %vm880_vm5, %v5063_v4 }
 0x582   : > { %v4937_v53 = vadd.f32 %v13449_v56, %v4901_v24 }
 0x584   : > { %v4969_v13 = vmax.f32 %v4937_v53, 0.0  ;;  %v13500_v53 = vpop.f32.mrf.mxu3 }
 0x586   : > { %v5001_v23 = vpack.c.bf16 %v4969_v13, %v4969_v13  ;;  %v5064_v45 = vmax.f32 %v4967_v49, %v4969_v13 }
 0x587   : > { %v4828_v7 = vpop.f32.mrf.mxu1 }
 0x588   : > { %5034 = vst.msk [vmem:[%s13458_s26 + $0xc] sm:$0xf] %vm5030_vm8, %v5001_v23  ;;  %v4902_v8 = vadd.f32 %v4828_v7, %v13344_v59  ;;  %10013 = vmatmul.msk.bf16.gmra.mxu1 %vm880_vm5, %v4750_v35  ;;  %v4731_v35 = vld [vmem:[#allocation3 + $0x142] sm:$0xff] }
 0x589   : > { %5080 = vst.msk [vmem:[#allocation12 + $0x8] sm:$0xff] %vm880_vm5, %v5064_v45  ;;  %v13506_v45 = vpop.f32.mrf.mxu0 }
 0x58a   : > { %v4938_v4 = vadd.f32 %v13449_v56, %v4902_v8  ;;  %v4730_v8 = vld [vmem:[#allocation3 + $0x13a] sm:$0xff] }
 0x58c   : > { %v4970_v24 = vmax.f32 %v4938_v4, 0.0  ;;  %v13509_v4 = vpop.f32.mrf.mxu2  ;;  %v13511_v62 = vpop.f32.mrf.mxu3 }
 0x58e   : > { %v5002_v49 = vpack.c.bf16 %v4970_v24, %v4970_v24 }
 0x58f   : > { %v4830_v13 = vpop.f32.mrf.mxu1 }
 0x590   : > { %v5095_v23 = vld [vmem:[#allocation12] ss:$2 sm:$0xff]  ;;  %v5111_v32 = vld [vmem:[#allocation12 + $0x1] ss:$2 sm:$0xff]  ;;  %5035 = vst.msk [vmem:[%s13458_s26 + $0x10] sm:$0xf] %vm5030_vm8, %v5002_v49  ;;  %v4903_v59 = vadd.f32 %v4830_v13, %v13351_v41 }
 0x591   : > { %v5126_v28 = vmax.f32 %v5095_v23, %v5111_v32  ;;  %v4751_v32 = vpack.c.bf16 %v4731_v35, %v4730_v8  ;;  %v5209_v49 = vld [vmem:[#allocation4 + $0x1] sm:$0xff]  ;;  %v4239_v35 = vadd.f32 %v13400_v40, %v13263_v37 }
 0x592   : > { %v4939_v18 = vadd.f32 %v13449_v56, %v4903_v59  ;;  %v5196_v13 = vld [vmem:[#allocation4] sm:$0xff] }
 0x593   : > { %5188 = vst.msk [vmem:[#allocation4 + $0x11] sm:$0xff] %vm880_vm5, %v5126_v28 }
 0x594   : > { %v4971_v7 = vmax.f32 %v4939_v18, 0.0 }
 0x596   : > { %v5003_v22 = vpack.c.bf16 %v4971_v7, %v4971_v7 }
 0x597   : > { %v4833_v15 = vpop.f32.mrf.mxu1 }
 0x598   : > { %5036 = vst.msk [vmem:[%s13458_s26 + $0x14] sm:$0xf] %vm5030_vm8, %v5003_v22  ;;  %v4904_v41 = vadd.f32 %v4833_v15, %v13358_v16  ;;  %10014 = vmatmul.msk.bf16.gmra.mxu1 %vm880_vm5, %v4751_v32  ;;  %v13524_v22 = vpop.f32.mrf.mxu0 }
 0x59a   : > { %v4940_v23 = vadd.f32 %v13449_v56, %v4904_v41  ;;  %v13518_v59 = vld [vmem:[#allocation4 + $0x11] sm:$0xff]  ;;  %v13530_v41 = vpop.f32.mrf.mxu2 }
 0x59b   : > { %v13520_v28 = vld [vmem:[#allocation4 + $0x10] sm:$0xff]  ;;  %v5217_v18 = vpack.c.bf16 %v13518_v59, %v5209_v49  ;;  %v13536_v49 = vpop.f32.mrf.mxu3 }
 0x59c   : > { %v5204_v58 = vpack.c.bf16 %v13520_v28, %v5196_v13  ;;  %v4972_v51 = vmax.f32 %v4940_v23, 0.0  ;;  %v4733_v23 = vld [vmem:[#allocation3 + $0x15a] sm:$0xff] }
 0x59d   : > { %10020 = vmatmul.msk.bf16.vlgmr.msra.gmra.mxu2 %vm880_vm5, %v5217_v18 }
 0x59e   : > { %10024 = vmatmul.msk.bf16.vlgmr.msra.gmra.mxu3 %vm880_vm5, %v5204_v58  ;;  %v5004_v16 = vpack.c.bf16 %v4972_v51, %v4972_v51  ;;  %v5065_v15 = vmax.f32 %v4970_v24, %v4972_v51  ;;  %v4462_v58 = vadd.f32 %v13402_v61, %v4239_v35  ;;  %v4732_v24 = vld [vmem:[#allocation3 + $0x152] sm:$0xff] }
 0x59f   : > { %v4835_v8 = vpop.f32.mrf.mxu1 }
 0x5a0   : > { %5037 = vst.msk [vmem:[%s13458_s26 + $0x18] sm:$0xf] %vm5030_vm8, %v5004_v16  ;;  %v4905_v32 = vadd.f32 %v4835_v8, %v13365_v26  ;;  %v4684_v37 = vadd.f32 %v13468_v9, %v4462_v58  ;;  %v13541_v6 = vpop.f32.mrf.mxu0  ;;  %v4240_v26 = vadd.f32 %v13408_v2, %v13274_v3  ;;  %v4752_v8 = vpack.c.bf16 %v4733_v23, %v4732_v24 }
 0x5a1   : > { %5081 = vst.msk [vmem:[#allocation12 + $0x10] sm:$0xff] %vm880_vm5, %v5065_v15  ;;  %v4241_v58 = vadd.f32 %v13416_v46, %v13282_v48  ;;  %v4735_v48 = vld [vmem:[#allocation3 + $0x172] sm:$0xff] }
 0x5a2   : > { %v4941_v13 = vadd.f32 %v13449_v56, %v4905_v32  ;;  %v13548_v61 = vpop.f32.mrf.mxu2  ;;  %v4463_v9 = vadd.f32 %v13410_v21, %v4240_v26  ;;  %v4734_v26 = vld [vmem:[#allocation3 + $0x16a] sm:$0xff] }
 0x5a4   : > { %v4973_v51 = vmax.f32 %v4941_v13, 0.0  ;;  %v4685_v3 = vadd.f32 %v13479_v20, %v4463_v9  ;;  %v4464_v20 = vadd.f32 %v13418_v33, %v4241_v58  ;;  %v4242_v9 = vadd.f32 %v13424_v50, %v13293_v38 }
 0x5a6   : > { %v5005_v40 = vpack.c.bf16 %v4973_v51, %v4973_v51  ;;  %v5066_v18 = vmax.f32 %v4971_v7, %v4973_v51  ;;  %v13553_v7 = vpop.f32.mrf.mxu3 }
 0x5a7   : > { %v4838_v16 = vpop.f32.mrf.mxu1 }
 0x5a8   : > { %5038 = vst.msk [vmem:[%s13458_s26 + $0x1c] sm:$0xf] %vm5030_vm8, %v5005_v40  ;;  %v4906_v15 = vadd.f32 %v4838_v16, %v4684_v37  ;;  %10015 = vmatmul.msk.bf16.gmra.mxu1 %vm880_vm5, %v4752_v8  ;;  %v13560_v37 = vpop.f32.mrf.mxu0 }
 0x5a9   : > { %5082 = vst.msk [vmem:[#allocation12 + $0x18] sm:$0xff] %vm880_vm5, %v5066_v18 }
 0x5aa   : > { %v4942_v35 = vadd.f32 %v13449_v56, %v4906_v15  ;;  %v13565_v18 = vpop.f32.mrf.mxu2  ;;  %v4686_v15 = vadd.f32 %v13493_v47, %v4464_v20 }
 0x5ac   : > { %v4974_v32 = vmax.f32 %v4942_v35, 0.0 }
 0x5ae   : > { %v5006_v2 = vpack.c.bf16 %v4974_v32, %v4974_v32  ;;  %v13567_v46 = vpop.f32.mrf.mxu3 }
 0x5af   : > { %v4840_v13 = vpop.f32.mrf.mxu1 }
 0x5b0   : > { %v5097_v51 = vld [vmem:[#allocation12 + $0x10] ss:$2 sm:$0xff]  ;;  %v5113_v24 = vld [vmem:[#allocation12 + $0x11] ss:$2 sm:$0xff]  ;;  %5039 = vst.msk [vmem:[%s13458_s26 + $0x20] sm:$0xf] %vm5030_vm8, %v5006_v2  ;;  %v4907_v23 = vadd.f32 %v4840_v13, %v4685_v3  ;;  %v4753_v2 = vpack.c.bf16 %v4735_v48, %v4734_v26 }
 0x5b1   : > { %v5127_v40 = vmax.f32 %v5097_v51, %v5113_v24  ;;  %v13574_v13 = vld [vmem:[#allocation4 + $0x12] sm:$0xff]  ;;  %v13584_v24 = vpop.f32.mrf.mxu0 }
 0x5b2   : > { %v4943_v21 = vadd.f32 %v13449_v56, %v4907_v23  ;;  %v13593_v20 = vpop.f32.mrf.mxu2 }
 0x5b3   : > { %5189 = vst.msk [vmem:[#allocation4 + $0x21] sm:$0xff] %vm880_vm5, %v5127_v40  ;;  %v4465_v40 = vadd.f32 %v13429_v25, %v4242_v9  ;;  %v10058_v25 = vld [vmem:[%s15324_s0 + $0x20] sm:$0xf] }
 0x5b4   : > { %v4975_v16 = vmax.f32 %v4943_v21, 0.0 }
 0x5b5   : > { %v4687_v26 = vadd.f32 %v13506_v45, %v4465_v40 }
 0x5b6   : > { %v5007_v8 = vpack.c.bf16 %v4975_v16, %v4975_v16 }
 0x5b7   : > { %v4843_v35 = vpop.f32.mrf.mxu1 }
 0x5b8   : > { %5040 = vst.msk [vmem:[%s13458_s26 + $0x24] sm:$0xf] %vm5030_vm8, %v5007_v8  ;;  %v4908_v3 = vadd.f32 %v4843_v35, %v4686_v15  ;;  %10016 = vmatmul.msk.bf16.gmra.mxu1 %vm880_vm5, %v4753_v2  ;;  %v4243_v35 = vadd.f32 %v13434_v30, %v13301_v12 }
 0x5b9   : > { %v13609_v30 = vpop.f32.mrf.mxu0 }
 0x5ba   : > { %v4944_v33 = vadd.f32 %v13449_v56, %v4908_v3  ;;  %v13578_v58 = vld [vmem:[#allocation4 + $0x21] sm:$0xff]  ;;  %v13598_v3 = vpop.f32.mrf.mxu3  ;;  %v4466_v9 = vadd.f32 %v13437_v29, %v4243_v35 }
 0x5bb   : > { %v13580_v51 = vld [vmem:[#allocation4 + $0x20] sm:$0xff]  ;;  %v5451_v50 = vpack.c.bf16 %v13578_v58, %v13518_v59 }
 0x5bc   : > { %v13582_v47 = vld [vmem:[#allocation4 + $0x22] sm:$0xff]  ;;  %v5385_v38 = vpack.c.bf16 %v13580_v51, %v13520_v28  ;;  %v4976_v21 = vmax.f32 %v4944_v33, 0.0  ;;  %v4688_v33 = vadd.f32 %v13524_v22, %v4466_v9 }
 0x5bd   : > { %v5517_v23 = vpack.c.bf16 %v13582_v47, %v13574_v13 }
 0x5be   : > { %v5008_v48 = vpack.c.bf16 %v4976_v21, %v4976_v21  ;;  %v5067_v15 = vmax.f32 %v4974_v32, %v4976_v21  ;;  %v5735_v32 = vsel %vm3142_vm4, %v10058_v25, 0 }
 0x5bf   : > { %v4845_v8 = vpop.f32.mrf.mxu1  ;;  %5744 = vmatpush.bf16.msrb.mxu0 %v5735_v32 }
 0x5c0   : > { %5041 = vst.msk [vmem:[%s13458_s26 + $0x28] sm:$0xf] %vm5030_vm8, %v5008_v48  ;;  %v4909_v2 = vadd.f32 %v4845_v8, %v4687_v26  ;;  %v4244_v48 = vadd.f32 %v13442_v5, %v13312_v39 }
 0x5c1   : > { %5083 = vst.msk [vmem:[#allocation12 + $0x20] sm:$0xff] %vm880_vm5, %v5067_v15  ;;  %v13614_v15 = vpop.f32.mrf.mxu2 }
 0x5c2   : > { %v4945_v45 = vadd.f32 %v13449_v56, %v4909_v2  ;;  %v13619_v29 = vpop.f32.mrf.mxu3  ;;  %v4467_v22 = vadd.f32 %v13444_v57, %v4244_v48  ;;  %v13626_v2 = vpop.f32.mrf.mxu0 }
 0x5c4   : > { %v4977_v12 = vmax.f32 %v4945_v45, 0.0  ;;  %v4689_v39 = vadd.f32 %v13541_v6, %v4467_v22  ;;  %v4245_v45 = vadd.f32 %v13460_v63, %v13322_v10  ;;  %v4738_v6 = vld [vmem:[#allocation3 + $0x19a] sm:$0xff]  ;;  %v4246_v22 = vadd.f32 %v13470_v14, %v13334_v42 }
 0x5c6   : > { %v5009_v40 = vpack.c.bf16 %v4977_v12, %v4977_v12  ;;  %v5068_v21 = vmax.f32 %v4975_v16, %v4977_v12 }
 0x5c7   : > { %v4848_v26 = vpop.f32.mrf.mxu1 }
 0x5c8   : > { %5042 = vst.msk [vmem:[%s13458_s26 + $0x2c] sm:$0xf] %vm5030_vm8, %v5009_v40  ;;  %v4910_v8 = vadd.f32 %v4848_v26, %v4688_v33  ;;  %10017 = vmatmul.msk.bf16.gmra.mxu1 %vm880_vm5, %v13314_v31  ;;  %v4739_v40 = vld [vmem:[#allocation3 + $0x1a2] sm:$0xff] }
 0x5c9   : > { %5084 = vst.msk [vmem:[#allocation12 + $0x28] sm:$0xff] %vm880_vm5, %v5068_v21  ;;  %v13632_v31 = vpop.f32.mrf.mxu2  ;;  %v4468_v21 = vadd.f32 %v13462_v1, %v4245_v45 }
 0x5ca   : > { %v4946_v35 = vadd.f32 %v13449_v56, %v4910_v8  ;;  %v13637_v26 = vpop.f32.mrf.mxu3  ;;  %v4755_v8 = vpack.c.bf16 %v4739_v40, %v4738_v6 }
 0x5cb   : > { %v4690_v63 = vadd.f32 %v13560_v37, %v4468_v21 }
 0x5cc   : > { %v4978_v16 = vmax.f32 %v4946_v35, 0.0 }
 0x5ce   : > { %v5010_v5 = vpack.c.bf16 %v4978_v16, %v4978_v16 }
 0x5cf   : > { %v4850_v25 = vpop.f32.mrf.mxu1 }
 0x5d0   : > { %v5099_v32 = vld [vmem:[#allocation12 + $0x20] ss:$2 sm:$0xff]  ;;  %v5115_v9 = vld [vmem:[#allocation12 + $0x21] ss:$2 sm:$0xff]  ;;  %5043 = vst.msk [vmem:[%s13458_s26 + $0x30] sm:$0xf] %vm5030_vm8, %v5010_v5  ;;  %v4911_v12 = vadd.f32 %v4850_v25, %v4689_v39  ;;  %v4641_v5 = vpop.f32.mrf.mxu0 }
 0x5d1   : > { %v5128_v33 = vmax.f32 %v5099_v32, %v5115_v9  ;;  %v4469_v9 = vadd.f32 %v13475_v44, %v4246_v22  ;;  %v4247_v44 = vadd.f32 %v13485_v27, %v13340_v55  ;;  %v4248_v55 = vadd.f32 %v13498_v54, %v13348_v60 }
 0x5d2   : > { %v4947_v57 = vadd.f32 %v13449_v56, %v4911_v12  ;;  %v13665_v12 = vpop.f32.mrf.mxu2  ;;  %v4249_v60 = vadd.f32 %v13509_v4, %v13354_v19 }
 0x5d3   : > { %5190 = vst.msk [vmem:[#allocation4 + $0x31] sm:$0xff] %vm880_vm5, %v5128_v33  ;;  %v4691_v6 = vadd.f32 %v13584_v24, %v4469_v9  ;;  %v4470_v24 = vadd.f32 %v13488_v43, %v4247_v44 }
 0x5d4   : > { %v4979_v10 = vmax.f32 %v4947_v57, 0.0  ;;  %v13671_v57 = vpop.f32.mrf.mxu3 }
 0x5d6   : > { %v5011_v48 = vpack.c.bf16 %v4979_v10, %v4979_v10 }
 0x5d7   : > { %v4853_v35 = vpop.f32.mrf.mxu1 }
 0x5d8   : > { %5044 = vst.msk [vmem:[%s13458_s26 + $0x34] sm:$0xf] %vm5030_vm8, %v5011_v48  ;;  %v4912_v39 = vadd.f32 %v4853_v35, %v4690_v63  ;;  %10018 = vmatmul.msk.bf16.gmra.mxu1 %vm880_vm5, %v4755_v8  ;;  %v4643_v35 = vpop.f32.mrf.mxu0 }
 0x5da   : > { %v4948_v25 = vadd.f32 %v13449_v56, %v4912_v39  ;;  %v13646_v1 = vld [vmem:[#allocation4 + $0x31] sm:$0xff]  ;;  %v4692_v39 = vadd.f32 %v13609_v30, %v4470_v24 }
 0x5db   : > { %v13648_v45 = vld [vmem:[#allocation4 + $0x30] sm:$0xff]  ;;  %v13654_v37 = vpack.c.bf16 %v13646_v1, %v13578_v58 }
 0x5dc   : > { %v13650_v32 = vld [vmem:[#allocation4 + $0x32] sm:$0xff]  ;;  %v13658_v42 = vpack.c.bf16 %v13648_v45, %v13580_v51  ;;  %v4980_v33 = vmax.f32 %v4948_v25, 0.0  ;;  %v13688_v27 = vpop.f32.mrf.mxu3 }
 0x5dd   : > { %v13662_v14 = vpack.c.bf16 %v13650_v32, %v13582_v47  ;;  %10021 = vmatmul.msk.bf16.gmra.mxu2 %vm880_vm5, %v13654_v37  ;;  %v10048_v51 = vld [vmem:[%s15324_s0 + $0x18] sm:$0xf] }
 0x5de   : > { %10025 = vmatmul.msk.bf16.gmra.mxu3 %vm880_vm5, %v13658_v42  ;;  %v5012_v40 = vpack.c.bf16 %v4980_v33, %v4980_v33  ;;  %v5069_v21 = vmax.f32 %v4978_v16, %v4980_v33  ;;  %v13683_v16 = vpop.f32.mrf.mxu2 }
 0x5df   : > { %10059 = vmatmul.msk.bf16.vlgmr.msrb.gmra.mxu0 %vm880_vm5, %v13662_v14  ;;  %v4855_v63 = vpop.f32.mrf.mxu1 }
 0x5e0   : > { %5045 = vst.msk [vmem:[%s13458_s26 + $0x38] sm:$0xf] %vm5030_vm8, %v5012_v40  ;;  %v4913_v48 = vadd.f32 %v4855_v63, %v4691_v6  ;;  %v4471_v40 = vadd.f32 %v13500_v53, %v4248_v55  ;;  %v4646_v30 = vpop.f32.mrf.mxu0  ;;  %v4250_v55 = vadd.f32 %v13530_v41, %v13362_v36 }
 0x5e1   : > { %5085 = vst.msk [vmem:[#allocation12 + $0x30] sm:$0xff] %vm880_vm5, %v5069_v21 }
 0x5e2   : > { %v4949_v8 = vadd.f32 %v13449_v56, %v4913_v48 }
 0x5e4   : > { %v4981_v22 = vmax.f32 %v4949_v8, 0.0 }
 0x5e6   : > { %v5013_v25 = vpack.c.bf16 %v4981_v22, %v4981_v22  ;;  %v5070_v9 = vmax.f32 %v4979_v10, %v4981_v22  ;;  %v4693_v10 = vadd.f32 %v13626_v2, %v4471_v40  ;;  %v13698_v54 = vpop.f32.mrf.mxu2  ;;  %v4472_v2 = vadd.f32 %v13511_v62, %v4249_v60 }
 0x5e7   : > { %v4858_v33 = vpop.f32.mrf.mxu1 }
 0x5e8   : > { %5046 = vst.msk [vmem:[%s13458_s26 + $0x3c] sm:$0xf] %vm5030_vm8, %v5013_v25  ;;  %v4914_v6 = vadd.f32 %v4858_v33, %v4692_v39  ;;  %v13702_v39 = vpop.f32.mrf.mxu3  ;;  %v4648_v4 = vpop.f32.mrf.mxu0 }
 0x5e9   : > { %5086 = vst.msk [vmem:[#allocation12 + $0x38] sm:$0xff] %vm880_vm5, %v5070_v9  ;;  %v4694_v9 = vadd.f32 %v4641_v5, %v4472_v2  ;;  %v4251_v2 = vadd.f32 %v13548_v61, %v13368_v34  ;;  %v4252_v34 = vadd.f32 %v13565_v18, %v13380_v0  ;;  %v4253_v0 = vadd.f32 %v13593_v20, %v13384_v17 }
 0x5ea   : > { %v4950_v43 = vadd.f32 %v13449_v56, %v4914_v6 }
 0x5eb   : > { %v4476_v17 = vadd.f32 %v13598_v3, %v4253_v0 }
 0x5ec   : > { %v4982_v21 = vmax.f32 %v4950_v43, 0.0 }
 0x5ee   : > { %v5014_v63 = vpack.c.bf16 %v4982_v21, %v4982_v21  ;;  %v13711_v43 = vpop.f32.mrf.mxu2 }
 0x5ef   : > { %v4860_v44 = vpop.f32.mrf.mxu1 }
 0x5f0   : > { %v5101_v48 = vld [vmem:[#allocation12 + $0x30] ss:$2 sm:$0xff]  ;;  %v5117_v8 = vld [vmem:[#allocation12 + $0x31] ss:$2 sm:$0xff]  ;;  %5047 = vst.msk [vmem:[%s13458_s26 + $0x40] sm:$0xf] %vm5030_vm8, %v5014_v63  ;;  %v4915_v24 = vadd.f32 %v4860_v44, %v4693_v10  ;;  %v4473_v44 = vadd.f32 %v13536_v49, %v4250_v55  ;;  %v13727_v60 = vpop.f32.mrf.mxu3  ;;  %v4474_v49 = vadd.f32 %v13553_v7, %v4251_v2 }
 0x5f1   : > { %v5129_v22 = vmax.f32 %v5101_v48, %v5117_v8 }
 0x5f2   : > { %v4951_v53 = vadd.f32 %v13449_v56, %v4915_v24  ;;  %v4695_v8 = vadd.f32 %v4643_v35, %v4473_v44 }
 0x5f3   : > { %5191 = vst.msk [vmem:[#allocation4 + $0x41] sm:$0xff] %vm880_vm5, %v5129_v22 }
 0x5f4   : > { %v4983_v25 = vmax.f32 %v4951_v53, 0.0 }
 0x5f6   : > { %v5015_v19 = vpack.c.bf16 %v4983_v25, %v4983_v25  ;;  %v13736_v55 = vpop.f32.mrf.mxu2 }
 0x5f7   : > { %v4863_v33 = vpop.f32.mrf.mxu1 }
 0x5f8   : > { %5048 = vst.msk [vmem:[%s13458_s26 + $0x44] sm:$0xf] %vm5030_vm8, %v5015_v19  ;;  %v4916_v6 = vadd.f32 %v4863_v33, %v4694_v9  ;;  %v4651_v19 = vpop.f32.mrf.mxu0 }
 0x5fa   : > { %v4952_v40 = vadd.f32 %v13449_v56, %v4916_v6  ;;  %v13714_v10 = vld [vmem:[#allocation4 + $0x41] sm:$0xff]  ;;  %v13738_v6 = vpop.f32.mrf.mxu3 }
 0x5fb   : > { %v13716_v63 = vld [vmem:[#allocation4 + $0x40] sm:$0xff]  ;;  %v5452_v36 = vpack.c.bf16 %v13714_v10, %v13646_v1 }
 0x5fc   : > { %v13718_v62 = vld [vmem:[#allocation4 + $0x42] sm:$0xff]  ;;  %v5386_v5 = vpack.c.bf16 %v13716_v63, %v13648_v45  ;;  %v4984_v48 = vmax.f32 %v4952_v40, 0.0  ;;  %v5603_v45 = vsel %vm3142_vm4, %v10048_v51, 0 }
 0x5fd   : > { %v5518_v41 = vpack.c.bf16 %v13718_v62, %v13650_v32 }
 0x5fe   : > { %v5016_v24 = vpack.c.bf16 %v4984_v48, %v4984_v48  ;;  %v5071_v22 = vmax.f32 %v4982_v21, %v4984_v48  ;;  %v4696_v21 = vadd.f32 %v4646_v30, %v4474_v49 }
 0x5ff   : > { %v4865_v53 = vpop.f32.mrf.mxu1 }
 0x600   : > { %5049 = vst.msk [vmem:[%s13458_s26 + $0x48] sm:$0xf] %vm5030_vm8, %v5016_v24  ;;  %v4917_v9 = vadd.f32 %v4865_v53, %v4695_v8  ;;  %v4653_v8 = vpop.f32.mrf.mxu0  ;;  %v4475_v24 = vadd.f32 %v13567_v46, %v4252_v34  ;;  %v13747_v53 = vpop.f32.mrf.mxu2  ;;  %v10028_v46 = vld [vmem:[%s15324_s0 + $0x8] sm:$0xf]  ;;  %v4698_v34 = vadd.f32 %v4651_v19, %v4476_v17 }
 0x601   : > { %5087 = vst.msk [vmem:[#allocation12 + $0x40] sm:$0xff] %vm880_vm5, %v5071_v22 }
 0x602   : > { %v4953_v33 = vadd.f32 %v13449_v56, %v4917_v9  ;;  %v13749_v30 = vpop.f32.mrf.mxu3 }
 0x604   : > { %v4985_v35 = vmax.f32 %v4953_v33, 0.0 }
 0x606   : > { %v5017_v40 = vpack.c.bf16 %v4985_v35, %v4985_v35  ;;  %v5072_v44 = vmax.f32 %v4983_v25, %v4985_v35  ;;  %v4697_v25 = vadd.f32 %v4648_v4, %v4475_v24  ;;  %v10033_v4 = vld [vmem:[%s15324_s0 + $0xc] sm:$0xf]  ;;  %v4254_v24 = vadd.f32 %v13614_v15, %v13389_v11 }
 0x607   : > { %v4868_v48 = vpop.f32.mrf.mxu1 }
 0x608   : > { %5050 = vst.msk [vmem:[%s13458_s26 + $0x4c] sm:$0xf] %vm5030_vm8, %v5017_v40  ;;  %v4918_v61 = vadd.f32 %v4868_v48, %v4696_v21  ;;  %v5338_v40 = vsel %vm3142_vm4, %v10028_v46, 0  ;;  %v4656_v48 = vpop.f32.mrf.mxu0 }
 0x609   : > { %5088 = vst.msk [vmem:[#allocation12 + $0x48] sm:$0xff] %vm880_vm5, %v5072_v44  ;;  %v5404_v44 = vsel %vm3142_vm4, %v10033_v4, 0  ;;  %5347 = vmatpush.bf16.msrb.mxu2 %v5338_v40 }
 0x60a   : > { %v4954_v7 = vadd.f32 %v13449_v56, %v4918_v61  ;;  %5413 = vmatpush.bf16.msrb.mxu3 %v5404_v44  ;;  %v4255_v44 = vadd.f32 %v13632_v31, %v13392_v52  ;;  %v15334_v52 = vld [vmem:[#allocation27_spill] sm:$0xff] }
 0x60b   : > { %v4256_v31 = vadd.f32 %v13665_v12, %v15334_v52  ;;  %v15336_v52 = vld [vmem:[#allocation33_spill] sm:$0xff] }
 0x60c   : > { %v4986_v22 = vmax.f32 %v4954_v7, 0.0 }
 0x60e   : > { %v5018_v2 = vpack.c.bf16 %v4986_v22, %v4986_v22 }
 0x60f   : > { %v4870_v9 = vpop.f32.mrf.mxu1 }
 0x610   : > { %v5103_v18 = vld [vmem:[#allocation12 + $0x40] ss:$2 sm:$0xff]  ;;  %v5119_v33 = vld [vmem:[#allocation12 + $0x41] ss:$2 sm:$0xff]  ;;  %5051 = vst.msk [vmem:[%s13458_s26 + $0x50] sm:$0xf] %vm5030_vm8, %v5018_v2  ;;  %v4919_v49 = vadd.f32 %v4870_v9, %v4697_v25  ;;  %v13768_v25 = vpop.f32.mrf.mxu2  ;;  %v13770_v2 = vpop.f32.mrf.mxu3 }
 0x611   : > { %v5130_v35 = vmax.f32 %v5103_v18, %v5119_v33  ;;  %v4658_v17 = vpop.f32.mrf.mxu0 }
 0x612   : > { %v4955_v21 = vadd.f32 %v13449_v56, %v4919_v49  ;;  %v4477_v49 = vadd.f32 %v13619_v29, %v4254_v24 }
 0x613   : > { %5192 = vst.msk [vmem:[#allocation4 + $0x51] sm:$0xff] %vm880_vm5, %v5130_v35 }
 0x614   : > { %v4987_v20 = vmax.f32 %v4955_v21, 0.0  ;;  %v4699_v21 = vadd.f32 %v4653_v8, %v4477_v49 }
 0x616   : > { %v5019_v61 = vpack.c.bf16 %v4987_v20, %v4987_v20 }
 0x617   : > { %v4873_v7 = vpop.f32.mrf.mxu1 }
 0x618   : > { %5052 = vst.msk [vmem:[%s13458_s26 + $0x54] sm:$0xf] %vm5030_vm8, %v5019_v61  ;;  %v4920_v3 = vadd.f32 %v4873_v7, %v4698_v34 }
 0x61a   : > { %v4956_v9 = vadd.f32 %v13449_v56, %v4920_v3  ;;  %v13775_v0 = vld [vmem:[#allocation4 + $0x51] sm:$0xff] }
 0x61b   : > { %v13777_v18 = vld [vmem:[#allocation4 + $0x50] sm:$0xff]  ;;  %v13783_v33 = vpack.c.bf16 %v13775_v0, %v13714_v10 }
 0x61c   : > { %v13779_v19 = vld [vmem:[#allocation4 + $0x52] sm:$0xff]  ;;  %v13787_v11 = vpack.c.bf16 %v13777_v18, %v13716_v63  ;;  %v4988_v35 = vmax.f32 %v4956_v9, 0.0 }
 0x61d   : > { %v13791_v15 = vpack.c.bf16 %v13779_v19, %v13718_v62  ;;  %10022 = vmatmul.msk.bf16.gmra.mxu2 %vm880_vm5, %v13783_v33 }
 0x61e   : > { %10026 = vmatmul.msk.bf16.gmra.mxu3 %vm880_vm5, %v13787_v11  ;;  %v5020_v46 = vpack.c.bf16 %v4988_v35, %v4988_v35  ;;  %v5073_v4 = vmax.f32 %v4986_v22, %v4988_v35  ;;  %v4478_v22 = vadd.f32 %v13637_v26, %v4255_v44 }
 0x61f   : > { %10060 = vmatmul.msk.bf16.gmra.mxu0 %vm880_vm5, %v13791_v15  ;;  %v4875_v40 = vpop.f32.mrf.mxu1 }
 0x620   : > { %5053 = vst.msk [vmem:[%s13458_s26 + $0x58] sm:$0xf] %vm5030_vm8, %v5020_v46  ;;  %v4921_v29 = vadd.f32 %v4875_v40, %v4699_v21  ;;  %v5247_v34 = vpop.f32.mrf.mxu2  ;;  %v4700_v3 = vadd.f32 %v4656_v48, %v4478_v22  ;;  %v4661_v46 = vpop.f32.mrf.mxu0  ;;  %v4479_v40 = vadd.f32 %v13671_v57, %v4256_v31 }
 0x621   : > { %v5291_v61 = vpop.f32.mrf.mxu3  ;;  %5089 = vst.msk [vmem:[#allocation12 + $0x50] sm:$0xff] %vm880_vm5, %v5073_v4 }
 0x622   : > { %v13805_v7 = vadd.f32 %v5291_v61, %v5247_v34  ;;  %v4957_v8 = vadd.f32 %v13449_v56, %v4921_v29  ;;  %v4701_v44 = vadd.f32 %v4658_v17, %v4479_v40 }
 0x624   : > { %v4989_v24 = vmax.f32 %v4957_v8, 0.0 }
 0x626   : > { %v5021_v9 = vpack.c.bf16 %v4989_v24, %v4989_v24  ;;  %v5074_v49 = vmax.f32 %v4987_v20, %v4989_v24  ;;  %v15335_v20 = vld [vmem:[#allocation29_spill] sm:$0xff] }
 0x627   : > { %v4878_v35 = vpop.f32.mrf.mxu1  ;;  %v4257_v34 = vadd.f32 %v13683_v16, %v15335_v20  ;;  %v4258_v16 = vadd.f32 %v13698_v54, %v15336_v52  ;;  %v15338_v52 = vld [vmem:[#allocation35_spill] sm:$0xff] }
 0x628   : > { %5054 = vst.msk [vmem:[%s13458_s26 + $0x5c] sm:$0xf] %vm5030_vm8, %v5021_v9  ;;  %v4922_v21 = vadd.f32 %v4878_v35, %v4700_v3  ;;  %v4663_v3 = vpop.f32.mrf.mxu0 }
 0x629   : > { %5090 = vst.msk [vmem:[#allocation12 + $0x58] sm:$0xff] %vm880_vm5, %v5074_v49  ;;  %v4480_v57 = vadd.f32 %v13688_v27, %v4257_v34 }
 0x62a   : > { %v4958_v4 = vadd.f32 %v13449_v56, %v4922_v21 }
 0x62b   : > { %v4702_v9 = vadd.f32 %v4661_v46, %v4480_v57 }
 0x62c   : > { %v4990_v26 = vmax.f32 %v4958_v4, 0.0 }
 0x62e   : > { %v5022_v48 = vpack.c.bf16 %v4990_v26, %v4990_v26 }
 0x62f   : > { %v4880_v29 = vpop.f32.mrf.mxu1 }
 0x630   : > { %v5105_v61 = vld [vmem:[#allocation12 + $0x50] ss:$2 sm:$0xff]  ;;  %v5121_v12 = vld [vmem:[#allocation12 + $0x51] ss:$2 sm:$0xff]  ;;  %5055 = vst.msk [vmem:[%s13458_s26 + $0x60] sm:$0xf] %vm5030_vm8, %v5022_v48  ;;  %v4923_v8 = vadd.f32 %v4880_v29, %v4701_v44  ;;  %v4481_v44 = vadd.f32 %v13702_v39, %v4258_v16  ;;  %v4666_v54 = vpop.f32.mrf.mxu0  ;;  %v4260_v16 = vadd.f32 %v13736_v55, %v15338_v52  ;;  %v13868_v52 = vpop.f32.mrf.mxu2 }
 0x631   : > { %v5131_v22 = vmax.f32 %v5105_v61, %v5121_v12  ;;  %v15337_v12 = vld [vmem:[#allocation31_spill] sm:$0xff] }
 0x632   : > { %v4959_v24 = vadd.f32 %v13449_v56, %v4923_v8  ;;  %v4703_v29 = vadd.f32 %v4663_v3, %v4481_v44  ;;  %v4259_v8 = vadd.f32 %v13711_v43, %v15337_v12 }
 0x633   : > { %5193 = vst.msk [vmem:[#allocation4 + $0x61] sm:$0xff] %vm880_vm5, %v5131_v22 }
 0x634   : > { %v4991_v17 = vmax.f32 %v4959_v24, 0.0  ;;  %v4482_v57 = vadd.f32 %v13727_v60, %v4259_v8 }
 0x636   : > { %v5023_v49 = vpack.c.bf16 %v4991_v17, %v4991_v17 }
 0x637   : > { %v4883_v35 = vpop.f32.mrf.mxu1 }
 0x638   : > { %5056 = vst.msk [vmem:[%s13458_s26 + $0x64] sm:$0xf] %vm5030_vm8, %v5023_v49  ;;  %v4924_v31 = vadd.f32 %v4883_v35, %v4702_v9  ;;  %v4704_v9 = vadd.f32 %v4666_v54, %v4482_v57  ;;  %v4668_v35 = vpop.f32.mrf.mxu0 }
 0x63a   : > { %v4960_v21 = vadd.f32 %v13449_v56, %v4924_v31  ;;  %v13828_v4 = vld [vmem:[#allocation4 + $0x61] sm:$0xff] }
 0x63b   : > { %v13830_v40 = vld [vmem:[#allocation4 + $0x62] sm:$0xff]  ;;  %v5453_v27 = vpack.c.bf16 %v13828_v4, %v13775_v0 }
 0x63c   : > { %v5519_v46 = vpack.c.bf16 %v13830_v40, %v13779_v19  ;;  %v4992_v48 = vmax.f32 %v4960_v21, 0.0  ;;  %v4483_v21 = vadd.f32 %v13738_v6, %v4260_v16  ;;  %v10038_v6 = vld [vmem:[%s15324_s0 + $0x10] sm:$0xf]  ;;  %v13870_v16 = vpop.f32.mrf.mxu3 }
 0x63d   : > { %v5470_v57 = vsel %vm3142_vm4, %v10038_v6, 0 }
 0x63e   : > { %v5024_v20 = vpack.c.bf16 %v4992_v48, %v4992_v48  ;;  %v5075_v34 = vmax.f32 %v4990_v26, %v4992_v48  ;;  %v4705_v44 = vadd.f32 %v4668_v35, %v4483_v21  ;;  %5479 = vmatpush.bf16.msra.mxu2 %v5470_v57  ;;  %v15340_v35 = vld [vmem:[#allocation34_spill] sm:$0xff] }
 0x63f   : > { %v4885_v61 = vpop.f32.mrf.mxu1 }
 0x640   : > { %5057 = vst.msk [vmem:[%s13458_s26 + $0x68] sm:$0xf] %vm5030_vm8, %v5024_v20  ;;  %v4925_v22 = vadd.f32 %v4885_v61, %v4703_v29  ;;  %v4671_v61 = vpop.f32.mrf.mxu0 }
 0x641   : > { %5091 = vst.msk [vmem:[#allocation12 + $0x60] sm:$0xff] %vm880_vm5, %v5075_v34 }
 0x642   : > { %v4961_v24 = vadd.f32 %v13449_v56, %v4925_v22 }
 0x644   : > { %v4993_v39 = vmax.f32 %v4961_v24, 0.0 }
 0x646   : > { %v5025_v49 = vpack.c.bf16 %v4993_v39, %v4993_v39  ;;  %v5076_v3 = vmax.f32 %v4991_v17, %v4993_v39  ;;  %v15339_v17 = vld [vmem:[#allocation32_spill] sm:$0xff] }
 0x647   : > { %v4888_v26 = vpop.f32.mrf.mxu1  ;;  %v4261_v29 = vadd.f32 %v13747_v53, %v15339_v17  ;;  %v10043_v53 = vld [vmem:[%s15324_s0 + $0x14] sm:$0xf] }
 0x648   : > { %5058 = vst.msk [vmem:[%s13458_s26 + $0x6c] sm:$0xf] %vm5030_vm8, %v5025_v49  ;;  %v4926_v43 = vadd.f32 %v4888_v26, %v4704_v9  ;;  %v5536_v39 = vsel %vm3142_vm4, %v10043_v53, 0  ;;  %v4262_v26 = vadd.f32 %v13768_v25, %v15340_v35 }
 0x649   : > { %5092 = vst.msk [vmem:[#allocation12 + $0x68] sm:$0xff] %vm880_vm5, %v5076_v3  ;;  %v4484_v22 = vadd.f32 %v13749_v30, %v4261_v29  ;;  %5545 = vmatpush.bf16.msra.mxu3 %v5536_v39 }
 0x64a   : > { %v4962_v31 = vadd.f32 %v13449_v56, %v4926_v43  ;;  %v5202_v43 = vld [vmem:[#allocation4 + $0x60] sm:$0xff] }
 0x64b   : > { %v4706_v9 = vadd.f32 %v4671_v61, %v4484_v22  ;;  %v5387_v28 = vpack.c.bf16 %v5202_v43, %v13777_v18 }
 0x64c   : > { %v4994_v60 = vmax.f32 %v4962_v31, 0.0 }
 0x64e   : > { %v5026_v48 = vpack.c.bf16 %v4994_v60, %v4994_v60 }
 0x64f   : > { %v4890_v54 = vpop.f32.mrf.mxu1 }
 0x650   : > { %v5107_v20 = vld [vmem:[#allocation12 + $0x60] ss:$2 sm:$0xff]  ;;  %v5123_v34 = vld [vmem:[#allocation12 + $0x61] ss:$2 sm:$0xff]  ;;  %5059 = vst.msk [vmem:[%s13458_s26 + $0x70] sm:$0xf] %vm5030_vm8, %v5026_v48  ;;  %v4927_v55 = vadd.f32 %v4890_v54, %v4705_v44  ;;  %v4673_v54 = vpop.f32.mrf.mxu0 }
 0x651   : > { %v5132_v12 = vmax.f32 %v5107_v20, %v5123_v34  ;;  %v4485_v20 = vadd.f32 %v13770_v2, %v4262_v26 }
 0x652   : > { %v4963_v8 = vadd.f32 %v13449_v56, %v4927_v55 }
 0x653   : > { %5194 = vst.msk [vmem:[#allocation4 + $0x71] sm:$0xff] %vm880_vm5, %v5132_v12  ;;  %v4707_v55 = vadd.f32 %v4673_v54, %v4485_v20 }
 0x654   : > { %v4995_v24 = vmax.f32 %v4963_v8, 0.0  ;;  %v11102_v8 = vld [vmem:[%s15341_s6 + $0x8] sm:$0xff] }
 0x655   : > { %5857 = vmatpush.bf16.msrb.mxu1 %v11102_v8  ;;  %v5649_v8 = vld [vmem:[#allocation4 + $0x91] sm:$0xff] }
 0x656   : > { %v5027_v49 = vpack.c.bf16 %v4995_v24, %v4995_v24 }
 0x657   : > { %v4893_v3 = vpop.f32.mrf.mxu1 }
 0x658   : > { %5060 = vst.msk [vmem:[%s13458_s26 + $0x74] sm:$0xf] %vm5030_vm8, %v5027_v49  ;;  %v4928_v30 = vadd.f32 %v4893_v3, %v4706_v9  ;;  %v5311_v3 = vld [vmem:[#allocation4 + $0x2] sm:$0xff] }
 0x659   : > { %v5319_v35 = vpack.c.bf16 %v13574_v13, %v5311_v3 }
 0x65a   : > { %v4964_v31 = vadd.f32 %v13449_v56, %v4928_v30  ;;  %v13875_v21 = vld [vmem:[#allocation4 + $0x71] sm:$0xff] }
 0x65b   : > { %v5203_v44 = vld [vmem:[#allocation4 + $0x70] sm:$0xff]  ;;  %v13881_v25 = vpack.c.bf16 %v13875_v21, %v13828_v4 }
 0x65c   : > { %v13877_v48 = vld [vmem:[#allocation4 + $0x72] sm:$0xff]  ;;  %v13883_v17 = vpack.c.bf16 %v5203_v44, %v5202_v43  ;;  %v4996_v34 = vmax.f32 %v4964_v31, 0.0 }
 0x65d   : > { %v5718_v29 = vpack.c.bf16 %v13877_v48, %v13830_v40  ;;  %10023 = vmatmul.msk.bf16.gmra.mxu2 %vm880_vm5, %v13881_v25 }
 0x65e   : > { %10027 = vmatmul.msk.bf16.gmra.mxu3 %vm880_vm5, %v13883_v17  ;;  %v5028_v61 = vpack.c.bf16 %v4996_v34, %v4996_v34  ;;  %v5077_v12 = vmax.f32 %v4994_v60, %v4996_v34 }
 0x65f   : > { %10061 = vmatmul.msk.bf16.gmra.mxu0 %vm880_vm5, %v5718_v29  ;;  %v4895_v6 = vpop.f32.mrf.mxu1 }
 0x660   : > { %5061 = vst.msk [vmem:[%s13458_s26 + $0x78] sm:$0xf] %vm5030_vm8, %v5028_v61  ;;  %v4929_v2 = vadd.f32 %v4895_v6, %v4707_v55  ;;  %v5252_v53 = vpop.f32.mrf.mxu2 }
 0x661   : > { %v5296_v22 = vpop.f32.mrf.mxu3  ;;  %5093 = vst.msk [vmem:[#allocation12 + $0x70] sm:$0xff] %vm880_vm5, %v5077_v12  ;;  %v5583_v12 = vld [vmem:[#allocation4 + $0x90] sm:$0xff] }
 0x662   : > { %v13899_v57 = vadd.f32 %v5296_v22, %v5252_v53  ;;  %v4965_v39 = vadd.f32 %v13449_v56, %v4929_v2 }
 0x664   : > { %v4997_v60 = vmax.f32 %v4965_v39, 0.0 }
 0x666   : > { %v5029_v9 = vpack.c.bf16 %v4997_v60, %v4997_v60  ;;  %v5078_v49 = vmax.f32 %v4995_v24, %v4997_v60  ;;  %v5715_v24 = vld [vmem:[#allocation4 + $0x92] sm:$0xff] }
 0x668   : > { %5062 = vst.msk [vmem:[%s13458_s26 + $0x7c] sm:$0xf] %vm5030_vm8, %v5029_v9  ;;  %v13932_v63 = vpop.f32.mrf.mxu2 }
 0x669   : > { %5094 = vst.msk [vmem:[#allocation12 + $0x78] sm:$0xff] %vm880_vm5, %v5078_v49 }
 0x66d   : > { %10029 = vmatmul.msk.bf16.vlgmr.msrb.gmra.mxu2 %vm880_vm5, %v5319_v35 }
 0x66e   : > { %10034 = vmatmul.msk.bf16.vlgmr.msrb.gmra.mxu3 %vm880_vm5, %v5385_v38  ;;  %v10053_v38 = vld [vmem:[%s15324_s0 + $0x1c] sm:$0xf]  ;;  %5612 = vmatpush.bf16.msrb.mxu2 %v5603_v45  ;;  %v11101_v45 = vld [vmem:[%s15342_s3] sm:$0xff] }
 0x670   : > { %v5109_v26 = vld [vmem:[#allocation12 + $0x70] ss:$2 sm:$0xff]  ;;  %v5125_v30 = vld [vmem:[#allocation12 + $0x71] ss:$2 sm:$0xff] }
 0x671   : > { %v5133_v56 = vmax.f32 %v5109_v26, %v5125_v30 }
 0x673   : > { %5195 = vst.msk [vmem:[#allocation4 + $0x81] sm:$0xff] %vm880_vm5, %v5133_v56 }
 0x67a   : > { %v5714_v31 = vld [vmem:[#allocation4 + $0x82] sm:$0xff] }
 0x67b   : > { %v5719_v54 = vpack.c.bf16 %v5715_v24, %v5714_v31  ;;  %v5520_v20 = vpack.c.bf16 %v5714_v31, %v13877_v48  ;;  %v5384_v18 = vld [vmem:[#allocation4 + $0x80] sm:$0xff] }
 0x67c   : > { %v5450_v58 = vld [vmem:[#allocation4 + $0x81] sm:$0xff]  ;;  %v5587_v6 = vpack.c.bf16 %v5583_v12, %v5384_v18 }
 0x67d   : > { %10030 = vmatmul.msk.bf16.gmra.mxu2 %vm880_vm5, %v13662_v14  ;;  %10062 = vmatmul.msk.bf16.gmra.mxu0 %vm880_vm5, %v5719_v54  ;;  %v5669_v14 = vsel %vm3142_vm4, %v10053_v38, 0  ;;  %v5454_v47 = vpack.c.bf16 %v5450_v58, %v13875_v21  ;;  %v5653_v2 = vpack.c.bf16 %v5649_v8, %v5450_v58  ;;  %v15343_v54 = vmov 0.0   ;;  %v11104_v58 = vld [vmem:[%s15342_s3 + $0x18] sm:$0xff] }
 0x67e   : > { %10035 = vmatmul.msk.bf16.gmra.mxu3 %vm880_vm5, %v5386_v5  ;;  %v13934_v5 = vpop.f32.mrf.mxu3  ;;  %5160 = vst.msk [vmem:[#allocation5] sm:$0xff] %vm5159_vm9, %v15343_v54  ;;  %6036 = vmatpush.bf16.msra.mxu0 %v11104_v58  ;;  %vm7515_vm4 = vcmask 519168  }
 0x67f   : > { %5678 = vmatpush.bf16.msrb.mxu3 %v5669_v14  ;;  %5164 = vst.msk [vmem:[#allocation5 + $0x90] sm:$0xff] %vm5159_vm9, %v15343_v54  ;;  %v11103_v14 = vld [vmem:[%s15342_s3 + $0x10] sm:$0xff] }
 0x680   : > { %5162 = vst.msk [vmem:[#allocation5 + $0x8] sm:$0x3] %vm5161_vm10, %v15343_v54 }
 0x681   : > { %5165 = vst.msk [vmem:[#allocation5 + $0x98] sm:$0x3] %vm5161_vm10, %v15343_v54 }
 0x682   : > { %5167 = vst.msk [vmem:[#allocation5] sm:$0x1] %vm5166_vm11, %v15343_v54 }
 0x683   : > { %5168 = vst.msk [vmem:[#allocation5 + $0x10] sm:$0x1] %vm5166_vm11, %v15343_v54 }
 0x684   : > { %5169 = vst.msk [vmem:[#allocation5 + $0x20] sm:$0x1] %vm5166_vm11, %v15343_v54 }
 0x685   : > { %5170 = vst.msk [vmem:[#allocation5 + $0x30] sm:$0x1] %vm5166_vm11, %v15343_v54 }
 0x686   : > { %5171 = vst.msk [vmem:[#allocation5 + $0x40] sm:$0x1] %vm5166_vm11, %v15343_v54 }
 0x687   : > { %5172 = vst.msk [vmem:[#allocation5 + $0x50] sm:$0x1] %vm5166_vm11, %v15343_v54 }
 0x688   : > { %5173 = vst.msk [vmem:[#allocation5 + $0x60] sm:$0x1] %vm5166_vm11, %v15343_v54 }
 0x689   : > { %5174 = vst.msk [vmem:[#allocation5 + $0x70] sm:$0x1] %vm5166_vm11, %v15343_v54 }
 0x68a   : > { %5175 = vst.msk [vmem:[#allocation5 + $0x80] sm:$0x1] %vm5166_vm11, %v15343_v54 }
 0x68b   : > { %5176 = vst.msk [vmem:[#allocation5 + $0x90] sm:$0x1] %vm5166_vm11, %v15343_v54 }
 0x68c   : > { %5177 = vst.msk [vmem:[#allocation5 + $0x9] sm:$0x1] %vm5166_vm11, %v15343_v54 }
 0x68d   : > { %10031 = vmatmul.msk.bf16.gmra.mxu2 %vm880_vm5, %v13791_v15  ;;  %v5388_v15 = vpack.c.bf16 %v5384_v18, %v5203_v44  ;;  %5178 = vst.msk [vmem:[#allocation5 + $0x19] sm:$0x1] %vm5166_vm11, %v15343_v54 }
 0x68e   : > { %10036 = vmatmul.msk.bf16.gmra.mxu3 %vm880_vm5, %v5387_v28  ;;  %5179 = vst.msk [vmem:[#allocation5 + $0x29] sm:$0x1] %vm5166_vm11, %v15343_v54 }
 0x68f   : > { %5180 = vst.msk [vmem:[#allocation5 + $0x39] sm:$0x1] %vm5166_vm11, %v15343_v54 }
 0x690   : > { %5181 = vst.msk [vmem:[#allocation5 + $0x49] sm:$0x1] %vm5166_vm11, %v15343_v54 }
 0x691   : > { %5182 = vst.msk [vmem:[#allocation5 + $0x59] sm:$0x1] %vm5166_vm11, %v15343_v54 }
 0x692   : > { %5183 = vst.msk [vmem:[#allocation5 + $0x69] sm:$0x1] %vm5166_vm11, %v15343_v54 }
 0x693   : > { %5184 = vst.msk [vmem:[#allocation5 + $0x79] sm:$0x1] %vm5166_vm11, %v15343_v54 }
 0x694   : > { %5185 = vst.msk [vmem:[#allocation5 + $0x89] sm:$0x1] %vm5166_vm11, %v15343_v54 }
 0x695   : > { %5186 = vst.msk [vmem:[#allocation5 + $0x99] sm:$0x1] %vm5166_vm11, %v15343_v54 }
 0x696   : > { %6486 = vst.msk [vmem:[#allocation6 + $0x8] sm:$0x1] %vm5166_vm11, %v15343_v54 }
 0x697   : > { %6487 = vst.msk [vmem:[#allocation6 + $0x10] sm:$0x1] %vm5166_vm11, %v15343_v54 }
 0x698   : > { %6488 = vst.msk [vmem:[#allocation6 + $0x18] sm:$0x1] %vm5166_vm11, %v15343_v54 }
 0x699   : > { %6489 = vst.msk [vmem:[#allocation6 + $0x20] sm:$0x1] %vm5166_vm11, %v15343_v54 }
 0x69a   : > { %6492 = vst.msk [vmem:[#allocation6 + $0xd] sm:$0x1] %vm5166_vm11, %v15343_v54 }
 0x69b   : > { %6493 = vst.msk [vmem:[#allocation6 + $0x15] sm:$0x1] %vm5166_vm11, %v15343_v54 }
 0x69c   : > { %6494 = vst.msk [vmem:[#allocation6 + $0x1d] sm:$0x1] %vm5166_vm11, %v15343_v54 }
 0x69d   : > { %10032 = vmatmul.msk.bf16.gmra.mxu2 %vm880_vm5, %v5718_v29  ;;  %6495 = vst.msk [vmem:[#allocation6 + $0x25] sm:$0x1] %vm5166_vm11, %v15343_v54 }
 0x69e   : > { %10037 = vmatmul.msk.bf16.gmra.mxu3 %vm880_vm5, %v5388_v15  ;;  %6482 = vst.msk [vmem:[#allocation6] sm:$0x3f] %vm6481_vm12, %v15343_v54 }
 0x69f   : > { %6484 = vst.msk [vmem:[#allocation6 + $0x28] sm:$0x3f] %vm6481_vm12, %v15343_v54 }
 0x6a0   : > { %v5257_v43 = vpop.f32.mrf.mxu2  ;;  %6485 = vst.msk [vmem:[#allocation6] sm:$0x1] %vm5166_vm11, %v15343_v54 }
 0x6a1   : > { %v5301_v48 = vpop.f32.mrf.mxu3  ;;  %6490 = vst.msk [vmem:[#allocation6 + $0x28] sm:$0x1] %vm5166_vm11, %v15343_v54 }
 0x6a2   : > { %v5302_v34 = vadd.f32 %v5301_v48, %v5257_v43  ;;  %v5294_v43 = vadd.f32 %v13870_v16, %v13868_v52  ;;  %v5746_v48 = vpop.f32.mrf.mxu0  ;;  %6491 = vst.msk [vmem:[#allocation6 + $0x5] sm:$0x1] %vm5166_vm11, %v15343_v54 }
 0x6a3   : > { %6496 = vst.msk [vmem:[#allocation6 + $0x2d] sm:$0x1] %vm5166_vm11, %v15343_v54 }
 0x6a4   : > { %6498 = vst.msk [vmem:[#allocation7] sm:$0x3f] %vm6497_vm14, %v15343_v54 }
 0x6a5   : > { %6500 = vst.msk [vmem:[#allocation7 + $0x28] sm:$0x3f] %vm6497_vm14, %v15343_v54 }
 0x6a6   : > { %6502 = vst.msk [vmem:[#allocation7] sm:$0x1] %vm6501_vm15, %v15343_v54 }
 0x6a7   : > { %6507 = vst.msk [vmem:[#allocation7 + $0x28] sm:$0x1] %vm6501_vm15, %v15343_v54 }
 0x6a8   : > { %v13962_v59 = vpop.f32.mrf.mxu2  ;;  %6508 = vst.msk [vmem:[#allocation7 + $0x5] sm:$0x1] %vm6501_vm15, %v15343_v54 }
 0x6a9   : > { %v13964_v13 = vpop.f32.mrf.mxu3  ;;  %6513 = vst.msk [vmem:[#allocation7 + $0x2d] sm:$0x1] %vm6501_vm15, %v15343_v54 }
 0x6aa   : > { %6503 = vst.msk [vmem:[#allocation7 + $0x8] sm:$0x1] %vm6501_vm15, %v15343_v54 }
 0x6ab   : > { %6504 = vst.msk [vmem:[#allocation7 + $0x10] sm:$0x1] %vm6501_vm15, %v15343_v54 }
 0x6ac   : > { %6505 = vst.msk [vmem:[#allocation7 + $0x18] sm:$0x1] %vm6501_vm15, %v15343_v54 }
 0x6ad   : > { %10039 = vmatmul.msk.bf16.vlgmr.msra.gmra.mxu2 %vm880_vm5, %v5451_v50  ;;  %6506 = vst.msk [vmem:[#allocation7 + $0x20] sm:$0x1] %vm6501_vm15, %v15343_v54 }
 0x6ae   : > { %10044 = vmatmul.msk.bf16.vlgmr.msra.gmra.mxu3 %vm880_vm5, %v5517_v23  ;;  %5904 = vmatpush.bf16.msra.mxu2 %v11101_v45  ;;  %6509 = vst.msk [vmem:[#allocation7 + $0xd] sm:$0x1] %vm6501_vm15, %v15343_v54 }
 0x6af   : > { %5966 = vmatpush.bf16.msra.mxu3 %v11103_v14  ;;  %6510 = vst.msk [vmem:[#allocation7 + $0x15] sm:$0x1] %vm6501_vm15, %v15343_v54 }
 0x6b0   : > { %6511 = vst.msk [vmem:[#allocation7 + $0x1d] sm:$0x1] %vm6501_vm15, %v15343_v54 }
 0x6b1   : > { %6512 = vst.msk [vmem:[#allocation7 + $0x25] sm:$0x1] %vm6501_vm15, %v15343_v54 }
 0x6b2   : > { %7508 = vst.msk [vmem:[#allocation8 + $0x4] sm:$0x1] %vm6501_vm15, %v15343_v54 }
 0x6b3   : > { %7509 = vst.msk [vmem:[#allocation8 + $0x8] sm:$0x1] %vm6501_vm15, %v15343_v54 }
 0x6b4   : > { %7512 = vst.msk [vmem:[#allocation8 + $0x7] sm:$0x1] %vm6501_vm15, %v15343_v54 }
 0x6b5   : > { %7513 = vst.msk [vmem:[#allocation8 + $0xb] sm:$0x1] %vm6501_vm15, %v15343_v54 }
 0x6b6   : > { %7504 = vst.msk [vmem:[#allocation8] sm:$0xf] %vm6962_vm0, %v15343_v54 }
 0x6b7   : > { %7506 = vst.msk [vmem:[#allocation8 + $0xc] sm:$0xf] %vm6962_vm0, %v15343_v54 }
 0x6b8   : > { %7507 = vst.msk [vmem:[#allocation8] sm:$0x1] %vm6501_vm15, %v15343_v54 }
 0x6b9   : > { %7510 = vst.msk [vmem:[#allocation8 + $0xc] sm:$0x1] %vm6501_vm15, %v15343_v54 }
 0x6ba   : > { %7511 = vst.msk [vmem:[#allocation8 + $0x3] sm:$0x1] %vm6501_vm15, %v15343_v54 }
 0x6bb   : > { %7514 = vst.msk [vmem:[#allocation8 + $0xf] sm:$0x1] %vm6501_vm15, %v15343_v54 }
 0x6bc   : > { %7521 = vst.msk [vmem:[#allocation9 + $0x4] sm:$0x1] %vm7519_vm3, %v15343_v54 }
 0x6bd   : > { %10040 = vmatmul.msk.bf16.gmra.mxu2 %vm880_vm5, %v5452_v36  ;;  %7522 = vst.msk [vmem:[#allocation9 + $0x8] sm:$0x1] %vm7519_vm3, %v15343_v54 }
 0x6be   : > { %10045 = vmatmul.msk.bf16.gmra.mxu3 %vm880_vm5, %v5518_v41  ;;  %7525 = vst.msk [vmem:[#allocation9 + $0x7] sm:$0x1] %vm7519_vm3, %v15343_v54 }
 0x6bf   : > { %7526 = vst.msk [vmem:[#allocation9 + $0xb] sm:$0x1] %vm7519_vm3, %v15343_v54 }
 0x6c0   : > { %8501 = vst.msk [vmem:[#allocation10 + $0x4] sm:$0x1] %vm7519_vm3, %v15343_v54 }
 0x6c1   : > { %8504 = vst.msk [vmem:[#allocation10 + $0x6] sm:$0x1] %vm7519_vm3, %v15343_v54 }
 0x6c2   : > { %8510 = vst.msk [vmem:[#allocation11 + $0x4] sm:$0x1] %vm7519_vm3, %v15343_v54 }
 0x6c3   : > { %8513 = vst.msk [vmem:[#allocation11 + $0x6] sm:$0x1] %vm7519_vm3, %v15343_v54 }
 0x6c4   : > { %7516 = vst.msk [vmem:[#allocation9] sm:$0xf] %vm7515_vm4, %v15343_v54 }
 0x6c5   : > { %7518 = vst.msk [vmem:[#allocation9 + $0xc] sm:$0xf] %vm7515_vm4, %v15343_v54 }
 0x6c6   : > { %7520 = vst.msk [vmem:[#allocation9] sm:$0x1] %vm7519_vm3, %v15343_v54 }
 0x6c7   : > { %7523 = vst.msk [vmem:[#allocation9 + $0xc] sm:$0x1] %vm7519_vm3, %v15343_v54 }
 0x6c8   : > { %7524 = vst.msk [vmem:[#allocation9 + $0x3] sm:$0x1] %vm7519_vm3, %v15343_v54 }
 0x6c9   : > { %7527 = vst.msk [vmem:[#allocation9 + $0xf] sm:$0x1] %vm7519_vm3, %v15343_v54 }
 0x6ca   : > { %8497 = vst.msk [vmem:[#allocation10] sm:$0x7] %vm8496_vm7, %v15343_v54 }
 0x6cb   : > { %8499 = vst.msk [vmem:[#allocation10 + $0x8] sm:$0x7] %vm8496_vm7, %v15343_v54 }
 0x6cc   : > { %8500 = vst.msk [vmem:[#allocation10] sm:$0x1] %vm7519_vm3, %v15343_v54 }
 0x6cd   : > { %10041 = vmatmul.msk.bf16.gmra.mxu2 %vm880_vm5, %v5453_v27  ;;  %8503 = vst.msk [vmem:[#allocation10 + $0x2] sm:$0x1] %vm7519_vm3, %v15343_v54 }
 0x6ce   : > { %10046 = vmatmul.msk.bf16.gmra.mxu3 %vm880_vm5, %v5519_v46  ;;  %8506 = vst.msk [vmem:[#allocation11] sm:$0x7] %vm8496_vm7, %v15343_v54 }
 0x6cf   : > { %8508 = vst.msk [vmem:[#allocation11 + $0x8] sm:$0x7] %vm8496_vm7, %v15343_v54 }
 0x6d0   : > { %8502 = vst.msk [vmem:[#allocation10 + $0x8] sm:$0x1] %vm7519_vm3, %v15343_v54 }
 0x6d1   : > { %8505 = vst.msk [vmem:[#allocation10 + $0xa] sm:$0x1] %vm7519_vm3, %v15343_v54 }
 0x6d2   : > { %8509 = vst.msk [vmem:[#allocation11] sm:$0x1] %vm7519_vm3, %v15343_v54 }
 0x6d3   : > { %8511 = vst.msk [vmem:[#allocation11 + $0x8] sm:$0x1] %vm7519_vm3, %v15343_v54 }
 0x6d4   : > { %8512 = vst.msk [vmem:[#allocation11 + $0x2] sm:$0x1] %vm7519_vm3, %v15343_v54 }
 0x6d5   : > { %8514 = vst.msk [vmem:[#allocation11 + $0xa] sm:$0x1] %vm7519_vm3, %v15343_v54  ;;  %v11218_v54 = vld [vmem:[%s15353_s17 + $0xd8] sm:$0xff] }
 0x6dd   : > { %10042 = vmatmul.msk.bf16.gmra.mxu2 %vm880_vm5, %v5454_v47  ;;  %v11105_v47 = vld [vmem:[%s15342_s3 + $0x20] sm:$0xff] }
 0x6de   : > { %10047 = vmatmul.msk.bf16.gmra.mxu3 %vm880_vm5, %v5520_v20  ;;  %6106 = vmatpush.bf16.msra.mxu1 %v11105_v47 }
 0x6e0   : > { %v5262_v50 = vpop.f32.mrf.mxu2 }
 0x6e1   : > { %v5306_v23 = vpop.f32.mrf.mxu3 }
 0x6e2   : > { %v5307_v1 = vadd.f32 %v5306_v23, %v5262_v50 }
 0x6e8   : > { %v5264_v32 = vpop.f32.mrf.mxu2 }
 0x6e9   : > { %v5308_v10 = vpop.f32.mrf.mxu3 }
 0x6ea   : > { %v13969_v62 = vadd.f32 %v5308_v10, %v5264_v32 }
 0x6ed   : > { %10049 = vmatmul.msk.bf16.vlgmr.msrb.gmra.mxu2 %vm880_vm5, %v13658_v42 }
 0x6ee   : > { %10054 = vmatmul.msk.bf16.vlgmr.msrb.gmra.mxu3 %vm880_vm5, %v13654_v37 }
 0x6f0   : > { %v5349_v36 = vpop.f32.mrf.mxu2 }
 0x6f1   : > { %v5415_v41 = vpop.f32.mrf.mxu3  ;;  %v5369_v0 = vadd.f32 %v5349_v36, %v13805_v7 }
 0x6f3   : > { %v13976_v19 = vadd.f32 %v5415_v41, %v5369_v0  ;;  %v14083_v41 = vld [vmem:[%s15344_s9] ss:$0 sm:$0xff]  ;;  %v5748_v0 = vpop.f32.mrf.mxu0  ;;  %s14302_s9 = sand.u32 1, %s11444_s2  }
 0x6f4   : > { %s9708_s5 = sshll.u32 %s14302_s9, 5  ;;  %s9709_s21 = sshll.u32 %s14302_s9, 3 }
 0x6f5   : > { %s14312_s27 = scalar_lea.vmem [#allocation16], %s9708_s5  ;;  %s14542_s0 = scalar_lea.vmem [#allocation18], %s9709_s21 }
 0x6f6   : > { %s9710_s6 = sshll.u32 %s14302_s9, 1  ;;  %s11350_s5 = scalar_lea.hbm %s15357_s23, 16 }
 0x6f8   : > { %v13978_v4 = vpop.f32.mrf.mxu2 }
 0x6f9   : > { %v13980_v40 = vpop.f32.mrf.mxu3  ;;  %v5370_v50 = vadd.f32 %v13978_v4, %v5294_v43 }
 0x6fd   : > { %10050 = vmatmul.msk.bf16.gmra.mxu2 %vm880_vm5, %v13787_v11 }
 0x6fe   : > { %10055 = vmatmul.msk.bf16.gmra.mxu3 %vm880_vm5, %v13783_v33 }
 0x700   : > { %v5354_v42 = vpop.f32.mrf.mxu2 }
 0x701   : > { %v5420_v27 = vpop.f32.mrf.mxu3  ;;  %v5371_v37 = vadd.f32 %v5354_v42, %v13899_v57 }
 0x703   : > { %v13987_v46 = vadd.f32 %v5420_v27, %v5371_v37 }
 0x708   : > { %v13989_v21 = vpop.f32.mrf.mxu2 }
 0x709   : > { %v13991_v7 = vpop.f32.mrf.mxu3 }
 0x70d   : > { %10051 = vmatmul.msk.bf16.gmra.mxu2 %vm880_vm5, %v13883_v17 }
 0x70e   : > { %10056 = vmatmul.msk.bf16.gmra.mxu3 %vm880_vm5, %v13881_v25 }
 0x710   : > { %v5359_v11 = vpop.f32.mrf.mxu2 }
 0x711   : > { %v5425_v44 = vpop.f32.mrf.mxu3  ;;  %v5373_v29 = vadd.f32 %v5359_v11, %v5302_v34 }
 0x713   : > { %v13997_v33 = vadd.f32 %v5425_v44, %v5373_v29  ;;  %v5299_v44 = vadd.f32 %v13934_v5, %v13932_v63 }
 0x715   : > { %v5372_v8 = vadd.f32 %v13989_v21, %v5299_v44 }
 0x718   : > { %v13999_v55 = vpop.f32.mrf.mxu2 }
 0x719   : > { %v14001_v61 = vpop.f32.mrf.mxu3 }
 0x71d   : > { %10052 = vmatmul.msk.bf16.gmra.mxu2 %vm880_vm5, %v5587_v6  ;;  %v5751_v6 = vpop.f32.mrf.mxu0 }
 0x71e   : > { %10057 = vmatmul.msk.bf16.gmra.mxu3 %vm880_vm5, %v5653_v2  ;;  %vm7935_vm5 = vcmask 517120  }
 0x720   : > { %v5364_v17 = vpop.f32.mrf.mxu2 }
 0x721   : > { %v5430_v53 = vpop.f32.mrf.mxu3  ;;  %v5375_v25 = vadd.f32 %v5364_v17, %v5307_v1  ;;  %v5436_v1 = vadd.f32 %v13980_v40, %v5370_v50 }
 0x723   : > { %v14005_v22 = vadd.f32 %v5430_v53, %v5375_v25  ;;  %v5817_v53 = vld [vmem:[#allocation5 + $0x1] sm:$0xff] }
 0x724   : > { %v5803_v25 = vld [vmem:[#allocation5] sm:$0xff] }
 0x728   : > { %v14007_v57 = vpop.f32.mrf.mxu2 }
 0x729   : > { %v14009_v39 = vpop.f32.mrf.mxu3 }
 0x730   : > { %v5481_v60 = vpop.f32.mrf.mxu2 }
 0x731   : > { %v5547_v9 = vpop.f32.mrf.mxu3  ;;  %v5501_v34 = vadd.f32 %v5481_v60, %v13976_v19  ;;  %v5926_v60 = vld [vmem:[#allocation5 + $0x2] sm:$0xff] }
 0x733   : > { %v5567_v52 = vadd.f32 %v5547_v9, %v5501_v34  ;;  %v5753_v34 = vpop.f32.mrf.mxu0 }
 0x738   : > { %v5483_v49 = vpop.f32.mrf.mxu2 }
 0x739   : > { %v5549_v3 = vpop.f32.mrf.mxu3  ;;  %v5502_v10 = vadd.f32 %v5483_v49, %v5436_v1  ;;  %v5304_v1 = vadd.f32 %v13964_v13, %v13962_v59 }
 0x73b   : > { %v5568_v4 = vadd.f32 %v5549_v3, %v5502_v10 }
 0x740   : > { %v14011_v35 = vpop.f32.mrf.mxu2 }
 0x741   : > { %v14013_v26 = vpop.f32.mrf.mxu3  ;;  %v5503_v29 = vadd.f32 %v14011_v35, %v13987_v46  ;;  %v5438_v46 = vadd.f32 %v13991_v7, %v5372_v8 }
 0x743   : > { %v5569_v63 = vadd.f32 %v14013_v26, %v5503_v29 }
 0x748   : > { %v14015_v30 = vpop.f32.mrf.mxu2 }
 0x749   : > { %v14017_v56 = vpop.f32.mrf.mxu3  ;;  %v5504_v3 = vadd.f32 %v14015_v30, %v5438_v46 }
 0x74b   : > { %v5570_v58 = vadd.f32 %v14017_v56, %v5504_v3 }
 0x750   : > { %v14019_v24 = vpop.f32.mrf.mxu2 }
 0x751   : > { %v14021_v31 = vpop.f32.mrf.mxu3  ;;  %v5505_v10 = vadd.f32 %v14019_v24, %v13997_v33 }
 0x758   : > { %v14027_v20 = vpop.f32.mrf.mxu2 }
 0x759   : > { %v14029_v28 = vpop.f32.mrf.mxu3 }
 0x760   : > { %v14031_v51 = vpop.f32.mrf.mxu2 }
 0x761   : > { %v14033_v38 = vpop.f32.mrf.mxu3 }
 0x768   : > { %v14043_v18 = vpop.f32.mrf.mxu2 }
 0x769   : > { %v14045_v15 = vpop.f32.mrf.mxu3 }
 0x770   : > { %v5614_v16 = vpop.f32.mrf.mxu2 }
 0x771   : > { %v5680_v23 = vpop.f32.mrf.mxu3  ;;  %v5634_v32 = vadd.f32 %v5614_v16, %v5567_v52 }
 0x773   : > { %v5700_v36 = vadd.f32 %v5680_v23, %v5634_v32 }
 0x775   : > { %v5766_v19 = vadd.f32 %v5746_v48, %v5700_v36 }
 0x777   : > { %v5778_v40 = vadd.f32 %v14083_v41, %v5766_v19  ;;  %v5374_v19 = vadd.f32 %v13999_v55, %v5304_v1 }
 0x778   : > { %v5616_v42 = vpop.f32.mrf.mxu2 }
 0x779   : > { %v5682_v27 = vpop.f32.mrf.mxu3  ;;  %v5786_v37 = vmax.f32 %v5778_v40, 0.0  ;;  %v5635_v11 = vadd.f32 %v5616_v42, %v5568_v4  ;;  %v5756_v4 = vpop.f32.mrf.mxu0  ;;  %v5571_v40 = vadd.f32 %v14021_v31, %v5505_v10  ;;  %v5440_v59 = vadd.f32 %v14001_v61, %v5374_v19 }
 0x77b   : > { %5795 = vst.msk [vmem:[#allocation5 + $0x11] sm:$0xff] %vm5159_vm9, %v5786_v37  ;;  %v5701_v12 = vadd.f32 %v5682_v27, %v5635_v11  ;;  %v5506_v55 = vadd.f32 %v14027_v20, %v5440_v59  ;;  %v11106_v20 = vld [vmem:[%s15342_s3 + $0x28] sm:$0xff] }
 0x77c   : > { %6176 = vmatpush.bf16.msrb.mxu2 %v11106_v20 }
 0x77d   : > { %v5767_v2 = vadd.f32 %v5748_v0, %v5701_v12 }
 0x77f   : > { %v5779_v5 = vadd.f32 %v14083_v41, %v5767_v2 }
 0x780   : > { %v5619_v21 = vpop.f32.mrf.mxu2 }
 0x781   : > { %v5685_v17 = vpop.f32.mrf.mxu3  ;;  %v5787_v9 = vmax.f32 %v5779_v5, 0.0  ;;  %v5636_v49 = vadd.f32 %v5619_v21, %v5569_v63  ;;  %v11107_v63 = vld [vmem:[%s15342_s3 + $0x30] sm:$0xff]  ;;  %v5572_v5 = vadd.f32 %v14029_v28, %v5506_v55  ;;  %v5376_v28 = vadd.f32 %v14007_v57, %v13969_v62 }
 0x782   : > { %v14124_v35 = vld [vmem:[#allocation5 + $0x11] sm:$0xff]  ;;  %6247 = vmatpush.bf16.msrb.mxu3 %v11107_v63 }
 0x783   : > { %v5804_v26 = vld [vmem:[#allocation5 + $0x10] sm:$0xff]  ;;  %5796 = vst.msk [vmem:[#allocation5 + $0x21] sm:$0xff] %vm5159_vm9, %v5787_v9  ;;  %v5702_v45 = vadd.f32 %v5685_v17, %v5636_v49  ;;  %v5825_v14 = vpack.c.bf16 %v14124_v35, %v5817_v53  ;;  %v5507_v49 = vadd.f32 %v14031_v51, %v14005_v22  ;;  %v5442_v22 = vadd.f32 %v14009_v39, %v5376_v28 }
 0x784   : > { %v14128_v7 = vld [vmem:[#allocation5 + $0x12] sm:$0xff]  ;;  %v5811_v43 = vpack.c.bf16 %v5804_v26, %v5803_v25 }
 0x785   : > { %v5934_v48 = vpack.c.bf16 %v14128_v7, %v5926_v60  ;;  %v5768_v30 = vadd.f32 %v5751_v6, %v5702_v45  ;;  %10069 = vmatmul.msk.bf16.vlgmr.msrb.gmra.mxu1 %vm5159_vm9, %v5825_v14  ;;  %v5758_v60 = vpop.f32.mrf.mxu0  ;;  %v11108_v14 = vld [vmem:[%s15342_s3 + $0x38] sm:$0xff] }
 0x786   : > { %10077 = vmatmul.msk.bf16.vlgmr.msra.gmra.mxu2 %vm5159_vm9, %v5811_v43  ;;  %v5573_v43 = vadd.f32 %v14033_v38, %v5507_v49  ;;  %6317 = vmatpush.bf16.msrb.mxu0 %v11108_v14 }
 0x787   : > { %10087 = vmatmul.msk.bf16.vlgmr.msra.gmra.mxu3 %vm5159_vm9, %v5934_v48  ;;  %v5780_v47 = vadd.f32 %v14083_v41, %v5768_v30 }
 0x788   : > { %v5621_v50 = vpop.f32.mrf.mxu2 }
 0x789   : > { %v5687_v52 = vpop.f32.mrf.mxu3  ;;  %v5788_v16 = vmax.f32 %v5780_v47, 0.0  ;;  %v5637_v23 = vadd.f32 %v5621_v50, %v5570_v58  ;;  %v5508_v50 = vadd.f32 %v14043_v18, %v5442_v22  ;;  %v11109_v18 = vld [vmem:[%s15342_s3 + $0x40] sm:$0xff] }
 0x78a   : > { %v5997_v32 = vld [vmem:[#allocation5 + $0x20] sm:$0xff]  ;;  %6387 = vmatpush.bf16.msrb.mxu1 %v11109_v18  ;;  %v6354_v18 = vld [vmem:[#allocation5 + $0x92] sm:$0xff] }
 0x78b   : > { %5797 = vst.msk [vmem:[#allocation5 + $0x31] sm:$0xff] %vm5159_vm9, %v5788_v16  ;;  %v5703_v36 = vadd.f32 %v5687_v52, %v5637_v23  ;;  %v6004_v0 = vpack.c.bf16 %v5997_v32, %v5804_v26  ;;  %v14152_v24 = vld [vmem:[#allocation5 + $0x21] sm:$0xff] }
 0x78c   : > { %v14154_v11 = vld [vmem:[#allocation5 + $0x22] sm:$0xff] }
 0x78d   : > { %v5769_v56 = vadd.f32 %v5753_v34, %v5703_v36  ;;  %10097 = vmatmul.msk.bf16.vlgmr.msra.gmra.mxu0 %vm5159_vm9, %v6004_v0  ;;  %v5761_v57 = vpop.f32.mrf.mxu0  ;;  %v5574_v36 = vadd.f32 %v14045_v15, %v5508_v50 }
 0x78f   : > { %v5781_v42 = vadd.f32 %v14083_v41, %v5769_v56 }
 0x790   : > { %v5624_v13 = vpop.f32.mrf.mxu2 }
 0x791   : > { %v5690_v27 = vpop.f32.mrf.mxu3  ;;  %v5789_v37 = vmax.f32 %v5781_v42, 0.0  ;;  %v5638_v33 = vadd.f32 %v5624_v13, %v5571_v40 }
 0x792   : > { %v14157_v44 = vld [vmem:[#allocation5 + $0x31] sm:$0xff] }
 0x793   : > { %v5806_v29 = vld [vmem:[#allocation5 + $0x30] sm:$0xff]  ;;  %5798 = vst.msk [vmem:[#allocation5 + $0x41] sm:$0xff] %vm5159_vm9, %v5789_v37  ;;  %v5704_v31 = vadd.f32 %v5690_v27, %v5638_v33  ;;  %v14164_v61 = vpack.c.bf16 %v14157_v44, %v14152_v24 }
 0x794   : > { %v14159_v12 = vld [vmem:[#allocation5 + $0x32] sm:$0xff]  ;;  %v14166_v8 = vpack.c.bf16 %v5806_v29, %v5997_v32 }
 0x795   : > { %v14170_v6 = vpack.c.bf16 %v14159_v12, %v14154_v11  ;;  %v5770_v2 = vadd.f32 %v5756_v4, %v5704_v31  ;;  %10070 = vmatmul.msk.bf16.gmra.mxu1 %vm5159_vm9, %v14164_v61  ;;  %v5763_v27 = vpop.f32.mrf.mxu0 }
 0x796   : > { %10078 = vmatmul.msk.bf16.gmra.mxu2 %vm5159_vm9, %v14166_v8 }
 0x797   : > { %10088 = vmatmul.msk.bf16.gmra.mxu3 %vm5159_vm9, %v14170_v6  ;;  %v5782_v46 = vadd.f32 %v14083_v41, %v5770_v2 }
 0x798   : > { %v5626_v21 = vpop.f32.mrf.mxu2 }
 0x799   : > { %v5692_v17 = vpop.f32.mrf.mxu3  ;;  %v5790_v53 = vmax.f32 %v5782_v46, 0.0  ;;  %v5639_v25 = vadd.f32 %v5626_v21, %v5572_v5 }
 0x79a   : > { %v5999_v9 = vld [vmem:[#allocation5 + $0x40] sm:$0xff] }
 0x79b   : > { %5799 = vst.msk [vmem:[#allocation5 + $0x51] sm:$0xff] %vm5159_vm9, %v5790_v53  ;;  %v5705_v3 = vadd.f32 %v5692_v17, %v5639_v25  ;;  %v6005_v26 = vpack.c.bf16 %v5999_v9, %v5806_v29  ;;  %v5821_v47 = vld [vmem:[#allocation5 + $0x41] sm:$0xff]  ;;  %v6144_v53 = vpack.c.bf16 %v14154_v11, %v14128_v7 }
 0x79c   : > { %v5930_v62 = vld [vmem:[#allocation5 + $0x42] sm:$0xff]  ;;  %v6075_v25 = vpack.c.bf16 %v5821_v47, %v14157_v44  ;;  %v6214_v44 = vld [vmem:[#allocation5 + $0x90] sm:$0xff] }
 0x79d   : > { %v5771_v45 = vadd.f32 %v5758_v60, %v5705_v3  ;;  %10098 = vmatmul.msk.bf16.gmra.mxu0 %vm5159_vm9, %v6005_v26  ;;  %v6145_v60 = vpack.c.bf16 %v5930_v62, %v14159_v12 }
 0x79f   : > { %v5783_v48 = vadd.f32 %v14083_v41, %v5771_v45 }
 0x7a0   : > { %v5629_v51 = vpop.f32.mrf.mxu2 }
 0x7a1   : > { %v5695_v30 = vpop.f32.mrf.mxu3  ;;  %v5791_v34 = vmax.f32 %v5783_v48, 0.0  ;;  %v5640_v58 = vadd.f32 %v5629_v51, %v5573_v43 }
 0x7a2   : > { %v5822_v52 = vld [vmem:[#allocation5 + $0x51] sm:$0xff] }
 0x7a3   : > { %v5808_v16 = vld [vmem:[#allocation5 + $0x50] sm:$0xff]  ;;  %5800 = vst.msk [vmem:[#allocation5 + $0x61] sm:$0xff] %vm5159_vm9, %v5791_v34  ;;  %v5706_v38 = vadd.f32 %v5695_v30, %v5640_v58  ;;  %v5827_v1 = vpack.c.bf16 %v5822_v52, %v5821_v47 }
 0x7a4   : > { %v5931_v23 = vld [vmem:[#allocation5 + $0x52] sm:$0xff]  ;;  %v5813_v32 = vpack.c.bf16 %v5808_v16, %v5999_v9 }
 0x7a5   : > { %v14200_v10 = vpack.c.bf16 %v5931_v23, %v5930_v62  ;;  %v5772_v39 = vadd.f32 %v5761_v57, %v5706_v38  ;;  %10071 = vmatmul.msk.bf16.gmra.mxu1 %vm5159_vm9, %v5827_v1  ;;  %v6284_v9 = vld [vmem:[#allocation5 + $0x91] sm:$0xff] }
 0x7a6   : > { %10079 = vmatmul.msk.bf16.gmra.mxu2 %vm5159_vm9, %v5813_v32 }
 0x7a7   : > { %10089 = vmatmul.msk.bf16.gmra.mxu3 %vm5159_vm9, %v14200_v10  ;;  %v5784_v0 = vadd.f32 %v14083_v41, %v5772_v39 }
 0x7a8   : > { %v5631_v19 = vpop.f32.mrf.mxu2 }
 0x7a9   : > { %v5792_v56 = vmax.f32 %v5784_v0, 0.0  ;;  %v5641_v4 = vadd.f32 %v5631_v19, %v5574_v36  ;;  %v5697_v40 = vpop.f32.mrf.mxu3 }
 0x7aa   : > { %v6001_v42 = vld [vmem:[#allocation5 + $0x60] sm:$0xff] }
 0x7ab   : > { %5801 = vst.msk [vmem:[#allocation5 + $0x71] sm:$0xff] %vm5159_vm9, %v5792_v56  ;;  %v5707_v59 = vadd.f32 %v5697_v40, %v5641_v4  ;;  %v6006_v13 = vpack.c.bf16 %v6001_v42, %v5808_v16  ;;  %v5823_v15 = vld [vmem:[#allocation5 + $0x61] sm:$0xff] }
 0x7ac   : > { %v5932_v29 = vld [vmem:[#allocation5 + $0x62] sm:$0xff] }
 0x7ad   : > { %v5773_v37 = vadd.f32 %v5763_v27, %v5707_v59  ;;  %10099 = vmatmul.msk.bf16.gmra.mxu0 %vm5159_vm9, %v6006_v13  ;;  %v6146_v7 = vpack.c.bf16 %v5932_v29, %v5931_v23 }
 0x7af   : > { %v5785_v33 = vadd.f32 %v14083_v41, %v5773_v37  ;;  %v6074_v41 = vpack.c.bf16 %v14152_v24, %v14124_v35  ;;  %v6076_v35 = vpack.c.bf16 %v5823_v15, %v5822_v52 }
 0x7b1   : > { %v5793_v55 = vmax.f32 %v5785_v33, 0.0 }
 0x7b2   : > { %v5824_v31 = vld [vmem:[#allocation5 + $0x71] sm:$0xff] }
 0x7b3   : > { %v5810_v2 = vld [vmem:[#allocation5 + $0x70] sm:$0xff]  ;;  %5802 = vst.msk [vmem:[#allocation5 + $0x81] sm:$0xff] %vm5159_vm9, %v5793_v55  ;;  %v5828_v63 = vpack.c.bf16 %v5824_v31, %v5823_v15 }
 0x7b4   : > { %v5933_v20 = vld [vmem:[#allocation5 + $0x72] sm:$0xff]  ;;  %v5814_v5 = vpack.c.bf16 %v5810_v2, %v6001_v42 }
 0x7b5   : > { %v5937_v46 = vpack.c.bf16 %v5933_v20, %v5932_v29  ;;  %10072 = vmatmul.msk.bf16.gmra.mxu1 %vm5159_vm9, %v5828_v63 }
 0x7b6   : > { %10080 = vmatmul.msk.bf16.gmra.mxu2 %vm5159_vm9, %v5814_v5 }
 0x7b7   : > { %10090 = vmatmul.msk.bf16.gmra.mxu3 %vm5159_vm9, %v5937_v46 }
 0x7ba   : > { %v6003_v21 = vld [vmem:[#allocation5 + $0x80] sm:$0xff] }
 0x7bb   : > { %v6007_v17 = vpack.c.bf16 %v6003_v21, %v5810_v2  ;;  %v6073_v24 = vld [vmem:[#allocation5 + $0x81] sm:$0xff] }
 0x7bc   : > { %v6143_v11 = vld [vmem:[#allocation5 + $0x82] sm:$0xff]  ;;  %v6077_v12 = vpack.c.bf16 %v6073_v24, %v5824_v31  ;;  %v6288_v49 = vpack.c.bf16 %v6284_v9, %v6073_v24 }
 0x7bd   : > { %10100 = vmatmul.msk.bf16.gmra.mxu0 %vm5159_vm9, %v6007_v17  ;;  %v6358_v56 = vpack.c.bf16 %v6354_v18, %v6143_v11  ;;  %v6519_v18 = vld [vmem:[#allocation6] sm:$0xf] }
 0x7be   : > { %6527 = vst [vmem:[#allocation1] ss:$2 sm:$0xff] %v6519_v18 }
 0x7c5   : > { %10107 = vmatmul.msk.bf16.vlgmr.msra.gmra.mxu1 %vm5159_vm9, %v6074_v41 }
 0x7c6   : > { %10117 = vmatmul.msk.bf16.vlgmr.msrb.gmra.mxu2 %vm5159_vm9, %v6144_v53 }
 0x7c7   : > { %10127 = vmatmul.msk.bf16.vlgmr.msrb.gmra.mxu3 %vm5159_vm9, %v14166_v8  ;;  %v6218_v8 = vpack.c.bf16 %v6214_v44, %v6003_v21 }
 0x7cd   : > { %10137 = vmatmul.msk.bf16.vlgmr.msrb.gmra.mxu0 %vm5159_vm9, %v14164_v61  ;;  %v6147_v61 = vpack.c.bf16 %v6143_v11, %v5933_v20 }
 0x7d5   : > { %10108 = vmatmul.msk.bf16.gmra.mxu1 %vm5159_vm9, %v6075_v25 }
 0x7d6   : > { %10118 = vmatmul.msk.bf16.gmra.mxu2 %vm5159_vm9, %v6145_v60 }
 0x7d7   : > { %10128 = vmatmul.msk.bf16.gmra.mxu3 %vm5159_vm9, %v5813_v32 }
 0x7dd   : > { %10138 = vmatmul.msk.bf16.gmra.mxu0 %vm5159_vm9, %v5827_v1 }
 0x7e5   : > { %10109 = vmatmul.msk.bf16.gmra.mxu1 %vm5159_vm9, %v6076_v35 }
 0x7e6   : > { %10119 = vmatmul.msk.bf16.gmra.mxu2 %vm5159_vm9, %v6146_v7 }
 0x7e7   : > { %10129 = vmatmul.msk.bf16.gmra.mxu3 %vm5159_vm9, %v5814_v5 }
 0x7ed   : > { %10139 = vmatmul.msk.bf16.gmra.mxu0 %vm5159_vm9, %v5828_v63 }
 0x7f5   : > { %10110 = vmatmul.msk.bf16.gmra.mxu1 %vm5159_vm9, %v6077_v12 }
 0x7f6   : > { %10120 = vmatmul.msk.bf16.gmra.mxu2 %vm5159_vm9, %v6147_v61 }
 0x7f7   : > { %10130 = vmatmul.msk.bf16.gmra.mxu3 %vm5159_vm9, %v6218_v8 }
 0x7fd   : > { %10140 = vmatmul.msk.bf16.gmra.mxu0 %vm5159_vm9, %v6288_v49 }
 0x802   : > { %v5859_v3 = vpop.f32.mrf.mxu1 }
 0x805   : > { %10147 = vmatmul.msk.bf16.vlgmr.msrb.gmra.mxu1 %vm5159_vm9, %v14170_v6 }
 0x809   : > { %v5906_v26 = vpop.f32.mrf.mxu2 }
 0x80a   : > { %v5968_v28 = vpop.f32.mrf.mxu3  ;;  %v5861_v45 = vpop.f32.mrf.mxu1  ;;  %v5907_v17 = vadd.f32 %v5906_v26, %v5859_v3 }
 0x80b   : > { %v6038_v14 = vpop.f32.mrf.mxu0 }
 0x80c   : > { %v5988_v53 = vadd.f32 %v5968_v28, %v5907_v17 }
 0x80e   : > { %v6058_v24 = vadd.f32 %v6038_v14, %v5988_v53 }
 0x811   : > { %v5908_v43 = vpop.f32.mrf.mxu2 }
 0x812   : > { %v5970_v48 = vpop.f32.mrf.mxu3  ;;  %v5864_v22 = vpop.f32.mrf.mxu1  ;;  %v5909_v11 = vadd.f32 %v5908_v43, %v5861_v45 }
 0x813   : > { %v6040_v51 = vpop.f32.mrf.mxu0 }
 0x814   : > { %v5989_v61 = vadd.f32 %v5970_v48, %v5909_v11  ;;  %v14297_v48 = vld [vmem:[%s15345_s1] ss:$0 sm:$0xff]  ;;  %s15346_s1 = sld [smem:[#allocation56_spill]] }
 0x815   : > { %10148 = vmatmul.msk.bf16.gmra.mxu1 %vm5159_vm9, %v14200_v10 }
 0x816   : > { %v6059_v3 = vadd.f32 %v6040_v51, %v5989_v61 }
 0x819   : > { %v5911_v30 = vpop.f32.mrf.mxu2 }
 0x81a   : > { %v14247_v34 = vpop.f32.mrf.mxu3  ;;  %v14249_v58 = vpop.f32.mrf.mxu1  ;;  %v5912_v26 = vadd.f32 %v5911_v30, %v5864_v22 }
 0x81b   : > { %v14251_v47 = vpop.f32.mrf.mxu0 }
 0x81c   : > { %v5990_v45 = vadd.f32 %v14247_v34, %v5912_v26 }
 0x81e   : > { %v6060_v34 = vadd.f32 %v14251_v47, %v5990_v45 }
 0x821   : > { %v14253_v62 = vpop.f32.mrf.mxu2 }
 0x822   : > { %v14255_v6 = vpop.f32.mrf.mxu3  ;;  %v5869_v57 = vpop.f32.mrf.mxu1 }
 0x823   : > { %v14257_v50 = vpop.f32.mrf.mxu0 }
 0x825   : > { %10149 = vmatmul.msk.bf16.gmra.mxu1 %vm5159_vm9, %v5937_v46 }
 0x829   : > { %v5916_v52 = vpop.f32.mrf.mxu2 }
 0x82a   : > { %v5917_v16 = vadd.f32 %v5916_v52, %v5869_v57  ;;  %v5978_v23 = vpop.f32.mrf.mxu3  ;;  %v14260_v38 = vpop.f32.mrf.mxu1 }
 0x82b   : > { %v6048_v1 = vpop.f32.mrf.mxu0 }
 0x82c   : > { %v5992_v32 = vadd.f32 %v5978_v23, %v5917_v16  ;;  %v5914_v16 = vadd.f32 %v14253_v62, %v14249_v58 }
 0x82e   : > { %v6062_v10 = vadd.f32 %v6048_v1, %v5992_v32 }
 0x831   : > { %v14262_v39 = vpop.f32.mrf.mxu2 }
 0x832   : > { %v14264_v36 = vpop.f32.mrf.mxu3  ;;  %v5874_v0 = vpop.f32.mrf.mxu1 }
 0x833   : > { %v14266_v19 = vpop.f32.mrf.mxu0 }
 0x835   : > { %10150 = vmatmul.msk.bf16.gmra.mxu1 %vm5159_vm9, %v6358_v56 }
 0x839   : > { %v5921_v4 = vpop.f32.mrf.mxu2 }
 0x83a   : > { %v5922_v40 = vadd.f32 %v5921_v4, %v5874_v0  ;;  %v5983_v42 = vpop.f32.mrf.mxu3  ;;  %v14269_v59 = vpop.f32.mrf.mxu1  ;;  %v5991_v4 = vadd.f32 %v14255_v6, %v5914_v16 }
 0x83b   : > { %v6053_v27 = vpop.f32.mrf.mxu0 }
 0x83c   : > { %v5994_v13 = vadd.f32 %v5983_v42, %v5922_v40 }
 0x83e   : > { %v6064_v37 = vadd.f32 %v6053_v27, %v5994_v13  ;;  %v6061_v27 = vadd.f32 %v14257_v50, %v5991_v4 }
 0x841   : > { %v14273_v31 = vpop.f32.mrf.mxu2 }
 0x842   : > { %v6108_v33 = vpop.f32.mrf.mxu1  ;;  %v14277_v63 = vpop.f32.mrf.mxu3 }
 0x843   : > { %v14279_v5 = vpop.f32.mrf.mxu0  ;;  %v6128_v44 = vadd.f32 %v6108_v33, %v6058_v24 }
 0x849   : > { %v6178_v46 = vpop.f32.mrf.mxu2 }
 0x84a   : > { %v6110_v55 = vpop.f32.mrf.mxu1  ;;  %v6249_v41 = vpop.f32.mrf.mxu3  ;;  %v6198_v8 = vadd.f32 %v6178_v46, %v6128_v44 }
 0x84b   : > { %v6319_v25 = vpop.f32.mrf.mxu0  ;;  %v6129_v52 = vadd.f32 %v6110_v55, %v6059_v3 }
 0x84c   : > { %v6269_v28 = vadd.f32 %v6249_v41, %v6198_v8 }
 0x84e   : > { %v6339_v14 = vadd.f32 %v6319_v25, %v6269_v28  ;;  %v5919_v28 = vadd.f32 %v14262_v39, %v14260_v38 }
 0x851   : > { %v6180_v60 = vpop.f32.mrf.mxu2 }
 0x852   : > { %v6113_v15 = vpop.f32.mrf.mxu1  ;;  %v6251_v12 = vpop.f32.mrf.mxu3  ;;  %v6199_v43 = vadd.f32 %v6180_v60, %v6129_v52 }
 0x853   : > { %v6321_v49 = vpop.f32.mrf.mxu0  ;;  %v6130_v0 = vadd.f32 %v6113_v15, %v6060_v34 }
 0x854   : > { %v6270_v23 = vadd.f32 %v6251_v12, %v6199_v43  ;;  %v11111_v43 = vld [vmem:[%s15346_s1 + $0x8] sm:$0xff] }
 0x855   : > { %6580 = vmatpush.bf16.msra.mxu2 %v11111_v43 }
 0x856   : > { %v6340_v40 = vadd.f32 %v6321_v49, %v6270_v23 }
 0x859   : > { %v6183_v57 = vpop.f32.mrf.mxu2 }
 0x85a   : > { %v14271_v29 = vpop.f32.mrf.mxu1  ;;  %v6254_v22 = vpop.f32.mrf.mxu3  ;;  %v6200_v42 = vadd.f32 %v6183_v57, %v6130_v0 }
 0x85b   : > { %v6324_v1 = vpop.f32.mrf.mxu0  ;;  %v6131_v55 = vadd.f32 %v14271_v29, %v6061_v27 }
 0x862   : > { %v6118_v2 = vpop.f32.mrf.mxu1  ;;  %v6256_v62 = vpop.f32.mrf.mxu3 }
 0x863   : > { %v14275_v20 = vadd.f32 %v6118_v2, %v6062_v10  ;;  %v6185_v10 = vpop.f32.mrf.mxu2  ;;  %v6326_v6 = vpop.f32.mrf.mxu0 }
 0x864   : > { %v6201_v17 = vadd.f32 %v6185_v10, %v6131_v55 }
 0x866   : > { %v6272_v50 = vadd.f32 %v6256_v62, %v6201_v17 }
 0x868   : > { %v6342_v29 = vadd.f32 %v6326_v6, %v6272_v50 }
 0x86a   : > { %v14281_v21 = vpop.f32.mrf.mxu1  ;;  %v6259_v24 = vpop.f32.mrf.mxu3 }
 0x86b   : > { %v6188_v2 = vpop.f32.mrf.mxu2  ;;  %v6329_v44 = vpop.f32.mrf.mxu0 }
 0x86c   : > { %v6202_v10 = vadd.f32 %v6188_v2, %v14275_v20 }
 0x86e   : > { %v6273_v20 = vadd.f32 %v6259_v24, %v6202_v10 }
 0x872   : > { %v6123_v35 = vpop.f32.mrf.mxu1 }
 0x873   : > { %v14283_v7 = vadd.f32 %v6123_v35, %v6064_v37  ;;  %v6271_v37 = vadd.f32 %v6254_v22, %v6200_v42  ;;  %v6190_v61 = vpop.f32.mrf.mxu2  ;;  %v11110_v22 = vld [vmem:[%s15346_s1] sm:$0xff]  ;;  %v6331_v34 = vpop.f32.mrf.mxu0 }
 0x874   : > { %6603 = vmatpush.bf16.msra.mxu3 %v11110_v22 }
 0x875   : > { %v6341_v46 = vadd.f32 %v6324_v1, %v6271_v37  ;;  %v6343_v37 = vadd.f32 %v6329_v44, %v6273_v20  ;;  %v11112_v20 = vld [vmem:[%s15346_s1 + $0x10] sm:$0xff] }
 0x876   : > { %6649 = vmatpush.bf16.msrb.mxu2 %v11112_v20 }
 0x87a   : > { %v14285_v9 = vpop.f32.mrf.mxu1 }
 0x87b   : > { %v6193_v16 = vpop.f32.mrf.mxu2 }
 0x882   : > { %v6389_v51 = vpop.f32.mrf.mxu1 }
 0x883   : > { %v6409_v30 = vadd.f32 %v6389_v51, %v6339_v14  ;;  %v6261_v14 = vpop.f32.mrf.mxu3  ;;  %v5993_v51 = vadd.f32 %v14264_v36, %v5919_v28  ;;  %v5924_v36 = vadd.f32 %v14273_v31, %v14269_v59  ;;  %v6541_v59 = vld [vmem:[#allocation6 + $0x1] sm:$0xf] }
 0x885   : > { %v6421_v32 = vadd.f32 %v14297_v48, %v6409_v30  ;;  %v6063_v23 = vadd.f32 %v14266_v19, %v5993_v51  ;;  %v5995_v18 = vadd.f32 %v14277_v63, %v5924_v36 }
 0x887   : > { %v6429_v56 = vmax.f32 %v6421_v32, 0.0  ;;  %v6133_v32 = vadd.f32 %v14281_v21, %v6063_v23  ;;  %v6204_v21 = vadd.f32 %v6193_v16, %v14283_v7  ;;  %v6065_v63 = vadd.f32 %v14279_v5, %v5995_v18 }
 0x889   : > { %v6437_v13 = vpack.c.bf16 %v6429_v56, %v6429_v56  ;;  %v6203_v0 = vadd.f32 %v6190_v61, %v6133_v32  ;;  %v6135_v27 = vadd.f32 %v14285_v9, %v6065_v63 }
 0x88a   : > { %v6391_v47 = vpop.f32.mrf.mxu1 }
 0x88b   : > { %6446 = vst.msk [vmem:[%s14312_s27] sm:$0xf] %vm6445_vm13, %v6437_v13  ;;  %v6410_v58 = vadd.f32 %v6391_v47, %v6340_v40  ;;  %v6264_v19 = vpop.f32.mrf.mxu3  ;;  %v6274_v42 = vadd.f32 %v6261_v14, %v6203_v0  ;;  %v6334_v47 = vpop.f32.mrf.mxu0 }
 0x88c   : > { %v6275_v7 = vadd.f32 %v6264_v19, %v6204_v21 }
 0x88d   : > { %v6422_v33 = vadd.f32 %v14297_v48, %v6410_v58  ;;  %v6195_v58 = vpop.f32.mrf.mxu2 }
 0x88e   : > { %v6205_v55 = vadd.f32 %v6195_v58, %v6135_v27 }
 0x88f   : > { %v6430_v15 = vmax.f32 %v6422_v33, 0.0  ;;  %v6344_v33 = vadd.f32 %v6331_v34, %v6274_v42  ;;  %v11113_v42 = vld [vmem:[%s15346_s1 + $0x18] sm:$0xff] }
 0x890   : > { %6697 = vmatpush.bf16.msrb.mxu3 %v11113_v42 }
 0x891   : > { %v6438_v41 = vpack.c.bf16 %v6430_v15, %v6430_v15  ;;  %v6454_v53 = vmax.f32 %v6429_v56, %v6430_v15  ;;  %v6345_v15 = vadd.f32 %v6334_v47, %v6275_v7 }
 0x892   : > { %v6394_v25 = vpop.f32.mrf.mxu1 }
 0x893   : > { %6447 = vst.msk [vmem:[%s14312_s27 + $0x4] sm:$0xf] %vm6445_vm13, %v6438_v41  ;;  %v6411_v60 = vadd.f32 %v6394_v25, %v6341_v46  ;;  %v6266_v9 = vpop.f32.mrf.mxu3  ;;  %v6610_v46 = vld [vmem:[#allocation6 + $0x2] sm:$0xf]  ;;  %v6336_v24 = vpop.f32.mrf.mxu0 }
 0x894   : > { %6458 = vst.msk [vmem:[#allocation13] sm:$0xff] %vm5159_vm9, %v6454_v53  ;;  %v6276_v17 = vadd.f32 %v6266_v9, %v6205_v55  ;;  %v11115_v55 = vld [vmem:[%s15346_s1 + $0x28] sm:$0xff] }
 0x895   : > { %v6423_v35 = vadd.f32 %v14297_v48, %v6411_v60 }
 0x897   : > { %v6431_v11 = vmax.f32 %v6423_v35, 0.0 }
 0x899   : > { %v6439_v12 = vpack.c.bf16 %v6431_v11, %v6431_v11 }
 0x89a   : > { %v6396_v8 = vpop.f32.mrf.mxu1 }
 0x89b   : > { %v6462_v49 = vld [vmem:[#allocation13] ss:$2 sm:$0xf]  ;;  %v6470_v57 = vld [vmem:[#allocation13 + $0x1] ss:$2 sm:$0xf]  ;;  %v6412_v3 = vadd.f32 %v6396_v8, %v6342_v29 }
 0x89c   : > { %v6477_v26 = vmax.f32 %v6462_v49, %v6470_v57  ;;  %6448 = vst.msk [vmem:[%s14312_s27 + $0x8] sm:$0xf] %vm6445_vm13, %v6439_v12 }
 0x89d   : > { %v6424_v52 = vadd.f32 %v14297_v48, %v6412_v3 }
 0x89e   : > { %6515 = vst.msk [vmem:[#allocation6 + $0x9] sm:$0xf] %vm6445_vm13, %v6477_v26 }
 0x89f   : > { %v6432_v45 = vmax.f32 %v6424_v52, 0.0 }
 0x8a1   : > { %v6440_v30 = vpack.c.bf16 %v6432_v45, %v6432_v45  ;;  %v6455_v38 = vmax.f32 %v6431_v11, %v6432_v45  ;;  %v6346_v11 = vadd.f32 %v6336_v24, %v6276_v17  ;;  %v6967_v17 = vld [vmem:[#allocation7] sm:$0xf]  ;;  %v11116_v24 = vld [vmem:[%s15346_s1 + $0x30] sm:$0xff] }
 0x8a2   : > { %v6399_v39 = vpop.f32.mrf.mxu1 }
 0x8a3   : > { %6449 = vst.msk [vmem:[%s14312_s27 + $0xc] sm:$0xf] %vm6445_vm13, %v6440_v30  ;;  %v6413_v5 = vadd.f32 %v6399_v39, %v6343_v37 }
 0x8a4   : > { %6459 = vst.msk [vmem:[#allocation13 + $0x8] sm:$0xff] %vm5159_vm9, %v6455_v38 }
 0x8a5   : > { %v6520_v1 = vld [vmem:[#allocation6 + $0x8] sm:$0xf]  ;;  %v6425_v25 = vadd.f32 %v14297_v48, %v6413_v5 }
 0x8a6   : > { %6529 = vst [vmem:[#allocation1 + $0x1] ss:$2 sm:$0xff] %v6520_v1  ;;  %v6542_v62 = vld [vmem:[#allocation6 + $0x9] sm:$0xf] }
 0x8a7   : > { %v6611_v60 = vld [vmem:[#allocation6 + $0xa] sm:$0xf]  ;;  %v6433_v44 = vmax.f32 %v6425_v25, 0.0 }
 0x8a8   : > { %v6658_v3 = vld [vmem:[#allocation6 + $0x8] sm:$0xf] }
 0x8a9   : > { %v6441_v26 = vpack.c.bf16 %v6433_v44, %v6433_v44  ;;  %v6706_v30 = vld [vmem:[#allocation6 + $0x9] sm:$0xf] }
 0x8aa   : > { %v6401_v31 = vpop.f32.mrf.mxu1  ;;  %v6754_v10 = vld [vmem:[#allocation6 + $0xa] sm:$0xf] }
 0x8ab   : > { %v6464_v56 = vld [vmem:[#allocation13 + $0x8] ss:$2 sm:$0xf]  ;;  %v6472_v4 = vld [vmem:[#allocation13 + $0x9] ss:$2 sm:$0xf]  ;;  %v6414_v2 = vadd.f32 %v6401_v31, %v6344_v33 }
 0x8ac   : > { %v6478_v40 = vmax.f32 %v6464_v56, %v6472_v4  ;;  %6450 = vst.msk [vmem:[%s14312_s27 + $0x10] sm:$0xf] %vm6445_vm13, %v6441_v26  ;;  %v11114_v33 = vld [vmem:[%s15346_s1 + $0x20] sm:$0xff] }
 0x8ad   : > { %v14359_v13 = vld.sshfl [vmem:[#allocation1] sm:$0xff pattern:$0x75316420]  ;;  %v6426_v35 = vadd.f32 %v14297_v48, %v6414_v2 }
 0x8ae   : > { %6549 = vst [vmem:[#allocation1] ss:$2 sm:$0xff] %v6541_v59 }
 0x8af   : > { %6551 = vst [vmem:[#allocation1 + $0x1] ss:$2 sm:$0xff] %v6542_v62  ;;  %v6434_v61 = vmax.f32 %v6426_v35, 0.0 }
 0x8b0   : > { %6516 = vst.msk [vmem:[#allocation6 + $0x11] sm:$0xf] %vm6445_vm13, %v6478_v40 }
 0x8b1   : > { %v6442_v52 = vpack.c.bf16 %v6434_v61, %v6434_v61  ;;  %v6456_v43 = vmax.f32 %v6433_v44, %v6434_v61  ;;  %v11118_v61 = vld [vmem:[%s15346_s1 + $0x40] sm:$0xff] }
 0x8b2   : > { %v6404_v6 = vpop.f32.mrf.mxu1  ;;  %6938 = vmatpush.bf16.msra.mxu0 %v11118_v61  ;;  %v6991_v61 = vld [vmem:[#allocation7 + $0x1] sm:$0xf] }
 0x8b3   : > { %v6415_v41 = vadd.f32 %v6404_v6, %v6345_v15  ;;  %6451 = vst.msk [vmem:[%s14312_s27 + $0x14] sm:$0xf] %vm6445_vm13, %v6442_v52 }
 0x8b4   : > { %6460 = vst.msk [vmem:[#allocation13 + $0x10] sm:$0xff] %vm5159_vm9, %v6456_v43  ;;  %v6902_v43 = vld [vmem:[#allocation6 + $0x2a] sm:$0xf] }
 0x8b5   : > { %v6427_v29 = vadd.f32 %v14297_v48, %v6415_v41 }
 0x8b6   : > { %v14375_v53 = vld.sshfl [vmem:[#allocation1] sm:$0xff pattern:$0x75316420] }
 0x8b7   : > { %6618 = vst [vmem:[#allocation1] ss:$2 sm:$0xff] %v6610_v46  ;;  %v6521_v50 = vld [vmem:[#allocation6 + $0x10] sm:$0xf]  ;;  %v6435_v49 = vmax.f32 %v6427_v29, 0.0 }
 0x8b8   : > { %6620 = vst [vmem:[#allocation1 + $0x1] ss:$2 sm:$0xff] %v6611_v60  ;;  %v6659_v14 = vld [vmem:[#allocation6 + $0x10] sm:$0xf] }
 0x8b9   : > { %6531 = vst [vmem:[#allocation1 + $0x10] ss:$2 sm:$0xff] %v6521_v50  ;;  %v6443_v22 = vpack.c.bf16 %v6435_v49, %v6435_v49  ;;  %v6707_v39 = vld [vmem:[#allocation6 + $0x11] sm:$0xf] }
 0x8ba   : > { %v6406_v12 = vpop.f32.mrf.mxu1  ;;  %v6755_v0 = vld [vmem:[#allocation6 + $0x12] sm:$0xf] }
 0x8bb   : > { %v6416_v8 = vadd.f32 %v6406_v12, %v6346_v11  ;;  %6452 = vst.msk [vmem:[%s14312_s27 + $0x18] sm:$0xf] %vm6445_vm13, %v6443_v22  ;;  %v6466_v34 = vld [vmem:[#allocation13 + $0x10] ss:$2 sm:$0xf]  ;;  %v11117_v11 = vld [vmem:[%s15346_s1 + $0x38] sm:$0xff] }
 0x8bc   : > { %v6474_v16 = vld [vmem:[#allocation13 + $0x11] ss:$2 sm:$0xf]  ;;  %v6803_v31 = vld [vmem:[#allocation6 + $0x10] sm:$0xf] }
 0x8bd   : > { %v6428_v57 = vadd.f32 %v14297_v48, %v6416_v8  ;;  %v6479_v23 = vmax.f32 %v6466_v34, %v6474_v16  ;;  %v6543_v56 = vld [vmem:[#allocation6 + $0x11] sm:$0xf] }
 0x8be   : > { %v6851_v47 = vld [vmem:[#allocation6 + $0x11] sm:$0xf] }
 0x8bf   : > { %v14389_v28 = vld.sshfl [vmem:[#allocation1] sm:$0xff pattern:$0x75316420]  ;;  %v6436_v45 = vmax.f32 %v6428_v57, 0.0  ;;  %6517 = vst.msk [vmem:[#allocation6 + $0x19] sm:$0xf] %vm6445_vm13, %v6479_v23 }
 0x8c0   : > { %6666 = vst [vmem:[#allocation1] ss:$2 sm:$0xff] %v6658_v3  ;;  %v6612_v7 = vld [vmem:[#allocation6 + $0x12] sm:$0xf] }
 0x8c1   : > { %6668 = vst [vmem:[#allocation1 + $0x1] ss:$2 sm:$0xff] %v6659_v14  ;;  %v6444_v48 = vpack.c.bf16 %v6436_v45, %v6436_v45  ;;  %v6457_v51 = vmax.f32 %v6435_v49, %v6436_v45  ;;  %v6899_v5 = vld [vmem:[#allocation6 + $0x12] sm:$0xf]  ;;  %v6806_v49 = vld [vmem:[#allocation6 + $0x28] sm:$0xf] }
 0x8c3   : > { %6453 = vst.msk [vmem:[%s14312_s27 + $0x1c] sm:$0xf] %vm6445_vm13, %v6444_v48 }
 0x8c4   : > { %6461 = vst.msk [vmem:[#allocation13 + $0x18] sm:$0xff] %vm5159_vm9, %v6457_v51 }
 0x8c6   : > { %v6522_v19 = vld [vmem:[#allocation6 + $0x18] sm:$0xf] }
 0x8c7   : > { %6533 = vst [vmem:[#allocation1 + $0x11] ss:$2 sm:$0xff] %v6522_v19  ;;  %v6804_v21 = vld [vmem:[#allocation6 + $0x18] sm:$0xf] }
 0x8c8   : > { %v14403_v38 = vld.sshfl [vmem:[#allocation1] sm:$0xff pattern:$0x75316420] }
 0x8c9   : > { %6714 = vst [vmem:[#allocation1] ss:$2 sm:$0xff] %v6706_v30  ;;  %v6544_v40 = vld [vmem:[#allocation6 + $0x19] sm:$0xf] }
 0x8ca   : > { %6716 = vst [vmem:[#allocation1 + $0x1] ss:$2 sm:$0xff] %v6707_v39  ;;  %v6852_v62 = vld [vmem:[#allocation6 + $0x19] sm:$0xf] }
 0x8cb   : > { %v6468_v36 = vld [vmem:[#allocation13 + $0x18] ss:$2 sm:$0xf]  ;;  %v6476_v1 = vld [vmem:[#allocation13 + $0x19] ss:$2 sm:$0xf] }
 0x8cc   : > { %v6480_v32 = vmax.f32 %v6468_v36, %v6476_v1  ;;  %v6613_v37 = vld [vmem:[#allocation6 + $0x1a] sm:$0xf] }
 0x8cd   : > { %v6900_v15 = vld [vmem:[#allocation6 + $0x1a] sm:$0xf] }
 0x8ce   : > { %6518 = vst.msk [vmem:[#allocation6 + $0x21] sm:$0xf] %vm6445_vm13, %v6480_v32  ;;  %v6535_v4 = vld.sshfl [vmem:[#allocation1 + $0x10] sm:$0xff pattern:$0x75316420] }
 0x8cf   : > { %6553 = vst [vmem:[#allocation1 + $0x10] ss:$2 sm:$0xff] %v6543_v56  ;;  %v6538_v63 = vpack.c.bf16 %v6535_v4, %v14359_v13  ;;  %v6660_v9 = vld [vmem:[#allocation6 + $0x18] sm:$0xf] }
 0x8d0   : > { %6555 = vst [vmem:[#allocation1 + $0x11] ss:$2 sm:$0xff] %v6544_v40  ;;  %v6708_v25 = vld [vmem:[#allocation6 + $0x19] sm:$0xf] }
 0x8d1   : > { %v14406_v18 = vld.sshfl [vmem:[#allocation1] sm:$0xff pattern:$0x75316420]  ;;  %10162 = vmatmul.msk.bf16.vlgmr.msra.gmra.mxu3 %vm5159_vm9, %v6538_v63 }
 0x8d2   : > { %6762 = vst [vmem:[#allocation1] ss:$2 sm:$0xff] %v6754_v10  ;;  %6793 = vmatpush.bf16.msra.mxu3 %v11115_v55  ;;  %v6756_v29 = vld [vmem:[#allocation6 + $0x1a] sm:$0xf] }
 0x8d3   : > { %6764 = vst [vmem:[#allocation1 + $0x1] ss:$2 sm:$0xff] %v6755_v0 }
 0x8d5   : > { %v6661_v46 = vld [vmem:[#allocation6 + $0x20] sm:$0xf] }
 0x8d6   : > { %v6709_v50 = vld [vmem:[#allocation6 + $0x21] sm:$0xf] }
 0x8d7   : > { %v6557_v27 = vld.sshfl [vmem:[#allocation1 + $0x10] sm:$0xff pattern:$0x75316420]  ;;  %v6757_v12 = vld [vmem:[#allocation6 + $0x22] sm:$0xf] }
 0x8d8   : > { %6622 = vst [vmem:[#allocation1 + $0x10] ss:$2 sm:$0xff] %v6612_v7  ;;  %v6560_v13 = vpack.c.bf16 %v6557_v27, %v14375_v53  ;;  %v6805_v3 = vld [vmem:[#allocation6 + $0x20] sm:$0xf] }
 0x8d9   : > { %6624 = vst [vmem:[#allocation1 + $0x11] ss:$2 sm:$0xff] %v6613_v37  ;;  %v6853_v45 = vld [vmem:[#allocation6 + $0x21] sm:$0xf]  ;;  %v11325_v37 = vld [vmem:[%s15347_s10] ss:$0 sm:$0xff] }
 0x8da   : > { %v14409_v59 = vld.sshfl [vmem:[#allocation1] sm:$0xff pattern:$0x75316420]  ;;  %10157 = vmatmul.msk.bf16.vlgmr.msra.gmra.mxu2 %vm5159_vm9, %v6560_v13  ;;  %v6901_v48 = vld [vmem:[#allocation6 + $0x22] sm:$0xf]  ;;  %s9472_s10 = sand.u32 1, %s11612_s7  }
 0x8db   : > { %6811 = vst [vmem:[#allocation1] ss:$2 sm:$0xff] %v6803_v31  ;;  %6745 = vmatpush.bf16.msra.mxu2 %v11114_v33  ;;  %s15081_s26 = scalar_lea.sflag [#allocation19], %s9472_s10 }
 0x8dc   : > { %6813 = vst [vmem:[#allocation1 + $0x1] ss:$2 sm:$0xff] %v6804_v21 }
 0x8e0   : > { %v6626_v2 = vld.sshfl [vmem:[#allocation1 + $0x10] sm:$0xff pattern:$0x75316420] }
 0x8e1   : > { %6670 = vst [vmem:[#allocation1 + $0x10] ss:$2 sm:$0xff] %v6660_v9  ;;  %v6629_v53 = vpack.c.bf16 %v6626_v2, %v14389_v28  ;;  %v6854_v28 = vld [vmem:[#allocation6 + $0x29] sm:$0xf]  ;;  %v11122_v9 = vld [vmem:[%s15348_s11 + $0x18] sm:$0xff] }
 0x8e2   : > { %6672 = vst [vmem:[#allocation1 + $0x11] ss:$2 sm:$0xff] %v6661_v46  ;;  %7038 = vmatpush.bf16.msra.mxu1 %v11122_v9 }
 0x8e3   : > { %v14419_v58 = vld.sshfl [vmem:[#allocation1] sm:$0xff pattern:$0x75316420] }
 0x8e4   : > { %6859 = vst [vmem:[#allocation1] ss:$2 sm:$0xff] %v6851_v47 }
 0x8e5   : > { %6861 = vst [vmem:[#allocation1 + $0x1] ss:$2 sm:$0xff] %v6852_v62 }
 0x8e9   : > { %v6674_v60 = vld.sshfl [vmem:[#allocation1 + $0x10] sm:$0xff pattern:$0x75316420] }
 0x8ea   : > { %6718 = vst [vmem:[#allocation1 + $0x10] ss:$2 sm:$0xff] %v6708_v25  ;;  %10169 = vmatmul.msk.bf16.vlgmr.msrb.gmra.mxu2 %vm5159_vm9, %v6629_v53  ;;  %v6677_v35 = vpack.c.bf16 %v6674_v60, %v14403_v38  ;;  %v11120_v53 = vld [vmem:[%s15348_s11 + $0x8] sm:$0xff] }
 0x8eb   : > { %6720 = vst [vmem:[#allocation1 + $0x11] ss:$2 sm:$0xff] %v6709_v50  ;;  %6842 = vmatpush.bf16.msrb.mxu2 %v11116_v24 }
 0x8ec   : > { %v6866_v6 = vld.sshfl [vmem:[#allocation1] sm:$0xff pattern:$0x75316420]  ;;  %10176 = vmatmul.msk.bf16.vlgmr.msrb.gmra.mxu3 %vm5159_vm9, %v6677_v35 }
 0x8ed   : > { %6907 = vst [vmem:[#allocation1] ss:$2 sm:$0xff] %v6899_v5  ;;  %6890 = vmatpush.bf16.msrb.mxu3 %v11117_v11  ;;  %v11119_v35 = vld [vmem:[%s15348_s11] sm:$0xff] }
 0x8ee   : > { %6909 = vst [vmem:[#allocation1 + $0x1] ss:$2 sm:$0xff] %v6900_v15 }
 0x8f2   : > { %v6722_v44 = vld.sshfl [vmem:[#allocation1 + $0x10] sm:$0xff pattern:$0x75316420] }
 0x8f3   : > { %6766 = vst [vmem:[#allocation1 + $0x10] ss:$2 sm:$0xff] %v6756_v29  ;;  %v6725_v8 = vpack.c.bf16 %v6722_v44, %v14406_v18 }
 0x8f4   : > { %6768 = vst [vmem:[#allocation1 + $0x11] ss:$2 sm:$0xff] %v6757_v12  ;;  %v11121_v12 = vld [vmem:[%s15348_s11 + $0x10] sm:$0xff] }
 0x8f5   : > { %v6914_v41 = vld.sshfl [vmem:[#allocation1] sm:$0xff pattern:$0x75316420]  ;;  %7039 = vmatpush.bf16.msra.mxu1 %v11121_v12 }
 0x8f6   : > { %6975 = vst [vmem:[#allocation1] ss:$2 sm:$0xff] %v6967_v17 }
 0x8fa   : > { %10183 = vmatmul.msk.bf16.vlgmr.msra.gmra.mxu2 %vm5159_vm9, %v6725_v8 }
 0x8fb   : > { %v6770_v57 = vld.sshfl [vmem:[#allocation1 + $0x10] sm:$0xff pattern:$0x75316420]  ;;  %7067 = vmatpush.bf16.msra.mxu2 %v11120_v53 }
 0x8fc   : > { %6815 = vst [vmem:[#allocation1 + $0x10] ss:$2 sm:$0xff] %v6805_v3  ;;  %v6773_v26 = vpack.c.bf16 %v6770_v57, %v14409_v59  ;;  %v11124_v57 = vld [vmem:[%s15348_s11 + $0x28] sm:$0xff] }
 0x8fd   : > { %6817 = vst [vmem:[#allocation1 + $0x11] ss:$2 sm:$0xff] %v6806_v49 }
 0x8fe   : > { %10190 = vmatmul.msk.bf16.vlgmr.msra.gmra.mxu3 %vm5159_vm9, %v6773_v26  ;;  %v7075_v26 = vld [vmem:[#allocation7 + $0x2] sm:$0xf] }
 0x8ff   : > { %7068 = vmatpush.bf16.msra.mxu2 %v11119_v35  ;;  %7121 = vmatpush.bf16.msra.mxu3 %v11124_v57 }
 0x904   : > { %v6819_v52 = vld.sshfl [vmem:[#allocation1 + $0x10] sm:$0xff pattern:$0x75316420] }
 0x905   : > { %6863 = vst [vmem:[#allocation1 + $0x10] ss:$2 sm:$0xff] %v6853_v45  ;;  %v6822_v14 = vpack.c.bf16 %v6819_v52, %v14419_v58  ;;  %v11123_v52 = vld [vmem:[%s15348_s11 + $0x20] sm:$0xff] }
 0x906   : > { %6865 = vst [vmem:[#allocation1 + $0x11] ss:$2 sm:$0xff] %v6854_v28  ;;  %7122 = vmatpush.bf16.msra.mxu3 %v11123_v52 }
 0x90a   : > { %10197 = vmatmul.msk.bf16.vlgmr.msrb.gmra.mxu2 %vm5159_vm9, %v6822_v14  ;;  %v11126_v14 = vld [vmem:[%s15348_s11 + $0x38] sm:$0xff] }
 0x90b   : > { %7177 = vmatpush.bf16.msrb.mxu0 %v11126_v14 }
 0x90d   : > { %v6867_v22 = vld.sshfl [vmem:[#allocation1 + $0x10] sm:$0xff pattern:$0x75316420] }
 0x90e   : > { %6911 = vst [vmem:[#allocation1 + $0x10] ss:$2 sm:$0xff] %v6901_v48  ;;  %v6870_v51 = vpack.c.bf16 %v6867_v22, %v6866_v6  ;;  %v11125_v22 = vld [vmem:[%s15348_s11 + $0x30] sm:$0xff] }
 0x90f   : > { %6913 = vst [vmem:[#allocation1 + $0x11] ss:$2 sm:$0xff] %v6902_v43  ;;  %7178 = vmatpush.bf16.msrb.mxu0 %v11125_v22 }
 0x910   : > { %10204 = vmatmul.msk.bf16.vlgmr.msrb.gmra.mxu3 %vm5159_vm9, %v6870_v51 }
 0x916   : > { %v6915_v30 = vld.sshfl [vmem:[#allocation1 + $0x10] sm:$0xff pattern:$0x75316420] }
 0x917   : > { %v6918_v38 = vpack.c.bf16 %v6915_v30, %v6914_v41 }
 0x919   : > { %10211 = vmatmul.msk.bf16.vlgmr.msra.gmra.mxu0 %vm5159_vm9, %v6918_v38  ;;  %v11128_v38 = vld [vmem:[%s15348_s11 + $0x48] sm:$0xff] }
 0x91a   : > { %7233 = vmatpush.bf16.msrb.mxu1 %v11128_v38 }
 0x954   : > { %v6605_v39 = vpop.f32.mrf.mxu3 }
 0x95c   : > { %v6607_v23 = vpop.f32.mrf.mxu3 }
 0x95d   : > { %v6582_v34 = vpop.f32.mrf.mxu2 }
 0x95e   : > { %v6606_v19 = vadd.f32 %v6605_v39, %v6582_v34 }
 0x965   : > { %v6584_v16 = vpop.f32.mrf.mxu2 }
 0x966   : > { %v6608_v4 = vadd.f32 %v6607_v23, %v6584_v16  ;;  %v11127_v23 = vld [vmem:[%s15348_s11 + $0x40] sm:$0xff] }
 0x967   : > { %7234 = vmatpush.bf16.msrb.mxu1 %v11127_v23 }
 0x96d   : > { %v6651_v36 = vpop.f32.mrf.mxu2 }
 0x96e   : > { %v6656_v59 = vadd.f32 %v6651_v36, %v6606_v19 }
 0x96f   : > { %v6699_v1 = vpop.f32.mrf.mxu3 }
 0x970   : > { %v6704_v21 = vadd.f32 %v6699_v1, %v6656_v59 }
 0x975   : > { %v6653_v32 = vpop.f32.mrf.mxu2 }
 0x976   : > { %v6657_v40 = vadd.f32 %v6653_v32, %v6608_v4  ;;  %v11132_v4 = vld [vmem:[%s15348_s11 + $0x68] sm:$0xff] }
 0x977   : > { %v6701_v10 = vpop.f32.mrf.mxu3  ;;  %7346 = vmatpush.bf16.msrb.mxu3 %v11132_v4 }
 0x978   : > { %v6705_v47 = vadd.f32 %v6701_v10, %v6657_v40 }
 0x97d   : > { %v6747_v18 = vpop.f32.mrf.mxu2 }
 0x97e   : > { %v6752_v20 = vadd.f32 %v6747_v18, %v6704_v21  ;;  %v11130_v18 = vld [vmem:[%s15348_s11 + $0x58] sm:$0xff] }
 0x97f   : > { %7289 = vmatpush.bf16.msrb.mxu2 %v11130_v18 }
 0x981   : > { %v6795_v0 = vpop.f32.mrf.mxu3 }
 0x982   : > { %v6800_v42 = vadd.f32 %v6795_v0, %v6752_v20 }
 0x985   : > { %v6749_v31 = vpop.f32.mrf.mxu2 }
 0x986   : > { %v6753_v62 = vadd.f32 %v6749_v31, %v6705_v47  ;;  %v11129_v31 = vld [vmem:[%s15348_s11 + $0x50] sm:$0xff] }
 0x987   : > { %7290 = vmatpush.bf16.msrb.mxu2 %v11129_v31 }
 0x989   : > { %v6797_v56 = vpop.f32.mrf.mxu3 }
 0x98a   : > { %v6801_v33 = vadd.f32 %v6797_v56, %v6753_v62  ;;  %v11134_v62 = vld [vmem:[%s15348_s11 + $0x78] sm:$0xff] }
 0x98b   : > { %7402 = vmatpush.bf16.msra.mxu0 %v11134_v62 }
 0x98d   : > { %v6844_v63 = vpop.f32.mrf.mxu2 }
 0x98e   : > { %v6849_v58 = vadd.f32 %v6844_v63, %v6800_v42 }
 0x993   : > { %v6892_v7 = vpop.f32.mrf.mxu3 }
 0x994   : > { %v6897_v27 = vadd.f32 %v6892_v7, %v6849_v58  ;;  %v11131_v58 = vld [vmem:[%s15348_s11 + $0x60] sm:$0xff] }
 0x995   : > { %v6846_v13 = vpop.f32.mrf.mxu2  ;;  %7347 = vmatpush.bf16.msrb.mxu3 %v11131_v58  ;;  %v11326_v58 = vld [vmem:[%s15349_s12] ss:$0 sm:$0xff]  ;;  %s14919_s12 = scalar_lea.vmem [#allocation20], %s9710_s6 }
 0x996   : > { %v6940_v55 = vpop.f32.mrf.mxu0  ;;  %v6850_v6 = vadd.f32 %v6846_v13, %v6801_v33 }
 0x997   : > { %v6945_v5 = vadd.f32 %v6940_v55, %v6897_v27 }
 0x999   : > { %v6951_v15 = vadd.f32 %v11325_v37, %v6945_v5  ;;  %v11133_v5 = vld [vmem:[%s15348_s11 + $0x70] sm:$0xff] }
 0x99a   : > { %7403 = vmatpush.bf16.msra.mxu0 %v11133_v5 }
 0x99b   : > { %v6953_v2 = vmax.f32 %v6951_v15, 0.0  ;;  %v6894_v46 = vpop.f32.mrf.mxu3  ;;  %v11136_v15 = vld [vmem:[%s15348_s11 + $0x88] sm:$0xff] }
 0x99c   : > { %v6898_v17 = vadd.f32 %v6894_v46, %v6850_v6 }
 0x99d   : > { %v6957_v41 = vrot.slane %v6953_v2, 4  ;;  %6963 = vst.msk [vmem:[#allocation7 + $0x9] sm:$0xf] %vm6962_vm0, %v6953_v2 }
 0x99e   : > { %v6942_v25 = vpop.f32.mrf.mxu0 }
 0x99f   : > { %6964 = vst.msk [vmem:[#allocation7 + $0x11] sm:$0xf] %vm6962_vm0, %v6957_v41  ;;  %v6946_v60 = vadd.f32 %v6942_v25, %v6898_v17  ;;  %v11135_v41 = vld [vmem:[%s15348_s11 + $0x80] sm:$0xff]  ;;  %s9513_s11 = sshll.u32 %s14542_s0, 4  ;;  %s9514_s11 = int_to_ptr.vmem [resolvable:$true] %s9513_s11 }
 0x9a1   : > { %v6952_v50 = vadd.f32 %v11325_v37, %v6946_v60 }
 0x9a3   : > { %v6954_v11 = vmax.f32 %v6952_v50, 0.0  ;;  %v7303_v50 = vld [vmem:[#allocation7 + $0x28] sm:$0xf] }
 0x9a4   : > { %v6968_v24 = vld [vmem:[#allocation7 + $0x8] sm:$0xf] }
 0x9a5   : > { %6977 = vst [vmem:[#allocation1 + $0x1] ss:$2 sm:$0xff] %v6968_v24  ;;  %v6958_v44 = vrot.slane %v6954_v11, 4  ;;  %v6992_v49 = vld [vmem:[#allocation7 + $0x9] sm:$0xf] }
 0x9a6   : > { %v6969_v29 = vld [vmem:[#allocation7 + $0x10] sm:$0xf]  ;;  %6965 = vst.msk [vmem:[#allocation7 + $0x19] sm:$0xf] %vm6962_vm0, %v6954_v11  ;;  %v7076_v45 = vld [vmem:[#allocation7 + $0xa] sm:$0xf] }
 0x9a7   : > { %6979 = vst [vmem:[#allocation1 + $0x10] ss:$2 sm:$0xff] %v6969_v29  ;;  %v6993_v51 = vld [vmem:[#allocation7 + $0x11] sm:$0xf]  ;;  %v7131_v34 = vld [vmem:[#allocation7 + $0x8] sm:$0xf] }
 0x9a8   : > { %6966 = vst.msk [vmem:[#allocation7 + $0x21] sm:$0xf] %vm6962_vm0, %v6958_v44  ;;  %v7132_v16 = vld [vmem:[#allocation7 + $0x10] sm:$0xf]  ;;  %v7187_v19 = vld [vmem:[#allocation7 + $0x9] sm:$0xf] }
 0x9a9   : > { %v7077_v36 = vld [vmem:[#allocation7 + $0x12] sm:$0xf]  ;;  %v7243_v42 = vld [vmem:[#allocation7 + $0xa] sm:$0xf] }
 0x9aa   : > { %v7188_v59 = vld [vmem:[#allocation7 + $0x11] sm:$0xf] }
 0x9ab   : > { %v7244_v47 = vld [vmem:[#allocation7 + $0x12] sm:$0xf] }
 0x9ac   : > { %v6982_v8 = vld.sshfl [vmem:[#allocation1] sm:$0xff pattern:$0x75316420]  ;;  %v7300_v55 = vld [vmem:[#allocation7 + $0x10] sm:$0xf] }
 0x9ad   : > { %6999 = vst [vmem:[#allocation1] ss:$2 sm:$0xff] %v6991_v61  ;;  %v6970_v3 = vld [vmem:[#allocation7 + $0x18] sm:$0xf]  ;;  %v7356_v53 = vld [vmem:[#allocation7 + $0x11] sm:$0xf] }
 0x9ae   : > { %7001 = vst [vmem:[#allocation1 + $0x1] ss:$2 sm:$0xff] %v6992_v49  ;;  %v6994_v30 = vld [vmem:[#allocation7 + $0x19] sm:$0xf]  ;;  %v7412_v29 = vld [vmem:[#allocation7 + $0x12] sm:$0xf] }
 0x9af   : > { %6981 = vst [vmem:[#allocation1 + $0x11] ss:$2 sm:$0xff] %v6970_v3  ;;  %v7078_v32 = vld [vmem:[#allocation7 + $0x1a] sm:$0xf]  ;;  %v7134_v20 = vld [vmem:[#allocation7 + $0x20] sm:$0xf] }
 0x9b0   : > { %v7133_v56 = vld [vmem:[#allocation7 + $0x18] sm:$0xf]  ;;  %v7190_v37 = vld [vmem:[#allocation7 + $0x21] sm:$0xf]  ;;  %v7359_v61 = vld [vmem:[#allocation7 + $0x29] sm:$0xf] }
 0x9b1   : > { %v7189_v27 = vld [vmem:[#allocation7 + $0x19] sm:$0xf]  ;;  %v7246_v46 = vld [vmem:[#allocation7 + $0x22] sm:$0xf]  ;;  %v7415_v3 = vld [vmem:[#allocation7 + $0x2a] sm:$0xf] }
 0x9b2   : > { %v7301_v6 = vld [vmem:[#allocation7 + $0x18] sm:$0xf]  ;;  %v7302_v24 = vld [vmem:[#allocation7 + $0x20] sm:$0xf] }
 0x9b3   : > { %v7245_v9 = vld [vmem:[#allocation7 + $0x1a] sm:$0xf]  ;;  %v7358_v49 = vld [vmem:[#allocation7 + $0x21] sm:$0xf] }
 0x9b4   : > { %v7357_v60 = vld [vmem:[#allocation7 + $0x19] sm:$0xf] }
 0x9b5   : > { %v7006_v28 = vld.sshfl [vmem:[#allocation1] sm:$0xff pattern:$0x75316420]  ;;  %v7413_v12 = vld [vmem:[#allocation7 + $0x1a] sm:$0xf] }
 0x9b6   : > { %7083 = vst [vmem:[#allocation1] ss:$2 sm:$0xff] %v7075_v26  ;;  %v6983_v43 = vld.sshfl [vmem:[#allocation1 + $0x10] sm:$0xff pattern:$0x75316420] }
 0x9b7   : > { %7085 = vst [vmem:[#allocation1 + $0x1] ss:$2 sm:$0xff] %v7076_v45  ;;  %v6986_v48 = vpack.c.bf16 %v6983_v43, %v6982_v8  ;;  %v7531_v45 = vld [vmem:[#allocation8] sm:$0x3] }
 0x9b8   : > { %7003 = vst [vmem:[#allocation1 + $0x10] ss:$2 sm:$0xff] %v6993_v51 }
 0x9b9   : > { %10233 = vmatmul.msk.bf16.vlgmr.msra.gmra.mxu2 %vm7028_vm1, %v6986_v48  ;;  %7005 = vst [vmem:[#allocation1 + $0x11] ss:$2 sm:$0xff] %v6994_v30 }
 0x9be   : > { %v7090_v39 = vld.sshfl [vmem:[#allocation1] sm:$0xff pattern:$0x75316420] }
 0x9bf   : > { %7139 = vst [vmem:[#allocation1] ss:$2 sm:$0xff] %v7131_v34 }
 0x9c0   : > { %7141 = vst [vmem:[#allocation1 + $0x1] ss:$2 sm:$0xff] %v7132_v16  ;;  %v7007_v1 = vld.sshfl [vmem:[#allocation1 + $0x10] sm:$0xff pattern:$0x75316420] }
 0x9c1   : > { %7087 = vst [vmem:[#allocation1 + $0x10] ss:$2 sm:$0xff] %v7077_v36  ;;  %v7010_v10 = vpack.c.bf16 %v7007_v1, %v7006_v28  ;;  %v7414_v28 = vld [vmem:[#allocation7 + $0x22] sm:$0xf] }
 0x9c2   : > { %7089 = vst [vmem:[#allocation1 + $0x11] ss:$2 sm:$0xff] %v7078_v32 }
 0x9c3   : > { %10224 = vmatmul.msk.bf16.vlgmr.msra.gmra.mxu1 %vm7028_vm1, %v7010_v10 }
 0x9c4   : > { %7458 = vmatpush.bf16.msra.mxu1 %v11136_v15  ;;  %v11137_v15 = vld [vmem:[%s15350_s13] sm:$0xff] }
 0x9c7   : > { %v7146_v0 = vld.sshfl [vmem:[#allocation1] sm:$0xff pattern:$0x75316420] }
 0x9c8   : > { %7195 = vst [vmem:[#allocation1] ss:$2 sm:$0xff] %v7187_v19  ;;  %7459 = vmatpush.bf16.msra.mxu1 %v11135_v41 }
 0x9c9   : > { %7197 = vst [vmem:[#allocation1 + $0x1] ss:$2 sm:$0xff] %v7188_v59  ;;  %v7091_v21 = vld.sshfl [vmem:[#allocation1 + $0x10] sm:$0xff pattern:$0x75316420] }
 0x9ca   : > { %7143 = vst [vmem:[#allocation1 + $0x10] ss:$2 sm:$0xff] %v7133_v56  ;;  %v7094_v40 = vpack.c.bf16 %v7091_v21, %v7090_v39 }
 0x9cb   : > { %7145 = vst [vmem:[#allocation1 + $0x11] ss:$2 sm:$0xff] %v7134_v20 }
 0x9cc   : > { %10246 = vmatmul.msk.bf16.vlgmr.msra.gmra.mxu3 %vm7028_vm1, %v7094_v40 }
 0x9d0   : > { %v7202_v63 = vld.sshfl [vmem:[#allocation1] sm:$0xff pattern:$0x75316420] }
 0x9d1   : > { %7251 = vst [vmem:[#allocation1] ss:$2 sm:$0xff] %v7243_v42 }
 0x9d2   : > { %7253 = vst [vmem:[#allocation1 + $0x1] ss:$2 sm:$0xff] %v7244_v47  ;;  %v7147_v7 = vld.sshfl [vmem:[#allocation1 + $0x10] sm:$0xff pattern:$0x75316420] }
 0x9d3   : > { %7199 = vst [vmem:[#allocation1 + $0x10] ss:$2 sm:$0xff] %v7189_v27  ;;  %v7150_v13 = vpack.c.bf16 %v7147_v7, %v7146_v0 }
 0x9d4   : > { %7201 = vst [vmem:[#allocation1 + $0x11] ss:$2 sm:$0xff] %v7190_v37 }
 0x9d5   : > { %10259 = vmatmul.msk.bf16.vlgmr.msrb.gmra.mxu0 %vm7028_vm1, %v7150_v13  ;;  %v11138_v13 = vld [vmem:[%s15350_s13 + $0x8] sm:$0xff] }
 0x9d6   : > { %7609 = vmatpush.bf16.msra.mxu3 %v11138_v13 }
 0x9d9   : > { %v7258_v33 = vld.sshfl [vmem:[#allocation1] sm:$0xff pattern:$0x75316420] }
 0x9da   : > { %7308 = vst [vmem:[#allocation1] ss:$2 sm:$0xff] %v7300_v55  ;;  %7610 = vmatpush.bf16.msra.mxu3 %v11137_v15 }
 0x9db   : > { %7310 = vst [vmem:[#allocation1 + $0x1] ss:$2 sm:$0xff] %v7301_v6  ;;  %v7203_v2 = vld.sshfl [vmem:[#allocation1 + $0x10] sm:$0xff pattern:$0x75316420] }
 0x9dc   : > { %7255 = vst [vmem:[#allocation1 + $0x10] ss:$2 sm:$0xff] %v7245_v9  ;;  %v7206_v17 = vpack.c.bf16 %v7203_v2, %v7202_v63 }
 0x9dd   : > { %7257 = vst [vmem:[#allocation1 + $0x11] ss:$2 sm:$0xff] %v7246_v46 }
 0x9de   : > { %10272 = vmatmul.msk.bf16.vlgmr.msrb.gmra.mxu1 %vm7028_vm1, %v7206_v17 }
 0x9e2   : > { %v7315_v25 = vld.sshfl [vmem:[#allocation1] sm:$0xff pattern:$0x75316420] }
 0x9e3   : > { %7364 = vst [vmem:[#allocation1] ss:$2 sm:$0xff] %v7356_v53 }
 0x9e4   : > { %7366 = vst [vmem:[#allocation1 + $0x1] ss:$2 sm:$0xff] %v7357_v60  ;;  %v7259_v35 = vld.sshfl [vmem:[#allocation1 + $0x10] sm:$0xff pattern:$0x75316420]  ;;  %v11140_v60 = vld [vmem:[%s15350_s13 + $0x18] sm:$0xff] }
 0x9e5   : > { %7312 = vst [vmem:[#allocation1 + $0x10] ss:$2 sm:$0xff] %v7302_v24  ;;  %v7262_v11 = vpack.c.bf16 %v7259_v35, %v7258_v33  ;;  %7581 = vmatpush.bf16.msra.mxu2 %v11140_v60  ;;  %v11139_v35 = vld [vmem:[%s15350_s13 + $0x10] sm:$0xff] }
 0x9e6   : > { %7314 = vst [vmem:[#allocation1 + $0x11] ss:$2 sm:$0xff] %v7303_v50 }
 0x9e7   : > { %10285 = vmatmul.msk.bf16.vlgmr.msrb.gmra.mxu2 %vm7028_vm1, %v7262_v11 }
 0x9e9   : > { %7582 = vmatpush.bf16.msra.mxu2 %v11139_v35 }
 0x9eb   : > { %v7371_v44 = vld.sshfl [vmem:[#allocation1] sm:$0xff pattern:$0x75316420] }
 0x9ec   : > { %7420 = vst [vmem:[#allocation1] ss:$2 sm:$0xff] %v7412_v29 }
 0x9ed   : > { %7422 = vst [vmem:[#allocation1 + $0x1] ss:$2 sm:$0xff] %v7413_v12  ;;  %v7316_v8 = vld.sshfl [vmem:[#allocation1 + $0x10] sm:$0xff pattern:$0x75316420] }
 0x9ee   : > { %7368 = vst [vmem:[#allocation1 + $0x10] ss:$2 sm:$0xff] %v7358_v49  ;;  %v7319_v57 = vpack.c.bf16 %v7316_v8, %v7315_v25 }
 0x9ef   : > { %7370 = vst [vmem:[#allocation1 + $0x11] ss:$2 sm:$0xff] %v7359_v61 }
 0x9f0   : > { %10298 = vmatmul.msk.bf16.vlgmr.msrb.gmra.mxu3 %vm7028_vm1, %v7319_v57  ;;  %v11142_v57 = vld [vmem:[%s15350_s13 + $0x28] sm:$0xff] }
 0x9f1   : > { %7652 = vmatpush.bf16.msrb.mxu0 %v11142_v57 }
 0x9f4   : > { %v7427_v14 = vld.sshfl [vmem:[#allocation1] sm:$0xff pattern:$0x75316420] }
 0x9f6   : > { %v7372_v26 = vld.sshfl [vmem:[#allocation1 + $0x10] sm:$0xff pattern:$0x75316420] }
 0x9f7   : > { %7424 = vst [vmem:[#allocation1 + $0x10] ss:$2 sm:$0xff] %v7414_v28  ;;  %v7375_v52 = vpack.c.bf16 %v7372_v26, %v7371_v44 }
 0x9f8   : > { %7426 = vst [vmem:[#allocation1 + $0x11] ss:$2 sm:$0xff] %v7415_v3  ;;  %v11141_v3 = vld [vmem:[%s15350_s13 + $0x20] sm:$0xff] }
 0x9f9   : > { %10311 = vmatmul.msk.bf16.vlgmr.msra.gmra.mxu0 %vm7028_vm1, %v7375_v52 }
 0x9fa   : > { %7653 = vmatpush.bf16.msrb.mxu0 %v11141_v3  ;;  %v11158_v3 = vld [vmem:[%s15351_s15 + $0x18] sm:$0xff] }
 0x9ff   : > { %v7428_v43 = vld.sshfl [vmem:[#allocation1 + $0x10] sm:$0xff pattern:$0x75316420] }
 0xa00   : > { %7535 = vst [vmem:[#allocation1] ss:$4 sm:$0xff] %v7531_v45  ;;  %v7431_v22 = vpack.c.bf16 %v7428_v43, %v7427_v14  ;;  %v11144_v14 = vld [vmem:[%s15350_s13 + $0x38] sm:$0xff]  ;;  %v11143_v43 = vld [vmem:[%s15350_s13 + $0x30] sm:$0xff] }
 0xa01   : > { %7696 = vmatpush.bf16.msrb.mxu1 %v11144_v14 }
 0xa02   : > { %10324 = vmatmul.msk.bf16.vlgmr.msra.gmra.mxu1 %vm7028_vm1, %v7431_v22  ;;  %v7545_v22 = vld [vmem:[#allocation8 + $0x1] sm:$0x3] }
 0xa05   : > { %7697 = vmatpush.bf16.msrb.mxu1 %v11143_v43  ;;  %v11162_v43 = vld [vmem:[%s15351_s15 + $0x38] sm:$0xff] }
 0xa3c   : > { %v7070_v51 = vpop.f32.mrf.mxu2 }
 0xa40   : > { %v7041_v48 = vpop.f32.mrf.mxu1 }
 0xa41   : > { %v7071_v36 = vadd.f32 %v7070_v51, %v7041_v48  ;;  %v11146_v51 = vld [vmem:[%s15350_s13 + $0x48] sm:$0xff] }
 0xa42   : > { %7740 = vmatpush.bf16.msrb.mxu2 %v11146_v51  ;;  %v7938_v51 = vld [vmem:[#allocation9] sm:$0x3] }
 0xa44   : > { %v7072_v34 = vpop.f32.mrf.mxu2 }
 0xa48   : > { %v7043_v38 = vpop.f32.mrf.mxu1 }
 0xa49   : > { %v7073_v19 = vadd.f32 %v7072_v34, %v7043_v38  ;;  %v11145_v38 = vld [vmem:[%s15350_s13 + $0x40] sm:$0xff]  ;;  %v7616_v34 = vld [vmem:[#allocation8 + $0x2] sm:$0x3] }
 0xa4a   : > { %7741 = vmatpush.bf16.msrb.mxu2 %v11145_v38 }
 0xa4f   : > { %v7124_v30 = vpop.f32.mrf.mxu3 }
 0xa50   : > { %v7129_v1 = vadd.f32 %v7124_v30, %v7071_v36  ;;  %v11147_v36 = vld [vmem:[%s15350_s13 + $0x50] sm:$0xff] }
 0xa52   : > { %v7180_v39 = vpop.f32.mrf.mxu0 }
 0xa53   : > { %v7185_v18 = vadd.f32 %v7180_v39, %v7129_v1 }
 0xa57   : > { %v7126_v16 = vpop.f32.mrf.mxu3 }
 0xa58   : > { %v7130_v21 = vadd.f32 %v7126_v16, %v7073_v19  ;;  %v11148_v16 = vld [vmem:[%s15350_s13 + $0x58] sm:$0xff]  ;;  %v11149_v19 = vld [vmem:[%s15350_s13 + $0x60] sm:$0xff] }
 0xa59   : > { %7784 = vmatpush.bf16.msrb.mxu3 %v11148_v16 }
 0xa5a   : > { %v7182_v32 = vpop.f32.mrf.mxu0 }
 0xa5b   : > { %v7236_v23 = vpop.f32.mrf.mxu1  ;;  %v7186_v40 = vadd.f32 %v7182_v32, %v7130_v21  ;;  %v11154_v21 = vld [vmem:[%s15350_s13 + $0x88] sm:$0xff] }
 0xa5c   : > { %v7241_v59 = vadd.f32 %v7236_v23, %v7185_v18 }
 0xa5d   : > { %7785 = vmatpush.bf16.msrb.mxu3 %v11147_v36  ;;  %v11160_v36 = vld [vmem:[%s15351_s15 + $0x28] sm:$0xff] }
 0xa63   : > { %v7238_v31 = vpop.f32.mrf.mxu1 }
 0xa64   : > { %v7242_v42 = vadd.f32 %v7238_v31, %v7186_v40  ;;  %v11151_v40 = vld [vmem:[%s15350_s13 + $0x70] sm:$0xff] }
 0xa6a   : > { %v7292_v10 = vpop.f32.mrf.mxu2 }
 0xa6b   : > { %v7297_v56 = vadd.f32 %v7292_v10, %v7241_v59  ;;  %v11150_v10 = vld [vmem:[%s15350_s13 + $0x68] sm:$0xff] }
 0xa6c   : > { %7829 = vmatpush.bf16.msra.mxu0 %v11150_v10  ;;  %v11159_v10 = vld [vmem:[%s15351_s15 + $0x20] sm:$0xff] }
 0xa70   : > { %7830 = vmatpush.bf16.msra.mxu0 %v11149_v19  ;;  %v11327_v19 = vld [vmem:[%s15352_s14] ss:$0 sm:$0xff]  ;;  %s11263_s14 = sshll.u32 %s11612_s7, 5 }
 0xa72   : > { %v7294_v63 = vpop.f32.mrf.mxu2 }
 0xa73   : > { %v7349_v0 = vpop.f32.mrf.mxu3  ;;  %v7298_v27 = vadd.f32 %v7294_v63, %v7242_v42 }
 0xa74   : > { %v7354_v20 = vadd.f32 %v7349_v0, %v7297_v56  ;;  %v11152_v56 = vld [vmem:[%s15350_s13 + $0x78] sm:$0xff] }
 0xa75   : > { %7873 = vmatpush.bf16.msra.mxu1 %v11152_v56  ;;  %v11164_v56 = vld [vmem:[%s15351_s15 + $0x48] sm:$0xff] }
 0xa76   : > { %v7405_v4 = vpop.f32.mrf.mxu0 }
 0xa77   : > { %v7410_v47 = vadd.f32 %v7405_v4, %v7354_v20 }
 0xa79   : > { %7874 = vmatpush.bf16.msra.mxu1 %v11151_v40  ;;  %v11163_v40 = vld [vmem:[%s15351_s15 + $0x40] sm:$0xff] }
 0xa7b   : > { %v7351_v62 = vpop.f32.mrf.mxu3 }
 0xa7c   : > { %v7355_v33 = vadd.f32 %v7351_v62, %v7298_v27 }
 0xa7e   : > { %v7407_v5 = vpop.f32.mrf.mxu0 }
 0xa7f   : > { %v7461_v7 = vpop.f32.mrf.mxu1  ;;  %v7411_v2 = vadd.f32 %v7407_v5, %v7355_v33  ;;  %v7838_v5 = vld [vmem:[#allocation8 + $0xd] sm:$0x3] }
 0xa80   : > { %v7466_v37 = vadd.f32 %v7461_v7, %v7410_v47  ;;  %v11153_v47 = vld [vmem:[%s15350_s13 + $0x80] sm:$0xff]  ;;  %s11264_s13 = sshll.u32 %s11612_s7, 3 }
 0xa81   : > { %s9512_s3 = scalar_lea.hbm %s15357_s23, %s11264_s13 }
 0xa82   : > { %v7472_v55 = vadd.f32 %v11326_v58, %v7466_v37  ;;  %v7794_v37 = vld [vmem:[#allocation8 + $0xc] sm:$0x3]  ;;  %s9515_s6 = sshll.u32 %s9512_s3, 4  ;;  %s9516_s6 = int_to_ptr.hbm [resolvable:$true] %s9515_s6 }
 0xa83   : > { %s11344_s1 = sshra.s32 %s9516_s6, 4  ;;  %s11345_s1 = int_to_ptr.hbm [resolvable:$true] %s11344_s1 }
 0xa84   : > { %v7474_v6 = vmax.f32 %v7472_v55, 0.0  ;;  %p11351_p0 = scmp.lt.s32.totalorder %s11345_s1, %s15357_s23 }
 0xa86   : > { %v7478_v9 = vrot.slane %v7474_v6, 4  ;;  %v7482_v46 = vpack.c.bf16 %v7474_v6, %v7474_v6 }
 0xa87   : > { %v7463_v17 = vpop.f32.mrf.mxu1 }
 0xa88   : > { %v7483_v41 = vpack.c.bf16 %v7478_v9, %v7478_v9  ;;  %7487 = vst.msk [vmem:[%s14542_s0] sm:$0x3] %vm7486_vm2, %v7482_v46  ;;  %v7491_v53 = vmax.f32 %v7474_v6, %v7478_v9  ;;  %v7467_v25 = vadd.f32 %v7463_v17, %v7411_v2  ;;  %v7882_v9 = vld [vmem:[#allocation8 + $0xe] sm:$0x3] }
 0xa8a   : > { %7488 = vst.msk [vmem:[%s14542_s0 + $0x2] sm:$0x3] %vm7486_vm2, %v7483_v41  ;;  %v7473_v50 = vadd.f32 %v11326_v58, %v7467_v25 }
 0xa8b   : > { %7493 = vst.msk [vmem:[#allocation14] sm:$0xf] %vm6962_vm0, %v7491_v53 }
 0xa8c   : > { %v7475_v24 = vmax.f32 %v7473_v50, 0.0 }
 0xa8e   : > { %v7479_v11 = vrot.slane %v7475_v24, 4  ;;  %v7484_v29 = vpack.c.bf16 %v7475_v24, %v7475_v24 }
 0xa90   : > { %v7485_v44 = vpack.c.bf16 %v7479_v11, %v7479_v11  ;;  %7489 = vst.msk [vmem:[%s14542_s0 + $0x4] sm:$0x3] %vm7486_vm2, %v7484_v29  ;;  %v7492_v12 = vmax.f32 %v7475_v24, %v7479_v11 }
 0xa92   : > { %v7495_v61 = vld [vmem:[#allocation14] ss:$2 sm:$0x3]  ;;  %v7499_v8 = vld [vmem:[#allocation14 + $0x1] ss:$2 sm:$0x3] }
 0xa93   : > { %v7502_v49 = vmax.f32 %v7495_v61, %v7499_v8  ;;  %7490 = vst.msk [vmem:[%s14542_s0 + $0x6] sm:$0x3] %vm7486_vm2, %v7485_v44 }
 0xa94   : > { %7494 = vst.msk [vmem:[#allocation14 + $0x4] sm:$0xf] %vm6962_vm0, %v7492_v12 }
 0xa95   : > { %7529 = vst.msk [vmem:[#allocation8 + $0x5] sm:$0x3] %vm7486_vm2, %v7502_v49 }
 0xa9b   : > { %v7497_v26 = vld [vmem:[#allocation14 + $0x4] ss:$2 sm:$0x3]  ;;  %v7501_v28 = vld [vmem:[#allocation14 + $0x5] ss:$2 sm:$0x3] }
 0xa9c   : > { %v7532_v52 = vld [vmem:[#allocation8 + $0x4] sm:$0x3]  ;;  %v7503_v45 = vmax.f32 %v7497_v26, %v7501_v28  ;;  %v7617_v1 = vld [vmem:[#allocation8 + $0x6] sm:$0x3] }
 0xa9d   : > { %7537 = vst [vmem:[#allocation1 + $0x1] ss:$4 sm:$0xff] %v7532_v52  ;;  %v7546_v39 = vld [vmem:[#allocation8 + $0x5] sm:$0x3]  ;;  %v11157_v52 = vld [vmem:[%s15351_s15 + $0x10] sm:$0xff] }
 0xa9e   : > { %7530 = vst.msk [vmem:[#allocation8 + $0x9] sm:$0x3] %vm7486_vm2, %v7503_v45  ;;  %v7660_v18 = vld [vmem:[#allocation8 + $0x4] sm:$0x3]  ;;  %v7748_v58 = vld [vmem:[#allocation8 + $0x6] sm:$0x3] }
 0xa9f   : > { %v7704_v4 = vld [vmem:[#allocation8 + $0x5] sm:$0x3] }
 0xaa4   : > { %v7538_v48 = vld.sshfl [vmem:[#allocation1] sm:$0xff pattern:$0x73625140] }
 0xaa5   : > { %v7540_v30 = vpack.c.bf16 %v7538_v48, %v7538_v48  ;;  %7549 = vst [vmem:[#allocation1] ss:$4 sm:$0xff] %v7545_v22  ;;  %v7661_v59 = vld [vmem:[#allocation8 + $0x8] sm:$0x3]  ;;  %v7749_v7 = vld [vmem:[#allocation8 + $0xa] sm:$0x3] }
 0xaa6   : > { %7551 = vst [vmem:[#allocation1 + $0x1] ss:$4 sm:$0xff] %v7546_v39  ;;  %v7705_v63 = vld [vmem:[#allocation8 + $0x9] sm:$0x3]  ;;  %v11156_v22 = vld [vmem:[%s15351_s15 + $0x8] sm:$0xff]  ;;  %v11155_v39 = vld [vmem:[%s15351_s15] sm:$0xff] }
 0xaa7   : > { %10346 = vmatmul.msk.bf16.vlgmr.msra.gmra.mxu3 %vm7028_vm1, %v7540_v30  ;;  %v7793_v13 = vld [vmem:[#allocation8 + $0x8] sm:$0x3]  ;;  %v7881_v46 = vld [vmem:[#allocation8 + $0xa] sm:$0x3] }
 0xaa8   : > { %v7837_v6 = vld [vmem:[#allocation8 + $0x9] sm:$0x3]  ;;  %8007 = vmatpush.bf16.msra.mxu3 %v11162_v43 }
 0xaa9   : > { %v11161_v30 = vld [vmem:[%s15351_s15 + $0x30] sm:$0xff] }
 0xaac   : > { %8008 = vmatpush.bf16.msra.mxu3 %v11161_v30  ;;  %v11187_v30 = vld [vmem:[%s15351_s15 + $0x100] sm:$0xff] }
 0xaad   : > { %v7552_v23 = vld.sshfl [vmem:[#allocation1] sm:$0xff pattern:$0x73625140] }
 0xaae   : > { %v7554_v32 = vpack.c.bf16 %v7552_v23, %v7552_v23  ;;  %7620 = vst [vmem:[#allocation1] ss:$4 sm:$0xff] %v7616_v34 }
 0xaaf   : > { %7622 = vst [vmem:[#allocation1 + $0x1] ss:$4 sm:$0xff] %v7617_v1  ;;  %v11166_v1 = vld [vmem:[%s15351_s15 + $0x58] sm:$0xff] }
 0xab0   : > { %10337 = vmatmul.msk.bf16.vlgmr.msra.gmra.mxu2 %vm7028_vm1, %v7554_v32  ;;  %8009 = vmatpush.bf16.msra.mxu3 %v11160_v36 }
 0xab1   : > { %7917 = vmatpush.bf16.msra.mxu2 %v11154_v21 }
 0xab4   : > { %8010 = vmatpush.bf16.msra.mxu3 %v11159_v10 }
 0xab5   : > { %7918 = vmatpush.bf16.msra.mxu2 %v11153_v47 }
 0xab6   : > { %v7623_v0 = vld.sshfl [vmem:[#allocation1] sm:$0xff pattern:$0x73625140] }
 0xab7   : > { %v7625_v31 = vpack.c.bf16 %v7623_v0, %v7623_v0  ;;  %7664 = vst [vmem:[#allocation1] ss:$4 sm:$0xff] %v7660_v18  ;;  %v11165_v18 = vld [vmem:[%s15351_s15 + $0x50] sm:$0xff] }
 0xab8   : > { %7666 = vst [vmem:[#allocation1 + $0x1] ss:$4 sm:$0xff] %v7661_v59 }
 0xab9   : > { %10359 = vmatmul.msk.bf16.vlgmr.msrb.gmra.mxu0 %vm7028_vm1, %v7625_v31 }
 0xaba   : > { %8047 = vmatpush.bf16.msrb.mxu0 %v11158_v3  ;;  %v11184_v3 = vld [vmem:[%s15351_s15 + $0xe8] sm:$0xff] }
 0xabe   : > { %8048 = vmatpush.bf16.msrb.mxu0 %v11157_v52  ;;  %v11189_v52 = vld [vmem:[%s15351_s15 + $0x110] sm:$0xff] }
 0xabf   : > { %v7667_v20 = vld.sshfl [vmem:[#allocation1] sm:$0xff pattern:$0x73625140] }
 0xac0   : > { %v7669_v42 = vpack.c.bf16 %v7667_v20, %v7667_v20  ;;  %7708 = vst [vmem:[#allocation1] ss:$4 sm:$0xff] %v7704_v4  ;;  %v11170_v4 = vld [vmem:[%s15351_s15 + $0x78] sm:$0xff] }
 0xac1   : > { %7710 = vst [vmem:[#allocation1 + $0x1] ss:$4 sm:$0xff] %v7705_v63  ;;  %v11169_v63 = vld [vmem:[%s15351_s15 + $0x70] sm:$0xff] }
 0xac2   : > { %10372 = vmatmul.msk.bf16.vlgmr.msrb.gmra.mxu1 %vm7028_vm1, %v7669_v42  ;;  %8049 = vmatpush.bf16.msrb.mxu0 %v11156_v22  ;;  %v11188_v22 = vld [vmem:[%s15351_s15 + $0x108] sm:$0xff] }
 0xac3   : > { %8106 = vmatpush.bf16.msrb.mxu1 %v11166_v1  ;;  %v8358_v1 = vld [vmem:[#allocation9 + $0xd] sm:$0x3] }
 0xac6   : > { %8050 = vmatpush.bf16.msrb.mxu0 %v11155_v39 }
 0xac7   : > { %8107 = vmatpush.bf16.msrb.mxu1 %v11165_v18 }
 0xac8   : > { %v7711_v62 = vld.sshfl [vmem:[#allocation1] sm:$0xff pattern:$0x73625140] }
 0xac9   : > { %v7713_v27 = vpack.c.bf16 %v7711_v62, %v7711_v62  ;;  %7752 = vst [vmem:[#allocation1] ss:$4 sm:$0xff] %v7748_v58  ;;  %v11168_v62 = vld [vmem:[%s15351_s15 + $0x68] sm:$0xff] }
 0xaca   : > { %7754 = vst [vmem:[#allocation1 + $0x1] ss:$4 sm:$0xff] %v7749_v7  ;;  %v11174_v7 = vld [vmem:[%s15351_s15 + $0x98] sm:$0xff] }
 0xacb   : > { %10385 = vmatmul.msk.bf16.vlgmr.msrb.gmra.mxu2 %vm7028_vm1, %v7713_v27  ;;  %8108 = vmatpush.bf16.msrb.mxu1 %v11164_v56  ;;  %v11167_v27 = vld [vmem:[%s15351_s15 + $0x60] sm:$0xff] }
 0xacc   : > { %8166 = vmatpush.bf16.msrb.mxu2 %v11170_v4 }
 0xacf   : > { %8109 = vmatpush.bf16.msrb.mxu1 %v11163_v40 }
 0xad0   : > { %8167 = vmatpush.bf16.msrb.mxu2 %v11169_v63 }
 0xad1   : > { %v7755_v33 = vld.sshfl [vmem:[#allocation1] sm:$0xff pattern:$0x73625140] }
 0xad2   : > { %v7757_v55 = vpack.c.bf16 %v7755_v33, %v7755_v33  ;;  %7797 = vst [vmem:[#allocation1] ss:$4 sm:$0xff] %v7793_v13  ;;  %v11178_v13 = vld [vmem:[%s15351_s15 + $0xb8] sm:$0xff] }
 0xad3   : > { %7799 = vst [vmem:[#allocation1 + $0x1] ss:$4 sm:$0xff] %v7794_v37  ;;  %v11173_v37 = vld [vmem:[%s15351_s15 + $0x90] sm:$0xff]  ;;  %v7956_v33 = vld [vmem:[#allocation9 + $0x1] sm:$0x3] }
 0xad4   : > { %10398 = vmatmul.msk.bf16.vlgmr.msrb.gmra.mxu3 %vm7028_vm1, %v7757_v55  ;;  %8168 = vmatpush.bf16.msrb.mxu2 %v11168_v62  ;;  %v11172_v55 = vld [vmem:[%s15351_s15 + $0x88] sm:$0xff]  ;;  %v11198_v62 = vld [vmem:[%s15353_s17 + $0x38] sm:$0xff] }
 0xad5   : > { %8226 = vmatpush.bf16.msrb.mxu3 %v11174_v7  ;;  %v11197_v7 = vld [vmem:[%s15353_s17 + $0x30] sm:$0xff] }
 0xad8   : > { %8169 = vmatpush.bf16.msrb.mxu2 %v11167_v27  ;;  %v11202_v27 = vld [vmem:[%s15353_s17 + $0x58] sm:$0xff] }
 0xad9   : > { %8227 = vmatpush.bf16.msrb.mxu3 %v11173_v37  ;;  %v11206_v37 = vld [vmem:[%s15353_s17 + $0x78] sm:$0xff] }
 0xada   : > { %v7800_v15 = vld.sshfl [vmem:[#allocation1] sm:$0xff pattern:$0x73625140] }
 0xadb   : > { %v7802_v2 = vpack.c.bf16 %v7800_v15, %v7800_v15  ;;  %7841 = vst [vmem:[#allocation1] ss:$4 sm:$0xff] %v7837_v6  ;;  %v11177_v15 = vld [vmem:[%s15351_s15 + $0xb0] sm:$0xff] }
 0xadc   : > { %7843 = vst [vmem:[#allocation1 + $0x1] ss:$4 sm:$0xff] %v7838_v5 }
 0xadd   : > { %10411 = vmatmul.msk.bf16.vlgmr.msra.gmra.mxu0 %vm7028_vm1, %v7802_v2  ;;  %8228 = vmatpush.bf16.msrb.mxu3 %v11172_v55 }
 0xade   : > { %8286 = vmatpush.bf16.msra.mxu0 %v11178_v13 }
 0xae2   : > { %8287 = vmatpush.bf16.msra.mxu0 %v11177_v15  ;;  %v11201_v15 = vld [vmem:[%s15353_s17 + $0x50] sm:$0xff] }
 0xae3   : > { %v7844_v17 = vld.sshfl [vmem:[#allocation1] sm:$0xff pattern:$0x73625140] }
 0xae4   : > { %v7846_v41 = vpack.c.bf16 %v7844_v17, %v7844_v17  ;;  %7885 = vst [vmem:[#allocation1] ss:$4 sm:$0xff] %v7881_v46  ;;  %v11176_v46 = vld [vmem:[%s15351_s15 + $0xa8] sm:$0xff]  ;;  %v11182_v17 = vld [vmem:[%s15351_s15 + $0xd8] sm:$0xff] }
 0xae5   : > { %7887 = vst [vmem:[#allocation1 + $0x1] ss:$4 sm:$0xff] %v7882_v9  ;;  %v11171_v9 = vld [vmem:[%s15351_s15 + $0x80] sm:$0xff] }
 0xae6   : > { %10424 = vmatmul.msk.bf16.vlgmr.msra.gmra.mxu1 %vm7028_vm1, %v7846_v41  ;;  %8229 = vmatpush.bf16.msrb.mxu3 %v11171_v9  ;;  %v11195_v9 = vld [vmem:[%s15353_s17 + $0x20] sm:$0xff] }
 0xae7   : > { %8288 = vmatpush.bf16.msra.mxu0 %v11176_v46  ;;  %8347 = vmatpush.bf16.msra.mxu1 %v11182_v17  ;;  %v11193_v46 = vld [vmem:[%s15353_s17 + $0x10] sm:$0xff]  ;;  %v11200_v17 = vld [vmem:[%s15353_s17 + $0x48] sm:$0xff] }
 0xaec   : > { %v7888_v53 = vld.sshfl [vmem:[#allocation1] sm:$0xff pattern:$0x73625140] }
 0xaed   : > { %v7890_v25 = vpack.c.bf16 %v7888_v53, %v7888_v53  ;;  %7942 = vst [vmem:[#allocation1] ss:$4 sm:$0xff] %v7938_v51  ;;  %v8056_v53 = vld [vmem:[#allocation9 + $0x2] sm:$0x3] }
 0xaef   : > { %10437 = vmatmul.msk.bf16.vlgmr.msra.gmra.mxu2 %vm7028_vm1, %v7890_v25 }
 0xb2a   : > { %v7612_v60 = vpop.f32.mrf.mxu3 }
 0xb32   : > { %v7614_v50 = vpop.f32.mrf.mxu3 }
 0xb33   : > { %v7584_v35 = vpop.f32.mrf.mxu2  ;;  %v11181_v50 = vld [vmem:[%s15351_s15 + $0xd0] sm:$0xff] }
 0xb34   : > { %v7613_v28 = vadd.f32 %v7612_v60, %v7584_v35  ;;  %v11175_v60 = vld [vmem:[%s15351_s15 + $0xa0] sm:$0xff]  ;;  %8348 = vmatpush.bf16.msra.mxu1 %v11181_v50 }
 0xb35   : > { %8289 = vmatpush.bf16.msra.mxu0 %v11175_v60 }
 0xb36   : > { %v7655_v24 = vpop.f32.mrf.mxu0 }
 0xb37   : > { %v7659_v48 = vadd.f32 %v7655_v24, %v7613_v28  ;;  %v11180_v24 = vld [vmem:[%s15351_s15 + $0xc8] sm:$0xff] }
 0xb38   : > { %8349 = vmatpush.bf16.msra.mxu1 %v11180_v24  ;;  %v11199_v24 = vld [vmem:[%s15353_s17 + $0x40] sm:$0xff] }
 0xb3b   : > { %v7586_v11 = vpop.f32.mrf.mxu2 }
 0xb3c   : > { %v11186_v11 = vld [vmem:[%s15351_s15 + $0xf8] sm:$0xff] }
 0xb3d   : > { %8407 = vmatpush.bf16.msra.mxu2 %v11186_v11 }
 0xb3e   : > { %v7657_v29 = vpop.f32.mrf.mxu0 }
 0xb3f   : > { %v7699_v44 = vpop.f32.mrf.mxu1 }
 0xb40   : > { %v7703_v38 = vadd.f32 %v7699_v44, %v7659_v48 }
 0xb47   : > { %v7701_v12 = vpop.f32.mrf.mxu1 }
 0xb48   : > { %v11179_v12 = vld [vmem:[%s15351_s15 + $0xc0] sm:$0xff] }
 0xb49   : > { %8350 = vmatpush.bf16.msra.mxu1 %v11179_v12 }
 0xb4e   : > { %v7743_v61 = vpop.f32.mrf.mxu2 }
 0xb4f   : > { %v7747_v34 = vadd.f32 %v7743_v61, %v7703_v38  ;;  %v11185_v61 = vld [vmem:[%s15351_s15 + $0xf0] sm:$0xff] }
 0xb50   : > { %8408 = vmatpush.bf16.msra.mxu2 %v11185_v61  ;;  %v11191_v61 = vld [vmem:[%s15353_s17] sm:$0xff] }
 0xb54   : > { %8409 = vmatpush.bf16.msra.mxu2 %v11184_v3 }
 0xb56   : > { %v7745_v8 = vpop.f32.mrf.mxu2 }
 0xb57   : > { %v7787_v49 = vpop.f32.mrf.mxu3 }
 0xb58   : > { %v7791_v16 = vadd.f32 %v7787_v49, %v7747_v34  ;;  %v8298_v34 = vld [vmem:[#allocation9 + $0xc] sm:$0x3] }
 0xb5a   : > { %v7832_v57 = vpop.f32.mrf.mxu0 }
 0xb5b   : > { %v7836_v32 = vadd.f32 %v7832_v57, %v7791_v16  ;;  %v11190_v57 = vld [vmem:[%s15351_s15 + $0x118] sm:$0xff] }
 0xb5f   : > { %v7789_v26 = vpop.f32.mrf.mxu3 }
 0xb62   : > { %v7834_v45 = vpop.f32.mrf.mxu0 }
 0xb63   : > { %v7876_v14 = vpop.f32.mrf.mxu1  ;;  %v11183_v45 = vld [vmem:[%s15351_s15 + $0xe0] sm:$0xff]  ;;  %s11346_s15 = scalar_lea.hbm %s11345_s1, 8 }
 0xb64   : > { %v7880_v0 = vadd.f32 %v7876_v14, %v7836_v32  ;;  %8410 = vmatpush.bf16.msra.mxu2 %v11183_v45  ;;  %p11347_p11 = scmp.ne.s32.totalorder %s11345_s1, %s11346_s15  ;;  %p11352_p1 = scmp.lt.s32.totalorder %s11350_s5, %s11346_s15 }
 0xb66   : > { %p11348_p12 = pnand %p11347_p11, %p11631_p5  ;;  %p11353_p2 = por %p11352_p1, %p11351_p0 }
 0xb68   : > { %p11349_p13 = pneg %p11348_p12 }
 0xb6a   : > { %p11354_p3 = pnand %p11353_p2, %p11349_p13 }
 0xb6b   : > { %v7878_v23 = vpop.f32.mrf.mxu1 }
 0xb72   : > { %v7920_v59 = vpop.f32.mrf.mxu2 }
 0xb73   : > { %v7924_v31 = vadd.f32 %v7920_v59, %v7880_v0  ;;  %v8418_v0 = vld [vmem:[#allocation9 + $0xe] sm:$0x3] }
 0xb75   : > { %v7929_v21 = vadd.f32 %v11327_v19, %v7924_v31 }
 0xb77   : > { %v7930_v20 = vmax.f32 %v7929_v21, 0.0 }
 0xb79   : > { %v7932_v42 = vrot.slane %v7930_v20, 2  ;;  %7936 = vst.msk [vmem:[#allocation9 + $0x5] sm:$0x3] %vm7935_vm5, %v7930_v20 }
 0xb7a   : > { %v7922_v47 = vpop.f32.mrf.mxu2 }
 0xb7b   : > { %7937 = vst.msk [vmem:[#allocation9 + $0x9] sm:$0x3] %vm7935_vm5, %v7932_v42 }
 0xb80   : > { %v7939_v58 = vld [vmem:[#allocation9 + $0x4] sm:$0x3]  ;;  %v8057_v41 = vld [vmem:[#allocation9 + $0x6] sm:$0x3] }
 0xb81   : > { %7944 = vst [vmem:[#allocation1 + $0x1] ss:$4 sm:$0xff] %v7939_v58  ;;  %v7957_v5 = vld [vmem:[#allocation9 + $0x5] sm:$0x3] }
 0xb82   : > { %v8116_v29 = vld [vmem:[#allocation9 + $0x4] sm:$0x3]  ;;  %v8117_v8 = vld [vmem:[#allocation9 + $0x8] sm:$0x3]  ;;  %v8236_v48 = vld [vmem:[#allocation9 + $0x6] sm:$0x3] }
 0xb83   : > { %v8176_v26 = vld [vmem:[#allocation9 + $0x5] sm:$0x3]  ;;  %v8177_v14 = vld [vmem:[#allocation9 + $0x9] sm:$0x3] }
 0xb84   : > { %v8237_v38 = vld [vmem:[#allocation9 + $0xa] sm:$0x3]  ;;  %v8297_v16 = vld [vmem:[#allocation9 + $0x8] sm:$0x3] }
 0xb85   : > { %v8357_v32 = vld [vmem:[#allocation9 + $0x9] sm:$0x3] }
 0xb86   : > { %v8417_v19 = vld [vmem:[#allocation9 + $0xa] sm:$0x3] }
 0xb88   : > { %v7945_v6 = vld.sshfl [vmem:[#allocation1] sm:$0xff pattern:$0x73625140] }
 0xb89   : > { %v7947_v2 = vpack.c.bf16 %v7945_v6, %v7945_v6  ;;  %7962 = vst [vmem:[#allocation1 + $0x1] ss:$4 sm:$0xff] %v7957_v5  ;;  %v11196_v5 = vld [vmem:[%s15353_s17 + $0x28] sm:$0xff]  ;;  %v11194_v6 = vld [vmem:[%s15353_s17 + $0x18] sm:$0xff] }
 0xb8a   : > { %7960 = vst [vmem:[#allocation1] ss:$4 sm:$0xff] %v7956_v33 }
 0xb8b   : > { %10479 = vmatmul.msk.bf16.vlgmr.msrb.gmra.mxu0 %vm7999_vm6, %v7947_v2  ;;  %v11205_v2 = vld [vmem:[%s15353_s17 + $0x70] sm:$0xff] }
 0xb8c   : > { %8569 = vmatpush.bf16.msrb.mxu0 %v11198_v62 }
 0xb90   : > { %8570 = vmatpush.bf16.msrb.mxu0 %v11197_v7 }
 0xb91   : > { %v7963_v25 = vld.sshfl [vmem:[#allocation1] sm:$0xff pattern:$0x73625140] }
 0xb92   : > { %v7965_v35 = vpack.c.bf16 %v7963_v25, %v7963_v25  ;;  %8062 = vst [vmem:[#allocation1 + $0x1] ss:$4 sm:$0xff] %v8057_v41  ;;  %v8527_v25 = vld [vmem:[#allocation10 + $0x1] sm:$0x1] }
 0xb93   : > { %8060 = vst [vmem:[#allocation1] ss:$4 sm:$0xff] %v8056_v53  ;;  %v11204_v53 = vld [vmem:[%s15353_s17 + $0x68] sm:$0xff]  ;;  %v8528_v60 = vpack.c.bf16 %v8527_v25, %v8527_v25 }
 0xb94   : > { %10462 = vmatmul.msk.bf16.vlgmr.msra.gmra.mxu3 %vm7999_vm6, %v7965_v35  ;;  %8571 = vmatpush.bf16.msrb.mxu0 %v11196_v5  ;;  %v11192_v35 = vld [vmem:[%s15353_s17 + $0x8] sm:$0xff] }
 0xb95   : > { %8467 = vmatpush.bf16.msra.mxu3 %v11190_v57  ;;  %v8517_v57 = vld [vmem:[#allocation10] sm:$0x1] }
 0xb96   : > { %v8518_v3 = vpack.c.bf16 %v8517_v57, %v8517_v57 }
 0xb98   : > { %8572 = vmatpush.bf16.msrb.mxu0 %v11195_v9  ;;  %v11223_v9 = vld [vmem:[%s15353_s17 + $0x100] sm:$0xff] }
 0xb99   : > { %8468 = vmatpush.bf16.msra.mxu3 %v11189_v52  ;;  %v11222_v52 = vld [vmem:[%s15353_s17 + $0xf8] sm:$0xff] }
 0xb9a   : > { %v8063_v44 = vld.sshfl [vmem:[#allocation1] sm:$0xff pattern:$0x73625140] }
 0xb9b   : > { %v8065_v49 = vpack.c.bf16 %v8063_v44, %v8063_v44  ;;  %8120 = vst [vmem:[#allocation1] ss:$4 sm:$0xff] %v8116_v29  ;;  %v11203_v29 = vld [vmem:[%s15353_s17 + $0x60] sm:$0xff]  ;;  %v8618_v44 = vld [vmem:[#allocation10 + $0x2] sm:$0x1] }
 0xb9c   : > { %8122 = vst [vmem:[#allocation1 + $0x1] ss:$4 sm:$0xff] %v8117_v8  ;;  %v8619_v12 = vpack.c.bf16 %v8618_v44, %v8618_v44  ;;  %v8670_v8 = vld [vmem:[#allocation10 + $0x4] sm:$0x1] }
 0xb9d   : > { %10504 = vmatmul.msk.bf16.vlgmr.msrb.gmra.mxu1 %vm7999_vm6, %v8065_v49  ;;  %8469 = vmatpush.bf16.msra.mxu3 %v11188_v22  ;;  %v8671_v49 = vpack.c.bf16 %v8670_v8, %v8670_v8 }
 0xb9e   : > { %8609 = vmatpush.bf16.msrb.mxu1 %v11194_v6 }
 0xba1   : > { %8470 = vmatpush.bf16.msra.mxu3 %v11187_v30 }
 0xba2   : > { %8610 = vmatpush.bf16.msrb.mxu1 %v11193_v46 }
 0xba3   : > { %v8123_v28 = vld.sshfl [vmem:[#allocation1] sm:$0xff pattern:$0x73625140] }
 0xba4   : > { %v8125_v43 = vpack.c.bf16 %v8123_v28, %v8123_v28  ;;  %8180 = vst [vmem:[#allocation1] ss:$4 sm:$0xff] %v8176_v26  ;;  %v11210_v28 = vld [vmem:[%s15353_s17 + $0x98] sm:$0xff] }
 0xba5   : > { %8182 = vst [vmem:[#allocation1 + $0x1] ss:$4 sm:$0xff] %v8177_v14  ;;  %v11214_v14 = vld [vmem:[%s15353_s17 + $0xb8] sm:$0xff] }
 0xba6   : > { %10529 = vmatmul.msk.bf16.vlgmr.msrb.gmra.mxu2 %vm7999_vm6, %v8125_v43  ;;  %8611 = vmatpush.bf16.msrb.mxu1 %v11192_v35  ;;  %v11217_v43 = vld [vmem:[%s15353_s17 + $0xd0] sm:$0xff]  ;;  %v11234_v35 = vld [vmem:[%s15355_s19 + $0x38] sm:$0xff] }
 0xba7   : > { %8660 = vmatpush.bf16.msrb.mxu2 %v11202_v27  ;;  %v11225_v27 = vld [vmem:[%s15353_s17 + $0x110] sm:$0xff] }
 0xbaa   : > { %8612 = vmatpush.bf16.msrb.mxu1 %v11191_v61 }
 0xbab   : > { %8661 = vmatpush.bf16.msrb.mxu2 %v11201_v15 }
 0xbac   : > { %v8183_v51 = vld.sshfl [vmem:[#allocation1] sm:$0xff pattern:$0x73625140] }
 0xbad   : > { %v8185_v39 = vpack.c.bf16 %v8183_v51, %v8183_v51  ;;  %8240 = vst [vmem:[#allocation1] ss:$4 sm:$0xff] %v8236_v48  ;;  %v11209_v48 = vld [vmem:[%s15353_s17 + $0x90] sm:$0xff] }
 0xbae   : > { %8242 = vst [vmem:[#allocation1 + $0x1] ss:$4 sm:$0xff] %v8237_v38  ;;  %v11221_v51 = vld [vmem:[%s15353_s17 + $0xf0] sm:$0xff] }
 0xbaf   : > { %10554 = vmatmul.msk.bf16.vlgmr.msrb.gmra.mxu3 %vm7999_vm6, %v8185_v39  ;;  %8662 = vmatpush.bf16.msrb.mxu2 %v11200_v17  ;;  %v11213_v38 = vld [vmem:[%s15353_s17 + $0xb0] sm:$0xff]  ;;  %v11216_v39 = vld [vmem:[%s15353_s17 + $0xc8] sm:$0xff] }
 0xbb0   : > { %8712 = vmatpush.bf16.msrb.mxu3 %v11206_v37 }
 0xbb3   : > { %8663 = vmatpush.bf16.msrb.mxu2 %v11199_v24  ;;  %v11230_v24 = vld [vmem:[%s15355_s19 + $0x18] sm:$0xff] }
 0xbb4   : > { %8713 = vmatpush.bf16.msrb.mxu3 %v11205_v2 }
 0xbb5   : > { %v8243_v23 = vld.sshfl [vmem:[#allocation1] sm:$0xff pattern:$0x73625140] }
 0xbb6   : > { %v8245_v36 = vpack.c.bf16 %v8243_v23, %v8243_v23  ;;  %8301 = vst [vmem:[#allocation1] ss:$4 sm:$0xff] %v8297_v16  ;;  %v11220_v16 = vld [vmem:[%s15353_s17 + $0xe8] sm:$0xff] }
 0xbb7   : > { %8303 = vst [vmem:[#allocation1 + $0x1] ss:$4 sm:$0xff] %v8298_v34  ;;  %v11208_v34 = vld [vmem:[%s15353_s17 + $0x88] sm:$0xff] }
 0xbb8   : > { %10579 = vmatmul.msk.bf16.vlgmr.msra.gmra.mxu0 %vm7999_vm6, %v8245_v36  ;;  %8714 = vmatpush.bf16.msrb.mxu3 %v11204_v53 }
 0xbb9   : > { %8764 = vmatpush.bf16.msra.mxu0 %v11210_v28  ;;  %v11232_v28 = vld [vmem:[%s15355_s19 + $0x28] sm:$0xff] }
 0xbbc   : > { %8715 = vmatpush.bf16.msrb.mxu3 %v11203_v29  ;;  %v11238_v29 = vld [vmem:[%s15355_s19 + $0x58] sm:$0xff] }
 0xbbd   : > { %8765 = vmatpush.bf16.msra.mxu0 %v11209_v48  ;;  %v11236_v48 = vld [vmem:[%s15355_s19 + $0x48] sm:$0xff] }
 0xbbe   : > { %v8304_v10 = vld.sshfl [vmem:[#allocation1] sm:$0xff pattern:$0x73625140] }
 0xbbf   : > { %v8306_v18 = vpack.c.bf16 %v8304_v10, %v8304_v10  ;;  %8361 = vst [vmem:[#allocation1] ss:$4 sm:$0xff] %v8357_v32  ;;  %v11215_v32 = vld [vmem:[%s15353_s17 + $0xc0] sm:$0xff]  ;;  %v8826_v10 = vld [vmem:[#allocation10 + $0x8] sm:$0x1] }
 0xbc0   : > { %8363 = vst [vmem:[#allocation1 + $0x1] ss:$4 sm:$0xff] %v8358_v1  ;;  %v11212_v1 = vld [vmem:[%s15353_s17 + $0xa8] sm:$0xff] }
 0xbc1   : > { %10604 = vmatmul.msk.bf16.vlgmr.msra.gmra.mxu1 %vm7999_vm6, %v8306_v18  ;;  %8766 = vmatpush.bf16.msra.mxu0 %v11208_v34  ;;  %v11207_v18 = vld [vmem:[%s15353_s17 + $0x80] sm:$0xff] }
 0xbc2   : > { %8816 = vmatpush.bf16.msra.mxu1 %v11214_v14  ;;  %v11228_v14 = vld [vmem:[%s15355_s19 + $0x8] sm:$0xff] }
 0xbc5   : > { %8767 = vmatpush.bf16.msra.mxu0 %v11207_v18 }
 0xbc6   : > { %8817 = vmatpush.bf16.msra.mxu1 %v11213_v38  ;;  %v11227_v38 = vld [vmem:[%s15355_s19] sm:$0xff] }
 0xbc7   : > { %v8364_v59 = vld.sshfl [vmem:[#allocation1] sm:$0xff pattern:$0x73625140] }
 0xbc8   : > { %v8366_v31 = vpack.c.bf16 %v8364_v59, %v8364_v59  ;;  %8421 = vst [vmem:[#allocation1] ss:$4 sm:$0xff] %v8417_v19  ;;  %10679 = vmatmul.msk.bf16.vlgmr.msrb.gmra.mxu0 %vm7999_vm6, %v8528_v60  ;;  %v8827_v19 = vpack.c.bf16 %v8826_v10, %v8826_v10  ;;  %v8930_v60 = vld [vmem:[#allocation10 + $0xa] sm:$0x1]  ;;  %v11250_v10 = vld [vmem:[%s15355_s19 + $0xb8] sm:$0xff] }
 0xbc9   : > { %8423 = vst [vmem:[#allocation1 + $0x1] ss:$4 sm:$0xff] %v8418_v0  ;;  %v11219_v0 = vld [vmem:[%s15353_s17 + $0xe0] sm:$0xff] }
 0xbca   : > { %10629 = vmatmul.msk.bf16.vlgmr.msra.gmra.mxu2 %vm7999_vm6, %v8366_v31  ;;  %8818 = vmatpush.bf16.msra.mxu1 %v11212_v1  ;;  %v11211_v31 = vld [vmem:[%s15353_s17 + $0xa0] sm:$0xff] }
 0xbcb   : > { %8868 = vmatpush.bf16.msra.mxu2 %v11218_v54 }
 0xbce   : > { %8819 = vmatpush.bf16.msra.mxu1 %v11211_v31 }
 0xbcf   : > { %8869 = vmatpush.bf16.msra.mxu2 %v11217_v43 }
 0xbd0   : > { %v8424_v21 = vld.sshfl [vmem:[#allocation1] sm:$0xff pattern:$0x73625140] }
 0xbd1   : > { %v8426_v56 = vpack.c.bf16 %v8424_v21, %v8424_v21  ;;  %10696 = vmatmul.msk.bf16.vlgmr.msrb.gmra.mxu1 %vm7999_vm6, %v8518_v3 }
 0xbd2   : > { %9039 = vmatpush.bf16.msrb.mxu1 %v11234_v35  ;;  %v11261_v35 = vld [vmem:[%s15355_s19 + $0x110] sm:$0xff] }
 0xbd3   : > { %10654 = vmatmul.msk.bf16.vlgmr.msra.gmra.mxu3 %vm7999_vm6, %v8426_v56  ;;  %8870 = vmatpush.bf16.msra.mxu2 %v11216_v39  ;;  %v8878_v56 = vld [vmem:[#allocation10 + $0x9] sm:$0x1]  ;;  %v8997_v39 = vld [vmem:[#allocation11 + $0x1] sm:$0x1] }
 0xbd4   : > { %8920 = vmatpush.bf16.msra.mxu3 %v11222_v52  ;;  %v11237_v52 = vld [vmem:[%s15355_s19 + $0x50] sm:$0xff]  ;;  %v8998_v34 = vpack.c.bf16 %v8997_v39, %v8997_v39 }
 0xbd7   : > { %8871 = vmatpush.bf16.msra.mxu2 %v11215_v32  ;;  %v9088_v32 = vld [vmem:[#allocation11 + $0x2] sm:$0x1] }
 0xbd8   : > { %8921 = vmatpush.bf16.msra.mxu3 %v11221_v51  ;;  %v11242_v51 = vld [vmem:[%s15355_s19 + $0x78] sm:$0xff] }
 0xbda   : > { %10721 = vmatmul.msk.bf16.vlgmr.msrb.gmra.mxu2 %vm7999_vm6, %v8619_v12 }
 0xbdb   : > { %9079 = vmatpush.bf16.msrb.mxu2 %v11230_v24 }
 0xbdc   : > { %8922 = vmatpush.bf16.msra.mxu3 %v11220_v16  ;;  %v11235_v16 = vld [vmem:[%s15355_s19 + $0x40] sm:$0xff] }
 0xbe0   : > { %8923 = vmatpush.bf16.msra.mxu3 %v11219_v0  ;;  %v9089_v0 = vpack.c.bf16 %v9088_v32, %v9088_v32 }
 0xbe3   : > { %10746 = vmatmul.msk.bf16.vlgmr.msrb.gmra.mxu3 %vm7999_vm6, %v8671_v49 }
 0xbe4   : > { %9130 = vmatpush.bf16.msrb.mxu3 %v11238_v29  ;;  %v11260_v29 = vld [vmem:[%s15355_s19 + $0x108] sm:$0xff] }
 0xbe8   : > { %9131 = vmatpush.bf16.msrb.mxu3 %v11237_v52 }
 0xbea   : > { %10821 = vmatmul.msk.bf16.vlgmr.msra.gmra.mxu2 %vm7999_vm6, %v8827_v19  ;;  %v11240_v19 = vld [vmem:[%s15355_s19 + $0x68] sm:$0xff] }
 0xbec   : > { %9132 = vmatpush.bf16.msrb.mxu3 %v11236_v48 }
 0xbf0   : > { %9133 = vmatpush.bf16.msrb.mxu3 %v11235_v16 }
 0xc08   : > { %v14761_v4 = vpop.f32.mrf.mxu0 }
 0xc10   : > { %v8054_v20 = vpop.f32.mrf.mxu0 }
 0xc17   : > { %v14763_v40 = vpop.f32.mrf.mxu3 }
 0xc18   : > { %v8053_v26 = vadd.f32 %v14761_v4, %v14763_v40  ;;  %v8879_v4 = vpack.c.bf16 %v8878_v56, %v8878_v56  ;;  %v11246_v56 = vld [vmem:[%s15355_s19 + $0x98] sm:$0xff] }
 0xc1a   : > { %v14765_v63 = vpop.f32.mrf.mxu1  ;;  %10846 = vmatmul.msk.bf16.vlgmr.msra.gmra.mxu3 %vm7999_vm6, %v8879_v4  ;;  %v11239_v4 = vld [vmem:[%s15355_s19 + $0x60] sm:$0xff] }
 0xc1b   : > { %v8115_v22 = vadd.f32 %v14765_v63, %v8053_v26  ;;  %v11328_v63 = vld [vmem:[%s15354_s16] ss:$0 sm:$0xff]  ;;  %v11229_v26 = vld [vmem:[%s15355_s19 + $0x10] sm:$0xff] }
 0xc1c   : > { %9080 = vmatpush.bf16.msrb.mxu2 %v11229_v26 }
 0xc1f   : > { %v8014_v42 = vpop.f32.mrf.mxu3 }
 0xc20   : > { %v11226_v42 = vld [vmem:[%s15353_s17 + $0x118] sm:$0xff]  ;;  %9081 = vmatpush.bf16.msrb.mxu2 %v11228_v14 }
 0xc21   : > { %8972 = vmatpush.bf16.msrb.mxu0 %v11226_v42 }
 0xc22   : > { %v8113_v47 = vpop.f32.mrf.mxu1 }
 0xc23   : > { %v8774_v47 = vld [vmem:[#allocation10 + $0x6] sm:$0x1] }
 0xc24   : > { %v8775_v62 = vpack.c.bf16 %v8774_v47, %v8774_v47  ;;  %9082 = vmatpush.bf16.msrb.mxu2 %v11227_v38  ;;  %v11245_v47 = vld [vmem:[%s15355_s19 + $0x90] sm:$0xff] }
 0xc25   : > { %8973 = vmatpush.bf16.msrb.mxu0 %v11225_v27  ;;  %v11244_v27 = vld [vmem:[%s15355_s19 + $0x88] sm:$0xff] }
 0xc26   : > { %10796 = vmatmul.msk.bf16.vlgmr.msra.gmra.mxu1 %vm7999_vm6, %v8775_v62  ;;  %v11252_v62 = vld [vmem:[%s15355_s19 + $0xc8] sm:$0xff] }
 0xc28   : > { %9286 = vmatpush.bf16.msra.mxu2 %v11250_v10 }
 0xc29   : > { %v14767_v58 = vpop.f32.mrf.mxu2 }
 0xc2a   : > { %v8175_v30 = vadd.f32 %v14767_v58, %v8115_v22  ;;  %v11231_v22 = vld [vmem:[%s15355_s19 + $0x20] sm:$0xff]  ;;  %10938 = vmatmul.msk.bf16.vlgmr.msrb.gmra.mxu3 %vm7999_vm6, %v9089_v0 }
 0xc31   : > { %v8173_v13 = vpop.f32.mrf.mxu2 }
 0xc32   : > { %v14781_v33 = vpop.f32.mrf.mxu3 }
 0xc33   : > { %v8235_v23 = vadd.f32 %v14781_v33, %v8175_v30  ;;  %v11224_v33 = vld [vmem:[%s15353_s17 + $0x108] sm:$0xff] }
 0xc34   : > { %8974 = vmatpush.bf16.msrb.mxu0 %v11224_v33 }
 0xc35   : > { %v14785_v55 = vpop.f32.mrf.mxu0 }
 0xc36   : > { %v8295_v59 = vadd.f32 %v14785_v55, %v8235_v23  ;;  %v11241_v23 = vld [vmem:[%s15355_s19 + $0x70] sm:$0xff] }
 0xc38   : > { %8975 = vmatpush.bf16.msrb.mxu0 %v11223_v9 }
 0xc3a   : > { %v8233_v41 = vpop.f32.mrf.mxu3 }
 0xc3d   : > { %v8293_v50 = vpop.f32.mrf.mxu0 }
 0xc3e   : > { %v8352_v11 = vpop.f32.mrf.mxu1  ;;  %v8931_v50 = vpack.c.bf16 %v8930_v60, %v8930_v60  ;;  %v11255_v60 = vld [vmem:[%s15355_s19 + $0xe0] sm:$0xff] }
 0xc3f   : > { %v8356_v21 = vadd.f32 %v8352_v11, %v8295_v59  ;;  %v11233_v11 = vld [vmem:[%s15355_s19 + $0x30] sm:$0xff] }
 0xc40   : > { %9040 = vmatpush.bf16.msrb.mxu1 %v11233_v11 }
 0xc44   : > { %9041 = vmatpush.bf16.msrb.mxu1 %v11232_v28 }
 0xc45   : > { %v14944_v44 = vpop.f32.mrf.mxu0 }
 0xc46   : > { %v8354_v45 = vpop.f32.mrf.mxu1 }
 0xc48   : > { %9042 = vmatpush.bf16.msrb.mxu1 %v11231_v22 }
 0xc4b   : > { %10896 = vmatmul.msk.bf16.vlgmr.msrb.gmra.mxu1 %vm7999_vm6, %v8998_v34 }
 0xc4c   : > { %9234 = vmatpush.bf16.msra.mxu1 %v11246_v56 }
 0xc4d   : > { %v8412_v36 = vpop.f32.mrf.mxu2  ;;  %v8576_v12 = vpop.f32.mrf.mxu0 }
 0xc4e   : > { %v8416_v20 = vadd.f32 %v8412_v36, %v8356_v21  ;;  %v14946_v61 = vpop.f32.mrf.mxu1  ;;  %v8987_v36 = vld [vmem:[#allocation11] sm:$0x1]  ;;  %v11254_v21 = vld [vmem:[%s15355_s19 + $0xd8] sm:$0xff] }
 0xc4f   : > { %v8988_v1 = vpack.c.bf16 %v8987_v36, %v8987_v36  ;;  %9338 = vmatpush.bf16.msra.mxu3 %v11254_v21  ;;  %v8615_v33 = vadd.f32 %v14946_v61, %v14944_v44  ;;  %v11259_v61 = vld [vmem:[%s15355_s19 + $0x100] sm:$0xff] }
 0xc50   : > { %9235 = vmatpush.bf16.msra.mxu1 %v11245_v47 }
 0xc51   : > { %10913 = vmatmul.msk.bf16.vlgmr.msrb.gmra.mxu2 %vm7999_vm6, %v8988_v1 }
 0xc54   : > { %9236 = vmatpush.bf16.msra.mxu1 %v11244_v27 }
 0xc55   : > { %v8414_v40 = vpop.f32.mrf.mxu2 }
 0xc56   : > { %v8472_v58 = vpop.f32.mrf.mxu3  ;;  %v8616_v54 = vpop.f32.mrf.mxu1  ;;  %v11253_v40 = vld [vmem:[%s15355_s19 + $0xd0] sm:$0xff] }
 0xc57   : > { %v8476_v7 = vadd.f32 %v8472_v58, %v8416_v20  ;;  %v11249_v20 = vld [vmem:[%s15355_s19 + $0xb0] sm:$0xff]  ;;  %9339 = vmatpush.bf16.msra.mxu3 %v11253_v40  ;;  %v11248_v58 = vld [vmem:[%s15355_s19 + $0xa8] sm:$0xff] }
 0xc58   : > { %9287 = vmatpush.bf16.msra.mxu2 %v11249_v20 }
 0xc59   : > { %v8481_v37 = vadd.f32 %v11328_v63, %v8476_v7  ;;  %v9140_v63 = vld [vmem:[#allocation11 + $0x4] sm:$0x1] }
 0xc5a   : > { %v9141_v42 = vpack.c.bf16 %v9140_v63, %v9140_v63  ;;  %v11258_v7 = vld [vmem:[%s15355_s19 + $0xf8] sm:$0xff] }
 0xc5b   : > { %v8482_v13 = vmax.f32 %v8481_v37, 0.0  ;;  %9340 = vmatpush.bf16.msra.mxu3 %v11252_v62  ;;  %v11247_v37 = vld [vmem:[%s15355_s19 + $0xa0] sm:$0xff] }
 0xc5c   : > { %9288 = vmatpush.bf16.msra.mxu2 %v11248_v58 }
 0xc5d   : > { %v8484_v55 = vrot.slane %v8482_v13, 2  ;;  %v8486_v5 = vpack.c.bf16 %v8482_v13, %v8482_v13  ;;  %v14948_v8 = vpop.f32.mrf.mxu2 }
 0xc5e   : > { %v8474_v6 = vpop.f32.mrf.mxu3 }
 0xc5f   : > { %v8487_v15 = vpack.c.bf16 %v8484_v55, %v8484_v55  ;;  %8488 = vst.msk [vmem:[%s14919_s12] sm:$0x1] %vm7519_vm3, %v8486_v5  ;;  %v8490_v2 = vmax.f32 %v8482_v13, %v8484_v55  ;;  %v11251_v13 = vld [vmem:[%s15355_s19 + $0xc0] sm:$0xff]  ;;  %v11257_v55 = vld [vmem:[%s15355_s19 + $0xf0] sm:$0xff]  ;;  %v9244_v5 = vld [vmem:[#allocation11 + $0x6] sm:$0x1] }
 0xc60   : > { %v11243_v6 = vld [vmem:[%s15355_s19 + $0x80] sm:$0xff]  ;;  %9289 = vmatpush.bf16.msra.mxu2 %v11247_v37  ;;  %9341 = vmatpush.bf16.msra.mxu3 %v11251_v13 }
 0xc61   : > { %8489 = vst.msk [vmem:[%s14919_s12 + $0x1] sm:$0x1] %vm7519_vm3, %v8487_v15  ;;  %v9245_v15 = vpack.c.bf16 %v9244_v5, %v9244_v5  ;;  %9237 = vmatpush.bf16.msra.mxu1 %v11243_v6 }
 0xc62   : > { %8491 = vst.msk [vmem:[#allocation15] sm:$0x3] %vm7935_vm5, %v8490_v2  ;;  %v9296_v2 = vld [vmem:[#allocation11 + $0x8] sm:$0x1] }
 0xc63   : > { %v9297_v9 = vpack.c.bf16 %v9296_v2, %v9296_v2  ;;  %11013 = vmatmul.msk.bf16.vlgmr.msra.gmra.mxu2 %vm7999_vm6, %v9245_v15 }
 0xc65   : > { %v8667_v57 = vpop.f32.mrf.mxu2  ;;  %11038 = vmatmul.msk.bf16.vlgmr.msra.gmra.mxu3 %vm7999_vm6, %v9297_v9 }
 0xc66   : > { %v14950_v49 = vpop.f32.mrf.mxu3  ;;  %v8982_v57 = vld [vmem:[%s15356_s18] sm:$0x1] }
 0xc69   : > { %v8492_v46 = vld [vmem:[#allocation15] ss:$2 sm:$0x1]  ;;  %v8494_v17 = vld [vmem:[#allocation15 + $0x1] ss:$2 sm:$0x1] }
 0xc6a   : > { %v8495_v41 = vmax.f32 %v8492_v46, %v8494_v17  ;;  %v11256_v46 = vld [vmem:[%s15355_s19 + $0xe8] sm:$0xff]  ;;  %v8669_v17 = vadd.f32 %v14948_v8, %v8615_v33 }
 0xc6c   : > { %8516 = vst.msk [vmem:[#allocation10 + $0x5] sm:$0x1] %vm7519_vm3, %v8495_v41 }
 0xc6d   : > { %v14966_v43 = vpop.f32.mrf.mxu2 }
 0xc6e   : > { %v8719_v3 = vpop.f32.mrf.mxu3 }
 0xc73   : > { %v8722_v53 = vld [vmem:[#allocation10 + $0x5] sm:$0x1] }
 0xc74   : > { %v8723_v25 = vpack.c.bf16 %v8722_v53, %v8722_v53  ;;  %v11262_v53 = vld [vmem:[%s15355_s19 + $0x118] sm:$0xff] }
 0xc75   : > { %v8875_v59 = vpop.f32.mrf.mxu2  ;;  %9442 = vmatpush.bf16.msrb.mxu1 %v11262_v53 }
 0xc76   : > { %10771 = vmatmul.msk.bf16.vlgmr.msra.gmra.mxu0 %vm7999_vm6, %v8723_v25  ;;  %v8721_v25 = vadd.f32 %v14950_v49, %v8669_v17 }
 0xc77   : > { %9182 = vmatpush.bf16.msra.mxu0 %v11242_v51 }
 0xc79   : > { %9443 = vmatpush.bf16.msrb.mxu1 %v11261_v35 }
 0xc7b   : > { %9183 = vmatpush.bf16.msra.mxu0 %v11241_v23 }
 0xc7d   : > { %9444 = vmatpush.bf16.msrb.mxu1 %v11260_v29 }
 0xc7f   : > { %9184 = vmatpush.bf16.msra.mxu0 %v11240_v19 }
 0xc81   : > { %9445 = vmatpush.bf16.msrb.mxu1 %v11259_v61 }
 0xc83   : > { %9185 = vmatpush.bf16.msra.mxu0 %v11239_v4 }
 0xc86   : > { %10871 = vmatmul.msk.bf16.vlgmr.msrb.gmra.mxu0 %vm7999_vm6, %v8931_v50  ;;  %v9348_v50 = vld [vmem:[#allocation11 + $0x9] sm:$0x1] }
 0xc87   : > { %9390 = vmatpush.bf16.msrb.mxu0 %v11258_v7  ;;  %v9349_v11 = vpack.c.bf16 %v9348_v50, %v9348_v50 }
 0xc8b   : > { %9391 = vmatpush.bf16.msrb.mxu0 %v11257_v55 }
 0xc8f   : > { %9392 = vmatpush.bf16.msrb.mxu0 %v11256_v46 }
 0xc93   : > { %9393 = vmatpush.bf16.msrb.mxu0 %v11255_v60 }
 0xc96   : > { %10963 = vmatmul.msk.bf16.vlgmr.msra.gmra.mxu0 %vm7999_vm6, %v9141_v42 }
 0xc9d   : > { %v14977_v30 = vpop.f32.mrf.mxu3 }
 0xca3   : > { %v14961_v45 = vpop.f32.mrf.mxu1 }
 0xca5   : > { %v8927_v31 = vpop.f32.mrf.mxu3 }
 0xca6   : > { %11063 = vmatmul.msk.bf16.vlgmr.msrb.gmra.mxu0 %vm7999_vm6, %v9349_v11 }
 0xcab   : > { %v8823_v18 = vpop.f32.mrf.mxu1 }
 0xcf3   : > { %v8769_v41 = vpop.f32.mrf.mxu0 }
 0xcf4   : > { %v8773_v24 = vadd.f32 %v8769_v41, %v8721_v25 }
 0xcf6   : > { %v8825_v44 = vadd.f32 %v14961_v45, %v8773_v24 }
 0xcf8   : > { %v8877_v8 = vadd.f32 %v14966_v43, %v8825_v44  ;;  %v9400_v43 = vld [vmem:[#allocation11 + $0xa] sm:$0x1] }
 0xcf9   : > { %v9401_v22 = vpack.c.bf16 %v9400_v43, %v9400_v43 }
 0xcfa   : > { %v8929_v49 = vadd.f32 %v14977_v30, %v8877_v8 }
 0xcfb   : > { %v8771_v12 = vpop.f32.mrf.mxu0 }
 0xd03   : > { %v8977_v54 = vpop.f32.mrf.mxu0 }
 0xd04   : > { %v8981_v3 = vadd.f32 %v8977_v54, %v8929_v49 }
 0xd06   : > { %v8983_v26 = vadd.f32 %v8982_v57, %v8981_v3 }
 0xd08   : > { %v8984_v28 = vmax.f32 %v8983_v26, 0.0 }
 0xd0a   : > { %8986 = vst.msk [vmem:[#allocation11 + $0x5] sm:$0x1] %vm7519_vm3, %v8984_v28 }
 0xd0b   : > { %v8979_v52 = vpop.f32.mrf.mxu0 }
 0xd11   : > { %v9192_v45 = vld [vmem:[#allocation11 + $0x5] sm:$0x1] }
 0xd12   : > { %v9193_v14 = vpack.c.bf16 %v9192_v45, %v9192_v45 }
 0xd14   : > { %10988 = vmatmul.msk.bf16.vlgmr.msra.gmra.mxu1 %vm7999_vm6, %v9193_v14 }
 0xd24   : > { %11088 = vmatmul.msk.bf16.vlgmr.msrb.gmra.mxu1 %vm7999_vm6, %v9401_v22 }
 0xd25   : > { %11357 = shalt.err (!%p11354_p3)
}
 0xd26   : > { %s11455_s0 = smov 32   ;;  %s11456_s3 = smov 2  }
 0xd27   : > { %11266 = dma.vmem_to_hbm [thread:$0]  (%p11631_p5), %s9514_s11, 128, %s9516_s6, %s15081_s26, %s11455_s0, %s11455_s0, %s11456_s3  }
 0xd28   : > { %s9495_s10 = scalar_lea.hbm %s15174_s22, %s11263_s14  ;;  %s9496_s13 = sshll.u32 %s14312_s27, 4  ;;  %s9497_s13 = int_to_ptr.vmem [resolvable:$true] %s9496_s13 }
 0xd29   : > { %s9498_s15 = sshll.u32 %s9495_s10, 4  ;;  %s11096_s1 = sshll.u32 %s11612_s7, 1  ;;  %s9499_s15 = int_to_ptr.hbm [resolvable:$true] %s9498_s15 }
 0xd2a   : > { %s9468_s5 = scalar_lea.sflag [#allocation17], %s14302_s9  ;;  %s11372_s21 = sshra.s32 %s9499_s15, 4  ;;  %s11373_s21 = int_to_ptr.hbm [resolvable:$true] %s11372_s21 }
 0xd2b   : > { %s11374_s18 = scalar_lea.hbm %s11373_s21, 32  ;;  %s11378_s11 = scalar_lea.hbm %s15174_s22, 64 }
 0xd2c   : > { %p11375_p4 = scmp.ne.s32.totalorder %s11373_s21, %s11374_s18  ;;  %p11379_p9 = scmp.lt.s32.totalorder %s11373_s21, %s15174_s22 }
 0xd2d   : > { %p11380_p10 = scmp.lt.s32.totalorder %s11378_s11, %s11374_s18 }
 0xd2e   : > { %p11376_p7 = pnand %p11375_p4, %p11631_p5 }
 0xd2f   : > { %p11381_p11 = por %p11380_p10, %p11379_p9 }
 0xd30   : > { %p11377_p8 = pneg %p11376_p7 }
 0xd32   : > { %p11382_p12 = pnand %p11381_p11, %p11377_p8 }
 0xd34   : > { %11385 = shalt.err (!%p11382_p12)
}
 0xd35   : > { %s11457_s7 = smov 64   ;;  %s11458_s9 = smov 4  }
 0xd36   : > { %11265 = dma.vmem_to_hbm [thread:$0]  (%p11631_p5), %s9497_s13, 512, %s9499_s15, %s9468_s5, %s11457_s7, %s11457_s7, %s11458_s9  }
 0xd37   : > { %s9528_s19 = scalar_lea.hbm %s15176_s24, %s11096_s1  ;;  %s9529_s23 = sshll.u32 %s14919_s12, 4  ;;  %s9530_s23 = int_to_ptr.vmem [resolvable:$true] %s9529_s23 }
 0xd38   : > { %s9531_s3 = sshll.u32 %s9528_s19, 4  ;;  %s11406_s21 = scalar_lea.hbm %s15176_s24, 4  ;;  %s9532_s3 = int_to_ptr.hbm [resolvable:$true] %s9531_s3 }
 0xd39   : > { %s11400_s16 = sshra.s32 %s9532_s3, 4  ;;  %s11401_s16 = int_to_ptr.hbm [resolvable:$true] %s11400_s16 }
 0xd3a   : > { %s11402_s18 = scalar_lea.hbm %s11401_s16, 2  ;;  %p11407_p2 = scmp.lt.s32.totalorder %s11401_s16, %s15176_s24 }
 0xd3b   : > { %p11403_p13 = scmp.ne.s32.totalorder %s11401_s16, %s11402_s18  ;;  %p11408_p3 = scmp.lt.s32.totalorder %s11406_s21, %s11402_s18 }
 0xd3d   : > { %p11404_p0 = pnand %p11403_p13, %p11631_p5  ;;  %p11409_p4 = por %p11408_p3, %p11407_p2 }
 0xd3f   : > { %p11405_p1 = pneg %p11404_p0 }
 0xd41   : > { %p11410_p7 = pnand %p11409_p4, %p11405_p1 }
 0xd43   : > { %11413 = shalt.err (!%p11410_p7)
}
 0xd44   : > { %s11459_s12 = smov 16   ;;  %s11460_s1 = smov 1   ;;  %v9044_v48 = vpop.f32.mrf.mxu1  ;;  %v9084_v30 = vpop.f32.mrf.mxu2  ;;  %v9452_v47 = vld [vmem:[%s15172_s20] sm:$0x1]  ;;  %vm9457_vm8 = vsmask.f32 256 }
 0xd45   : > { %11267 = dma.vmem_to_hbm [thread:$0]  (%p11631_p5), %s9530_s23, 32, %s9532_s3, %s15081_s26, %s11459_s12, %s11459_s12, %s11460_s1   ;;  %v9135_v38 = vpop.f32.mrf.mxu3  ;;  %v9187_v39 = vpop.f32.mrf.mxu0  ;;  %v9085_v19 = vadd.f32 %v9084_v30, %v9044_v48  ;;  %vm9458_vm9 = vmand %vm7519_vm3, %vm9457_vm8 }
 0xd46   : > { %s800_s6 = scalar_lea.vmem %s15177_s25, %s11723_s8 }
 0xd47   : > { %v9139_v59 = vadd.f32 %v9135_v38, %v9085_v19  ;;  %v9459_v27 = vld [vmem:[%s800_s6] sm:$0x1] }
 0xd49   : > { %v9191_v21 = vadd.f32 %v9187_v39, %v9139_v59 }
 0xd4c   : > { %v9046_v51 = vpop.f32.mrf.mxu1  ;;  %v9086_v34 = vpop.f32.mrf.mxu2 }
 0xd4d   : > { %v9137_v16 = vpop.f32.mrf.mxu3  ;;  %v9189_v23 = vpop.f32.mrf.mxu0 }
 0xd54   : > { %v9291_v36 = vpop.f32.mrf.mxu2 }
 0xd55   : > { %v9343_v1 = vpop.f32.mrf.mxu3  ;;  %v9395_v32 = vpop.f32.mrf.mxu0 }
 0xd5c   : > { %v9293_v10 = vpop.f32.mrf.mxu2 }
 0xd5d   : > { %v9345_v18 = vpop.f32.mrf.mxu3  ;;  %v9397_v0 = vpop.f32.mrf.mxu0 }
 0xd91   : > { %v9239_v31 = vpop.f32.mrf.mxu1 }
 0xd92   : > { %v9243_v56 = vadd.f32 %v9239_v31, %v9191_v21 }
 0xd94   : > { %v9295_v4 = vadd.f32 %v9291_v36, %v9243_v56 }
 0xd96   : > { %v9347_v40 = vadd.f32 %v9343_v1, %v9295_v4 }
 0xd98   : > { %v9399_v63 = vadd.f32 %v9395_v32, %v9347_v40 }
 0xd99   : > { %v9241_v20 = vpop.f32.mrf.mxu1 }
 0xda1   : > { %v9447_v42 = vpop.f32.mrf.mxu1 }
 0xda2   : > { %v9451_v58 = vadd.f32 %v9447_v42, %v9399_v63 }
 0xda4   : > { %v9453_v62 = vadd.f32 %v9452_v47, %v9451_v58 }
 0xda6   : > { %v9454_v7 = vmax.f32 %v9453_v62, 0.0 }
 0xda8   : > { %v9455_v37 = vpack.c.bf16 %v9454_v7, %v9454_v7 }
 0xda9   : > { %v9449_v13 = vpop.f32.mrf.mxu1 }
 0xdaa   : > { %v9460_v33 = vsel %vm9458_vm9, %v9455_v37, %v9459_v27 }
 0xdab   : > { %9461 = vst [vmem:[%s800_s6] sm:$0x1] %v9460_v33 }
 0xdac PF: > { %p11281_p5 = scmp.ge.s32.totalorder %s11452_s30, 2  ;;  %s9557_s0 = sand.u32 1, %s11440_s29  }
 0xdad   : > { %s9558_s8 = scalar_lea.sflag [#allocation17], %s9557_s0 }
 0xdae   : > { %p11272_p8 = pnand %p11281_p5, %p11635_p6 }
 0xdb0   : > { %p11273_p9 = pneg %p11272_p8 }
 0xdb2   : > { %11431 = dma.done.wait (%p11273_p9), %s9558_s8, 512  }
 0xdb3   : > { %11433 = vsyncadd (%p11273_p9), %s9558_s8, 4294966784  ;;  %s15358_s7 = sadd.s32 4294967294, %s11452_s30  }
 0xdb4   : > { %s9567_s9 = sand.u32 1, %s15358_s7  }
 0xdb5   : > { %s9568_s27 = scalar_lea.sflag [#allocation19], %s9567_s9 }
 0xdb6   : > { %11435 = dma.done.wait (%p11273_p9), %s9568_s27, 160  }
 0xdb7   : > { %11437 = vsyncadd (%p11273_p9), %s9568_s27, 4294967136  ;;  %s15359_s30 = sld [smem:[#allocation24_spill]]  ;;  %s15362_s29 = smov %s11444_s2 }
 0xdb8   : > { %s15360_s14 = sld [smem:[#allocation23_spill]] }
 0xdb9   : > { %s15361_s6 = sld [smem:[#allocation25_spill]] }
 0xdbd   : > { %p39_p10 = scmp.ge.s32.totalorder %s15359_s30, 4  }
 0xdbe   : > { %s15363_s2 = smov %s15360_s14 }
 0xdbf   :  { %41 = sbr.rel (!%p39_p10) target bundleno = 28 (0x1c), region = 401 }
 0xdc4   :  { %9590 = vsyncpa [#allocation17], 1 }
 0xdc5   :  { %9592 = vsyncpa [#allocation17 + $0x1], 1 }
 0xdc6   :  { %9593 = vsyncpa [#allocation19], 1 }
 0xdc7   :  { %9595 = vsyncpa [#allocation19 + $0x1], 1 }

</bundles_post_ra>
